<compile_context>
chip_gen: v5e
topology: v5e:2x2
jax: 0.10.0
libtpu: 0.0.40
codegen_flags: <defaults>
</compile_context>

<pallas_src>
import jax
import jax.numpy as jnp
from jax.experimental import pallas as pl
from jax.experimental.pallas import tpu as pltpu

EPS = 1e-5
HIDDEN = (1024, 512, 256, 128, 64, 32)   # widths of layers 1..6
OUT_PAD = 128                            # lane-dense padded output width


def make_mlp_kernel(out_pad):
    widths = HIDDEN

    def kernel(x_ref, w1_ref, gb_ref,
               w2_hbm, w3_hbm, w4_hbm, w5_hbm, w6_hbm, w7_hbm,
               out_ref,
               w2_v, w3_v, w4_v, w5_v, w6_v, w7_v, sems):
        hbm_refs = (w2_hbm, w3_hbm, w4_hbm, w5_hbm, w6_hbm, w7_hbm)
        vmem_bufs = (w2_v, w3_v, w4_v, w5_v, w6_v, w7_v)

        # Kick off all later-layer weight DMAs up front so they overlap with
        # layer-1..k compute.  Each copy gets its own semaphore slot.
        copies = []
        for i in range(6):
            cp = pltpu.make_async_copy(hbm_refs[i], vmem_bufs[i], sems.at[i])
            cp.start()
            copies.append(cp)

        def bn_relu(z, l):
            # z: (B, n) f32.  Training-mode BN with biased variance, gamma folded
            # into the rsqrt scale, followed by ReLU.  All elementwise math in f32.
            n = widths[l]
            g = gb_ref[2 * l:2 * l + 1, :n]
            be = gb_ref[2 * l + 1:2 * l + 2, :n]
            mean = jnp.mean(z, axis=0, keepdims=True)
            d = z - mean
            var = jnp.mean(d * d, axis=0, keepdims=True)
            scale = g * jax.lax.rsqrt(var + EPS)
            return jnp.maximum(d * scale + be, 0.0)

        # Layer 1: W1 is auto-blocked (already in VMEM when the body starts).
        # Linear bias omitted: it cancels exactly in the BN mean subtraction.
        h = bn_relu(
            jnp.dot(x_ref[...].astype(jnp.bfloat16), w1_ref[...],
                    preferred_element_type=jnp.float32), 0)

        # Layers 2..6: wait for that layer's weight DMA, matmul (bf16 in, f32 acc),
        # then BN + ReLU in f32.
        for l in range(1, 6):
            copies[l - 1].wait()
            h = bn_relu(
                jnp.dot(h.astype(jnp.bfloat16), vmem_bufs[l - 1][...],
                        preferred_element_type=jnp.float32), l)

        # Layer 7: Linear only (bias b7 is the last packed row, zero-padded to 128).
        copies[5].wait()
        b7 = gb_ref[12:13, :out_pad]
        out_ref[...] = (jnp.dot(h.astype(jnp.bfloat16), w7_v[...],
                                preferred_element_type=jnp.float32)
                        + b7).astype(out_ref.dtype)

    return kernel


def mlp_classifier_forward(x, params):
    """x: (B, C, H, W) float32.  params: dict from init_params."""
    B = x.shape[0]
    x2d = x.reshape(B, -1).astype(jnp.float32)       # == torch.flatten(x, start_dim=1)
    in_dim = x2d.shape[1]
    out_dim = params['w'][-1].shape[1]

    # Weights as bf16, cast once here (not per-iteration inside the kernel).
    w_bf16 = [w.astype(jnp.bfloat16) for w in params['w'][:6]]
    w7 = params['w'][6].astype(jnp.bfloat16)
    w7p = jnp.zeros((w7.shape[0], OUT_PAD), jnp.bfloat16).at[:, :out_dim].set(w7)

    # Pack gamma/beta (layers 1..6) + b7 into a single (13, 1024) f32 array.
    maxw = max(HIDDEN)
    rows = []
    for l in range(6):
        for v in (params['gamma'][l], params['beta'][l]):
            rows.append(jnp.zeros((1, maxw), jnp.float32).at[:, :HIDDEN[l]].set(v))
    rows.append(jnp.zeros((1, maxw), jnp.float32).at[:, :out_dim].set(params['b'][6]))
    gb = jnp.concatenate(rows, axis=0)                # (13, 1024)

    out_padded = pl.pallas_call(
        make_mlp_kernel(OUT_PAD),
        out_shape=jax.ShapeDtypeStruct((B, OUT_PAD), jnp.float32),
        grid=(1,),
        in_specs=[
            pl.BlockSpec((B, in_dim), lambda i: (0, 0)),          # x (VMEM)
            pl.BlockSpec((in_dim, HIDDEN[0]), lambda i: (0, 0)),  # W1 (VMEM)
            pl.BlockSpec(gb.shape, lambda i: (0, 0)),             # packed gamma/beta/b7
        ] + [pl.BlockSpec(memory_space=pl.ANY)] * 6,              # W2..W7 stay in HBM
        out_specs=pl.BlockSpec((B, OUT_PAD), lambda i: (0, 0)),
        scratch_shapes=[
            pltpu.VMEM((HIDDEN[0], HIDDEN[1]), jnp.bfloat16),     # W2
            pltpu.VMEM((HIDDEN[1], HIDDEN[2]), jnp.bfloat16),     # W3
            pltpu.VMEM((HIDDEN[2], HIDDEN[3]), jnp.bfloat16),     # W4
            pltpu.VMEM((HIDDEN[3], HIDDEN[4]), jnp.bfloat16),     # W5
            pltpu.VMEM((HIDDEN[4], HIDDEN[5]), jnp.bfloat16),     # W6
            pltpu.VMEM((HIDDEN[5], OUT_PAD), jnp.bfloat16),       # W7 (padded cols)
            pltpu.SemaphoreType.DMA((6,)),
        ],
        compiler_params=pltpu.CompilerParams(
            dimension_semantics=("arbitrary",),
            vmem_limit_bytes=16 << 20,                # honest footprint, v7x-safe
        ),
    )(x2d, w_bf16[0], gb, w_bf16[1], w_bf16[2], w_bf16[3], w_bf16[4], w_bf16[5], w7p)

    return out_padded[:, :out_dim]


def init_params(key, in_dim, out_dim):
    """Mirror PyTorch nn.Linear / nn.BatchNorm1d default init.

    Linear: W ~ U(-1/sqrt(fan_in), 1/sqrt(fan_in)), stored pre-transposed as
    (in, out); bias same bound.  BatchNorm1d: gamma = 1, beta = 0.
    """
    dims = [in_dim] + list(HIDDEN) + [out_dim]
    Ws, Bs, Gs, Bes = [], [], [], []
    for l in range(7):
        fi, fo = dims[l], dims[l + 1]
        key, kw, kb = jax.random.split(key, 3)
        bound = 1.0 / (fi ** 0.5)
        Ws.append(jax.random.uniform(kw, (fi, fo), jnp.float32, -bound, bound))
        Bs.append(jax.random.uniform(kb, (1, fo), jnp.float32, -bound, bound))
        if l < 6:
            Gs.append(jnp.ones((1, fo), jnp.float32))
            Bes.append(jnp.zeros((1, fo), jnp.float32))
    return dict(w=Ws, b=Bs, gamma=Gs, beta=Bes)


def mlp_ref(x, params):
    """Pure-JAX reference: same math as the PyTorch module in training mode.

    Uses the same bf16-quantized weights as the kernel (cast back to f32) so the
    comparison isolates kernel correctness; keeps the layer-1..6 Linear biases
    (which the kernel drops) to demonstrate they cancel in BN.
    """
    h = x.reshape(x.shape[0], -1).astype(jnp.float32)
    wq = [w.astype(jnp.bfloat16).astype(jnp.float32) for w in params['w']]
    for l in range(6):
        z = h @ wq[l] + params['b'][l]
        mean = z.mean(0, keepdims=True)
        var = ((z - mean) ** 2).mean(0, keepdims=True)
        z = (z - mean) * jax.lax.rsqrt(var + EPS) * params['gamma'][l] + params['beta'][l]
        h = jnp.maximum(z, 0.0)
    return h @ wq[6] + params['b'][6]


if __name__ == "__main__":
    key = jax.random.PRNGKey(0)
    kx, kp = jax.random.split(key)

    # Small shapes consistent with the module: input_dim = C*H*W = 3*16*16 = 768
    B, C, H, W = 8, 3, 16, 16
    in_dim, out_dim = C * H * W, 10

    x = jax.random.normal(kx, (B, C, H, W), jnp.float32)
    params = init_params(kp, in_dim, out_dim)

    y = mlp_classifier_forward(x, params)
    y = jax.block_until_ready(y)

    y_ref = mlp_ref(x, params)
    assert y.shape == (B, out_dim)
    assert jnp.allclose(y, y_ref, atol=5e-2, rtol=5e-2), "mismatch vs JAX reference"

    print("KERNEL_OK")
</pallas_src>

<mosaic_0001>
module attributes {stable_mosaic.version = 11 : i64} {
  func.func @kernel(%arg0: i32, %arg1: memref<8x768xf32, #tpu.memory_space<vmem>>, %arg2: memref<768x1024xbf16, #tpu.memory_space<vmem>>, %arg3: memref<13x1024xf32, #tpu.memory_space<vmem>>, %arg4: memref<1024x512xbf16, #tpu.memory_space<any>>, %arg5: memref<512x256xbf16, #tpu.memory_space<any>>, %arg6: memref<256x128xbf16, #tpu.memory_space<any>>, %arg7: memref<128x64xbf16, #tpu.memory_space<any>>, %arg8: memref<64x32xbf16, #tpu.memory_space<any>>, %arg9: memref<32x128xbf16, #tpu.memory_space<any>>, %arg10: memref<8x128xf32, #tpu.memory_space<vmem>>, %arg11: memref<1024x512xbf16, #tpu.memory_space<vmem>>, %arg12: memref<512x256xbf16, #tpu.memory_space<vmem>>, %arg13: memref<256x128xbf16, #tpu.memory_space<vmem>>, %arg14: memref<128x64xbf16, #tpu.memory_space<vmem>>, %arg15: memref<64x32xbf16, #tpu.memory_space<vmem>>, %arg16: memref<32x128xbf16, #tpu.memory_space<vmem>>, %arg17: memref<6x!tpu.dma_semaphore, #tpu.memory_space<semaphore_mem>>) attributes {dimension_semantics = [#tpu.dimension_semantics<arbitrary>], iteration_bounds = array<i64: 1>, scalar_prefetch = 0 : i64, scratch_operands = 7 : i64, tpu.core_type = #tpu.core_type<tc>, window_params = [{pipeline_mode = #tpu.pipeline_mode<synchronous>, transform_indices = @transform_0, window_bounds = array<i64: 8, 768>}, {pipeline_mode = #tpu.pipeline_mode<synchronous>, transform_indices = @transform_1, window_bounds = array<i64: 768, 1024>}, {pipeline_mode = #tpu.pipeline_mode<synchronous>, transform_indices = @transform_2, window_bounds = array<i64: 13, 1024>}, {}, {}, {}, {}, {}, {}, {pipeline_mode = #tpu.pipeline_mode<synchronous>, transform_indices = @transform_9, window_bounds = array<i64: 8, 128>}]} {
    %c0_i32 = arith.constant 0 : i32
    %0 = tpu.memref_slice %arg17[%c0_i32] : memref<6x!tpu.dma_semaphore, #tpu.memory_space<semaphore_mem>> -> memref<1x!tpu.dma_semaphore, #tpu.memory_space<semaphore_mem>>
    %1 = tpu.memref_squeeze %0 : memref<1x!tpu.dma_semaphore, #tpu.memory_space<semaphore_mem>> -> memref<!tpu.dma_semaphore, #tpu.memory_space<semaphore_mem>>
    tpu.enqueue_dma source(%arg4 : memref<1024x512xbf16, #tpu.memory_space<any>>) target(%arg11 : memref<1024x512xbf16, #tpu.memory_space<vmem>>) target_semaphore(%1 : memref<!tpu.dma_semaphore, #tpu.memory_space<semaphore_mem>>)
    %c1_i32 = arith.constant 1 : i32
    %2 = tpu.memref_slice %arg17[%c1_i32] : memref<6x!tpu.dma_semaphore, #tpu.memory_space<semaphore_mem>> -> memref<1x!tpu.dma_semaphore, #tpu.memory_space<semaphore_mem>>
    %3 = tpu.memref_squeeze %2 : memref<1x!tpu.dma_semaphore, #tpu.memory_space<semaphore_mem>> -> memref<!tpu.dma_semaphore, #tpu.memory_space<semaphore_mem>>
    tpu.enqueue_dma source(%arg5 : memref<512x256xbf16, #tpu.memory_space<any>>) target(%arg12 : memref<512x256xbf16, #tpu.memory_space<vmem>>) target_semaphore(%3 : memref<!tpu.dma_semaphore, #tpu.memory_space<semaphore_mem>>)
    %c2_i32 = arith.constant 2 : i32
    %4 = tpu.memref_slice %arg17[%c2_i32] : memref<6x!tpu.dma_semaphore, #tpu.memory_space<semaphore_mem>> -> memref<1x!tpu.dma_semaphore, #tpu.memory_space<semaphore_mem>>
    %5 = tpu.memref_squeeze %4 : memref<1x!tpu.dma_semaphore, #tpu.memory_space<semaphore_mem>> -> memref<!tpu.dma_semaphore, #tpu.memory_space<semaphore_mem>>
    tpu.enqueue_dma source(%arg6 : memref<256x128xbf16, #tpu.memory_space<any>>) target(%arg13 : memref<256x128xbf16, #tpu.memory_space<vmem>>) target_semaphore(%5 : memref<!tpu.dma_semaphore, #tpu.memory_space<semaphore_mem>>)
    %c3_i32 = arith.constant 3 : i32
    %6 = tpu.memref_slice %arg17[%c3_i32] : memref<6x!tpu.dma_semaphore, #tpu.memory_space<semaphore_mem>> -> memref<1x!tpu.dma_semaphore, #tpu.memory_space<semaphore_mem>>
    %7 = tpu.memref_squeeze %6 : memref<1x!tpu.dma_semaphore, #tpu.memory_space<semaphore_mem>> -> memref<!tpu.dma_semaphore, #tpu.memory_space<semaphore_mem>>
    tpu.enqueue_dma source(%arg7 : memref<128x64xbf16, #tpu.memory_space<any>>) target(%arg14 : memref<128x64xbf16, #tpu.memory_space<vmem>>) target_semaphore(%7 : memref<!tpu.dma_semaphore, #tpu.memory_space<semaphore_mem>>)
    %c4_i32 = arith.constant 4 : i32
    %8 = tpu.memref_slice %arg17[%c4_i32] : memref<6x!tpu.dma_semaphore, #tpu.memory_space<semaphore_mem>> -> memref<1x!tpu.dma_semaphore, #tpu.memory_space<semaphore_mem>>
    %9 = tpu.memref_squeeze %8 : memref<1x!tpu.dma_semaphore, #tpu.memory_space<semaphore_mem>> -> memref<!tpu.dma_semaphore, #tpu.memory_space<semaphore_mem>>
    tpu.enqueue_dma source(%arg8 : memref<64x32xbf16, #tpu.memory_space<any>>) target(%arg15 : memref<64x32xbf16, #tpu.memory_space<vmem>>) target_semaphore(%9 : memref<!tpu.dma_semaphore, #tpu.memory_space<semaphore_mem>>)
    %c5_i32 = arith.constant 5 : i32
    %10 = tpu.memref_slice %arg17[%c5_i32] : memref<6x!tpu.dma_semaphore, #tpu.memory_space<semaphore_mem>> -> memref<1x!tpu.dma_semaphore, #tpu.memory_space<semaphore_mem>>
    %11 = tpu.memref_squeeze %10 : memref<1x!tpu.dma_semaphore, #tpu.memory_space<semaphore_mem>> -> memref<!tpu.dma_semaphore, #tpu.memory_space<semaphore_mem>>
    tpu.enqueue_dma source(%arg9 : memref<32x128xbf16, #tpu.memory_space<any>>) target(%arg16 : memref<32x128xbf16, #tpu.memory_space<vmem>>) target_semaphore(%11 : memref<!tpu.dma_semaphore, #tpu.memory_space<semaphore_mem>>)
    %c0 = arith.constant 0 : index
    %c0_0 = arith.constant 0 : index
    %12 = vector.load %arg1[%c0, %c0_0] : memref<8x768xf32, #tpu.memory_space<vmem>>, vector<8x768xf32>
    %13 = arith.truncf %12 : vector<8x768xf32> to vector<8x768xbf16>
    %c0_1 = arith.constant 0 : index
    %c0_2 = arith.constant 0 : index
    %14 = vector.load %arg2[%c0_1, %c0_2] : memref<768x1024xbf16, #tpu.memory_space<vmem>>, vector<768x1024xbf16>
    %cst = arith.constant dense<0.000000e+00> : vector<8x1024xf32>
    %15 = tpu.matmul %13, %14, %cst {dimension_numbers = #tpu.dot_dimension_numbers<[1], [0], [0], [1], [0, 0, 1, 1], [], []>} : vector<8x768xbf16>, vector<768x1024xbf16>, vector<8x1024xf32> -> vector<8x1024xf32>
    %c0_3 = arith.constant 0 : index
    %c0_4 = arith.constant 0 : index
    %16 = vector.load %arg3[%c0_3, %c0_4] : memref<13x1024xf32, #tpu.memory_space<vmem>>, vector<1x1024xf32>
    %c1 = arith.constant 1 : index
    %c0_5 = arith.constant 0 : index
    %17 = vector.load %arg3[%c1, %c0_5] : memref<13x1024xf32, #tpu.memory_space<vmem>>, vector<1x1024xf32>
    %cst_6 = arith.constant dense<0.000000e+00> : vector<1024xf32>
    %18 = vector.multi_reduction <add>, %15, %cst_6 [0] : vector<8x1024xf32> to vector<1024xf32>
    %19 = vector.shape_cast %18 : vector<1024xf32> to vector<1x1024xf32>
    %cst_7 = arith.constant 8.000000e+00 : f32
    %20 = vector.broadcast %cst_7 : f32 to vector<1x1024xf32>
    %21 = arith.divf %19, %20 : vector<1x1024xf32>
    %22 = vector.broadcast %21 : vector<1x1024xf32> to vector<8x1024xf32>
    %23 = arith.subf %15, %22 : vector<8x1024xf32>
    %24 = arith.mulf %23, %23 : vector<8x1024xf32>
    %cst_8 = arith.constant dense<0.000000e+00> : vector<1024xf32>
    %25 = vector.multi_reduction <add>, %24, %cst_8 [0] : vector<8x1024xf32> to vector<1024xf32>
    %26 = vector.shape_cast %25 : vector<1024xf32> to vector<1x1024xf32>
    %cst_9 = arith.constant 8.000000e+00 : f32
    %27 = vector.broadcast %cst_9 : f32 to vector<1x1024xf32>
    %28 = arith.divf %26, %27 : vector<1x1024xf32>
    %cst_10 = arith.constant 9.99999974E-6 : f32
    %29 = vector.broadcast %cst_10 : f32 to vector<1x1024xf32>
    %30 = arith.addf %28, %29 : vector<1x1024xf32>
    %31 = math.rsqrt %30 : vector<1x1024xf32>
    %32 = arith.mulf %16, %31 : vector<1x1024xf32>
    %33 = vector.broadcast %32 : vector<1x1024xf32> to vector<8x1024xf32>
    %34 = arith.mulf %23, %33 : vector<8x1024xf32>
    %35 = vector.broadcast %17 : vector<1x1024xf32> to vector<8x1024xf32>
    %36 = arith.addf %34, %35 : vector<8x1024xf32>
    %cst_11 = arith.constant 0.000000e+00 : f32
    %37 = vector.broadcast %cst_11 : f32 to vector<8x1024xf32>
    %38 = arith.maximumf %36, %37 : vector<8x1024xf32>
    %c0_i32_12 = arith.constant 0 : i32
    %39 = tpu.memref_slice %arg17[%c0_i32_12] : memref<6x!tpu.dma_semaphore, #tpu.memory_space<semaphore_mem>> -> memref<1x!tpu.dma_semaphore, #tpu.memory_space<semaphore_mem>>
    %40 = tpu.memref_squeeze %39 : memref<1x!tpu.dma_semaphore, #tpu.memory_space<semaphore_mem>> -> memref<!tpu.dma_semaphore, #tpu.memory_space<semaphore_mem>>
    tpu.wait_dma2 semaphore(%40 : memref<!tpu.dma_semaphore, #tpu.memory_space<semaphore_mem>>) src(%arg4 : memref<1024x512xbf16, #tpu.memory_space<any>>) dst(%arg11 : memref<1024x512xbf16, #tpu.memory_space<vmem>>)
    %41 = arith.truncf %38 : vector<8x1024xf32> to vector<8x1024xbf16>
    %c0_13 = arith.constant 0 : index
    %c0_14 = arith.constant 0 : index
    %42 = vector.load %arg11[%c0_13, %c0_14] : memref<1024x512xbf16, #tpu.memory_space<vmem>>, vector<1024x512xbf16>
    %cst_15 = arith.constant dense<0.000000e+00> : vector<8x512xf32>
    %43 = tpu.matmul %41, %42, %cst_15 {dimension_numbers = #tpu.dot_dimension_numbers<[1], [0], [0], [1], [0, 0, 1, 1], [], []>} : vector<8x1024xbf16>, vector<1024x512xbf16>, vector<8x512xf32> -> vector<8x512xf32>
    %c2 = arith.constant 2 : index
    %c0_16 = arith.constant 0 : index
    %44 = vector.load %arg3[%c2, %c0_16] : memref<13x1024xf32, #tpu.memory_space<vmem>>, vector<1x512xf32>
    %c3 = arith.constant 3 : index
    %c0_17 = arith.constant 0 : index
    %45 = vector.load %arg3[%c3, %c0_17] : memref<13x1024xf32, #tpu.memory_space<vmem>>, vector<1x512xf32>
    %cst_18 = arith.constant dense<0.000000e+00> : vector<512xf32>
    %46 = vector.multi_reduction <add>, %43, %cst_18 [0] : vector<8x512xf32> to vector<512xf32>
    %47 = vector.shape_cast %46 : vector<512xf32> to vector<1x512xf32>
    %cst_19 = arith.constant 8.000000e+00 : f32
    %48 = vector.broadcast %cst_19 : f32 to vector<1x512xf32>
    %49 = arith.divf %47, %48 : vector<1x512xf32>
    %50 = vector.broadcast %49 : vector<1x512xf32> to vector<8x512xf32>
    %51 = arith.subf %43, %50 : vector<8x512xf32>
    %52 = arith.mulf %51, %51 : vector<8x512xf32>
    %cst_20 = arith.constant dense<0.000000e+00> : vector<512xf32>
    %53 = vector.multi_reduction <add>, %52, %cst_20 [0] : vector<8x512xf32> to vector<512xf32>
    %54 = vector.shape_cast %53 : vector<512xf32> to vector<1x512xf32>
    %cst_21 = arith.constant 8.000000e+00 : f32
    %55 = vector.broadcast %cst_21 : f32 to vector<1x512xf32>
    %56 = arith.divf %54, %55 : vector<1x512xf32>
    %cst_22 = arith.constant 9.99999974E-6 : f32
    %57 = vector.broadcast %cst_22 : f32 to vector<1x512xf32>
    %58 = arith.addf %56, %57 : vector<1x512xf32>
    %59 = math.rsqrt %58 : vector<1x512xf32>
    %60 = arith.mulf %44, %59 : vector<1x512xf32>
    %61 = vector.broadcast %60 : vector<1x512xf32> to vector<8x512xf32>
    %62 = arith.mulf %51, %61 : vector<8x512xf32>
    %63 = vector.broadcast %45 : vector<1x512xf32> to vector<8x512xf32>
    %64 = arith.addf %62, %63 : vector<8x512xf32>
    %cst_23 = arith.constant 0.000000e+00 : f32
    %65 = vector.broadcast %cst_23 : f32 to vector<8x512xf32>
    %66 = arith.maximumf %64, %65 : vector<8x512xf32>
    %c1_i32_24 = arith.constant 1 : i32
    %67 = tpu.memref_slice %arg17[%c1_i32_24] : memref<6x!tpu.dma_semaphore, #tpu.memory_space<semaphore_mem>> -> memref<1x!tpu.dma_semaphore, #tpu.memory_space<semaphore_mem>>
    %68 = tpu.memref_squeeze %67 : memref<1x!tpu.dma_semaphore, #tpu.memory_space<semaphore_mem>> -> memref<!tpu.dma_semaphore, #tpu.memory_space<semaphore_mem>>
    tpu.wait_dma2 semaphore(%68 : memref<!tpu.dma_semaphore, #tpu.memory_space<semaphore_mem>>) src(%arg5 : memref<512x256xbf16, #tpu.memory_space<any>>) dst(%arg12 : memref<512x256xbf16, #tpu.memory_space<vmem>>)
    %69 = arith.truncf %66 : vector<8x512xf32> to vector<8x512xbf16>
    %c0_25 = arith.constant 0 : index
    %c0_26 = arith.constant 0 : index
    %70 = vector.load %arg12[%c0_25, %c0_26] : memref<512x256xbf16, #tpu.memory_space<vmem>>, vector<512x256xbf16>
    %cst_27 = arith.constant dense<0.000000e+00> : vector<8x256xf32>
    %71 = tpu.matmul %69, %70, %cst_27 {dimension_numbers = #tpu.dot_dimension_numbers<[1], [0], [0], [1], [0, 0, 1, 1], [], []>} : vector<8x512xbf16>, vector<512x256xbf16>, vector<8x256xf32> -> vector<8x256xf32>
    %c4 = arith.constant 4 : index
    %c0_28 = arith.constant 0 : index
    %72 = vector.load %arg3[%c4, %c0_28] : memref<13x1024xf32, #tpu.memory_space<vmem>>, vector<1x256xf32>
    %c5 = arith.constant 5 : index
    %c0_29 = arith.constant 0 : index
    %73 = vector.load %arg3[%c5, %c0_29] : memref<13x1024xf32, #tpu.memory_space<vmem>>, vector<1x256xf32>
    %cst_30 = arith.constant dense<0.000000e+00> : vector<256xf32>
    %74 = vector.multi_reduction <add>, %71, %cst_30 [0] : vector<8x256xf32> to vector<256xf32>
    %75 = vector.shape_cast %74 : vector<256xf32> to vector<1x256xf32>
    %cst_31 = arith.constant 8.000000e+00 : f32
    %76 = vector.broadcast %cst_31 : f32 to vector<1x256xf32>
    %77 = arith.divf %75, %76 : vector<1x256xf32>
    %78 = vector.broadcast %77 : vector<1x256xf32> to vector<8x256xf32>
    %79 = arith.subf %71, %78 : vector<8x256xf32>
    %80 = arith.mulf %79, %79 : vector<8x256xf32>
    %cst_32 = arith.constant dense<0.000000e+00> : vector<256xf32>
    %81 = vector.multi_reduction <add>, %80, %cst_32 [0] : vector<8x256xf32> to vector<256xf32>
    %82 = vector.shape_cast %81 : vector<256xf32> to vector<1x256xf32>
    %cst_33 = arith.constant 8.000000e+00 : f32
    %83 = vector.broadcast %cst_33 : f32 to vector<1x256xf32>
    %84 = arith.divf %82, %83 : vector<1x256xf32>
    %cst_34 = arith.constant 9.99999974E-6 : f32
    %85 = vector.broadcast %cst_34 : f32 to vector<1x256xf32>
    %86 = arith.addf %84, %85 : vector<1x256xf32>
    %87 = math.rsqrt %86 : vector<1x256xf32>
    %88 = arith.mulf %72, %87 : vector<1x256xf32>
    %89 = vector.broadcast %88 : vector<1x256xf32> to vector<8x256xf32>
    %90 = arith.mulf %79, %89 : vector<8x256xf32>
    %91 = vector.broadcast %73 : vector<1x256xf32> to vector<8x256xf32>
    %92 = arith.addf %90, %91 : vector<8x256xf32>
    %cst_35 = arith.constant 0.000000e+00 : f32
    %93 = vector.broadcast %cst_35 : f32 to vector<8x256xf32>
    %94 = arith.maximumf %92, %93 : vector<8x256xf32>
    %c2_i32_36 = arith.constant 2 : i32
    %95 = tpu.memref_slice %arg17[%c2_i32_36] : memref<6x!tpu.dma_semaphore, #tpu.memory_space<semaphore_mem>> -> memref<1x!tpu.dma_semaphore, #tpu.memory_space<semaphore_mem>>
    %96 = tpu.memref_squeeze %95 : memref<1x!tpu.dma_semaphore, #tpu.memory_space<semaphore_mem>> -> memref<!tpu.dma_semaphore, #tpu.memory_space<semaphore_mem>>
    tpu.wait_dma2 semaphore(%96 : memref<!tpu.dma_semaphore, #tpu.memory_space<semaphore_mem>>) src(%arg6 : memref<256x128xbf16, #tpu.memory_space<any>>) dst(%arg13 : memref<256x128xbf16, #tpu.memory_space<vmem>>)
    %97 = arith.truncf %94 : vector<8x256xf32> to vector<8x256xbf16>
    %c0_37 = arith.constant 0 : index
    %c0_38 = arith.constant 0 : index
    %98 = vector.load %arg13[%c0_37, %c0_38] : memref<256x128xbf16, #tpu.memory_space<vmem>>, vector<256x128xbf16>
    %cst_39 = arith.constant dense<0.000000e+00> : vector<8x128xf32>
    %99 = tpu.matmul %97, %98, %cst_39 {dimension_numbers = #tpu.dot_dimension_numbers<[1], [0], [0], [1], [0, 0, 1, 1], [], []>} : vector<8x256xbf16>, vector<256x128xbf16>, vector<8x128xf32> -> vector<8x128xf32>
    %c6 = arith.constant 6 : index
    %c0_40 = arith.constant 0 : index
    %100 = vector.load %arg3[%c6, %c0_40] : memref<13x1024xf32, #tpu.memory_space<vmem>>, vector<1x128xf32>
    %c7 = arith.constant 7 : index
    %c0_41 = arith.constant 0 : index
    %101 = vector.load %arg3[%c7, %c0_41] : memref<13x1024xf32, #tpu.memory_space<vmem>>, vector<1x128xf32>
    %cst_42 = arith.constant dense<0.000000e+00> : vector<128xf32>
    %102 = vector.multi_reduction <add>, %99, %cst_42 [0] : vector<8x128xf32> to vector<128xf32>
    %103 = vector.shape_cast %102 : vector<128xf32> to vector<1x128xf32>
    %cst_43 = arith.constant 8.000000e+00 : f32
    %104 = vector.broadcast %cst_43 : f32 to vector<1x128xf32>
    %105 = arith.divf %103, %104 : vector<1x128xf32>
    %106 = vector.broadcast %105 : vector<1x128xf32> to vector<8x128xf32>
    %107 = arith.subf %99, %106 : vector<8x128xf32>
    %108 = arith.mulf %107, %107 : vector<8x128xf32>
    %cst_44 = arith.constant dense<0.000000e+00> : vector<128xf32>
    %109 = vector.multi_reduction <add>, %108, %cst_44 [0] : vector<8x128xf32> to vector<128xf32>
    %110 = vector.shape_cast %109 : vector<128xf32> to vector<1x128xf32>
    %cst_45 = arith.constant 8.000000e+00 : f32
    %111 = vector.broadcast %cst_45 : f32 to vector<1x128xf32>
    %112 = arith.divf %110, %111 : vector<1x128xf32>
    %cst_46 = arith.constant 9.99999974E-6 : f32
    %113 = vector.broadcast %cst_46 : f32 to vector<1x128xf32>
    %114 = arith.addf %112, %113 : vector<1x128xf32>
    %115 = math.rsqrt %114 : vector<1x128xf32>
    %116 = arith.mulf %100, %115 : vector<1x128xf32>
    %117 = vector.broadcast %116 : vector<1x128xf32> to vector<8x128xf32>
    %118 = arith.mulf %107, %117 : vector<8x128xf32>
    %119 = vector.broadcast %101 : vector<1x128xf32> to vector<8x128xf32>
    %120 = arith.addf %118, %119 : vector<8x128xf32>
    %cst_47 = arith.constant 0.000000e+00 : f32
    %121 = vector.broadcast %cst_47 : f32 to vector<8x128xf32>
    %122 = arith.maximumf %120, %121 : vector<8x128xf32>
    %c3_i32_48 = arith.constant 3 : i32
    %123 = tpu.memref_slice %arg17[%c3_i32_48] : memref<6x!tpu.dma_semaphore, #tpu.memory_space<semaphore_mem>> -> memref<1x!tpu.dma_semaphore, #tpu.memory_space<semaphore_mem>>
    %124 = tpu.memref_squeeze %123 : memref<1x!tpu.dma_semaphore, #tpu.memory_space<semaphore_mem>> -> memref<!tpu.dma_semaphore, #tpu.memory_space<semaphore_mem>>
    tpu.wait_dma2 semaphore(%124 : memref<!tpu.dma_semaphore, #tpu.memory_space<semaphore_mem>>) src(%arg7 : memref<128x64xbf16, #tpu.memory_space<any>>) dst(%arg14 : memref<128x64xbf16, #tpu.memory_space<vmem>>)
    %125 = arith.truncf %122 : vector<8x128xf32> to vector<8x128xbf16>
    %c0_49 = arith.constant 0 : index
    %c0_50 = arith.constant 0 : index
    %126 = vector.load %arg14[%c0_49, %c0_50] : memref<128x64xbf16, #tpu.memory_space<vmem>>, vector<128x64xbf16>
    %cst_51 = arith.constant dense<0.000000e+00> : vector<8x64xf32>
    %127 = tpu.matmul %125, %126, %cst_51 {dimension_numbers = #tpu.dot_dimension_numbers<[1], [0], [0], [1], [0, 0, 1, 1], [], []>} : vector<8x128xbf16>, vector<128x64xbf16>, vector<8x64xf32> -> vector<8x64xf32>
    %c8 = arith.constant 8 : index
    %c0_52 = arith.constant 0 : index
    %128 = vector.load %arg3[%c8, %c0_52] : memref<13x1024xf32, #tpu.memory_space<vmem>>, vector<1x64xf32>
    %c9 = arith.constant 9 : index
    %c0_53 = arith.constant 0 : index
    %129 = vector.load %arg3[%c9, %c0_53] : memref<13x1024xf32, #tpu.memory_space<vmem>>, vector<1x64xf32>
    %cst_54 = arith.constant dense<0.000000e+00> : vector<64xf32>
    %130 = vector.multi_reduction <add>, %127, %cst_54 [0] : vector<8x64xf32> to vector<64xf32>
    %131 = vector.shape_cast %130 : vector<64xf32> to vector<1x64xf32>
    %cst_55 = arith.constant 8.000000e+00 : f32
    %132 = vector.broadcast %cst_55 : f32 to vector<1x64xf32>
    %133 = arith.divf %131, %132 : vector<1x64xf32>
    %134 = vector.broadcast %133 : vector<1x64xf32> to vector<8x64xf32>
    %135 = arith.subf %127, %134 : vector<8x64xf32>
    %136 = arith.mulf %135, %135 : vector<8x64xf32>
    %cst_56 = arith.constant dense<0.000000e+00> : vector<64xf32>
    %137 = vector.multi_reduction <add>, %136, %cst_56 [0] : vector<8x64xf32> to vector<64xf32>
    %138 = vector.shape_cast %137 : vector<64xf32> to vector<1x64xf32>
    %cst_57 = arith.constant 8.000000e+00 : f32
    %139 = vector.broadcast %cst_57 : f32 to vector<1x64xf32>
    %140 = arith.divf %138, %139 : vector<1x64xf32>
    %cst_58 = arith.constant 9.99999974E-6 : f32
    %141 = vector.broadcast %cst_58 : f32 to vector<1x64xf32>
    %142 = arith.addf %140, %141 : vector<1x64xf32>
    %143 = math.rsqrt %142 : vector<1x64xf32>
    %144 = arith.mulf %128, %143 : vector<1x64xf32>
    %145 = vector.broadcast %144 : vector<1x64xf32> to vector<8x64xf32>
    %146 = arith.mulf %135, %145 : vector<8x64xf32>
    %147 = vector.broadcast %129 : vector<1x64xf32> to vector<8x64xf32>
    %148 = arith.addf %146, %147 : vector<8x64xf32>
    %cst_59 = arith.constant 0.000000e+00 : f32
    %149 = vector.broadcast %cst_59 : f32 to vector<8x64xf32>
    %150 = arith.maximumf %148, %149 : vector<8x64xf32>
    %c4_i32_60 = arith.constant 4 : i32
    %151 = tpu.memref_slice %arg17[%c4_i32_60] : memref<6x!tpu.dma_semaphore, #tpu.memory_space<semaphore_mem>> -> memref<1x!tpu.dma_semaphore, #tpu.memory_space<semaphore_mem>>
    %152 = tpu.memref_squeeze %151 : memref<1x!tpu.dma_semaphore, #tpu.memory_space<semaphore_mem>> -> memref<!tpu.dma_semaphore, #tpu.memory_space<semaphore_mem>>
    tpu.wait_dma2 semaphore(%152 : memref<!tpu.dma_semaphore, #tpu.memory_space<semaphore_mem>>) src(%arg8 : memref<64x32xbf16, #tpu.memory_space<any>>) dst(%arg15 : memref<64x32xbf16, #tpu.memory_space<vmem>>)
    %153 = arith.truncf %150 : vector<8x64xf32> to vector<8x64xbf16>
    %c0_61 = arith.constant 0 : index
    %c0_62 = arith.constant 0 : index
    %154 = vector.load %arg15[%c0_61, %c0_62] : memref<64x32xbf16, #tpu.memory_space<vmem>>, vector<64x32xbf16>
    %cst_63 = arith.constant dense<0.000000e+00> : vector<8x32xf32>
    %155 = tpu.matmul %153, %154, %cst_63 {dimension_numbers = #tpu.dot_dimension_numbers<[1], [0], [0], [1], [0, 0, 1, 1], [], []>} : vector<8x64xbf16>, vector<64x32xbf16>, vector<8x32xf32> -> vector<8x32xf32>
    %c10 = arith.constant 10 : index
    %c0_64 = arith.constant 0 : index
    %156 = vector.load %arg3[%c10, %c0_64] : memref<13x1024xf32, #tpu.memory_space<vmem>>, vector<1x32xf32>
    %c11 = arith.constant 11 : index
    %c0_65 = arith.constant 0 : index
    %157 = vector.load %arg3[%c11, %c0_65] : memref<13x1024xf32, #tpu.memory_space<vmem>>, vector<1x32xf32>
    %cst_66 = arith.constant dense<0.000000e+00> : vector<32xf32>
    %158 = vector.multi_reduction <add>, %155, %cst_66 [0] : vector<8x32xf32> to vector<32xf32>
    %159 = vector.shape_cast %158 : vector<32xf32> to vector<1x32xf32>
    %cst_67 = arith.constant 8.000000e+00 : f32
    %160 = vector.broadcast %cst_67 : f32 to vector<1x32xf32>
    %161 = arith.divf %159, %160 : vector<1x32xf32>
    %162 = vector.broadcast %161 : vector<1x32xf32> to vector<8x32xf32>
    %163 = arith.subf %155, %162 : vector<8x32xf32>
    %164 = arith.mulf %163, %163 : vector<8x32xf32>
    %cst_68 = arith.constant dense<0.000000e+00> : vector<32xf32>
    %165 = vector.multi_reduction <add>, %164, %cst_68 [0] : vector<8x32xf32> to vector<32xf32>
    %166 = vector.shape_cast %165 : vector<32xf32> to vector<1x32xf32>
    %cst_69 = arith.constant 8.000000e+00 : f32
    %167 = vector.broadcast %cst_69 : f32 to vector<1x32xf32>
    %168 = arith.divf %166, %167 : vector<1x32xf32>
    %cst_70 = arith.constant 9.99999974E-6 : f32
    %169 = vector.broadcast %cst_70 : f32 to vector<1x32xf32>
    %170 = arith.addf %168, %169 : vector<1x32xf32>
    %171 = math.rsqrt %170 : vector<1x32xf32>
    %172 = arith.mulf %156, %171 : vector<1x32xf32>
    %173 = vector.broadcast %172 : vector<1x32xf32> to vector<8x32xf32>
    %174 = arith.mulf %163, %173 : vector<8x32xf32>
    %175 = vector.broadcast %157 : vector<1x32xf32> to vector<8x32xf32>
    %176 = arith.addf %174, %175 : vector<8x32xf32>
    %cst_71 = arith.constant 0.000000e+00 : f32
    %177 = vector.broadcast %cst_71 : f32 to vector<8x32xf32>
    %178 = arith.maximumf %176, %177 : vector<8x32xf32>
    %c5_i32_72 = arith.constant 5 : i32
    %179 = tpu.memref_slice %arg17[%c5_i32_72] : memref<6x!tpu.dma_semaphore, #tpu.memory_space<semaphore_mem>> -> memref<1x!tpu.dma_semaphore, #tpu.memory_space<semaphore_mem>>
    %180 = tpu.memref_squeeze %179 : memref<1x!tpu.dma_semaphore, #tpu.memory_space<semaphore_mem>> -> memref<!tpu.dma_semaphore, #tpu.memory_space<semaphore_mem>>
    tpu.wait_dma2 semaphore(%180 : memref<!tpu.dma_semaphore, #tpu.memory_space<semaphore_mem>>) src(%arg9 : memref<32x128xbf16, #tpu.memory_space<any>>) dst(%arg16 : memref<32x128xbf16, #tpu.memory_space<vmem>>)
    %c12 = arith.constant 12 : index
    %c0_73 = arith.constant 0 : index
    %181 = vector.load %arg3[%c12, %c0_73] : memref<13x1024xf32, #tpu.memory_space<vmem>>, vector<1x128xf32>
    %182 = arith.truncf %178 : vector<8x32xf32> to vector<8x32xbf16>
    %c0_74 = arith.constant 0 : index
    %c0_75 = arith.constant 0 : index
    %183 = vector.load %arg16[%c0_74, %c0_75] : memref<32x128xbf16, #tpu.memory_space<vmem>>, vector<32x128xbf16>
    %cst_76 = arith.constant dense<0.000000e+00> : vector<8x128xf32>
    %184 = tpu.matmul %182, %183, %cst_76 {dimension_numbers = #tpu.dot_dimension_numbers<[1], [0], [0], [1], [0, 0, 1, 1], [], []>} : vector<8x32xbf16>, vector<32x128xbf16>, vector<8x128xf32> -> vector<8x128xf32>
    %185 = vector.broadcast %181 : vector<1x128xf32> to vector<8x128xf32>
    %186 = arith.addf %184, %185 : vector<8x128xf32>
    %c0_77 = arith.constant 0 : index
    %c0_78 = arith.constant 0 : index
    %187 = vector.load %arg10[%c0_77, %c0_78] : memref<8x128xf32, #tpu.memory_space<vmem>>, vector<8x128xf32>
    tpu.vector_store %arg10[%c0_77, %c0_78], %186 {strides = array<i32>} : memref<8x128xf32, #tpu.memory_space<vmem>>, vector<8x128xf32>,
    return
  }
  func.func @transform_0(%arg0: i32) -> (i32, i32) {
    %c0_i32 = arith.constant 0 : i32
    %c0_i32_0 = arith.constant 0 : i32
    %c0_i32_1 = arith.constant 0 : i32
    return %c0_i32, %c0_i32_0 : i32, i32
  }
  func.func @transform_1(%arg0: i32) -> (i32, i32) {
    %c0_i32 = arith.constant 0 : i32
    %c0_i32_0 = arith.constant 0 : i32
    %c0_i32_1 = arith.constant 0 : i32
    return %c0_i32, %c0_i32_0 : i32, i32
  }
  func.func @transform_2(%arg0: i32) -> (i32, i32) {
    %c0_i32 = arith.constant 0 : i32
    %c0_i32_0 = arith.constant 0 : i32
    %c0_i32_1 = arith.constant 0 : i32
    return %c0_i32, %c0_i32_0 : i32, i32
  }
  func.func @transform_9(%arg0: i32) -> (i32, i32) {
    %c0_i32 = arith.constant 0 : i32
    %c0_i32_0 = arith.constant 0 : i32
    %c0_i32_1 = arith.constant 0 : i32
    return %c0_i32, %c0_i32_0 : i32, i32
  }
}

</mosaic_0001>

<bundles_post_ra>
// kernel: tpu_custom_call.1
= control target key start
LH: loop header
LB: loop body
LE: loop exit
PB: predicated region body
PF: predicated region fallthrough
CT: control target
= control target key end

     0   :  { %14 = vsyncpa [#allocation10], 0  ;;  %s11114_s0 = inlined_call_operand.hbm [shape: f32[8,768], index: 0, kind: input, shape index: {}]   ;;  %s11115_s1 = inlined_call_operand.hbm [shape: bf16[768,1024], index: 1, kind: input, shape index: {}]   ;;  %s11116_s2 = inlined_call_operand.hbm [shape: f32[13,1024], index: 2, kind: input, shape index: {}]   ;;  %s11117_s3 = inlined_call_operand.hbm [shape: bf16[1024,512], index: 3, kind: input, shape index: {}]   ;;  %s11118_s4 = inlined_call_operand.hbm [shape: bf16[512,256], index: 4, kind: input, shape index: {}]   ;;  %s11119_s5 = inlined_call_operand.hbm [shape: bf16[256,128], index: 5, kind: input, shape index: {}]   ;;  %s11120_s6 = inlined_call_operand.vmem [shape: bf16[128,64], index: 6, kind: input, shape index: {}]   ;;  %s11121_s7 = inlined_call_operand.vmem [shape: bf16[64,32], index: 7, kind: input, shape index: {}]   ;;  %s11122_s8 = inlined_call_operand.hbm [shape: bf16[32,128], index: 8, kind: input, shape index: {}]   ;;  %s11123_s9 = inlined_call_operand.hbm [shape: f32[8,128], index: 9, kind: output, shape index: {}]  }
   0x1   :  { %15 = vsyncpa [#allocation13], 0  ;;  %s32_s11 = sshll.u32 %s11115_s1, 4  ;;  %s33_s11 = int_to_ptr.hbm [resolvable:$true] %s32_s11 }
   0x2   :  { %16 = vsyncpa [#allocation11], 0  ;;  %s10576_s12 = smov [#allocation12]   ;;  %s22_s16 = sshll.u32 %s11114_s0, 4  ;;  %s23_s16 = int_to_ptr.hbm [resolvable:$true] %s22_s16 }
   0x3   :  { %s34_s13 = sshll.u32 %s10576_s12, 4  ;;  %s10577_s17 = smov 512   ;;  %s35_s13 = int_to_ptr.vmem [resolvable:$true] %s34_s13 }
   0x4   :  { %s10578_s18 = smov 32   ;;  %s10579_s19 = smov [#allocation9]  }
   0x5   :  { %40 = dma.hbm_to_vmem [thread:$0]  %s33_s11, 49152, %s35_s13, [#allocation13], %s10577_s17, %s10577_s17, %s10578_s18  }
   0x6   :  { %s24_s20 = sshll.u32 %s10579_s19, 4  ;;  %s45_s23 = sshll.u32 %s11116_s2, 4  ;;  %s25_s20 = int_to_ptr.vmem [resolvable:$true] %s24_s20  ;;  %s46_s23 = int_to_ptr.hbm [resolvable:$true] %s45_s23 }
   0x7   :  { %27 = dma.hbm_to_vmem [thread:$0]  %s23_s16, 768, %s25_s20, [#allocation10]  }
   0x8   :  { %s10580_s1 = smov [#allocation14]   ;;  %s10581_s25 = smov 1024  }
   0x9   :  { %s47_s24 = sshll.u32 %s10580_s1, 4  ;;  %s10582_s26 = smov 64   ;;  %s48_s24 = int_to_ptr.vmem [resolvable:$true] %s47_s24 }
   0xa   :  { %53 = dma.hbm_to_vmem [thread:$0]  %s46_s23, 2048, %s48_s24, [#allocation13], %s10581_s25, %s10581_s25, %s10582_s26  }
   0xb   :  { %10558 = dma.done.wait [#allocation10], 768  }
   0xc   :  { %10559 = vsyncadd [#allocation10], 4294966528 }
   0xd   :  { %10560 = dma.done.wait [#allocation13], 51200  }
   0xe   :  { %10561 = vsyncadd [#allocation13], 4294916096  ;;  %s74_s28 = sshll.u32 %s11117_s3, 4  ;;  %s10583_s29 = smov [#allocation2]   ;;  %v119_v0 = vld [vmem:[%s11120_s6] sm:$0xff]  ;;  %v121_v1 = vld [vmem:[%s11120_s6 + $0x8] sm:$0xff]  ;;  %s75_s28 = int_to_ptr.hbm [resolvable:$true] %s74_s28 }
   0xf   :  { %s76_s2 = sshll.u32 %s10583_s29, 4  ;;  %s88_s11 = sshll.u32 %s11118_s4, 4  ;;  %v123_v2 = vld [vmem:[%s11120_s6 + $0x10] sm:$0xff]  ;;  %120 = vst [vmem:[#allocation5 + $0x30] sm:$0xff] %v119_v0  ;;  %v125_v3 = vld [vmem:[%s11120_s6 + $0x18] sm:$0xff]  ;;  %v127_v4 = vld [vmem:[%s11120_s6 + $0x20] sm:$0xff]  ;;  %s77_s2 = int_to_ptr.vmem [resolvable:$true] %s76_s2  ;;  %s89_s11 = int_to_ptr.hbm [resolvable:$true] %s88_s11 }
  0x10   :  { %79 = dma.hbm_to_vmem [thread:$0]  %s75_s28, 32768, %s77_s2, [#allocation8]  ;;  %122 = vst [vmem:[#allocation5] sm:$0xff] %v121_v1  ;;  %v129_v5 = vld [vmem:[%s11120_s6 + $0x28] sm:$0xff]  ;;  %v131_v6 = vld [vmem:[%s11120_s6 + $0x30] sm:$0xff]  ;;  %v133_v7 = vld [vmem:[%s11120_s6 + $0x38] sm:$0xff] }
  0x11   :  { %s10584_s12 = smov [#allocation3]   ;;  %s102_s16 = sshll.u32 %s11119_s5, 4  ;;  %124 = vst [vmem:[#allocation5 + $0x18] sm:$0xff] %v123_v2  ;;  %s103_s16 = int_to_ptr.hbm [resolvable:$true] %s102_s16 }
  0x12   :  { %s90_s13 = sshll.u32 %s10584_s12, 4  ;;  %s10585_s5 = smov [#allocation4]   ;;  %126 = vst [vmem:[#allocation5 + $0x10] sm:$0xff] %v125_v3  ;;  %s91_s13 = int_to_ptr.vmem [resolvable:$true] %s90_s13 }
  0x13   :  { %93 = dma.hbm_to_vmem [thread:$0]  %s89_s11, 8192, %s91_s13, [#allocation8 + $0x1]  ;;  %128 = vst [vmem:[#allocation5 + $0x8] sm:$0xff] %v127_v4 }
  0x14   :  { %s104_s23 = sshll.u32 %s10585_s5, 4  ;;  %130 = vst [vmem:[#allocation5 + $0x20] sm:$0xff] %v129_v5  ;;  %s105_s23 = int_to_ptr.vmem [resolvable:$true] %s104_s23 }
  0x15   :  { %107 = dma.hbm_to_vmem [thread:$0]  %s103_s16, 2048, %s105_s23, [#allocation8 + $0x2]  ;;  %132 = vst [vmem:[#allocation5 + $0x28] sm:$0xff] %v131_v6 }
  0x16   :  { %134 = vst [vmem:[#allocation5 + $0x38] sm:$0xff] %v133_v7 }
  0x17   :  { %140 = vsyncadd [#allocation8 + $0x3], 1024  ;;  %v152_v8 = vld [vmem:[%s11121_s7] sm:$0xff]  ;;  %v154_v9 = vld [vmem:[%s11121_s7 + $0x8] sm:$0xff] }
  0x18   :  { %153 = vst [vmem:[#allocation6] sm:$0xff] %v152_v8  ;;  %v156_v10 = vld [vmem:[%s11121_s7 + $0x10] sm:$0xff]  ;;  %v158_v11 = vld [vmem:[%s11121_s7 + $0x18] sm:$0xff]  ;;  %v6865_v12 = vld [vmem:[#allocation12 + $0x1c0] sm:$0xf] }
  0x19   :  { %155 = vst [vmem:[#allocation6 + $0x18] sm:$0xff] %v154_v9  ;;  %v9643_v13 = vld [vmem:[#allocation12 + $0x1dc] sm:$0xf0] }
  0x1a   :  { %157 = vst [vmem:[#allocation6 + $0x10] sm:$0xff] %v156_v10  ;;  %v7121_v14 = vld [vmem:[#allocation12 + $0x3c0] sm:$0xf]  ;;  %v6866_v15 = vor.u32 %v9643_v13, %v6865_v12 }
  0x1b   :  { %159 = vst [vmem:[#allocation6 + $0x8] sm:$0xff] %v158_v11  ;;  %v9707_v16 = vld [vmem:[#allocation12 + $0x3dc] sm:$0xf0] }
  0x1c   :  { %v7377_v17 = vld [vmem:[#allocation12 + $0x5c0] sm:$0xf]  ;;  %v7122_v19 = vor.u32 %v9707_v16, %v7121_v14  ;;  %2496 = vmatpush.bf16.msra.mxu0 %v6866_v15 }
  0x1d   :  { %v9771_v18 = vld [vmem:[#allocation12 + $0x5dc] sm:$0xf0] }
  0x1e   :  { %v7378_v20 = vor.u32 %v9771_v18, %v7377_v17  ;;  %v7633_v21 = vld [vmem:[#allocation12 + $0x7c0] sm:$0xf]  ;;  %2509 = vmatpush.bf16.msra.mxu1 %v7122_v19 }
  0x1f   :  { %v9835_v22 = vld [vmem:[#allocation12 + $0x7dc] sm:$0xf0] }
  0x20   :  { %v6833_v23 = vld [vmem:[#allocation12 + $0x180] sm:$0xf]  ;;  %v7634_v24 = vor.u32 %v9835_v22, %v7633_v21  ;;  %2522 = vmatpush.bf16.msra.mxu2 %v7378_v20 }
  0x21   :  { %v9635_v25 = vld [vmem:[#allocation12 + $0x19c] sm:$0xf0] }
  0x22   :  { %v7089_v26 = vld [vmem:[#allocation12 + $0x380] sm:$0xf]  ;;  %v6834_v28 = vor.u32 %v9635_v25, %v6833_v23  ;;  %2535 = vmatpush.bf16.msra.mxu3 %v7634_v24 }
  0x23   :  { %v9699_v27 = vld [vmem:[#allocation12 + $0x39c] sm:$0xf0] }
  0x24   :  { %v7090_v29 = vor.u32 %v9699_v27, %v7089_v26  ;;  %v7345_v30 = vld [vmem:[#allocation12 + $0x580] sm:$0xf]  ;;  %2497 = vmatpush.bf16.msra.mxu0 %v6834_v28 }
  0x25   :  { %v9763_v31 = vld [vmem:[#allocation12 + $0x59c] sm:$0xf0] }
  0x26   :  { %v7601_v32 = vld [vmem:[#allocation12 + $0x780] sm:$0xf]  ;;  %v7346_v33 = vor.u32 %v9763_v31, %v7345_v30  ;;  %2510 = vmatpush.bf16.msra.mxu1 %v7090_v29 }
  0x27   :  { %v9827_v34 = vld [vmem:[#allocation12 + $0x79c] sm:$0xf0] }
  0x28   :  { %v6801_v35 = vld [vmem:[#allocation12 + $0x140] sm:$0xf]  ;;  %v7602_v37 = vor.u32 %v9827_v34, %v7601_v32  ;;  %2523 = vmatpush.bf16.msra.mxu2 %v7346_v33 }
  0x29   :  { %v9627_v36 = vld [vmem:[#allocation12 + $0x15c] sm:$0xf0] }
  0x2a   :  { %v7057_v38 = vld [vmem:[#allocation12 + $0x340] sm:$0xf]  ;;  %v6802_v41 = vor.u32 %v9627_v36, %v6801_v35  ;;  %2536 = vmatpush.bf16.msra.mxu3 %v7602_v37 }
  0x2b   :  { %v9691_v39 = vld [vmem:[#allocation12 + $0x35c] sm:$0xf0] }
  0x2c   :  { %v7313_v40 = vld [vmem:[#allocation12 + $0x540] sm:$0xf]  ;;  %v7058_v45 = vor.u32 %v9691_v39, %v7057_v38  ;;  %2498 = vmatpush.bf16.msra.mxu0 %v6802_v41 }
  0x2d   :  { %v9755_v42 = vld [vmem:[#allocation12 + $0x55c] sm:$0xf0] }
  0x2e   :  { %v7569_v43 = vld [vmem:[#allocation12 + $0x740] sm:$0xf]  ;;  %v7314_v46 = vor.u32 %v9755_v42, %v7313_v40  ;;  %2511 = vmatpush.bf16.msra.mxu1 %v7058_v45  ;;  %v9639_v45 = vld [vmem:[#allocation12 + $0x1c4] sm:$0xf] }
  0x2f   :  { %v9819_v44 = vld [vmem:[#allocation12 + $0x75c] sm:$0xf0] }
  0x30   :  { %v6769_v47 = vld [vmem:[#allocation12 + $0x100] sm:$0xf]  ;;  %v7570_v50 = vor.u32 %v9819_v44, %v7569_v43  ;;  %2524 = vmatpush.bf16.msra.mxu2 %v7314_v46  ;;  %v6867_v46 = vld [vmem:[#allocation12 + $0x1e0] sm:$0xf0] }
  0x31   :  { %v9619_v48 = vld [vmem:[#allocation12 + $0x11c] sm:$0xf0] }
  0x32   :  { %v7025_v49 = vld [vmem:[#allocation12 + $0x300] sm:$0xf]  ;;  %v6770_v56 = vor.u32 %v9619_v48, %v6769_v47  ;;  %2537 = vmatpush.bf16.msra.mxu3 %v7570_v50  ;;  %v7123_v50 = vld [vmem:[#allocation12 + $0x3e0] sm:$0xf0] }
  0x33   :  { %v9683_v51 = vld [vmem:[#allocation12 + $0x31c] sm:$0xf0] }
  0x34   :  { %v7281_v52 = vld [vmem:[#allocation12 + $0x500] sm:$0xf]  ;;  %v7026_v57 = vor.u32 %v9683_v51, %v7025_v49  ;;  %2499 = vmatpush.bf16.msra.mxu0 %v6770_v56  ;;  %v9703_v49 = vld [vmem:[#allocation12 + $0x3c4] sm:$0xf] }
  0x35   :  { %v9747_v53 = vld [vmem:[#allocation12 + $0x51c] sm:$0xf0] }
  0x36   :  { %v7537_v54 = vld [vmem:[#allocation12 + $0x700] sm:$0xf]  ;;  %v7282_v58 = vor.u32 %v9747_v53, %v7281_v52  ;;  %2512 = vmatpush.bf16.msra.mxu1 %v7026_v57 }
  0x37   :  { %v9811_v55 = vld [vmem:[#allocation12 + $0x71c] sm:$0xf0] }
  0x38   :  { %v6737_v59 = vld [vmem:[#allocation12 + $0xc0] sm:$0xf]  ;;  %v7538_v62 = vor.u32 %v9811_v55, %v7537_v54  ;;  %2525 = vmatpush.bf16.msra.mxu2 %v7282_v58  ;;  %v6870_v54 = vor.u32 %v9639_v45, %v6867_v46  ;;  %v7126_v58 = vor.u32 %v9703_v49, %v7123_v50 }
  0x39   :  { %v9611_v60 = vld [vmem:[#allocation12 + $0xdc] sm:$0xf0] }
  0x3a   :  { %v6993_v61 = vld [vmem:[#allocation12 + $0x2c0] sm:$0xf]  ;;  %v6738_v4 = vor.u32 %v9611_v60, %v6737_v59  ;;  %2538 = vmatpush.bf16.msra.mxu3 %v7538_v62  ;;  %v9631_v60 = vld [vmem:[#allocation12 + $0x184] sm:$0xf] }
  0x3b   :  { %v9675_v63 = vld [vmem:[#allocation12 + $0x2dc] sm:$0xf0]  ;;  %v9695_v62 = vld [vmem:[#allocation12 + $0x384] sm:$0xf] }
  0x3c   :  { %v7249_v0 = vld [vmem:[#allocation12 + $0x4c0] sm:$0xf]  ;;  %v6994_v5 = vor.u32 %v9675_v63, %v6993_v61  ;;  %2500 = vmatpush.bf16.msra.mxu0 %v6738_v4  ;;  %v6835_v61 = vld [vmem:[#allocation12 + $0x1a0] sm:$0xf0] }
  0x3d   :  { %v9739_v1 = vld [vmem:[#allocation12 + $0x4dc] sm:$0xf0]  ;;  %v7091_v63 = vld [vmem:[#allocation12 + $0x3a0] sm:$0xf0] }
  0x3e   :  { %v7505_v2 = vld [vmem:[#allocation12 + $0x6c0] sm:$0xf]  ;;  %v7250_v6 = vor.u32 %v9739_v1, %v7249_v0  ;;  %2513 = vmatpush.bf16.msra.mxu1 %v6994_v5  ;;  %v180_v0 = vld [vmem:[#allocation9] sm:$0xff]  ;;  %v6838_v5 = vor.u32 %v9631_v60, %v6835_v61 }
  0x3f   :  { %v9803_v3 = vld [vmem:[#allocation12 + $0x6dc] sm:$0xf0] }
  0x40   :  { %v6705_v7 = vld [vmem:[#allocation12 + $0x80] sm:$0xf]  ;;  %v7506_v10 = vor.u32 %v9803_v3, %v7505_v2  ;;  %2526 = vmatpush.bf16.msra.mxu2 %v7250_v6  ;;  %v10693_v3 = vpack.c.bf16 %v180_v0, %v180_v0  ;;  %v9591_v0 = vld [vmem:[#allocation12 + $0x44] sm:$0xf] }
  0x41   :  { %v9603_v8 = vld [vmem:[#allocation12 + $0x9c] sm:$0xf0] }
  0x42   :  { %v6961_v9 = vld [vmem:[#allocation12 + $0x280] sm:$0xf]  ;;  %v6706_v16 = vor.u32 %v9603_v8, %v6705_v7  ;;  %2539 = vmatpush.bf16.msra.mxu3 %v7506_v10  ;;  %v9623_v10 = vld [vmem:[#allocation12 + $0x144] sm:$0xf] }
  0x43   :  { %v9667_v11 = vld [vmem:[#allocation12 + $0x29c] sm:$0xf0] }
  0x44   :  { %v7217_v12 = vld [vmem:[#allocation12 + $0x480] sm:$0xf]  ;;  %v6962_v17 = vor.u32 %v9667_v11, %v6961_v9  ;;  %2501 = vmatpush.bf16.msra.mxu0 %v6706_v16  ;;  %v7094_v9 = vor.u32 %v9695_v62, %v7091_v63  ;;  %v6803_v11 = vld [vmem:[#allocation12 + $0x160] sm:$0xf0] }
  0x45   :  { %v9731_v13 = vld [vmem:[#allocation12 + $0x49c] sm:$0xf0] }
  0x46   :  { %v7473_v14 = vld [vmem:[#allocation12 + $0x680] sm:$0xf]  ;;  %v7218_v18 = vor.u32 %v9731_v13, %v7217_v12  ;;  %2514 = vmatpush.bf16.msra.mxu1 %v6962_v17  ;;  %v181_v12 = vld [vmem:[#allocation9 + $0x8] sm:$0xff]  ;;  %v9687_v13 = vld [vmem:[#allocation12 + $0x344] sm:$0xf] }
  0x47   :  { %v9795_v15 = vld [vmem:[#allocation12 + $0x69c] sm:$0xf0] }
  0x48   :  { %v6673_v19 = vld [vmem:[#allocation12 + $0x40] sm:$0xf]  ;;  %v7474_v22 = vor.u32 %v9795_v15, %v7473_v14  ;;  %2527 = vmatpush.bf16.msra.mxu2 %v7218_v18  ;;  %v7059_v14 = vld [vmem:[#allocation12 + $0x360] sm:$0xf0]  ;;  %v10696_v15 = vpack.c.bf16 %v181_v12, %v181_v12 }
  0x49   :  { %v9595_v20 = vld [vmem:[#allocation12 + $0x5c] sm:$0xf0]  ;;  %v9583_v12 = vld [vmem:[#allocation12 + $0x4] sm:$0xf] }
  0x4a   :  { %v6929_v21 = vld [vmem:[#allocation12 + $0x240] sm:$0xf]  ;;  %v6674_v28 = vor.u32 %v9595_v20, %v6673_v19  ;;  %2540 = vmatpush.bf16.msra.mxu3 %v7474_v22  ;;  %v6806_v20 = vor.u32 %v9623_v10, %v6803_v11 }
  0x4b   :  { %v9659_v23 = vld [vmem:[#allocation12 + $0x25c] sm:$0xf0] }
  0x4c   :  { %v7185_v24 = vld [vmem:[#allocation12 + $0x440] sm:$0xf]  ;;  %v6930_v31 = vor.u32 %v9659_v23, %v6929_v21  ;;  %2502 = vmatpush.bf16.msra.mxu0 %v6674_v28  ;;  %v183_v23 = vld [vmem:[#allocation9 + $0x18] sm:$0xff] }
  0x4d   :  { %v9723_v25 = vld [vmem:[#allocation12 + $0x45c] sm:$0xf0] }
  0x4e   :  { %v7441_v26 = vld [vmem:[#allocation12 + $0x640] sm:$0xf]  ;;  %v7186_v32 = vor.u32 %v9723_v25, %v7185_v24  ;;  %2515 = vmatpush.bf16.msra.mxu1 %v6930_v31  ;;  %v7062_v24 = vor.u32 %v9687_v13, %v7059_v14  ;;  %v10701_v31 = vpack.c.bf16 %v183_v23, %v183_v23  ;;  %v6643_v14 = vld [vmem:[#allocation12 + $0x20] sm:$0xf0] }
  0x4f   :  { %v9787_v27 = vld [vmem:[#allocation12 + $0x65c] sm:$0xf0]  ;;  %v9895_v23 = vld [vmem:[#allocation12 + $0x9c4] sm:$0xf] }
  0x50   :  { %v6641_v29 = vld [vmem:[#allocation12] sm:$0xf]  ;;  %v7442_v36 = vor.u32 %v9787_v27, %v7441_v26  ;;  %2528 = vmatpush.bf16.msra.mxu2 %v7186_v32  ;;  %v9615_v26 = vld [vmem:[#allocation12 + $0x104] sm:$0xf] }
  0x51   :  { %v9587_v30 = vld [vmem:[#allocation12 + $0x1c] sm:$0xf0]  ;;  %v6771_v27 = vld [vmem:[#allocation12 + $0x120] sm:$0xf0] }
  0x52   :  { %v6897_v33 = vld [vmem:[#allocation12 + $0x200] sm:$0xf]  ;;  %v6642_v43 = vor.u32 %v9587_v30, %v6641_v29  ;;  %2541 = vmatpush.bf16.msra.mxu3 %v7442_v36  ;;  %v9679_v29 = vld [vmem:[#allocation12 + $0x304] sm:$0xf] }
  0x53   :  { %v9651_v34 = vld [vmem:[#allocation12 + $0x21c] sm:$0xf0]  ;;  %v7027_v30 = vld [vmem:[#allocation12 + $0x320] sm:$0xf0] }
  0x54   :  { %v7153_v35 = vld [vmem:[#allocation12 + $0x400] sm:$0xf]  ;;  %v6898_v47 = vor.u32 %v9651_v34, %v6897_v33  ;;  %2503 = vmatpush.bf16.msra.mxu0 %v6642_v43  ;;  %v6774_v34 = vor.u32 %v9615_v26, %v6771_v27  ;;  %v6995_v43 = vld [vmem:[#allocation12 + $0x2e0] sm:$0xf0]  ;;  %v6646_v26 = vor.u32 %v9583_v12, %v6643_v14 }
  0x55   :  { %v9715_v37 = vld [vmem:[#allocation12 + $0x41c] sm:$0xf0]  ;;  %v9959_v27 = vld [vmem:[#allocation12 + $0xbc4] sm:$0xf] }
  0x56   :  { %v7409_v38 = vld [vmem:[#allocation12 + $0x600] sm:$0xf]  ;;  %v7154_v48 = vor.u32 %v9715_v37, %v7153_v35  ;;  %2516 = vmatpush.bf16.msra.mxu1 %v6898_v47  ;;  %v9735_v12 = vld [vmem:[#allocation12 + $0x4c4] sm:$0xf] }
  0x57   :  { %v9779_v39 = vld [vmem:[#allocation12 + $0x61c] sm:$0xf0]  ;;  %2504 = vmatmul.bf16.vlgmr.msra.gmra.mxu0 %v10693_v3  ;;  %v9799_v14 = vld [vmem:[#allocation12 + $0x6c4] sm:$0xf] }
  0x58   :  { %v7889_v40 = vld [vmem:[#allocation12 + $0x9c0] sm:$0xf]  ;;  %v7410_v51 = vor.u32 %v9779_v39, %v7409_v38  ;;  %2529 = vmatpush.bf16.msra.mxu2 %v7154_v48  ;;  %v7030_v38 = vor.u32 %v9679_v29, %v7027_v30  ;;  %v8147_v29 = vld [vmem:[#allocation12 + $0xbe0] sm:$0xf0]  ;;  %v184_v30 = vld [vmem:[#allocation9 + $0x20] sm:$0xff] }
  0x59   :  { %v9899_v41 = vld [vmem:[#allocation12 + $0x9dc] sm:$0xf0]  ;;  %2517 = vmatmul.bf16.vlgmr.msra.gmra.mxu1 %v10696_v15 }
  0x5a   :  { %v8145_v42 = vld [vmem:[#allocation12 + $0xbc0] sm:$0xf]  ;;  %v7890_v52 = vor.u32 %v9899_v41, %v7889_v40  ;;  %2542 = vmatpush.bf16.msra.mxu3 %v7410_v51  ;;  %v9607_v40 = vld [vmem:[#allocation12 + $0xc4] sm:$0xf] }
  0x5b   :  { %v9963_v44 = vld [vmem:[#allocation12 + $0xbdc] sm:$0xf0]  ;;  %v6739_v41 = vld [vmem:[#allocation12 + $0xe0] sm:$0xf0] }
  0x5c   :  { %v8146_v53 = vor.u32 %v9963_v44, %v8145_v42  ;;  %v7857_v55 = vld [vmem:[#allocation12 + $0x980] sm:$0xf]  ;;  %2548 = vmatpush.bf16.msrb.mxu0 %v7890_v52  ;;  %2574 = vmatpush.bf16.msrb.mxu2 %v6870_v54  ;;  %v9671_v42 = vld [vmem:[#allocation12 + $0x2c4] sm:$0xf]  ;;  %v6742_v46 = vor.u32 %v9607_v40, %v6739_v41  ;;  %v8150_v40 = vor.u32 %v9959_v27, %v8147_v29 }
  0x5d   :  { %v9891_v56 = vld [vmem:[#allocation12 + $0x99c] sm:$0xf0]  ;;  %2543 = vmatmul.bf16.vlgmr.msra.gmra.mxu3 %v10701_v31  ;;  %v6998_v50 = vor.u32 %v9671_v42, %v6995_v43  ;;  %v9599_v52 = vld [vmem:[#allocation12 + $0x84] sm:$0xf]  ;;  %v10705_v41 = vpack.c.bf16 %v184_v30, %v184_v30 }
  0x5e   :  { %v8113_v57 = vld [vmem:[#allocation12 + $0xb80] sm:$0xf]  ;;  %v7858_v1 = vor.u32 %v9891_v56, %v7857_v55  ;;  %2561 = vmatpush.bf16.msrb.mxu1 %v8146_v53  ;;  %2587 = vmatpush.bf16.msrb.mxu3 %v7126_v58  ;;  %v6707_v53 = vld [vmem:[#allocation12 + $0xa0] sm:$0xf0] }
  0x5f   :  { %v9955_v59 = vld [vmem:[#allocation12 + $0xb9c] sm:$0xf0]  ;;  %v9663_v54 = vld [vmem:[#allocation12 + $0x284] sm:$0xf]  ;;  %v6710_v58 = vor.u32 %v9599_v52, %v6707_v53 }
  0x60   :  { %v7825_v2 = vld [vmem:[#allocation12 + $0x940] sm:$0xf]  ;;  %v8114_v4 = vor.u32 %v9955_v59, %v8113_v57  ;;  %2549 = vmatpush.bf16.msrb.mxu0 %v7858_v1  ;;  %2575 = vmatpush.bf16.msrb.mxu2 %v6838_v5  ;;  %v6963_v55 = vld [vmem:[#allocation12 + $0x2a0] sm:$0xf0] }
  0x61   :  { %v9883_v6 = vld [vmem:[#allocation12 + $0x95c] sm:$0xf0]  ;;  %v6966_v62 = vor.u32 %v9663_v54, %v6963_v55  ;;  %v6675_v1 = vld [vmem:[#allocation12 + $0x60] sm:$0xf0] }
  0x62   :  { %v8081_v7 = vld [vmem:[#allocation12 + $0xb40] sm:$0xf]  ;;  %v7826_v16 = vor.u32 %v9883_v6, %v7825_v2  ;;  %2562 = vmatpush.bf16.msrb.mxu1 %v8114_v4  ;;  %2588 = vmatpush.bf16.msrb.mxu3 %v7094_v9  ;;  %v9655_v2 = vld [vmem:[#allocation12 + $0x244] sm:$0xf]  ;;  %v6678_v9 = vor.u32 %v9591_v0, %v6675_v1 }
  0x63   :  { %v9947_v8 = vld [vmem:[#allocation12 + $0xb5c] sm:$0xf0]  ;;  %v6931_v4 = vld [vmem:[#allocation12 + $0x260] sm:$0xf0] }
  0x64   :  { %v7793_v17 = vld [vmem:[#allocation12 + $0x900] sm:$0xf]  ;;  %v8082_v19 = vor.u32 %v9947_v8, %v8081_v7  ;;  %2550 = vmatpush.bf16.msrb.mxu0 %v7826_v16  ;;  %2576 = vmatpush.bf16.msrb.mxu2 %v6806_v20  ;;  %v6934_v13 = vor.u32 %v9655_v2, %v6931_v4  ;;  %v9647_v16 = vld [vmem:[#allocation12 + $0x204] sm:$0xf] }
  0x65   :  { %v9875_v18 = vld [vmem:[#allocation12 + $0x91c] sm:$0xf0]  ;;  %v9831_v20 = vld [vmem:[#allocation12 + $0x7c4] sm:$0xf] }
  0x66   :  { %v8049_v21 = vld [vmem:[#allocation12 + $0xb00] sm:$0xf]  ;;  %v7794_v32 = vor.u32 %v9875_v18, %v7793_v17  ;;  %2563 = vmatpush.bf16.msrb.mxu1 %v8082_v19  ;;  %2589 = vmatpush.bf16.msrb.mxu3 %v7062_v24  ;;  %v6899_v17 = vld [vmem:[#allocation12 + $0x220] sm:$0xf0] }
  0x67   :  { %v182_v22 = vld [vmem:[#allocation9 + $0x10] sm:$0xff] }
  0x68   :  { %v9939_v25 = vld [vmem:[#allocation12 + $0xb1c] sm:$0xf0]  ;;  %v10699_v28 = vpack.c.bf16 %v182_v22, %v182_v22  ;;  %2551 = vmatpush.bf16.msrb.mxu0 %v7794_v32  ;;  %2577 = vmatpush.bf16.msrb.mxu2 %v6774_v34  ;;  %v9767_v18 = vld [vmem:[#allocation12 + $0x5c4] sm:$0xf]  ;;  %v6902_v32 = vor.u32 %v9647_v16, %v6899_v17  ;;  %v185_v34 = vld [vmem:[#allocation9 + $0x28] sm:$0xff] }
  0x69   :  { %v8050_v33 = vor.u32 %v9939_v25, %v8049_v21  ;;  %v7761_v35 = vld [vmem:[#allocation12 + $0x8c0] sm:$0xf]  ;;  %v7379_v19 = vld [vmem:[#allocation12 + $0x5e0] sm:$0xf0] }
  0x6a   :  { %2530 = vmatmul.bf16.vlgmr.msra.gmra.mxu2 %v10699_v28  ;;  %v9867_v36 = vld [vmem:[#allocation12 + $0x8dc] sm:$0xf0]  ;;  %2590 = vmatpush.bf16.msrb.mxu3 %v7030_v38  ;;  %v7635_v22 = vld [vmem:[#allocation12 + $0x7e0] sm:$0xf0] }
  0x6b   :  { %v8017_v37 = vld [vmem:[#allocation12 + $0xac0] sm:$0xf]  ;;  %v7762_v44 = vor.u32 %v9867_v36, %v7761_v35  ;;  %2564 = vmatpush.bf16.msrb.mxu1 %v8050_v33  ;;  %v7891_v24 = vld [vmem:[#allocation12 + $0x9e0] sm:$0xf0]  ;;  %v7382_v33 = vor.u32 %v9767_v18, %v7379_v19  ;;  %v7638_v35 = vor.u32 %v9831_v20, %v7635_v22 }
  0x6c   :  { %v9931_v39 = vld [vmem:[#allocation12 + $0xadc] sm:$0xf0]  ;;  %2578 = vmatpush.bf16.msrb.mxu2 %v6742_v46  ;;  %v7894_v36 = vor.u32 %v9895_v23, %v7891_v24  ;;  %v7347_v38 = vld [vmem:[#allocation12 + $0x5a0] sm:$0xf0] }
  0x6d   :  { %v8018_v45 = vor.u32 %v9931_v39, %v8017_v37  ;;  %v7729_v47 = vld [vmem:[#allocation12 + $0x880] sm:$0xf]  ;;  %2552 = vmatpush.bf16.msrb.mxu0 %v7762_v44  ;;  %v9759_v37 = vld [vmem:[#allocation12 + $0x584] sm:$0xf] }
  0x6e   :  { %v9859_v48 = vld [vmem:[#allocation12 + $0x89c] sm:$0xf0]  ;;  %2591 = vmatpush.bf16.msrb.mxu3 %v6998_v50  ;;  %v9823_v39 = vld [vmem:[#allocation12 + $0x784] sm:$0xf] }
  0x6f   :  { %v7985_v49 = vld [vmem:[#allocation12 + $0xa80] sm:$0xf]  ;;  %v7730_v56 = vor.u32 %v9859_v48, %v7729_v47  ;;  %2565 = vmatpush.bf16.msrb.mxu1 %v8018_v45  ;;  %v7603_v42 = vld [vmem:[#allocation12 + $0x7a0] sm:$0xf0]  ;;  %v10707_v45 = vpack.c.bf16 %v185_v34, %v185_v34  ;;  %v7350_v48 = vor.u32 %v9759_v37, %v7347_v38 }
  0x70   :  { %v9923_v51 = vld [vmem:[#allocation12 + $0xa9c] sm:$0xf0]  ;;  %2579 = vmatpush.bf16.msrb.mxu2 %v6710_v58  ;;  %v9887_v43 = vld [vmem:[#allocation12 + $0x984] sm:$0xf] }
  0x71   :  { %v7986_v57 = vor.u32 %v9923_v51, %v7985_v49  ;;  %v7697_v59 = vld [vmem:[#allocation12 + $0x840] sm:$0xf]  ;;  %2553 = vmatpush.bf16.msrb.mxu0 %v7730_v56  ;;  %v7859_v44 = vld [vmem:[#allocation12 + $0x9a0] sm:$0xf0]  ;;  %v7606_v49 = vor.u32 %v9823_v39, %v7603_v42 }
  0x72   :  { %v9851_v60 = vld [vmem:[#allocation12 + $0x85c] sm:$0xf0]  ;;  %2592 = vmatpush.bf16.msrb.mxu3 %v6966_v62  ;;  %v9951_v46 = vld [vmem:[#allocation12 + $0xb84] sm:$0xf]  ;;  %v7862_v50 = vor.u32 %v9887_v43, %v7859_v44 }
  0x73   :  { %v7953_v61 = vld [vmem:[#allocation12 + $0xa40] sm:$0xf]  ;;  %v7698_v5 = vor.u32 %v9851_v60, %v7697_v59  ;;  %2566 = vmatpush.bf16.msrb.mxu1 %v7986_v57  ;;  %v8115_v47 = vld [vmem:[#allocation12 + $0xba0] sm:$0xf0] }
  0x74   :  { %v9915_v63 = vld [vmem:[#allocation12 + $0xa5c] sm:$0xf0]  ;;  %2580 = vmatpush.bf16.msrb.mxu2 %v6678_v9  ;;  %v9751_v51 = vld [vmem:[#allocation12 + $0x544] sm:$0xf]  ;;  %v8118_v54 = vor.u32 %v9951_v46, %v8115_v47 }
  0x75   :  { %v7665_v6 = vld [vmem:[#allocation12 + $0x800] sm:$0xf]  ;;  %v7954_v8 = vor.u32 %v9915_v63, %v7953_v61  ;;  %2554 = vmatpush.bf16.msrb.mxu0 %v7698_v5  ;;  %v7315_v52 = vld [vmem:[#allocation12 + $0x560] sm:$0xf0] }
  0x76   :  { %v9843_v7 = vld [vmem:[#allocation12 + $0x81c] sm:$0xf0]  ;;  %2593 = vmatpush.bf16.msrb.mxu3 %v6934_v13  ;;  %v9815_v53 = vld [vmem:[#allocation12 + $0x744] sm:$0xf]  ;;  %v7318_v60 = vor.u32 %v9751_v51, %v7315_v52 }
  0x77   :  { %v7921_v10 = vld [vmem:[#allocation12 + $0xa00] sm:$0xf]  ;;  %v7666_v21 = vor.u32 %v9843_v7, %v7665_v6  ;;  %2567 = vmatpush.bf16.msrb.mxu1 %v7954_v8  ;;  %v7571_v55 = vld [vmem:[#allocation12 + $0x760] sm:$0xf0] }
  0x78   :  { %v9907_v11 = vld [vmem:[#allocation12 + $0xa1c] sm:$0xf0]  ;;  %2581 = vmatpush.bf16.msrb.mxu2 %v6646_v26  ;;  %v9879_v56 = vld [vmem:[#allocation12 + $0x944] sm:$0xf]  ;;  %v7574_v61 = vor.u32 %v9815_v53, %v7571_v55 }
  0x79   :  { %v7922_v25 = vor.u32 %v9907_v11, %v7921_v10  ;;  %2555 = vmatpush.bf16.msrb.mxu0 %v7666_v21  ;;  %v7827_v57 = vld [vmem:[#allocation12 + $0x960] sm:$0xf0] }
  0x7a   :  { %2594 = vmatpush.bf16.msrb.mxu3 %v6902_v32  ;;  %v9943_v58 = vld [vmem:[#allocation12 + $0xb44] sm:$0xf]  ;;  %v7830_v62 = vor.u32 %v9879_v56, %v7827_v57 }
  0x7b   :  { %2568 = vmatpush.bf16.msrb.mxu1 %v7922_v25  ;;  %v8083_v59 = vld [vmem:[#allocation12 + $0xb60] sm:$0xf0]  ;;  %2582 = vmatmul.bf16.vlgmr.msrb.gmra.mxu2 %v10693_v3 }
  0x7c   :  { %2626 = vmatpush.bf16.msra.mxu2 %v7894_v36  ;;  %2556 = vmatmul.bf16.vlgmr.msrb.gmra.mxu0 %v10705_v41  ;;  %v9743_v63 = vld [vmem:[#allocation12 + $0x504] sm:$0xf]  ;;  %v8086_v2 = vor.u32 %v9943_v58, %v8083_v59 }
  0x7d   :  { %2600 = vmatpush.bf16.msra.mxu0 %v7382_v33  ;;  %2595 = vmatmul.bf16.vlgmr.msrb.gmra.mxu3 %v10696_v15  ;;  %v7283_v0 = vld [vmem:[#allocation12 + $0x520] sm:$0xf0] }
  0x7e   :  { %2639 = vmatpush.bf16.msra.mxu3 %v8150_v40  ;;  %2569 = vmatmul.bf16.vlgmr.msrb.gmra.mxu1 %v10707_v45  ;;  %v9807_v1 = vld [vmem:[#allocation12 + $0x704] sm:$0xf]  ;;  %v7286_v9 = vor.u32 %v9743_v63, %v7283_v0 }
  0x7f   :  { %2613 = vmatpush.bf16.msra.mxu1 %v7638_v35  ;;  %v7539_v4 = vld [vmem:[#allocation12 + $0x720] sm:$0xf0] }
  0x80   :  { %2627 = vmatpush.bf16.msra.mxu2 %v7862_v50  ;;  %v9871_v5 = vld [vmem:[#allocation12 + $0x904] sm:$0xf]  ;;  %v7542_v10 = vor.u32 %v9807_v1, %v7539_v4 }
  0x81   :  { %2601 = vmatpush.bf16.msra.mxu0 %v7350_v48  ;;  %v7795_v6 = vld [vmem:[#allocation12 + $0x920] sm:$0xf0] }
  0x82   :  { %2640 = vmatpush.bf16.msra.mxu3 %v8118_v54  ;;  %v9935_v7 = vld [vmem:[#allocation12 + $0xb04] sm:$0xf]  ;;  %v7798_v11 = vor.u32 %v9871_v5, %v7795_v6 }
  0x83   :  { %2614 = vmatpush.bf16.msra.mxu1 %v7606_v49  ;;  %v8051_v8 = vld [vmem:[#allocation12 + $0xb20] sm:$0xf0] }
  0x84   :  { %2628 = vmatpush.bf16.msra.mxu2 %v7830_v62  ;;  %v7251_v13 = vld [vmem:[#allocation12 + $0x4e0] sm:$0xf0]  ;;  %v8054_v16 = vor.u32 %v9935_v7, %v8051_v8 }
  0x85   :  { %2602 = vmatpush.bf16.msra.mxu0 %v7318_v60  ;;  %v7507_v17 = vld [vmem:[#allocation12 + $0x6e0] sm:$0xf0]  ;;  %v7254_v22 = vor.u32 %v9735_v12, %v7251_v13 }
  0x86   :  { %2641 = vmatpush.bf16.msra.mxu3 %v8086_v2  ;;  %v9863_v18 = vld [vmem:[#allocation12 + $0x8c4] sm:$0xf]  ;;  %v7510_v23 = vor.u32 %v9799_v14, %v7507_v17 }
  0x87   :  { %2615 = vmatpush.bf16.msra.mxu1 %v7574_v61  ;;  %v7763_v19 = vld [vmem:[#allocation12 + $0x8e0] sm:$0xf0] }
  0x88   :  { %v9927_v20 = vld [vmem:[#allocation12 + $0xac4] sm:$0xf]  ;;  %2629 = vmatpush.bf16.msra.mxu2 %v7798_v11  ;;  %v7766_v24 = vor.u32 %v9863_v18, %v7763_v19 }
  0x89   :  { %v8019_v21 = vld [vmem:[#allocation12 + $0xae0] sm:$0xf0]  ;;  %2603 = vmatpush.bf16.msra.mxu0 %v7286_v9 }
  0x8a   :  { %v9727_v25 = vld [vmem:[#allocation12 + $0x484] sm:$0xf]  ;;  %2642 = vmatpush.bf16.msra.mxu3 %v8054_v16  ;;  %v8022_v29 = vor.u32 %v9927_v20, %v8019_v21 }
  0x8b   :  { %2616 = vmatpush.bf16.msra.mxu1 %v7542_v10  ;;  %v7219_v26 = vld [vmem:[#allocation12 + $0x4a0] sm:$0xf0] }
  0x8c   :  { %v9791_v27 = vld [vmem:[#allocation12 + $0x684] sm:$0xf]  ;;  %v7222_v36 = vor.u32 %v9727_v25, %v7219_v26  ;;  %2630 = vmatpush.bf16.msra.mxu2 %v7766_v24 }
  0x8d   :  { %v7475_v30 = vld [vmem:[#allocation12 + $0x6a0] sm:$0xf0]  ;;  %2604 = vmatpush.bf16.msra.mxu0 %v7254_v22 }
  0x8e   :  { %v9855_v32 = vld [vmem:[#allocation12 + $0x884] sm:$0xf]  ;;  %v7478_v37 = vor.u32 %v9791_v27, %v7475_v30  ;;  %2643 = vmatpush.bf16.msra.mxu3 %v8022_v29 }
  0x8f   :  { %v7731_v33 = vld [vmem:[#allocation12 + $0x8a0] sm:$0xf0]  ;;  %2617 = vmatpush.bf16.msra.mxu1 %v7510_v23 }
  0x90   :  { %v9919_v34 = vld [vmem:[#allocation12 + $0xa84] sm:$0xf]  ;;  %v7734_v38 = vor.u32 %v9855_v32, %v7731_v33 }
  0x91   :  { %v7987_v35 = vld [vmem:[#allocation12 + $0xaa0] sm:$0xf0] }
  0x92   :  { %v9719_v39 = vld [vmem:[#allocation12 + $0x444] sm:$0xf]  ;;  %v7990_v43 = vor.u32 %v9919_v34, %v7987_v35 }
  0x93   :  { %v7187_v40 = vld [vmem:[#allocation12 + $0x460] sm:$0xf0] }
  0x94   :  { %v9783_v42 = vld [vmem:[#allocation12 + $0x644] sm:$0xf] }
  0x95   :  { %v7443_v44 = vld [vmem:[#allocation12 + $0x660] sm:$0xf0] }
  0x96   :  { %v9847_v46 = vld [vmem:[#allocation12 + $0x844] sm:$0xf] }
  0x97   :  { %v7699_v47 = vld [vmem:[#allocation12 + $0x860] sm:$0xf0] }
  0x98   :  { %v9911_v48 = vld [vmem:[#allocation12 + $0xa44] sm:$0xf] }
  0x99   :  { %v7955_v49 = vld [vmem:[#allocation12 + $0xa60] sm:$0xf0] }
  0x9a   :  { %165 = vsyncadd [#allocation8 + $0x4], 512  ;;  %2605 = vmatpush.bf16.msra.mxu0 %v7222_v36  ;;  %v7190_v50 = vor.u32 %v9719_v39, %v7187_v40  ;;  %v9711_v51 = vld [vmem:[#allocation12 + $0x404] sm:$0xf]  ;;  %2618 = vmatpush.bf16.msra.mxu1 %v7478_v37  ;;  %v7446_v53 = vor.u32 %v9783_v42, %v7443_v44  ;;  %v7702_v54 = vor.u32 %v9847_v46, %v7699_v47  ;;  %v6873_v62 = vld [vmem:[#allocation12 + $0x1c8] sm:$0xf] }
  0x9b   :  { %v7155_v52 = vld [vmem:[#allocation12 + $0x420] sm:$0xf0]  ;;  %2631 = vmatpush.bf16.msra.mxu2 %v7734_v38  ;;  %2644 = vmatpush.bf16.msra.mxu3 %v7990_v43  ;;  %v7958_v58 = vor.u32 %v9911_v48, %v7955_v49  ;;  %v9644_v63 = vld [vmem:[#allocation12 + $0x1e4] sm:$0xf0]  ;;  %vm3365_vm5 = vcmask 1040384   ;;  %vm3367_vm14 = vcmask 1042434  }
  0x9c   :  { %v9775_v55 = vld [vmem:[#allocation12 + $0x604] sm:$0xf]  ;;  %v7129_v0 = vld [vmem:[#allocation12 + $0x3c8] sm:$0xf]  ;;  %v7158_v1 = vor.u32 %v9711_v51, %v7155_v52  ;;  %v6874_v11 = vor.u32 %v9644_v63, %v6873_v62  ;;  %vm3369_vm15 = vcmask 1041408   ;;  %s174_s16 = sshll.u32 %s11122_s8, 4  ;;  %s175_s16 = int_to_ptr.hbm [resolvable:$true] %s174_s16 }
  0x9d   :  { %v7411_v56 = vld [vmem:[#allocation12 + $0x620] sm:$0xf0]  ;;  %v9708_v2 = vld [vmem:[#allocation12 + $0x3e4] sm:$0xf0]  ;;  %s10587_s17 = smov [#allocation7]  }
  0x9e   :  { %v9839_v57 = vld [vmem:[#allocation12 + $0x804] sm:$0xf]  ;;  %2606 = vmatpush.bf16.msra.mxu0 %v7190_v50  ;;  %v7385_v4 = vld [vmem:[#allocation12 + $0x5c8] sm:$0xf]  ;;  %2619 = vmatpush.bf16.msra.mxu1 %v7446_v53  ;;  %v7414_v6 = vor.u32 %v9775_v55, %v7411_v56  ;;  %v7130_v12 = vor.u32 %v9708_v2, %v7129_v0  ;;  %s176_s3 = sshll.u32 %s10587_s17, 4  ;;  %s177_s3 = int_to_ptr.vmem [resolvable:$true] %s176_s3 }
  0x9f   :  { %v7667_v59 = vld [vmem:[#allocation12 + $0x820] sm:$0xf0]  ;;  %v9772_v5 = vld [vmem:[#allocation12 + $0x5e4] sm:$0xf0]  ;;  %2632 = vmatpush.bf16.msra.mxu2 %v7702_v54  ;;  %2645 = vmatpush.bf16.msra.mxu3 %v7958_v58  ;;  %179 = dma.hbm_to_vmem [thread:$0]  %s175_s16, 256, %s177_s3, [#allocation8 + $0x5] }
  0xa0   :  { %v9903_v60 = vld [vmem:[#allocation12 + $0xa04] sm:$0xf]  ;;  %v7670_v7 = vor.u32 %v9839_v57, %v7667_v59  ;;  %v7641_v8 = vld [vmem:[#allocation12 + $0x7c8] sm:$0xf]  ;;  %v7386_v13 = vor.u32 %v9772_v5, %v7385_v4 }
  0xa1   :  { %v7923_v61 = vld [vmem:[#allocation12 + $0xa20] sm:$0xf0]  ;;  %v9836_v9 = vld [vmem:[#allocation12 + $0x7e4] sm:$0xf0] }
  0xa2   :  { %v7926_v10 = vor.u32 %v9903_v60, %v7923_v61  ;;  %v6841_v14 = vld [vmem:[#allocation12 + $0x188] sm:$0xf]  ;;  %2607 = vmatpush.bf16.msra.mxu0 %v7158_v1  ;;  %v7642_v18 = vor.u32 %v9836_v9, %v7641_v8  ;;  %2620 = vmatpush.bf16.msra.mxu1 %v7414_v6 }
  0xa3   :  { %v9636_v16 = vld [vmem:[#allocation12 + $0x1a4] sm:$0xf0]  ;;  %2633 = vmatpush.bf16.msra.mxu2 %v7670_v7 }
  0xa4   :  { %v7097_v17 = vld [vmem:[#allocation12 + $0x388] sm:$0xf]  ;;  %2646 = vmatpush.bf16.msra.mxu3 %v7926_v10  ;;  %v6842_v24 = vor.u32 %v9636_v16, %v6841_v14 }
  0xa5   :  { %v9700_v19 = vld [vmem:[#allocation12 + $0x3a4] sm:$0xf0]  ;;  %2608 = vmatmul.bf16.vlgmr.msra.gmra.mxu0 %v10699_v28  ;;  %2621 = vmatmul.bf16.vlgmr.msra.gmra.mxu1 %v10701_v31 }
  0xa6   :  { %v7353_v20 = vld [vmem:[#allocation12 + $0x588] sm:$0xf]  ;;  %2652 = vmatpush.bf16.msrb.mxu0 %v6874_v11  ;;  %2665 = vmatpush.bf16.msrb.mxu1 %v7130_v12  ;;  %v7098_v25 = vor.u32 %v9700_v19, %v7097_v17 }
  0xa7   :  { %v9764_v21 = vld [vmem:[#allocation12 + $0x5a4] sm:$0xf0]  ;;  %2678 = vmatpush.bf16.msrb.mxu2 %v7386_v13  ;;  %2647 = vmatmul.bf16.vlgmr.msra.gmra.mxu3 %v10707_v45 }
  0xa8   :  { %v7609_v22 = vld [vmem:[#allocation12 + $0x788] sm:$0xf]  ;;  %v7354_v26 = vor.u32 %v9764_v21, %v7353_v20  ;;  %2691 = vmatpush.bf16.msrb.mxu3 %v7642_v18  ;;  %2634 = vmatmul.bf16.vlgmr.msra.gmra.mxu2 %v10705_v41 }
  0xa9   :  { %v9828_v23 = vld [vmem:[#allocation12 + $0x7a4] sm:$0xf0] }
  0xaa   :  { %v6809_v27 = vld [vmem:[#allocation12 + $0x148] sm:$0xf]  ;;  %v7610_v32 = vor.u32 %v9828_v23, %v7609_v22  ;;  %2653 = vmatpush.bf16.msrb.mxu0 %v6842_v24  ;;  %2666 = vmatpush.bf16.msrb.mxu1 %v7098_v25 }
  0xab   :  { %v9628_v29 = vld [vmem:[#allocation12 + $0x164] sm:$0xf0]  ;;  %2679 = vmatpush.bf16.msrb.mxu2 %v7354_v26 }
  0xac   :  { %v7065_v30 = vld [vmem:[#allocation12 + $0x348] sm:$0xf]  ;;  %v6810_v38 = vor.u32 %v9628_v29, %v6809_v27  ;;  %2692 = vmatpush.bf16.msrb.mxu3 %v7610_v32 }
  0xad   :  { %v9692_v33 = vld [vmem:[#allocation12 + $0x364] sm:$0xf0] }
  0xae   :  { %v7321_v34 = vld [vmem:[#allocation12 + $0x548] sm:$0xf]  ;;  %v7066_v39 = vor.u32 %v9692_v33, %v7065_v30  ;;  %2654 = vmatpush.bf16.msrb.mxu0 %v6810_v38 }
  0xaf   :  { %v9756_v35 = vld [vmem:[#allocation12 + $0x564] sm:$0xf0] }
  0xb0   :  { %v7577_v36 = vld [vmem:[#allocation12 + $0x748] sm:$0xf]  ;;  %v7322_v40 = vor.u32 %v9756_v35, %v7321_v34  ;;  %2667 = vmatpush.bf16.msrb.mxu1 %v7066_v39 }
  0xb1   :  { %v9820_v37 = vld [vmem:[#allocation12 + $0x764] sm:$0xf0] }
  0xb2   :  { %v6777_v42 = vld [vmem:[#allocation12 + $0x108] sm:$0xf]  ;;  %v7578_v46 = vor.u32 %v9820_v37, %v7577_v36  ;;  %2680 = vmatpush.bf16.msrb.mxu2 %v7322_v40 }
  0xb3   :  { %v9620_v43 = vld [vmem:[#allocation12 + $0x124] sm:$0xf0] }
  0xb4   :  { %v7033_v44 = vld [vmem:[#allocation12 + $0x308] sm:$0xf]  ;;  %v6778_v52 = vor.u32 %v9620_v43, %v6777_v42  ;;  %2693 = vmatpush.bf16.msrb.mxu3 %v7578_v46 }
  0xb5   :  { %v9684_v47 = vld [vmem:[#allocation12 + $0x324] sm:$0xf0] }
  0xb6   :  { %v7289_v48 = vld [vmem:[#allocation12 + $0x508] sm:$0xf]  ;;  %v7034_v53 = vor.u32 %v9684_v47, %v7033_v44  ;;  %2655 = vmatpush.bf16.msrb.mxu0 %v6778_v52  ;;  %v9640_v47 = vld [vmem:[#allocation12 + $0x1cc] sm:$0xf] }
  0xb7   :  { %v9748_v49 = vld [vmem:[#allocation12 + $0x524] sm:$0xf0]  ;;  %v7131_v52 = vld [vmem:[#allocation12 + $0x3e8] sm:$0xf0] }
  0xb8   :  { %v7545_v50 = vld [vmem:[#allocation12 + $0x708] sm:$0xf]  ;;  %v7290_v54 = vor.u32 %v9748_v49, %v7289_v48  ;;  %2668 = vmatpush.bf16.msrb.mxu1 %v7034_v53  ;;  %v6875_v48 = vld [vmem:[#allocation12 + $0x1e8] sm:$0xf0] }
  0xb9   :  { %v9812_v51 = vld [vmem:[#allocation12 + $0x724] sm:$0xf0] }
  0xba   :  { %v6745_v55 = vld [vmem:[#allocation12 + $0xc8] sm:$0xf]  ;;  %v7546_v58 = vor.u32 %v9812_v51, %v7545_v50  ;;  %2681 = vmatpush.bf16.msrb.mxu2 %v7290_v54  ;;  %v9704_v51 = vld [vmem:[#allocation12 + $0x3cc] sm:$0xf] }
  0xbb   :  { %v9612_v56 = vld [vmem:[#allocation12 + $0xe4] sm:$0xf0] }
  0xbc   :  { %v7001_v57 = vld [vmem:[#allocation12 + $0x2c8] sm:$0xf]  ;;  %v6746_v0 = vor.u32 %v9612_v56, %v6745_v55  ;;  %2694 = vmatpush.bf16.msrb.mxu3 %v7546_v58  ;;  %v6878_v56 = vor.u32 %v9640_v47, %v6875_v48 }
  0xbd   :  { %v9676_v59 = vld [vmem:[#allocation12 + $0x2e4] sm:$0xf0] }
  0xbe   :  { %v7257_v60 = vld [vmem:[#allocation12 + $0x4c8] sm:$0xf]  ;;  %v7002_v1 = vor.u32 %v9676_v59, %v7001_v57  ;;  %2656 = vmatpush.bf16.msrb.mxu0 %v6746_v0  ;;  %v9696_v0 = vld [vmem:[#allocation12 + $0x38c] sm:$0xf] }
  0xbf   :  { %v9740_v61 = vld [vmem:[#allocation12 + $0x4e4] sm:$0xf0] }
  0xc0   :  { %v7513_v62 = vld [vmem:[#allocation12 + $0x6c8] sm:$0xf]  ;;  %v7258_v2 = vor.u32 %v9740_v61, %v7257_v60  ;;  %2669 = vmatpush.bf16.msrb.mxu1 %v7002_v1  ;;  %v7134_v60 = vor.u32 %v9704_v51, %v7131_v52  ;;  %v7099_v1 = vld [vmem:[#allocation12 + $0x3a8] sm:$0xf0] }
  0xc1   :  { %v9804_v63 = vld [vmem:[#allocation12 + $0x6e4] sm:$0xf0]  ;;  %v9600_v52 = vld [vmem:[#allocation12 + $0x8c] sm:$0xf] }
  0xc2   :  { %v6713_v4 = vld [vmem:[#allocation12 + $0x88] sm:$0xf]  ;;  %v7514_v7 = vor.u32 %v9804_v63, %v7513_v62  ;;  %2682 = vmatpush.bf16.msrb.mxu2 %v7258_v2  ;;  %v9632_v62 = vld [vmem:[#allocation12 + $0x18c] sm:$0xf] }
  0xc3   :  { %v9604_v5 = vld [vmem:[#allocation12 + $0xa4] sm:$0xf0]  ;;  %v6843_v63 = vld [vmem:[#allocation12 + $0x1a8] sm:$0xf0] }
  0xc4   :  { %v6969_v6 = vld [vmem:[#allocation12 + $0x288] sm:$0xf]  ;;  %v6714_v13 = vor.u32 %v9604_v5, %v6713_v4  ;;  %2695 = vmatpush.bf16.msrb.mxu3 %v7514_v7  ;;  %v6846_v5 = vor.u32 %v9632_v62, %v6843_v63 }
  0xc5   :  { %v9668_v8 = vld [vmem:[#allocation12 + $0x2a4] sm:$0xf0] }
  0xc6   :  { %v7225_v9 = vld [vmem:[#allocation12 + $0x488] sm:$0xf]  ;;  %v6970_v14 = vor.u32 %v9668_v8, %v6969_v6  ;;  %2657 = vmatpush.bf16.msrb.mxu0 %v6714_v13  ;;  %v9688_v13 = vld [vmem:[#allocation12 + $0x34c] sm:$0xf] }
  0xc7   :  { %v9732_v10 = vld [vmem:[#allocation12 + $0x4a4] sm:$0xf0] }
  0xc8   :  { %v7481_v11 = vld [vmem:[#allocation12 + $0x688] sm:$0xf]  ;;  %v7226_v16 = vor.u32 %v9732_v10, %v7225_v9  ;;  %2670 = vmatpush.bf16.msrb.mxu1 %v6970_v14  ;;  %v7102_v9 = vor.u32 %v9696_v0, %v7099_v1  ;;  %v7067_v14 = vld [vmem:[#allocation12 + $0x368] sm:$0xf0] }
  0xc9   :  { %v9796_v12 = vld [vmem:[#allocation12 + $0x6a4] sm:$0xf0]  ;;  %v9592_v0 = vld [vmem:[#allocation12 + $0x4c] sm:$0xf] }
  0xca   :  { %v6681_v17 = vld [vmem:[#allocation12 + $0x48] sm:$0xf]  ;;  %v7482_v20 = vor.u32 %v9796_v12, %v7481_v11  ;;  %2683 = vmatpush.bf16.msrb.mxu2 %v7226_v16  ;;  %v9624_v11 = vld [vmem:[#allocation12 + $0x14c] sm:$0xf] }
  0xcb   :  { %v9596_v18 = vld [vmem:[#allocation12 + $0x64] sm:$0xf0]  ;;  %v6811_v12 = vld [vmem:[#allocation12 + $0x168] sm:$0xf0] }
  0xcc   :  { %v6937_v19 = vld [vmem:[#allocation12 + $0x248] sm:$0xf]  ;;  %v6682_v26 = vor.u32 %v9596_v18, %v6681_v17  ;;  %2696 = vmatpush.bf16.msrb.mxu3 %v7482_v20  ;;  %v6814_v18 = vor.u32 %v9624_v11, %v6811_v12  ;;  %v6683_v1 = vld [vmem:[#allocation12 + $0x68] sm:$0xf0] }
  0xcd   :  { %v9660_v21 = vld [vmem:[#allocation12 + $0x264] sm:$0xf0]  ;;  %v9584_v12 = vld [vmem:[#allocation12 + $0xc] sm:$0xf] }
  0xce   :  { %v7193_v22 = vld [vmem:[#allocation12 + $0x448] sm:$0xf]  ;;  %v6938_v30 = vor.u32 %v9660_v21, %v6937_v19  ;;  %2658 = vmatpush.bf16.msrb.mxu0 %v6682_v26  ;;  %v9680_v26 = vld [vmem:[#allocation12 + $0x30c] sm:$0xf] }
  0xcf   :  { %v9724_v23 = vld [vmem:[#allocation12 + $0x464] sm:$0xf0] }
  0xd0   :  { %v7449_v24 = vld [vmem:[#allocation12 + $0x648] sm:$0xf]  ;;  %v7194_v32 = vor.u32 %v9724_v23, %v7193_v22  ;;  %2671 = vmatpush.bf16.msrb.mxu1 %v6938_v30  ;;  %v7070_v22 = vor.u32 %v9688_v13, %v7067_v14  ;;  %v6651_v14 = vld [vmem:[#allocation12 + $0x28] sm:$0xf0] }
  0xd1   :  { %v9788_v25 = vld [vmem:[#allocation12 + $0x664] sm:$0xf0] }
  0xd2   :  { %v6649_v27 = vld [vmem:[#allocation12 + $0x8] sm:$0xf]  ;;  %v7450_v36 = vor.u32 %v9788_v25, %v7449_v24  ;;  %2684 = vmatpush.bf16.msrb.mxu2 %v7194_v32  ;;  %v9616_v24 = vld [vmem:[#allocation12 + $0x10c] sm:$0xf] }
  0xd3   :  { %v9588_v29 = vld [vmem:[#allocation12 + $0x24] sm:$0xf0]  ;;  %v6779_v25 = vld [vmem:[#allocation12 + $0x128] sm:$0xf0] }
  0xd4   :  { %v6905_v33 = vld [vmem:[#allocation12 + $0x208] sm:$0xf]  ;;  %v6650_v44 = vor.u32 %v9588_v29, %v6649_v27  ;;  %2697 = vmatpush.bf16.msrb.mxu3 %v7450_v36  ;;  %v7035_v27 = vld [vmem:[#allocation12 + $0x328] sm:$0xf0]  ;;  %v6782_v32 = vor.u32 %v9616_v24, %v6779_v25 }
  0xd5   :  { %v9652_v34 = vld [vmem:[#allocation12 + $0x224] sm:$0xf0]  ;;  %v7038_v36 = vor.u32 %v9680_v26, %v7035_v27  ;;  %v7899_v24 = vld [vmem:[#allocation12 + $0x9e8] sm:$0xf0]  ;;  %v6654_v26 = vor.u32 %v9584_v12, %v6651_v14 }
  0xd6   :  { %v7161_v35 = vld [vmem:[#allocation12 + $0x408] sm:$0xf]  ;;  %v6906_v49 = vor.u32 %v9652_v34, %v6905_v33  ;;  %2659 = vmatpush.bf16.msrb.mxu0 %v6650_v44  ;;  %v9960_v27 = vld [vmem:[#allocation12 + $0xbcc] sm:$0xf] }
  0xd7   :  { %v9716_v37 = vld [vmem:[#allocation12 + $0x424] sm:$0xf0]  ;;  %v7259_v12 = vld [vmem:[#allocation12 + $0x4e8] sm:$0xf0] }
  0xd8   :  { %v7417_v38 = vld [vmem:[#allocation12 + $0x608] sm:$0xf]  ;;  %v7162_v50 = vor.u32 %v9716_v37, %v7161_v35  ;;  %2672 = vmatpush.bf16.msrb.mxu1 %v6906_v49 }
  0xd9   :  { %v9780_v39 = vld [vmem:[#allocation12 + $0x624] sm:$0xf0]  ;;  %2660 = vmatmul.bf16.vlgmr.msrb.gmra.mxu0 %v10693_v3 }
  0xda   :  { %v7897_v40 = vld [vmem:[#allocation12 + $0x9c8] sm:$0xf]  ;;  %v7418_v53 = vor.u32 %v9780_v39, %v7417_v38  ;;  %2685 = vmatpush.bf16.msrb.mxu2 %v7162_v50  ;;  %v9608_v38 = vld [vmem:[#allocation12 + $0xcc] sm:$0xf] }
  0xdb   :  { %v9900_v42 = vld [vmem:[#allocation12 + $0x9e4] sm:$0xf0]  ;;  %2673 = vmatmul.bf16.vlgmr.msrb.gmra.mxu1 %v10696_v15  ;;  %v6747_v39 = vld [vmem:[#allocation12 + $0xe8] sm:$0xf0] }
  0xdc   :  { %v8153_v43 = vld [vmem:[#allocation12 + $0xbc8] sm:$0xf]  ;;  %v7898_v54 = vor.u32 %v9900_v42, %v7897_v40  ;;  %2698 = vmatpush.bf16.msrb.mxu3 %v7418_v53  ;;  %v9672_v40 = vld [vmem:[#allocation12 + $0x2cc] sm:$0xf] }
  0xdd   :  { %v9964_v46 = vld [vmem:[#allocation12 + $0xbe4] sm:$0xf0]  ;;  %2686 = vmatmul.bf16.vlgmr.msrb.gmra.mxu2 %v10699_v28  ;;  %v7003_v42 = vld [vmem:[#allocation12 + $0x2e8] sm:$0xf0] }
  0xde   :  { %v8154_v55 = vor.u32 %v9964_v46, %v8153_v43  ;;  %v7865_v57 = vld [vmem:[#allocation12 + $0x988] sm:$0xf]  ;;  %2704 = vmatpush.bf16.msra.mxu0 %v7898_v54  ;;  %2730 = vmatpush.bf16.msra.mxu2 %v6878_v56  ;;  %v6750_v46 = vor.u32 %v9608_v38, %v6747_v39  ;;  %v7006_v50 = vor.u32 %v9672_v40, %v7003_v42  ;;  %v6715_v53 = vld [vmem:[#allocation12 + $0xa8] sm:$0xf0] }
  0xdf   :  { %v9892_v58 = vld [vmem:[#allocation12 + $0x9a4] sm:$0xf0]  ;;  %2699 = vmatmul.bf16.vlgmr.msrb.gmra.mxu3 %v10701_v31  ;;  %v9664_v54 = vld [vmem:[#allocation12 + $0x28c] sm:$0xf] }
  0xe0   :  { %v8121_v59 = vld [vmem:[#allocation12 + $0xb88] sm:$0xf]  ;;  %v7866_v2 = vor.u32 %v9892_v58, %v7865_v57  ;;  %2717 = vmatpush.bf16.msra.mxu1 %v8154_v55  ;;  %2743 = vmatpush.bf16.msra.mxu3 %v7134_v60  ;;  %v6971_v55 = vld [vmem:[#allocation12 + $0x2a8] sm:$0xf0]  ;;  %v6718_v58 = vor.u32 %v9600_v52, %v6715_v53 }
  0xe1   :  { %v9956_v61 = vld [vmem:[#allocation12 + $0xba4] sm:$0xf0]  ;;  %v6974_v62 = vor.u32 %v9664_v54, %v6971_v55  ;;  %v7611_v39 = vld [vmem:[#allocation12 + $0x7a8] sm:$0xf0] }
  0xe2   :  { %v8122_v4 = vor.u32 %v9956_v61, %v8121_v59  ;;  %v7833_v6 = vld [vmem:[#allocation12 + $0x948] sm:$0xf]  ;;  %2705 = vmatpush.bf16.msra.mxu0 %v7866_v2  ;;  %2731 = vmatpush.bf16.msra.mxu2 %v6846_v5  ;;  %v9656_v2 = vld [vmem:[#allocation12 + $0x24c] sm:$0xf] }
  0xe3   :  { %v9884_v7 = vld [vmem:[#allocation12 + $0x964] sm:$0xf0]  ;;  %v9888_v40 = vld [vmem:[#allocation12 + $0x98c] sm:$0xf] }
  0xe4   :  { %v8089_v8 = vld [vmem:[#allocation12 + $0xb48] sm:$0xf]  ;;  %v7834_v16 = vor.u32 %v9884_v7, %v7833_v6  ;;  %2718 = vmatpush.bf16.msra.mxu1 %v8122_v4  ;;  %2744 = vmatpush.bf16.msra.mxu3 %v7102_v9  ;;  %v6939_v4 = vld [vmem:[#allocation12 + $0x268] sm:$0xf0]  ;;  %v6686_v9 = vor.u32 %v9592_v0, %v6683_v1 }
  0xe5   :  { %v9948_v10 = vld [vmem:[#allocation12 + $0xb64] sm:$0xf0]  ;;  %v6942_v13 = vor.u32 %v9656_v2, %v6939_v4  ;;  %v7867_v42 = vld [vmem:[#allocation12 + $0x9a8] sm:$0xf0] }
  0xe6   :  { %v8090_v17 = vor.u32 %v9948_v10, %v8089_v8  ;;  %v7801_v19 = vld [vmem:[#allocation12 + $0x908] sm:$0xf]  ;;  %2706 = vmatpush.bf16.msra.mxu0 %v7834_v16  ;;  %2732 = vmatpush.bf16.msra.mxu2 %v6814_v18  ;;  %v9648_v16 = vld [vmem:[#allocation12 + $0x20c] sm:$0xf] }
  0xe7   :  { %v9876_v20 = vld [vmem:[#allocation12 + $0x924] sm:$0xf0]  ;;  %v9768_v18 = vld [vmem:[#allocation12 + $0x5cc] sm:$0xf] }
  0xe8   :  { %v8057_v21 = vld [vmem:[#allocation12 + $0xb08] sm:$0xf]  ;;  %v7802_v29 = vor.u32 %v9876_v20, %v7801_v19  ;;  %2719 = vmatpush.bf16.msra.mxu1 %v8090_v17  ;;  %2745 = vmatpush.bf16.msra.mxu3 %v7070_v22  ;;  %v6907_v17 = vld [vmem:[#allocation12 + $0x228] sm:$0xf0] }
  0xe9   :  { %v9940_v23 = vld [vmem:[#allocation12 + $0xb24] sm:$0xf0]  ;;  %v7387_v19 = vld [vmem:[#allocation12 + $0x5e8] sm:$0xf0] }
  0xea   :  { %v8058_v30 = vor.u32 %v9940_v23, %v8057_v21  ;;  %v7769_v33 = vld [vmem:[#allocation12 + $0x8c8] sm:$0xf]  ;;  %2707 = vmatpush.bf16.msra.mxu0 %v7802_v29  ;;  %2733 = vmatpush.bf16.msra.mxu2 %v6782_v32  ;;  %v9832_v20 = vld [vmem:[#allocation12 + $0x7cc] sm:$0xf]  ;;  %v7390_v32 = vor.u32 %v9768_v18, %v7387_v19 }
  0xeb   :  { %v9868_v34 = vld [vmem:[#allocation12 + $0x8e4] sm:$0xf0]  ;;  %v7643_v22 = vld [vmem:[#allocation12 + $0x7e8] sm:$0xf0] }
  0xec   :  { %v8025_v35 = vld [vmem:[#allocation12 + $0xac8] sm:$0xf]  ;;  %v7770_v43 = vor.u32 %v9868_v34, %v7769_v33  ;;  %2720 = vmatpush.bf16.msra.mxu1 %v8058_v30  ;;  %2746 = vmatpush.bf16.msra.mxu3 %v7038_v36  ;;  %v9896_v23 = vld [vmem:[#allocation12 + $0x9cc] sm:$0xf]  ;;  %v6910_v30 = vor.u32 %v9648_v16, %v6907_v17  ;;  %v7646_v33 = vor.u32 %v9832_v20, %v7643_v22 }
  0xed   :  { %v9932_v37 = vld [vmem:[#allocation12 + $0xae4] sm:$0xf0]  ;;  %v8155_v29 = vld [vmem:[#allocation12 + $0xbe8] sm:$0xf0]  ;;  %v7902_v34 = vor.u32 %v9896_v23, %v7899_v24 }
  0xee   :  { %v8026_v44 = vor.u32 %v9932_v37, %v8025_v35  ;;  %v7737_v47 = vld [vmem:[#allocation12 + $0x888] sm:$0xf]  ;;  %2708 = vmatpush.bf16.msra.mxu0 %v7770_v43  ;;  %2734 = vmatpush.bf16.msra.mxu2 %v6750_v46  ;;  %v9760_v35 = vld [vmem:[#allocation12 + $0x58c] sm:$0xf]  ;;  %v8158_v38 = vor.u32 %v9960_v27, %v8155_v29 }
  0xef   :  { %v9860_v48 = vld [vmem:[#allocation12 + $0x8a4] sm:$0xf0]  ;;  %v7355_v36 = vld [vmem:[#allocation12 + $0x5a8] sm:$0xf0] }
  0xf0   :  { %v7993_v49 = vld [vmem:[#allocation12 + $0xa88] sm:$0xf]  ;;  %v7738_v56 = vor.u32 %v9860_v48, %v7737_v47  ;;  %2721 = vmatpush.bf16.msra.mxu1 %v8026_v44  ;;  %2747 = vmatpush.bf16.msra.mxu3 %v7006_v50  ;;  %v9824_v37 = vld [vmem:[#allocation12 + $0x78c] sm:$0xf]  ;;  %v7358_v46 = vor.u32 %v9760_v35, %v7355_v36  ;;  %v7870_v48 = vor.u32 %v9888_v40, %v7867_v42 }
  0xf1   :  { %v9924_v51 = vld [vmem:[#allocation12 + $0xaa4] sm:$0xf0]  ;;  %v9952_v43 = vld [vmem:[#allocation12 + $0xb8c] sm:$0xf]  ;;  %v7614_v47 = vor.u32 %v9824_v37, %v7611_v39 }
  0xf2   :  { %v7994_v57 = vor.u32 %v9924_v51, %v7993_v49  ;;  %v7705_v59 = vld [vmem:[#allocation12 + $0x848] sm:$0xf]  ;;  %2709 = vmatpush.bf16.msra.mxu0 %v7738_v56  ;;  %2735 = vmatpush.bf16.msra.mxu2 %v6718_v58  ;;  %v8123_v44 = vld [vmem:[#allocation12 + $0xba8] sm:$0xf0] }
  0xf3   :  { %v9852_v60 = vld [vmem:[#allocation12 + $0x864] sm:$0xf0]  ;;  %v9752_v49 = vld [vmem:[#allocation12 + $0x54c] sm:$0xf]  ;;  %v8126_v52 = vor.u32 %v9952_v43, %v8123_v44 }
  0xf4   :  { %v7961_v61 = vld [vmem:[#allocation12 + $0xa48] sm:$0xf]  ;;  %v7706_v5 = vor.u32 %v9852_v60, %v7705_v59  ;;  %2722 = vmatpush.bf16.msra.mxu1 %v7994_v57  ;;  %2748 = vmatpush.bf16.msra.mxu3 %v6974_v62  ;;  %v7323_v50 = vld [vmem:[#allocation12 + $0x568] sm:$0xf0] }
  0xf5   :  { %v9916_v63 = vld [vmem:[#allocation12 + $0xa64] sm:$0xf0]  ;;  %v9816_v51 = vld [vmem:[#allocation12 + $0x74c] sm:$0xf]  ;;  %v7326_v58 = vor.u32 %v9752_v49, %v7323_v50 }
  0xf6   :  { %v7673_v6 = vld [vmem:[#allocation12 + $0x808] sm:$0xf]  ;;  %v7962_v8 = vor.u32 %v9916_v63, %v7961_v61  ;;  %2710 = vmatpush.bf16.msra.mxu0 %v7706_v5  ;;  %2736 = vmatpush.bf16.msra.mxu2 %v6686_v9  ;;  %v7579_v53 = vld [vmem:[#allocation12 + $0x768] sm:$0xf0] }
  0xf7   :  { %v9844_v7 = vld [vmem:[#allocation12 + $0x824] sm:$0xf0]  ;;  %v9880_v54 = vld [vmem:[#allocation12 + $0x94c] sm:$0xf]  ;;  %v7582_v59 = vor.u32 %v9816_v51, %v7579_v53  ;;  %v2531_v53 = vpop.f32.mrf.mxu2 }
  0xf8   :  { %v7929_v10 = vld [vmem:[#allocation12 + $0xa08] sm:$0xf]  ;;  %v7674_v21 = vor.u32 %v9844_v7, %v7673_v6  ;;  %2723 = vmatpush.bf16.msra.mxu1 %v7962_v8  ;;  %2749 = vmatpush.bf16.msra.mxu3 %v6942_v13  ;;  %v7835_v55 = vld [vmem:[#allocation12 + $0x968] sm:$0xf0]  ;;  %v2505_v7 = vpop.f32.mrf.mxu0 }
  0xf9   :  { %v9908_v11 = vld [vmem:[#allocation12 + $0xa24] sm:$0xf0]  ;;  %v9944_v56 = vld [vmem:[#allocation12 + $0xb4c] sm:$0xf]  ;;  %v7838_v60 = vor.u32 %v9880_v54, %v7835_v55 }
  0xfa   :  { %v7930_v25 = vor.u32 %v9908_v11, %v7929_v10  ;;  %2711 = vmatpush.bf16.msra.mxu0 %v7674_v21  ;;  %2737 = vmatpush.bf16.msra.mxu2 %v6654_v26  ;;  %v8091_v57 = vld [vmem:[#allocation12 + $0xb68] sm:$0xf0]  ;;  %v2518_v21 = vpop.f32.mrf.mxu1 }
  0xfb   :  { %v9744_v61 = vld [vmem:[#allocation12 + $0x50c] sm:$0xf]  ;;  %v8094_v0 = vor.u32 %v9944_v56, %v8091_v57  ;;  %v2519_v23 = vadd.f32 %v2518_v21, %v2505_v7  ;;  %v7137_v7 = vld [vmem:[#allocation12 + $0x3d0] sm:$0xf] }
  0xfc   :  { %2724 = vmatpush.bf16.msra.mxu1 %v7930_v25  ;;  %2750 = vmatpush.bf16.msra.mxu3 %v6910_v30  ;;  %v7291_v62 = vld [vmem:[#allocation12 + $0x528] sm:$0xf0] }
  0xfd   :  { %2712 = vmatmul.bf16.vlgmr.msra.gmra.mxu0 %v10705_v41  ;;  %2738 = vmatmul.bf16.vlgmr.msra.gmra.mxu2 %v10693_v3  ;;  %v9808_v63 = vld [vmem:[#allocation12 + $0x70c] sm:$0xf]  ;;  %v7294_v8 = vor.u32 %v9744_v61, %v7291_v62  ;;  %v2532_v57 = vadd.f32 %v2531_v53, %v2519_v23  ;;  %v9637_v23 = vld [vmem:[#allocation12 + $0x1ac] sm:$0xf0] }
  0xfe   :  { %2756 = vmatpush.bf16.msrb.mxu0 %v7390_v32  ;;  %2782 = vmatpush.bf16.msrb.mxu2 %v7902_v34  ;;  %v7547_v1 = vld [vmem:[#allocation12 + $0x728] sm:$0xf0]  ;;  %v6785_v53 = vld [vmem:[#allocation12 + $0x110] sm:$0xf] }
  0xff   :  { %2725 = vmatmul.bf16.vlgmr.msra.gmra.mxu1 %v10707_v45  ;;  %2751 = vmatmul.bf16.vlgmr.msra.gmra.mxu3 %v10696_v15  ;;  %v9872_v2 = vld [vmem:[#allocation12 + $0x90c] sm:$0xf]  ;;  %v7550_v9 = vor.u32 %v9808_v63, %v7547_v1 }
 0x100   :  { %2769 = vmatpush.bf16.msrb.mxu1 %v7646_v33  ;;  %2795 = vmatpush.bf16.msrb.mxu3 %v8158_v38  ;;  %v7803_v4 = vld [vmem:[#allocation12 + $0x928] sm:$0xf0]  ;;  %v2507_v37 = vpop.f32.mrf.mxu0 }
 0x101   :  { %v9936_v5 = vld [vmem:[#allocation12 + $0xb0c] sm:$0xf]  ;;  %v7806_v10 = vor.u32 %v9872_v2, %v7803_v4  ;;  %v2544_v4 = vpop.f32.mrf.mxu3 }
 0x102   :  { %2757 = vmatpush.bf16.msrb.mxu0 %v7358_v46  ;;  %2783 = vmatpush.bf16.msrb.mxu2 %v7870_v48  ;;  %v8059_v6 = vld [vmem:[#allocation12 + $0xb28] sm:$0xf0] }
 0x103   :  { %v9736_v11 = vld [vmem:[#allocation12 + $0x4cc] sm:$0xf]  ;;  %v8062_v14 = vor.u32 %v9936_v5, %v8059_v6  ;;  %v6881_v5 = vld [vmem:[#allocation12 + $0x1d0] sm:$0xf] }
 0x104   :  { %2770 = vmatpush.bf16.msrb.mxu1 %v7614_v47  ;;  %2796 = vmatpush.bf16.msrb.mxu3 %v8126_v52  ;;  %v9800_v13 = vld [vmem:[#allocation12 + $0x6cc] sm:$0xf]  ;;  %v7262_v22 = vor.u32 %v9736_v11, %v7259_v12  ;;  %v2520_v52 = vpop.f32.mrf.mxu1  ;;  %v9645_v6 = vld [vmem:[#allocation12 + $0x1ec] sm:$0xf0] }
 0x105   :  { %v7515_v16 = vld [vmem:[#allocation12 + $0x6e8] sm:$0xf0]  ;;  %v7393_v11 = vld [vmem:[#allocation12 + $0x5d0] sm:$0xf] }
 0x106   :  { %2758 = vmatpush.bf16.msrb.mxu0 %v7326_v58  ;;  %2784 = vmatpush.bf16.msrb.mxu2 %v7838_v60  ;;  %v9864_v17 = vld [vmem:[#allocation12 + $0x8cc] sm:$0xf]  ;;  %v7518_v24 = vor.u32 %v9800_v13, %v7515_v16  ;;  %v9773_v12 = vld [vmem:[#allocation12 + $0x5ec] sm:$0xf0] }
 0x107   :  { %v7771_v18 = vld [vmem:[#allocation12 + $0x8e8] sm:$0xf0]  ;;  %v7649_v16 = vld [vmem:[#allocation12 + $0x7d0] sm:$0xf] }
 0x108   :  { %2771 = vmatpush.bf16.msrb.mxu1 %v7582_v59  ;;  %2797 = vmatpush.bf16.msrb.mxu3 %v8094_v0  ;;  %v9928_v19 = vld [vmem:[#allocation12 + $0xacc] sm:$0xf]  ;;  %v7774_v25 = vor.u32 %v9864_v17, %v7771_v18  ;;  %v9837_v17 = vld [vmem:[#allocation12 + $0x7ec] sm:$0xf0] }
 0x109   :  { %v8027_v20 = vld [vmem:[#allocation12 + $0xae8] sm:$0xf0] }
 0x10a   :  { %2759 = vmatpush.bf16.msrb.mxu0 %v7294_v8  ;;  %2785 = vmatpush.bf16.msrb.mxu2 %v7806_v10  ;;  %v9728_v26 = vld [vmem:[#allocation12 + $0x48c] sm:$0xf]  ;;  %v8030_v30 = vor.u32 %v9928_v19, %v8027_v20  ;;  %v10725_v8 = vadd.f32 %v2544_v4, %v2532_v57  ;;  %v9709_v10 = vld [vmem:[#allocation12 + $0x3ec] sm:$0xf0]  ;;  %v6882_v19 = vor.u32 %v9645_v6, %v6881_v5 }
 0x10b   :  { %v7227_v27 = vld [vmem:[#allocation12 + $0x4a8] sm:$0xf0]  ;;  %v6849_v20 = vld [vmem:[#allocation12 + $0x190] sm:$0xf]  ;;  %v7138_v21 = vor.u32 %v9709_v10, %v7137_v7 }
 0x10c   :  { %2772 = vmatpush.bf16.msrb.mxu1 %v7550_v9  ;;  %v9792_v29 = vld [vmem:[#allocation12 + $0x68c] sm:$0xf]  ;;  %2798 = vmatpush.bf16.msrb.mxu3 %v8062_v14  ;;  %v7230_v38 = vor.u32 %v9728_v26, %v7227_v27  ;;  %v7650_v26 = vor.u32 %v9837_v17, %v7649_v16  ;;  %v9701_v27 = vld [vmem:[#allocation12 + $0x3ac] sm:$0xf0] }
 0x10d   :  { %v7483_v32 = vld [vmem:[#allocation12 + $0x6a8] sm:$0xf0]  ;;  %v6753_v4 = vld [vmem:[#allocation12 + $0xd0] sm:$0xf] }
 0x10e   :  { %v9856_v33 = vld [vmem:[#allocation12 + $0x88c] sm:$0xf]  ;;  %2760 = vmatpush.bf16.msrb.mxu0 %v7262_v22  ;;  %2786 = vmatpush.bf16.msrb.mxu2 %v7774_v25  ;;  %v7486_v39 = vor.u32 %v9792_v29, %v7483_v32  ;;  %v7394_v22 = vor.u32 %v9773_v12, %v7393_v11  ;;  %v2533_v25 = vpop.f32.mrf.mxu2  ;;  %v7361_v29 = vld [vmem:[#allocation12 + $0x590] sm:$0xf] }
 0x10f   :  { %v7739_v34 = vld [vmem:[#allocation12 + $0x8a8] sm:$0xf0]  ;;  %v7617_v32 = vld [vmem:[#allocation12 + $0x790] sm:$0xf] }
 0x110   :  { %v9920_v35 = vld [vmem:[#allocation12 + $0xa8c] sm:$0xf]  ;;  %2773 = vmatpush.bf16.msrb.mxu1 %v7518_v24  ;;  %v7742_v40 = vor.u32 %v9856_v33, %v7739_v34  ;;  %2799 = vmatpush.bf16.msrb.mxu3 %v8030_v30  ;;  %v7105_v24 = vld [vmem:[#allocation12 + $0x390] sm:$0xf]  ;;  %v6850_v34 = vor.u32 %v9637_v23, %v6849_v20 }
 0x111   :  { %v7995_v36 = vld [vmem:[#allocation12 + $0xaa8] sm:$0xf0]  ;;  %v9765_v30 = vld [vmem:[#allocation12 + $0x5ac] sm:$0xf0]  ;;  %v7106_v37 = vor.u32 %v9701_v27, %v7105_v24 }
 0x112   :  { %v9720_v42 = vld [vmem:[#allocation12 + $0x44c] sm:$0xf]  ;;  %v7998_v46 = vor.u32 %v9920_v35, %v7995_v36  ;;  %2761 = vmatpush.bf16.msrb.mxu0 %v7230_v38  ;;  %2787 = vmatpush.bf16.msrb.mxu2 %v7742_v40  ;;  %v9829_v33 = vld [vmem:[#allocation12 + $0x7ac] sm:$0xf0]  ;;  %v10586_v35 = vmov 8.0   ;;  %v2546_v36 = vpop.f32.mrf.mxu3  ;;  %v7362_v38 = vor.u32 %v9765_v30, %v7361_v29 }
 0x113   :  { %v7195_v43 = vld [vmem:[#allocation12 + $0x468] sm:$0xf0]  ;;  %10330 = vrcp.f32 %v10586_v35  ;;  %v9629_v40 = vld [vmem:[#allocation12 + $0x16c] sm:$0xf0] }
 0x114   :  { %v9784_v44 = vld [vmem:[#allocation12 + $0x64c] sm:$0xf]  ;;  %v7198_v54 = vor.u32 %v9720_v42, %v7195_v43  ;;  %2774 = vmatpush.bf16.msrb.mxu1 %v7486_v39  ;;  %2800 = vmatpush.bf16.msrb.mxu3 %v7998_v46  ;;  %v6817_v39 = vld [vmem:[#allocation12 + $0x150] sm:$0xf]  ;;  %v7618_v43 = vor.u32 %v9829_v33, %v7617_v32 }
 0x115   :  { %v7451_v47 = vld [vmem:[#allocation12 + $0x668] sm:$0xf0]  ;;  %v7073_v42 = vld [vmem:[#allocation12 + $0x350] sm:$0xf] }
 0x116   :  { %v9848_v48 = vld [vmem:[#allocation12 + $0x84c] sm:$0xf]  ;;  %v7454_v58 = vor.u32 %v9784_v44, %v7451_v47  ;;  %2762 = vmatpush.bf16.msrb.mxu0 %v7198_v54  ;;  %v9693_v44 = vld [vmem:[#allocation12 + $0x36c] sm:$0xf0]  ;;  %v2583_v33 = vpop.f32.mrf.mxu2 }
 0x117   :  { %v7707_v49 = vld [vmem:[#allocation12 + $0x868] sm:$0xf0]  ;;  %v7329_v46 = vld [vmem:[#allocation12 + $0x550] sm:$0xf] }
 0x118   :  { %v9912_v50 = vld [vmem:[#allocation12 + $0xa4c] sm:$0xf]  ;;  %v7710_v59 = vor.u32 %v9848_v48, %v7707_v49  ;;  %2775 = vmatpush.bf16.msrb.mxu1 %v7454_v58  ;;  %v9757_v47 = vld [vmem:[#allocation12 + $0x56c] sm:$0xf0] }
 0x119   :  { %v7963_v51 = vld [vmem:[#allocation12 + $0xa68] sm:$0xf0]  ;;  %v7585_v48 = vld [vmem:[#allocation12 + $0x750] sm:$0xf]  ;;  %v7330_v52 = vor.u32 %v9757_v47, %v7329_v46 }
 0x11a   :  { %v9712_v55 = vld [vmem:[#allocation12 + $0x40c] sm:$0xf]  ;;  %v7966_v63 = vor.u32 %v9912_v50, %v7963_v51  ;;  %2788 = vmatpush.bf16.msrb.mxu2 %v7710_v59  ;;  %v9821_v49 = vld [vmem:[#allocation12 + $0x76c] sm:$0xf0]  ;;  %v6818_v50 = vor.u32 %v9629_v40, %v6817_v39  ;;  %v7074_v51 = vor.u32 %v9693_v44, %v7073_v42  ;;  %v2596_v36 = vpop.f32.mrf.mxu3 }
 0x11b   :  { %v7163_v56 = vld [vmem:[#allocation12 + $0x428] sm:$0xf0]  ;;  %v9621_v54 = vld [vmem:[#allocation12 + $0x12c] sm:$0xf0]  ;;  %v7586_v57 = vor.u32 %v9821_v49, %v7585_v48  ;;  %v10739_v40 = vadd.f32 %v2596_v36, %v2583_v33 }
 0x11c   :  { %v9776_v60 = vld [vmem:[#allocation12 + $0x60c] sm:$0xf]  ;;  %v7166_v9 = vor.u32 %v9712_v55, %v7163_v56  ;;  %2801 = vmatpush.bf16.msrb.mxu3 %v7966_v63  ;;  %v7041_v55 = vld [vmem:[#allocation12 + $0x310] sm:$0xf]  ;;  %v10731_v56 = vpop.eup %10330 }
 0x11d   :  { %v7419_v61 = vld [vmem:[#allocation12 + $0x628] sm:$0xf0]  ;;  %v9685_v58 = vld [vmem:[#allocation12 + $0x32c] sm:$0xf0]  ;;  %v3176_v7 = vmul.f32 8.0, %v10731_v56  ;;  %vm3180_vm0 = vweird.f32 %v10731_v56 }
 0x11e   :  { %v9840_v62 = vld [vmem:[#allocation12 + $0x80c] sm:$0xf]  ;;  %v7422_v13 = vor.u32 %v9776_v60, %v7419_v61  ;;  %2763 = vmatpush.bf16.msrb.mxu0 %v7166_v9  ;;  %v7297_v59 = vld [vmem:[#allocation12 + $0x510] sm:$0xf]  ;;  %v2557_v61 = vpop.f32.mrf.mxu0  ;;  %v7042_v5 = vor.u32 %v9685_v58, %v7041_v55 }
 0x11f   :  { %v7675_v0 = vld [vmem:[#allocation12 + $0x828] sm:$0xf0]  ;;  %v9749_v60 = vld [vmem:[#allocation12 + $0x52c] sm:$0xf0] }
 0x120   :  { %v9904_v1 = vld [vmem:[#allocation12 + $0xa0c] sm:$0xf]  ;;  %v7678_v14 = vor.u32 %v9840_v62, %v7675_v0  ;;  %2776 = vmatpush.bf16.msrb.mxu1 %v7422_v13  ;;  %v7553_v62 = vld [vmem:[#allocation12 + $0x710] sm:$0xf]  ;;  %v2558_v0 = vadd.f32 %v2557_v61, %v10725_v8  ;;  %v7298_v6 = vor.u32 %v9749_v60, %v7297_v59 }
 0x121   :  { %v7931_v2 = vld [vmem:[#allocation12 + $0xa28] sm:$0xf0]  ;;  %2764 = vmatmul.bf16.vlgmr.msrb.gmra.mxu0 %v10699_v28  ;;  %v9813_v63 = vld [vmem:[#allocation12 + $0x72c] sm:$0xf0] }
 0x122   :  { %v7934_v18 = vor.u32 %v9904_v1, %v7931_v2  ;;  %2789 = vmatpush.bf16.msrb.mxu2 %v7678_v14  ;;  %2808 = vmatpush.bf16.msra.mxu0 %v6882_v19  ;;  %v6786_v1 = vor.u32 %v9621_v54, %v6785_v53  ;;  %v2570_v2 = vpop.f32.mrf.mxu1  ;;  %v9613_v9 = vld [vmem:[#allocation12 + $0xec] sm:$0xf0]  ;;  %v7554_v11 = vor.u32 %v9813_v63, %v7553_v62 }
 0x123   :  { %2777 = vmatmul.bf16.vlgmr.msrb.gmra.mxu1 %v10701_v31  ;;  %v7009_v10 = vld [vmem:[#allocation12 + $0x2d0] sm:$0xf]  ;;  %v10735_v12 = vadd.f32 %v2570_v2, %v2558_v0  ;;  %v6754_v19 = vor.u32 %v9613_v9, %v6753_v4 }
 0x124   :  { %2802 = vmatpush.bf16.msrb.mxu3 %v7934_v18  ;;  %2821 = vmatpush.bf16.msra.mxu1 %v7138_v21  ;;  %v9677_v13 = vld [vmem:[#allocation12 + $0x2ec] sm:$0xf0]  ;;  %v3177_v21 = vsub.f32 1.0, %v3176_v7 }
 0x125   :  { %2790 = vmatmul.bf16.vlgmr.msrb.gmra.mxu2 %v10705_v41  ;;  %v7265_v14 = vld [vmem:[#allocation12 + $0x4d0] sm:$0xf]  ;;  %v3127_v18 = vrot.slane %v10735_v12, 4 }
 0x126   :  { %2834 = vmatpush.bf16.msra.mxu2 %v7394_v22  ;;  %2809 = vmatpush.bf16.msra.mxu0 %v6850_v34  ;;  %v9741_v16 = vld [vmem:[#allocation12 + $0x4ec] sm:$0xf0]  ;;  %v7010_v22 = vor.u32 %v9677_v13, %v7009_v10  ;;  %v2585_v10 = vpop.f32.mrf.mxu2 }
 0x127   :  { %2803 = vmatmul.bf16.vlgmr.msrb.gmra.mxu3 %v10707_v45  ;;  %v7521_v17 = vld [vmem:[#allocation12 + $0x6d0] sm:$0xf]  ;;  %v7266_v23 = vor.u32 %v9741_v16, %v7265_v14  ;;  %v2598_v16 = vpop.f32.mrf.mxu3 }
 0x128   :  { %2847 = vmatpush.bf16.msra.mxu3 %v7650_v26  ;;  %2822 = vmatpush.bf16.msra.mxu1 %v7106_v37  ;;  %v9805_v8 = vld [vmem:[#allocation12 + $0x6ec] sm:$0xf0]  ;;  %v3128_v26 = vadd.f32 %v3127_v18, %v10735_v12  ;;  %v2559_v37 = vpop.f32.mrf.mxu0 }
 0x129   :  { %v6721_v20 = vld [vmem:[#allocation12 + $0x90] sm:$0xf]  ;;  %v7522_v27 = vor.u32 %v9805_v8, %v7521_v17  ;;  %v9633_v37 = vld [vmem:[#allocation12 + $0x194] sm:$0xf] }
 0x12a   :  { %2835 = vmatpush.bf16.msra.mxu2 %v7362_v38  ;;  %2810 = vmatpush.bf16.msra.mxu0 %v6818_v50  ;;  %v9605_v24 = vld [vmem:[#allocation12 + $0xac] sm:$0xf0]  ;;  %v3129_v38 = vrot.slane %v3128_v26, 2  ;;  %v2572_v42 = vpop.f32.mrf.mxu1 }
 0x12b   :  { %v6977_v25 = vld [vmem:[#allocation12 + $0x290] sm:$0xf]  ;;  %v6722_v39 = vor.u32 %v9605_v24, %v6721_v20  ;;  %v6883_v20 = vld [vmem:[#allocation12 + $0x1f0] sm:$0xf0] }
 0x12c   :  { %2848 = vmatpush.bf16.msra.mxu3 %v7618_v43  ;;  %2823 = vmatpush.bf16.msra.mxu1 %v7074_v51  ;;  %v9669_v29 = vld [vmem:[#allocation12 + $0x2ac] sm:$0xf0]  ;;  %v3178_v43 = vmul.f32 %v10731_v56, %v3177_v21  ;;  %v3130_v50 = vadd.f32 %v3129_v38, %v3128_v26  ;;  %v9705_v24 = vld [vmem:[#allocation12 + $0x3d4] sm:$0xf] }
 0x12d   :  { %v7233_v30 = vld [vmem:[#allocation12 + $0x490] sm:$0xf]  ;;  %v6978_v44 = vor.u32 %v9669_v29, %v6977_v25  ;;  %v7139_v25 = vld [vmem:[#allocation12 + $0x3f0] sm:$0xf0] }
 0x12e   :  { %2836 = vmatpush.bf16.msra.mxu2 %v7330_v52  ;;  %2811 = vmatpush.bf16.msra.mxu0 %v6786_v1  ;;  %v9733_v32 = vld [vmem:[#allocation12 + $0x4ac] sm:$0xf0]  ;;  %v3131_v58 = vrot.slane %v3130_v50, 1  ;;  %v3179_v62 = vadd.f32 %v10731_v56, %v3178_v43  ;;  %v7142_v36 = vor.u32 %v9705_v24, %v7139_v25  ;;  %v6851_v38 = vld [vmem:[#allocation12 + $0x1b0] sm:$0xf0] }
 0x12f   :  { %v7489_v34 = vld [vmem:[#allocation12 + $0x690] sm:$0xf]  ;;  %v7234_v46 = vor.u32 %v9733_v32, %v7233_v30  ;;  %v7107_v42 = vld [vmem:[#allocation12 + $0x3b0] sm:$0xf0] }
 0x130   :  { %2849 = vmatpush.bf16.msra.mxu3 %v7586_v57  ;;  %2824 = vmatpush.bf16.msra.mxu1 %v7042_v5  ;;  %v9797_v35 = vld [vmem:[#allocation12 + $0x6ac] sm:$0xf0]  ;;  %v3132_v17 = vadd.f32 %v3131_v58, %v3130_v50  ;;  %v10747_v21 = vsel %vm3180_vm0, %v10731_v56, %v3179_v62  ;;  %v9673_v25 = vld [vmem:[#allocation12 + $0x2d4] sm:$0xf] }
 0x131   :  { %v6689_v47 = vld [vmem:[#allocation12 + $0x50] sm:$0xf]  ;;  %v7490_v51 = vor.u32 %v9797_v35, %v7489_v34 }
 0x132   :  { %2837 = vmatpush.bf16.msra.mxu2 %v7298_v6  ;;  %2812 = vmatpush.bf16.msra.mxu0 %v6754_v19  ;;  %v9597_v48 = vld [vmem:[#allocation12 + $0x6c] sm:$0xf0]  ;;  %v9641_v19 = vld [vmem:[#allocation12 + $0x1d4] sm:$0xf]  ;;  %v3182_v35 = vmul.f32 %v10747_v21, %v3132_v17  ;;  %v2622_v16 = vpop.f32.mrf.mxu1 }
 0x133   :  { %v6945_v49 = vld [vmem:[#allocation12 + $0x250] sm:$0xf]  ;;  %v6690_v59 = vor.u32 %v9597_v48, %v6689_v47  ;;  %v6886_v30 = vor.u32 %v9641_v19, %v6883_v20 }
 0x134   :  { %2850 = vmatpush.bf16.msra.mxu3 %v7554_v11  ;;  %2825 = vmatpush.bf16.msra.mxu1 %v7010_v22  ;;  %v9661_v52 = vld [vmem:[#allocation12 + $0x26c] sm:$0xf0]  ;;  %v10751_v50 = vsub.f32 %v10735_v12, %v3182_v35 }
 0x135   :  { %v7201_v53 = vld [vmem:[#allocation12 + $0x450] sm:$0xf]  ;;  %v6946_v63 = vor.u32 %v9661_v52, %v6945_v49 }
 0x136   :  { %2838 = vmatpush.bf16.msra.mxu2 %v7266_v23  ;;  %v9725_v54 = vld [vmem:[#allocation12 + $0x46c] sm:$0xf0]  ;;  %2813 = vmatpush.bf16.msra.mxu0 %v6722_v39  ;;  %v9697_v39 = vld [vmem:[#allocation12 + $0x394] sm:$0xf] }
 0x137   :  { %v7457_v55 = vld [vmem:[#allocation12 + $0x650] sm:$0xf]  ;;  %v7202_v0 = vor.u32 %v9725_v54, %v7201_v53  ;;  %v9625_v53 = vld [vmem:[#allocation12 + $0x154] sm:$0xf] }
 0x138   :  { %2851 = vmatpush.bf16.msra.mxu3 %v7522_v27  ;;  %v9789_v57 = vld [vmem:[#allocation12 + $0x66c] sm:$0xf0]  ;;  %2826 = vmatpush.bf16.msra.mxu1 %v6978_v44  ;;  %v6819_v54 = vld [vmem:[#allocation12 + $0x170] sm:$0xf0] }
 0x139   :  { %v6657_v60 = vld [vmem:[#allocation12 + $0x10] sm:$0xf]  ;;  %v7458_v5 = vor.u32 %v9789_v57, %v7457_v55  ;;  %v9689_v55 = vld [vmem:[#allocation12 + $0x354] sm:$0xf] }
 0x13a   :  { %v9589_v61 = vld [vmem:[#allocation12 + $0x2c] sm:$0xf0]  ;;  %2839 = vmatpush.bf16.msra.mxu2 %v7234_v46  ;;  %2814 = vmatpush.bf16.msra.mxu0 %v6690_v59  ;;  %v6854_v46 = vor.u32 %v9633_v37, %v6851_v38  ;;  %v7075_v57 = vld [vmem:[#allocation12 + $0x370] sm:$0xf0]  ;;  %v6822_v59 = vor.u32 %v9625_v53, %v6819_v54  ;;  %v2648_v37 = vpop.f32.mrf.mxu3 }
 0x13b   :  { %v6913_v1 = vld [vmem:[#allocation12 + $0x210] sm:$0xf]  ;;  %v6658_v8 = vor.u32 %v9589_v61, %v6657_v60 }
 0x13c   :  { %v9653_v2 = vld [vmem:[#allocation12 + $0x22c] sm:$0xf0]  ;;  %2852 = vmatpush.bf16.msra.mxu3 %v7490_v51  ;;  %2827 = vmatpush.bf16.msra.mxu1 %v6946_v63  ;;  %v7110_v51 = vor.u32 %v9697_v39, %v7107_v42  ;;  %v3198_v63 = vmul.f32 %v10751_v50, %v10751_v50  ;;  %v9601_v39 = vld [vmem:[#allocation12 + $0x94] sm:$0xf] }
 0x13d   :  { %v7169_v4 = vld [vmem:[#allocation12 + $0x410] sm:$0xf]  ;;  %v6914_v22 = vor.u32 %v9653_v2, %v6913_v1  ;;  %v9617_v2 = vld [vmem:[#allocation12 + $0x114] sm:$0xf] }
 0x13e   :  { %v9717_v6 = vld [vmem:[#allocation12 + $0x42c] sm:$0xf0]  ;;  %2840 = vmatpush.bf16.msra.mxu2 %v7202_v0  ;;  %2815 = vmatpush.bf16.msra.mxu0 %v6658_v8  ;;  %v7078_v0 = vor.u32 %v9689_v55, %v7075_v57  ;;  %v3206_v19 = vrot.slane %v3198_v63, 4  ;;  %v6723_v42 = vld [vmem:[#allocation12 + $0xb0] sm:$0xf0]  ;;  %v2624_v57 = vpop.f32.mrf.mxu1 }
 0x13f   :  { %v7425_v7 = vld [vmem:[#allocation12 + $0x610] sm:$0xf]  ;;  %v7170_v23 = vor.u32 %v9717_v6, %v7169_v4  ;;  %v6787_v4 = vld [vmem:[#allocation12 + $0x130] sm:$0xf0] }
 0x140   :  { %v9781_v9 = vld [vmem:[#allocation12 + $0x62c] sm:$0xf0]  ;;  %2853 = vmatpush.bf16.msra.mxu3 %v7458_v5  ;;  %2828 = vmatpush.bf16.msra.mxu1 %v6914_v22  ;;  %v9681_v5 = vld [vmem:[#allocation12 + $0x314] sm:$0xf]  ;;  %v3207_v35 = vadd.f32 %v3206_v19, %v3198_v63 }
 0x141   :  { %v7905_v11 = vld [vmem:[#allocation12 + $0x9d0] sm:$0xf]  ;;  %v7426_v26 = vor.u32 %v9781_v9, %v7425_v7  ;;  %2816 = vmatmul.bf16.vlgmr.msra.gmra.mxu0 %v10693_v3  ;;  %v7043_v6 = vld [vmem:[#allocation12 + $0x330] sm:$0xf0]  ;;  %v2609_v9 = vpop.f32.mrf.mxu0 }
 0x142   :  { %v9901_v13 = vld [vmem:[#allocation12 + $0x9ec] sm:$0xf0]  ;;  %2841 = vmatpush.bf16.msra.mxu2 %v7170_v23  ;;  %v7046_v20 = vor.u32 %v9681_v5, %v7043_v6  ;;  %v9609_v22 = vld [vmem:[#allocation12 + $0xd4] sm:$0xf]  ;;  %v2650_v19 = vpop.f32.mrf.mxu3 }
 0x143   :  { %v8161_v14 = vld [vmem:[#allocation12 + $0xbd0] sm:$0xf]  ;;  %v7906_v27 = vor.u32 %v9901_v13, %v7905_v11  ;;  %2829 = vmatmul.bf16.vlgmr.msra.gmra.mxu1 %v10696_v15  ;;  %v6790_v13 = vor.u32 %v9617_v2, %v6787_v4  ;;  %v6755_v23 = vld [vmem:[#allocation12 + $0xf0] sm:$0xf0] }
 0x144   :  { %v9965_v18 = vld [vmem:[#allocation12 + $0xbec] sm:$0xf0]  ;;  %2854 = vmatpush.bf16.msra.mxu3 %v7426_v26  ;;  %v7011_v26 = vld [vmem:[#allocation12 + $0x2f0] sm:$0xf0] }
 0x145   :  { %v8162_v29 = vor.u32 %v9965_v18, %v8161_v14  ;;  %v7873_v32 = vld [vmem:[#allocation12 + $0x990] sm:$0xf]  ;;  %2860 = vmatpush.bf16.msrb.mxu0 %v7906_v27  ;;  %2842 = vmatmul.bf16.vlgmr.msra.gmra.mxu2 %v10699_v28  ;;  %v2610_v14 = vadd.f32 %v2609_v9, %v10739_v40  ;;  %v6947_v63 = vld [vmem:[#allocation12 + $0x270] sm:$0xf0] }
 0x146   :  { %v9893_v33 = vld [vmem:[#allocation12 + $0x9ac] sm:$0xf0]  ;;  %2886 = vmatpush.bf16.msrb.mxu2 %v6886_v30  ;;  %v6758_v30 = vor.u32 %v9609_v22, %v6755_v23  ;;  %v7395_v22 = vld [vmem:[#allocation12 + $0x5f0] sm:$0xf0] }
 0x147   :  { %v8129_v34 = vld [vmem:[#allocation12 + $0xb90] sm:$0xf]  ;;  %v7874_v43 = vor.u32 %v9893_v33, %v7873_v32  ;;  %2873 = vmatpush.bf16.msrb.mxu1 %v8162_v29  ;;  %2855 = vmatmul.bf16.vlgmr.msra.gmra.mxu3 %v10701_v31  ;;  %v2623_v24 = vadd.f32 %v2622_v16, %v2610_v14  ;;  %v2635_v32 = vpop.f32.mrf.mxu2  ;;  %v9833_v23 = vld [vmem:[#allocation12 + $0x7d4] sm:$0xf] }
 0x148   :  { %v9957_v56 = vld [vmem:[#allocation12 + $0xbac] sm:$0xf0]  ;;  %2899 = vmatpush.bf16.msrb.mxu3 %v7142_v36  ;;  %v7014_v36 = vor.u32 %v9673_v25, %v7011_v26  ;;  %v7651_v26 = vld [vmem:[#allocation12 + $0x7f0] sm:$0xf0] }
 0x149   :  { %v8130_v44 = vor.u32 %v9957_v56, %v8129_v34  ;;  %v7841_v47 = vld [vmem:[#allocation12 + $0x950] sm:$0xf]  ;;  %2861 = vmatpush.bf16.msrb.mxu0 %v7874_v43  ;;  %v2636_v56 = vadd.f32 %v2635_v32, %v2623_v24  ;;  %v9665_v43 = vld [vmem:[#allocation12 + $0x294] sm:$0xf] }
 0x14a   :  { %v9885_v48 = vld [vmem:[#allocation12 + $0x96c] sm:$0xf0]  ;;  %2887 = vmatpush.bf16.msrb.mxu2 %v6854_v46  ;;  %v7811_v19 = vld [vmem:[#allocation12 + $0x930] sm:$0xf0] }
 0x14b   :  { %v8097_v49 = vld [vmem:[#allocation12 + $0xb50] sm:$0xf]  ;;  %v7842_v58 = vor.u32 %v9885_v48, %v7841_v47  ;;  %2874 = vmatpush.bf16.msrb.mxu1 %v8130_v44  ;;  %v6979_v44 = vld [vmem:[#allocation12 + $0x2b0] sm:$0xf0]  ;;  %v10760_v46 = vadd.f32 %v2648_v37, %v2636_v56  ;;  %v7654_v37 = vor.u32 %v9833_v23, %v7651_v26 }
 0x14c   :  { %v9949_v52 = vld [vmem:[#allocation12 + $0xb6c] sm:$0xf0]  ;;  %2900 = vmatpush.bf16.msrb.mxu3 %v7110_v51 }
 0x14d   :  { %v8098_v12 = vor.u32 %v9949_v52, %v8097_v49  ;;  %v7809_v60 = vld [vmem:[#allocation12 + $0x910] sm:$0xf]  ;;  %2862 = vmatpush.bf16.msrb.mxu0 %v7842_v58  ;;  %v2611_v49 = vpop.f32.mrf.mxu0  ;;  %v6726_v52 = vor.u32 %v9601_v39, %v6723_v42  ;;  %v3208_v58 = vrot.slane %v3207_v35, 2  ;;  %v9761_v39 = vld [vmem:[#allocation12 + $0x594] sm:$0xf] }
 0x14e   :  { %v9877_v61 = vld [vmem:[#allocation12 + $0x92c] sm:$0xf0]  ;;  %2888 = vmatpush.bf16.msrb.mxu2 %v6822_v59  ;;  %v6982_v59 = vor.u32 %v9665_v43, %v6979_v44  ;;  %v7363_v42 = vld [vmem:[#allocation12 + $0x5b0] sm:$0xf0] }
 0x14f   :  { %v8065_v62 = vld [vmem:[#allocation12 + $0xb10] sm:$0xf]  ;;  %v7810_v7 = vor.u32 %v9877_v61, %v7809_v60  ;;  %2875 = vmatpush.bf16.msrb.mxu1 %v8098_v12  ;;  %v3133_v12 = vrot.slane %v10760_v46, 4  ;;  %v9593_v60 = vld [vmem:[#allocation12 + $0x54] sm:$0xf]  ;;  %v3209_v14 = vadd.f32 %v3208_v58, %v3207_v35  ;;  %v7366_v57 = vor.u32 %v9761_v39, %v7363_v42 }
 0x150   :  { %v9941_v1 = vld [vmem:[#allocation12 + $0xb2c] sm:$0xf0]  ;;  %2901 = vmatpush.bf16.msrb.mxu3 %v7078_v0  ;;  %v6691_v61 = vld [vmem:[#allocation12 + $0x70] sm:$0xf0] }
 0x151   :  { %v7777_v10 = vld [vmem:[#allocation12 + $0x8d0] sm:$0xf]  ;;  %v8066_v11 = vor.u32 %v9941_v1, %v8065_v62  ;;  %2863 = vmatpush.bf16.msrb.mxu0 %v7810_v7  ;;  %v9657_v62 = vld [vmem:[#allocation12 + $0x254] sm:$0xf]  ;;  %v3134_v0 = vadd.f32 %v3133_v12, %v10760_v46  ;;  %v6694_v7 = vor.u32 %v9593_v60, %v6691_v61 }
 0x152   :  { %v9869_v17 = vld [vmem:[#allocation12 + $0x8ec] sm:$0xf0]  ;;  %2889 = vmatpush.bf16.msrb.mxu2 %v6790_v13  ;;  %v2637_v13 = vpop.f32.mrf.mxu2  ;;  %v9825_v43 = vld [vmem:[#allocation12 + $0x794] sm:$0xf] }
 0x153   :  { %v8033_v8 = vld [vmem:[#allocation12 + $0xad0] sm:$0xf]  ;;  %v7778_v27 = vor.u32 %v9869_v17, %v7777_v10  ;;  %2876 = vmatpush.bf16.msrb.mxu1 %v8066_v11  ;;  %v9585_v10 = vld [vmem:[#allocation12 + $0x14] sm:$0xf]  ;;  %v3135_v16 = vrot.slane %v3134_v0, 2  ;;  %v6950_v17 = vor.u32 %v9657_v62, %v6947_v63 }
 0x154   :  { %v9933_v18 = vld [vmem:[#allocation12 + $0xaec] sm:$0xf0]  ;;  %2902 = vmatpush.bf16.msrb.mxu3 %v7046_v20  ;;  %v6659_v11 = vld [vmem:[#allocation12 + $0x30] sm:$0xf0] }
 0x155   :  { %v8034_v29 = vor.u32 %v9933_v18, %v8033_v8  ;;  %v7745_v40 = vld [vmem:[#allocation12 + $0x890] sm:$0xf]  ;;  %2864 = vmatpush.bf16.msrb.mxu0 %v7778_v27  ;;  %v9649_v8 = vld [vmem:[#allocation12 + $0x214] sm:$0xf]  ;;  %v3136_v24 = vadd.f32 %v3135_v16, %v3134_v0  ;;  %v6662_v32 = vor.u32 %v9585_v10, %v6659_v11 }
 0x156   :  { %v9861_v33 = vld [vmem:[#allocation12 + $0x8ac] sm:$0xf0]  ;;  %2890 = vmatpush.bf16.msrb.mxu2 %v6758_v30  ;;  %v6915_v18 = vld [vmem:[#allocation12 + $0x230] sm:$0xf0]  ;;  %v2661_v23 = vpop.f32.mrf.mxu0 }
 0x157   :  { %v8001_v34 = vld [vmem:[#allocation12 + $0xa90] sm:$0xf]  ;;  %v7746_v47 = vor.u32 %v9861_v33, %v7745_v40  ;;  %2877 = vmatpush.bf16.msrb.mxu1 %v8034_v29  ;;  %v9769_v20 = vld [vmem:[#allocation12 + $0x5d4] sm:$0xf]  ;;  %v3137_v35 = vrot.slane %v3136_v24, 1 }
 0x158   :  { %v9925_v38 = vld [vmem:[#allocation12 + $0xaac] sm:$0xf0]  ;;  %2903 = vmatpush.bf16.msrb.mxu3 %v7014_v36  ;;  %v9897_v27 = vld [vmem:[#allocation12 + $0x9d4] sm:$0xf]  ;;  %v6918_v36 = vor.u32 %v9649_v8, %v6915_v18  ;;  %v7398_v56 = vor.u32 %v9769_v20, %v7395_v22 }
 0x159   :  { %v7713_v48 = vld [vmem:[#allocation12 + $0x850] sm:$0xf]  ;;  %v8002_v51 = vor.u32 %v9925_v38, %v8001_v34  ;;  %2865 = vmatpush.bf16.msrb.mxu0 %v7746_v47  ;;  %v7907_v29 = vld [vmem:[#allocation12 + $0x9f0] sm:$0xf0]  ;;  %v3210_v34 = vrot.slane %v3209_v14, 1  ;;  %v3138_v44 = vadd.f32 %v3137_v35, %v3136_v24 }
 0x15a   :  { %v9853_v53 = vld [vmem:[#allocation12 + $0x86c] sm:$0xf0]  ;;  %2891 = vmatpush.bf16.msrb.mxu2 %v6726_v52  ;;  %v9961_v40 = vld [vmem:[#allocation12 + $0xbd4] sm:$0xf]  ;;  %v7910_v38 = vor.u32 %v9897_v27, %v7907_v29  ;;  %v2674_v29 = vpop.f32.mrf.mxu1 }
 0x15b   :  { %v7969_v54 = vld [vmem:[#allocation12 + $0xa50] sm:$0xf]  ;;  %v7714_v1 = vor.u32 %v9853_v53, %v7713_v48  ;;  %2878 = vmatpush.bf16.msrb.mxu1 %v8002_v51  ;;  %v8163_v33 = vld [vmem:[#allocation12 + $0xbf0] sm:$0xf0]  ;;  %v2675_v35 = vadd.f32 %v2674_v29, %v2661_v23 }
 0x15c   :  { %v9917_v55 = vld [vmem:[#allocation12 + $0xa6c] sm:$0xf0]  ;;  %2904 = vmatpush.bf16.msrb.mxu3 %v6982_v59  ;;  %v8166_v47 = vor.u32 %v9961_v40, %v8163_v33  ;;  %v7619_v48 = vld [vmem:[#allocation12 + $0x7b0] sm:$0xf0] }
 0x15d   :  { %v7681_v2 = vld [vmem:[#allocation12 + $0x810] sm:$0xf]  ;;  %v7970_v6 = vor.u32 %v9917_v55, %v7969_v54  ;;  %2866 = vmatpush.bf16.msrb.mxu0 %v7714_v1  ;;  %v9889_v49 = vld [vmem:[#allocation12 + $0x994] sm:$0xf]  ;;  %v3211_v54 = vadd.f32 %v3210_v34, %v3209_v14  ;;  %v3183_v55 = vmul.f32 %v10747_v21, %v3138_v44  ;;  %v7622_v58 = vor.u32 %v9825_v43, %v7619_v48 }
 0x15e   :  { %v9845_v4 = vld [vmem:[#allocation12 + $0x82c] sm:$0xf0]  ;;  %2892 = vmatpush.bf16.msrb.mxu2 %v6694_v7  ;;  %v7875_v51 = vld [vmem:[#allocation12 + $0x9b0] sm:$0xf0] }
 0x15f   :  { %v7937_v5 = vld [vmem:[#allocation12 + $0xa10] sm:$0xf]  ;;  %v7682_v25 = vor.u32 %v9845_v4, %v7681_v2  ;;  %2879 = vmatpush.bf16.msrb.mxu1 %v7970_v6  ;;  %v9953_v52 = vld [vmem:[#allocation12 + $0xb94] sm:$0xf]  ;;  %v7878_v12 = vor.u32 %v9889_v49, %v7875_v51  ;;  %v10766_v62 = vsub.f32 %v10760_v46, %v3183_v55  ;;  %v3254_v6 = vmul.f32 %v3211_v54, %v10747_v21 }
 0x160   :  { %v9909_v9 = vld [vmem:[#allocation12 + $0xa2c] sm:$0xf0]  ;;  %2905 = vmatpush.bf16.msrb.mxu3 %v6950_v17  ;;  %v8131_v53 = vld [vmem:[#allocation12 + $0xbb0] sm:$0xf0] }
 0x161   :  { %v7938_v30 = vor.u32 %v9909_v9, %v7937_v5  ;;  %2867 = vmatpush.bf16.msrb.mxu0 %v7682_v25  ;;  %v9753_v59 = vld [vmem:[#allocation12 + $0x554] sm:$0xf]  ;;  %v8134_v63 = vor.u32 %v9953_v52, %v8131_v53  ;;  %v3199_v7 = vmul.f32 %v10766_v62, %v10766_v62  ;;  %v10775_v24 = vadd.f32 1e-05, %v3254_v6 }
 0x162   :  { %2893 = vmatpush.bf16.msrb.mxu2 %v6662_v32  ;;  %v7331_v60 = vld [vmem:[#allocation12 + $0x570] sm:$0xf0] }
 0x163   :  { %2880 = vmatpush.bf16.msrb.mxu1 %v7938_v30  ;;  %v9817_v61 = vld [vmem:[#allocation12 + $0x754] sm:$0xf]  ;;  %v7334_v46 = vor.u32 %v9753_v59, %v7331_v60  ;;  %v3212_v17 = vrot.slane %v3199_v7, 4  ;;  %10332 = vrsqrt.f32 %v10775_v24  ;;  %vm3276_vm6 = vweird.f32 %v10775_v24 }
 0x164   :  { %2906 = vmatpush.bf16.msrb.mxu3 %v6918_v36  ;;  %2868 = vmatmul.bf16.vlgmr.msrb.gmra.mxu0 %v10705_v41  ;;  %v7587_v0 = vld [vmem:[#allocation12 + $0x770] sm:$0xf0] }
 0x165   :  { %2912 = vmatpush.bf16.msra.mxu0 %v7398_v56  ;;  %v9881_v1 = vld [vmem:[#allocation12 + $0x954] sm:$0xf]  ;;  %2894 = vmatmul.bf16.vlgmr.msrb.gmra.mxu2 %v10693_v3  ;;  %v7590_v10 = vor.u32 %v9817_v61, %v7587_v0  ;;  %v3213_v25 = vadd.f32 %v3212_v17, %v3199_v7  ;;  %v2663_v61 = vpop.f32.mrf.mxu0  ;;  %v2700_v0 = vpop.f32.mrf.mxu3 }
 0x166   :  { %2938 = vmatpush.bf16.msra.mxu2 %v7910_v38  ;;  %v7843_v2 = vld [vmem:[#allocation12 + $0x970] sm:$0xf0]  ;;  %2881 = vmatmul.bf16.vlgmr.msrb.gmra.mxu1 %v10707_v45  ;;  %v7113_v61 = vld [vmem:[#allocation12 + $0x398] sm:$0xf] }
 0x167   :  { %2925 = vmatpush.bf16.msra.mxu1 %v7654_v37  ;;  %v9945_v4 = vld [vmem:[#allocation12 + $0xb54] sm:$0xf]  ;;  %2907 = vmatmul.bf16.vlgmr.msrb.gmra.mxu3 %v10696_v15  ;;  %v7846_v11 = vor.u32 %v9881_v1, %v7843_v2  ;;  %v3214_v36 = vrot.slane %v3213_v25, 2 }
 0x168   :  { %2951 = vmatpush.bf16.msra.mxu3 %v8166_v47  ;;  %v8099_v5 = vld [vmem:[#allocation12 + $0xb70] sm:$0xf0] }
 0x169   :  { %2913 = vmatpush.bf16.msra.mxu0 %v7366_v57  ;;  %v9745_v9 = vld [vmem:[#allocation12 + $0x514] sm:$0xf]  ;;  %v8102_v8 = vor.u32 %v9945_v4, %v8099_v5  ;;  %v3215_v43 = vadd.f32 %v3214_v36, %v3213_v25  ;;  %v2676_v4 = vpop.f32.mrf.mxu1 }
 0x16a   :  { %2939 = vmatpush.bf16.msra.mxu2 %v7878_v12  ;;  %v7299_v13 = vld [vmem:[#allocation12 + $0x530] sm:$0xf0]  ;;  %v2687_v12 = vpop.f32.mrf.mxu2  ;;  %v9766_v4 = vld [vmem:[#allocation12 + $0x5b4] sm:$0xf0] }
 0x16b   :  { %2926 = vmatpush.bf16.msra.mxu1 %v7622_v58  ;;  %v9809_v14 = vld [vmem:[#allocation12 + $0x714] sm:$0xf]  ;;  %v7302_v26 = vor.u32 %v9745_v9, %v7299_v13  ;;  %v3216_v54 = vrot.slane %v3215_v43, 1 }
 0x16c   :  { %v7555_v16 = vld [vmem:[#allocation12 + $0x730] sm:$0xf0]  ;;  %2952 = vmatpush.bf16.msra.mxu3 %v8134_v63  ;;  %v2688_v63 = vadd.f32 %v2687_v12, %v2675_v35 }
 0x16d   :  { %v9873_v18 = vld [vmem:[#allocation12 + $0x914] sm:$0xf]  ;;  %2914 = vmatpush.bf16.msra.mxu0 %v7334_v46  ;;  %v7558_v30 = vor.u32 %v9809_v14, %v7555_v16  ;;  %v3217_v1 = vadd.f32 %v3216_v54, %v3215_v43  ;;  %v9838_v54 = vld [vmem:[#allocation12 + $0x7f4] sm:$0xf0] }
 0x16e   :  { %v9937_v20 = vld [vmem:[#allocation12 + $0xb14] sm:$0xf]  ;;  %2940 = vmatpush.bf16.msra.mxu2 %v7846_v11  ;;  %v7814_v32 = vor.u32 %v9873_v18, %v7811_v19  ;;  %v10780_v11 = vpop.eup %10332 }
 0x16f   :  { %v8067_v22 = vld [vmem:[#allocation12 + $0xb30] sm:$0xf0]  ;;  %2927 = vmatpush.bf16.msra.mxu1 %v7590_v10  ;;  %v10778_v10 = vadd.f32 %v2700_v0, %v2688_v63  ;;  %v3255_v13 = vmul.f32 %v3217_v1, %v10747_v21  ;;  %v9702_v1 = vld [vmem:[#allocation12 + $0x3b4] sm:$0xf0]  ;;  %vm3277_vm2 = vweird.f32 %v10780_v11 }
 0x170   :  { %v9737_v27 = vld [vmem:[#allocation12 + $0x4d4] sm:$0xf]  ;;  %2953 = vmatpush.bf16.msra.mxu3 %v8102_v8  ;;  %v8070_v56 = vor.u32 %v9937_v20, %v8067_v22  ;;  %vm3278_vm7 = vmor %vm3276_vm6, %vm3277_vm2 }
 0x171   :  { %v7267_v40 = vld [vmem:[#allocation12 + $0x4f0] sm:$0xf0]  ;;  %2915 = vmatpush.bf16.msra.mxu0 %v7302_v26  ;;  %v10783_v20 = vadd.f32 1e-05, %v3255_v13  ;;  %v3271_v26 = vmul.f32 %v10780_v11, %v10775_v24  ;;  %v7273_v24 = vld [vmem:[#allocation12 + $0x4d8] sm:$0xf] }
 0x172   :  { %v9801_v33 = vld [vmem:[#allocation12 + $0x6d4] sm:$0xf]  ;;  %v7270_v44 = vor.u32 %v9737_v27, %v7267_v40  ;;  %2941 = vmatpush.bf16.msra.mxu2 %v7814_v32 }
 0x173   :  { %v7523_v34 = vld [vmem:[#allocation12 + $0x6f0] sm:$0xf0]  ;;  %2928 = vmatpush.bf16.msra.mxu1 %v7558_v30  ;;  %10334 = vrsqrt.f32 %v10783_v20  ;;  %vm3286_vm3 = vweird.f32 %v10783_v20 }
 0x174   :  { %v9865_v37 = vld [vmem:[#allocation12 + $0x8d4] sm:$0xf]  ;;  %v7526_v48 = vor.u32 %v9801_v33, %v7523_v34  ;;  %2954 = vmatpush.bf16.msra.mxu3 %v8070_v56  ;;  %v2689_v56 = vpop.f32.mrf.mxu2 }
 0x175   :  { %v7779_v38 = vld [vmem:[#allocation12 + $0x8f0] sm:$0xf0]  ;;  %2916 = vmatpush.bf16.msra.mxu0 %v7270_v44  ;;  %v9710_v44 = vld [vmem:[#allocation12 + $0x3f4] sm:$0xf0] }
 0x176   :  { %v9929_v39 = vld [vmem:[#allocation12 + $0xad4] sm:$0xf]  ;;  %v7782_v49 = vor.u32 %v9865_v37, %v7779_v38  ;;  %v6889_v37 = vld [vmem:[#allocation12 + $0x1d8] sm:$0xf] }
 0x177   :  { %v8035_v42 = vld [vmem:[#allocation12 + $0xaf0] sm:$0xf0]  ;;  %2929 = vmatpush.bf16.msra.mxu1 %v7526_v48  ;;  %v9646_v38 = vld [vmem:[#allocation12 + $0x1f4] sm:$0xf0] }
 0x178   :  { %v9729_v47 = vld [vmem:[#allocation12 + $0x494] sm:$0xf]  ;;  %v8038_v55 = vor.u32 %v9929_v39, %v8035_v42  ;;  %2942 = vmatpush.bf16.msra.mxu2 %v7782_v49  ;;  %v7145_v39 = vld [vmem:[#allocation12 + $0x3d8] sm:$0xf]  ;;  %v2702_v42 = vpop.f32.mrf.mxu3  ;;  %v3272_v49 = vmul.f32 %v10780_v11, %v3271_v26 }
 0x179   :  { %v7235_v51 = vld [vmem:[#allocation12 + $0x4b0] sm:$0xf0]  ;;  %v9774_v48 = vld [vmem:[#allocation12 + $0x5f4] sm:$0xf0]  ;;  %v10789_v63 = vpop.eup %10334 }
 0x17a   :  { %v9793_v52 = vld [vmem:[#allocation12 + $0x694] sm:$0xf]  ;;  %v7238_v2 = vor.u32 %v9729_v47, %v7235_v51  ;;  %2955 = vmatpush.bf16.msra.mxu3 %v8038_v55  ;;  %v7401_v47 = vld [vmem:[#allocation12 + $0x5d8] sm:$0xf]  ;;  %vm3287_vm1 = vweird.f32 %v10789_v63 }
 0x17b   :  { %v7491_v53 = vld [vmem:[#allocation12 + $0x6b0] sm:$0xf0]  ;;  %v7402_v12 = vor.u32 %v9774_v48, %v7401_v47  ;;  %v7049_v56 = vld [vmem:[#allocation12 + $0x318] sm:$0xf]  ;;  %v2713_v47 = vpop.f32.mrf.mxu0  ;;  %vm10805_vm4 = vmor %vm3286_vm3, %vm3287_vm1 }
 0x17c   :  { %v9857_v57 = vld [vmem:[#allocation12 + $0x894] sm:$0xf]  ;;  %v7494_v5 = vor.u32 %v9793_v52, %v7491_v53  ;;  %2917 = vmatpush.bf16.msra.mxu0 %v7238_v2  ;;  %v7657_v53 = vld [vmem:[#allocation12 + $0x7d8] sm:$0xf] }
 0x17d   :  { %v7747_v58 = vld [vmem:[#allocation12 + $0x8b0] sm:$0xf0]  ;;  %v7658_v0 = vor.u32 %v9838_v54, %v7657_v53  ;;  %v7369_v2 = vld [vmem:[#allocation12 + $0x598] sm:$0xf]  ;;  %v2726_v54 = vpop.f32.mrf.mxu1 }
 0x17e   :  { %v9921_v59 = vld [vmem:[#allocation12 + $0xa94] sm:$0xf]  ;;  %v7750_v6 = vor.u32 %v9857_v57, %v7747_v58  ;;  %2930 = vmatpush.bf16.msra.mxu1 %v7494_v5  ;;  %v6890_v57 = vor.u32 %v9646_v38, %v6889_v37  ;;  %v7146_v58 = vor.u32 %v9710_v44, %v7145_v39  ;;  %v3273_v5 = vmul.f32 0.5, %v3272_v49  ;;  %v9686_v38 = vld [vmem:[#allocation12 + $0x334] sm:$0xf0] }
 0x17f   :  { %v8003_v60 = vld [vmem:[#allocation12 + $0xab0] sm:$0xf0]  ;;  %v7305_v39 = vld [vmem:[#allocation12 + $0x518] sm:$0xf] }
 0x180   :  { %v9721_v7 = vld [vmem:[#allocation12 + $0x454] sm:$0xf]  ;;  %v8006_v14 = vor.u32 %v9921_v59, %v8003_v60  ;;  %2943 = vmatpush.bf16.msra.mxu2 %v7750_v6  ;;  %v6857_v59 = vld [vmem:[#allocation12 + $0x198] sm:$0xf]  ;;  %v3281_v6 = vmul.f32 %v10789_v63, %v10783_v20  ;;  %v3274_v26 = vsub.f32 1.5, %v3273_v5 }
 0x181   :  { %v7203_v46 = vld [vmem:[#allocation12 + $0x470] sm:$0xf0]  ;;  %v9638_v60 = vld [vmem:[#allocation12 + $0x1b4] sm:$0xf0] }
 0x182   :  { %v9785_v9 = vld [vmem:[#allocation12 + $0x654] sm:$0xf]  ;;  %v7206_v22 = vor.u32 %v9721_v7, %v7203_v46  ;;  %2956 = vmatpush.bf16.msra.mxu3 %v8006_v14  ;;  %v7625_v7 = vld [vmem:[#allocation12 + $0x798] sm:$0xf]  ;;  %v3282_v13 = vmul.f32 %v10789_v63, %v3281_v6  ;;  %v7114_v14 = vor.u32 %v9702_v1, %v7113_v61 }
 0x183   :  { %v7459_v16 = vld [vmem:[#allocation12 + $0x670] sm:$0xf0]  ;;  %v9830_v46 = vld [vmem:[#allocation12 + $0x7b4] sm:$0xf0] }
 0x184   :  { %v9849_v17 = vld [vmem:[#allocation12 + $0x854] sm:$0xf]  ;;  %v7462_v27 = vor.u32 %v9785_v9, %v7459_v16  ;;  %2918 = vmatpush.bf16.msra.mxu0 %v7206_v22  ;;  %v6858_v9 = vor.u32 %v9638_v60, %v6857_v59  ;;  %v7370_v16 = vor.u32 %v9766_v4, %v7369_v2  ;;  %v9694_v22 = vld [vmem:[#allocation12 + $0x374] sm:$0xf0] }
 0x185   :  { %v7715_v8 = vld [vmem:[#allocation12 + $0x870] sm:$0xf0]  ;;  %v9750_v42 = vld [vmem:[#allocation12 + $0x534] sm:$0xf0] }
 0x186   :  { %v9913_v18 = vld [vmem:[#allocation12 + $0xa54] sm:$0xf]  ;;  %v7718_v29 = vor.u32 %v9849_v17, %v7715_v8  ;;  %2931 = vmatpush.bf16.msra.mxu1 %v7462_v27  ;;  %v6825_v17 = vld [vmem:[#allocation12 + $0x158] sm:$0xf]  ;;  %v3283_v27 = vmul.f32 0.5, %v3282_v13 }
 0x187   :  { %v7971_v19 = vld [vmem:[#allocation12 + $0xa70] sm:$0xf0]  ;;  %v9630_v8 = vld [vmem:[#allocation12 + $0x174] sm:$0xf0] }
 0x188   :  { %v9713_v23 = vld [vmem:[#allocation12 + $0x414] sm:$0xf]  ;;  %v7974_v33 = vor.u32 %v9913_v18, %v7971_v19  ;;  %2944 = vmatpush.bf16.msra.mxu2 %v7718_v29  ;;  %v7081_v18 = vld [vmem:[#allocation12 + $0x358] sm:$0xf]  ;;  %v7626_v19 = vor.u32 %v9830_v46, %v7625_v7 }
 0x189   :  { %v7171_v25 = vld [vmem:[#allocation12 + $0x430] sm:$0xf0]  ;;  %v7593_v29 = vld [vmem:[#allocation12 + $0x758] sm:$0xf] }
 0x18a   :  { %v9777_v30 = vld [vmem:[#allocation12 + $0x614] sm:$0xf]  ;;  %v7174_v43 = vor.u32 %v9713_v23, %v7171_v25  ;;  %2957 = vmatpush.bf16.msra.mxu3 %v7974_v33  ;;  %v7337_v23 = vld [vmem:[#allocation12 + $0x558] sm:$0xf]  ;;  %v3284_v33 = vsub.f32 1.5, %v3283_v27  ;;  %v2715_v27 = vpop.f32.mrf.mxu0 }
 0x18b   :  { %v7427_v32 = vld [vmem:[#allocation12 + $0x630] sm:$0xf0]  ;;  %v9758_v25 = vld [vmem:[#allocation12 + $0x574] sm:$0xf0] }
 0x18c   :  { %v9841_v40 = vld [vmem:[#allocation12 + $0x814] sm:$0xf]  ;;  %v7430_v51 = vor.u32 %v9777_v30, %v7427_v32  ;;  %2919 = vmatpush.bf16.msra.mxu0 %v7174_v43  ;;  %v9822_v30 = vld [vmem:[#allocation12 + $0x774] sm:$0xf0]  ;;  %v6826_v32 = vor.u32 %v9630_v8, %v6825_v17  ;;  %v3275_v43 = vmul.f32 %v10780_v11, %v3274_v26  ;;  %v3285_v44 = vmul.f32 %v10789_v63, %v3284_v33  ;;  %v2752_v26 = vpop.f32.mrf.mxu3 }
 0x18d   :  { %v7683_v34 = vld [vmem:[#allocation12 + $0x830] sm:$0xf0]  ;;  %v7594_v37 = vor.u32 %v9822_v30, %v7593_v29  ;;  %v7561_v48 = vld [vmem:[#allocation12 + $0x718] sm:$0xf] }
 0x18e   :  { %v9905_v35 = vld [vmem:[#allocation12 + $0xa14] sm:$0xf]  ;;  %v7686_v52 = vor.u32 %v9841_v40, %v7683_v34  ;;  %2932 = vmatpush.bf16.msra.mxu1 %v7430_v51  ;;  %v6793_v40 = vld [vmem:[#allocation12 + $0x118] sm:$0xf]  ;;  %v7082_v34 = vor.u32 %v9694_v22, %v7081_v18  ;;  %v3289_v20 = vsel %vm10805_vm4, %v10789_v63, %v3285_v44  ;;  %v3279_v2 = vsel %vm3278_vm7, %v10780_v11, %v3275_v43  ;;  %v2739_v22 = vpop.f32.mrf.mxu2 }
 0x18f   :  { %v7939_v36 = vld [vmem:[#allocation12 + $0xa30] sm:$0xf0]  ;;  %2920 = vmatmul.bf16.vlgmr.msra.gmra.mxu0 %v10699_v28  ;;  %v9814_v49 = vld [vmem:[#allocation12 + $0x734] sm:$0xf0]  ;;  %vm3371_vm7 = vcmask 1044484  }
 0x190   :  { %v7942_v55 = vor.u32 %v9905_v35, %v7939_v36  ;;  %2945 = vmatpush.bf16.msra.mxu2 %v7686_v52  ;;  %2964 = vmatpush.bf16.msrb.mxu0 %v6890_v57  ;;  %v7338_v35 = vor.u32 %v9758_v25, %v7337_v23  ;;  %v9622_v36 = vld [vmem:[#allocation12 + $0x134] sm:$0xf0]  ;;  %v2714_v52 = vadd.f32 %v2713_v47, %v10778_v10  ;;  %v3358_v10 = vrot.slane %v3289_v20, 7 }
 0x191   :  { %2933 = vmatmul.bf16.vlgmr.msra.gmra.mxu1 %v10701_v31  ;;  %v6794_v53 = vor.u32 %v9622_v36, %v6793_v40  ;;  %v7050_v57 = vor.u32 %v9686_v38, %v7049_v56  ;;  %v7017_v59 = vld [vmem:[#allocation12 + $0x2d8] sm:$0xf]  ;;  %v7562_v61 = vor.u32 %v9814_v49, %v7561_v48  ;;  %v2728_v40 = vpop.f32.mrf.mxu1 }
 0x192   :  { %2958 = vmatpush.bf16.msra.mxu3 %v7942_v55  ;;  %2977 = vmatpush.bf16.msrb.mxu1 %v7146_v58  ;;  %v6761_v55 = vld [vmem:[#allocation12 + $0xd8] sm:$0xf]  ;;  %v7306_v58 = vor.u32 %v9750_v42, %v7305_v39  ;;  %v10820_v5 = vsel %vm3365_vm5, %v3279_v2, %v3358_v10  ;;  %v6859_v40 = vld [vmem:[#allocation12 + $0x1b8] sm:$0xf0] }
 0x193   :  { %2946 = vmatmul.bf16.vlgmr.msra.gmra.mxu2 %v10705_v41  ;;  %v9678_v60 = vld [vmem:[#allocation12 + $0x2f4] sm:$0xf0] }
 0x194   :  { %2990 = vmatpush.bf16.msrb.mxu2 %v7402_v12  ;;  %2965 = vmatpush.bf16.msrb.mxu0 %v6858_v9  ;;  %v9614_v12 = vld [vmem:[#allocation12 + $0xf4] sm:$0xf0]  ;;  %v7018_v46 = vor.u32 %v9678_v60, %v7017_v59 }
 0x195   :  { %2959 = vmatmul.bf16.vlgmr.msra.gmra.mxu3 %v10707_v45  ;;  %v9742_v1 = vld [vmem:[#allocation12 + $0x4f4] sm:$0xf0]  ;;  %v6762_v7 = vor.u32 %v9614_v12, %v6761_v55 }
 0x196   :  { %3003 = vmatpush.bf16.msrb.mxu3 %v7658_v0  ;;  %2978 = vmatpush.bf16.msrb.mxu1 %v7114_v14  ;;  %v10816_v0 = vadd.f32 %v2726_v54, %v2714_v52  ;;  %v7529_v63 = vld [vmem:[#allocation12 + $0x6d8] sm:$0xf]  ;;  %v7274_v9 = vor.u32 %v9742_v1, %v7273_v24 }
 0x197   :  { %v9806_v4 = vld [vmem:[#allocation12 + $0x6f4] sm:$0xf0] }
 0x198   :  { %2991 = vmatpush.bf16.msrb.mxu2 %v7370_v16  ;;  %2966 = vmatpush.bf16.msrb.mxu0 %v6826_v32  ;;  %v3139_v6 = vrot.slane %v10816_v0, 4  ;;  %v6729_v13 = vld [vmem:[#allocation12 + $0x98] sm:$0xf]  ;;  %v7530_v11 = vor.u32 %v9806_v4, %v7529_v63  ;;  %v10824_v32 = vadd.f32 %v2752_v26, %v2739_v22  ;;  %v2754_v63 = vpop.f32.mrf.mxu3 }
 0x199   :  { %v9606_v14 = vld [vmem:[#allocation12 + $0xb4] sm:$0xf0] }
 0x19a   :  { %3004 = vmatpush.bf16.msrb.mxu3 %v7626_v19  ;;  %2979 = vmatpush.bf16.msrb.mxu1 %v7082_v34  ;;  %v6985_v16 = vld [vmem:[#allocation12 + $0x298] sm:$0xf]  ;;  %v3140_v17 = vadd.f32 %v3139_v6, %v10816_v0  ;;  %v6730_v30 = vor.u32 %v9606_v14, %v6729_v13 }
 0x19b   :  { %v9670_v8 = vld [vmem:[#allocation12 + $0x2b4] sm:$0xf0] }
 0x19c   :  { %2992 = vmatpush.bf16.msrb.mxu2 %v7338_v35  ;;  %2967 = vmatpush.bf16.msrb.mxu0 %v6794_v53  ;;  %v7241_v18 = vld [vmem:[#allocation12 + $0x498] sm:$0xf]  ;;  %v3141_v29 = vrot.slane %v3140_v17, 2  ;;  %v6986_v33 = vor.u32 %v9670_v8, %v6985_v16  ;;  %v9706_v16 = vld [vmem:[#allocation12 + $0x3dc] sm:$0xf] }
 0x19d   :  { %v9734_v19 = vld [vmem:[#allocation12 + $0x4b4] sm:$0xf0] }
 0x19e   :  { %3005 = vmatpush.bf16.msrb.mxu3 %v7594_v37  ;;  %2980 = vmatpush.bf16.msrb.mxu1 %v7050_v57  ;;  %v7497_v23 = vld [vmem:[#allocation12 + $0x698] sm:$0xf]  ;;  %v7242_v34 = vor.u32 %v9734_v19, %v7241_v18  ;;  %v3142_v37 = vadd.f32 %v3141_v29, %v3140_v17  ;;  %v7147_v17 = vld [vmem:[#allocation12 + $0x3f8] sm:$0xf0] }
 0x19f   :  { %v9798_v25 = vld [vmem:[#allocation12 + $0x6b4] sm:$0xf0]  ;;  %v7150_v27 = vor.u32 %v9706_v16, %v7147_v17  ;;  %v9610_v17 = vld [vmem:[#allocation12 + $0xdc] sm:$0xf] }
 0x1a0   :  { %2993 = vmatpush.bf16.msrb.mxu2 %v7306_v58  ;;  %2968 = vmatpush.bf16.msrb.mxu0 %v6762_v7  ;;  %v6697_v35 = vld [vmem:[#allocation12 + $0x58] sm:$0xf]  ;;  %v7498_v38 = vor.u32 %v9798_v25, %v7497_v23  ;;  %v3143_v48 = vrot.slane %v3142_v37, 1 }
 0x1a1   :  { %v9598_v36 = vld [vmem:[#allocation12 + $0x74] sm:$0xf0] }
 0x1a2   :  { %3006 = vmatpush.bf16.msrb.mxu3 %v7562_v61  ;;  %2981 = vmatpush.bf16.msrb.mxu1 %v7018_v46  ;;  %v6953_v56 = vld [vmem:[#allocation12 + $0x258] sm:$0xf]  ;;  %v6698_v49 = vor.u32 %v9598_v36, %v6697_v35  ;;  %v3144_v58 = vadd.f32 %v3143_v48, %v3142_v37  ;;  %v2741_v61 = vpop.f32.mrf.mxu2  ;;  %v9642_v46 = vld [vmem:[#allocation12 + $0x1dc] sm:$0xf] }
 0x1a3   :  { %v9662_v39 = vld [vmem:[#allocation12 + $0x274] sm:$0xf0]  ;;  %v9690_v48 = vld [vmem:[#allocation12 + $0x35c] sm:$0xf] }
 0x1a4   :  { %2994 = vmatpush.bf16.msrb.mxu2 %v7274_v9  ;;  %v7209_v42 = vld [vmem:[#allocation12 + $0x458] sm:$0xf]  ;;  %2969 = vmatpush.bf16.msrb.mxu0 %v6730_v30  ;;  %v6954_v53 = vor.u32 %v9662_v39, %v6953_v56  ;;  %v3184_v4 = vmul.f32 %v10747_v21, %v3144_v58  ;;  %v6891_v9 = vld [vmem:[#allocation12 + $0x1f8] sm:$0xf0] }
 0x1a5   :  { %v9726_v43 = vld [vmem:[#allocation12 + $0x474] sm:$0xf0]  ;;  %v6894_v19 = vor.u32 %v9642_v46, %v6891_v9  ;;  %v9634_v30 = vld [vmem:[#allocation12 + $0x19c] sm:$0xf] }
 0x1a6   :  { %3007 = vmatpush.bf16.msrb.mxu3 %v7530_v11  ;;  %v7465_v44 = vld [vmem:[#allocation12 + $0x658] sm:$0xf]  ;;  %2982 = vmatpush.bf16.msrb.mxu1 %v6986_v33  ;;  %v7210_v54 = vor.u32 %v9726_v43, %v7209_v42  ;;  %v10828_v26 = vsub.f32 %v10816_v0, %v3184_v4  ;;  %v9698_v33 = vld [vmem:[#allocation12 + $0x39c] sm:$0xf]  ;;  %v6862_v56 = vor.u32 %v9634_v30, %v6859_v40 }
 0x1a7   :  { %v9790_v47 = vld [vmem:[#allocation12 + $0x674] sm:$0xf0]  ;;  %v7051_v61 = vld [vmem:[#allocation12 + $0x338] sm:$0xf0] }
 0x1a8   :  { %v6665_v51 = vld [vmem:[#allocation12 + $0x18] sm:$0xf]  ;;  %2995 = vmatpush.bf16.msrb.mxu2 %v7242_v34  ;;  %v7466_v12 = vor.u32 %v9790_v47, %v7465_v44  ;;  %2970 = vmatpush.bf16.msrb.mxu0 %v6698_v49  ;;  %v7115_v34 = vld [vmem:[#allocation12 + $0x3b8] sm:$0xf0]  ;;  %v3200_v39 = vmul.f32 %v10828_v26, %v10828_v26 }
 0x1a9   :  { %v9590_v52 = vld [vmem:[#allocation12 + $0x34] sm:$0xf0]  ;;  %v7118_v42 = vor.u32 %v9698_v33, %v7115_v34  ;;  %v9626_v44 = vld [vmem:[#allocation12 + $0x15c] sm:$0xf] }
 0x1aa   :  { %v6921_v55 = vld [vmem:[#allocation12 + $0x218] sm:$0xf]  ;;  %3008 = vmatpush.bf16.msrb.mxu3 %v7498_v38  ;;  %v6666_v6 = vor.u32 %v9590_v52, %v6665_v51  ;;  %2983 = vmatpush.bf16.msrb.mxu1 %v6954_v53  ;;  %v6827_v47 = vld [vmem:[#allocation12 + $0x178] sm:$0xf0]  ;;  %v3218_v58 = vrot.slane %v3200_v39, 4 }
 0x1ab   :  { %v9654_v20 = vld [vmem:[#allocation12 + $0x234] sm:$0xf0]  ;;  %v7083_v49 = vld [vmem:[#allocation12 + $0x378] sm:$0xf0] }
 0x1ac   :  { %v7177_v57 = vld [vmem:[#allocation12 + $0x418] sm:$0xf]  ;;  %2996 = vmatpush.bf16.msrb.mxu2 %v7210_v54  ;;  %v6922_v13 = vor.u32 %v9654_v20, %v6921_v55  ;;  %2971 = vmatpush.bf16.msrb.mxu0 %v6666_v6  ;;  %v6830_v54 = vor.u32 %v9626_v44, %v6827_v47  ;;  %v2778_v6 = vpop.f32.mrf.mxu1 }
 0x1ad   :  { %v9718_v59 = vld [vmem:[#allocation12 + $0x434] sm:$0xf0] }
 0x1ae   :  { %v7433_v60 = vld [vmem:[#allocation12 + $0x618] sm:$0xf]  ;;  %v7178_v14 = vor.u32 %v9718_v59, %v7177_v57  ;;  %3009 = vmatpush.bf16.msrb.mxu3 %v7466_v12  ;;  %2984 = vmatpush.bf16.msrb.mxu1 %v6922_v13  ;;  %v7086_v12 = vor.u32 %v9690_v48, %v7083_v49  ;;  %v9618_v59 = vld [vmem:[#allocation12 + $0x11c] sm:$0xf]  ;;  %v3219_v13 = vadd.f32 %v3218_v58, %v3200_v39 }
 0x1af   :  { %v9782_v10 = vld [vmem:[#allocation12 + $0x634] sm:$0xf0]  ;;  %2972 = vmatmul.bf16.vlgmr.msrb.gmra.mxu0 %v10693_v3  ;;  %v6699_v58 = vld [vmem:[#allocation12 + $0x78] sm:$0xf0] }
 0x1b0   :  { %v7913_v24 = vld [vmem:[#allocation12 + $0x9d8] sm:$0xf]  ;;  %v7434_v11 = vor.u32 %v9782_v10, %v7433_v60  ;;  %2997 = vmatpush.bf16.msrb.mxu2 %v7178_v14  ;;  %v6795_v60 = vld [vmem:[#allocation12 + $0x138] sm:$0xf0]  ;;  %v3220_v33 = vrot.slane %v3219_v13, 2 }
 0x1b1   :  { %v9902_v1 = vld [vmem:[#allocation12 + $0x9f4] sm:$0xf0]  ;;  %2985 = vmatmul.bf16.vlgmr.msrb.gmra.mxu1 %v10696_v15  ;;  %v9682_v10 = vld [vmem:[#allocation12 + $0x31c] sm:$0xf]  ;;  %v6798_v63 = vor.u32 %v9618_v59, %v6795_v60 }
 0x1b2   :  { %v8169_v2 = vld [vmem:[#allocation12 + $0xbd8] sm:$0xf]  ;;  %v7914_v8 = vor.u32 %v9902_v1, %v7913_v24  ;;  %3010 = vmatpush.bf16.msrb.mxu3 %v7434_v11  ;;  %v2765_v1 = vpop.f32.mrf.mxu0  ;;  %v7054_v14 = vor.u32 %v9682_v10, %v7051_v61  ;;  %v6763_v11 = vld [vmem:[#allocation12 + $0xf8] sm:$0xf0] }
 0x1b3   :  { %v9966_v7 = vld [vmem:[#allocation12 + $0xbf4] sm:$0xf0]  ;;  %2998 = vmatmul.bf16.vlgmr.msrb.gmra.mxu2 %v10699_v28  ;;  %v2766_v4 = vadd.f32 %v2765_v1, %v10824_v32  ;;  %v6766_v32 = vor.u32 %v9610_v17, %v6763_v11  ;;  %v6955_v59 = vld [vmem:[#allocation12 + $0x278] sm:$0xf0] }
 0x1b4   :  { %v8170_v18 = vor.u32 %v9966_v7, %v8169_v2  ;;  %v7881_v22 = vld [vmem:[#allocation12 + $0x998] sm:$0xf]  ;;  %3016 = vmatpush.bf16.msra.mxu0 %v7914_v8  ;;  %3042 = vmatpush.bf16.msra.mxu2 %v6894_v19  ;;  %v7019_v19 = vld [vmem:[#allocation12 + $0x2f8] sm:$0xf0] }
 0x1b5   :  { %v9894_v23 = vld [vmem:[#allocation12 + $0x9b4] sm:$0xf0]  ;;  %3011 = vmatmul.bf16.vlgmr.msrb.gmra.mxu3 %v10701_v31  ;;  %v2779_v8 = vadd.f32 %v2778_v6, %v2766_v4  ;;  %v9586_v6 = vld [vmem:[#allocation12 + $0x1c] sm:$0xf] }
 0x1b6   :  { %v8137_v25 = vld [vmem:[#allocation12 + $0xb98] sm:$0xf]  ;;  %v7882_v35 = vor.u32 %v9894_v23, %v7881_v22  ;;  %3029 = vmatpush.bf16.msra.mxu1 %v8170_v18  ;;  %3055 = vmatpush.bf16.msra.mxu3 %v7150_v27  ;;  %v9674_v18 = vld [vmem:[#allocation12 + $0x2dc] sm:$0xf]  ;;  %v2791_v27 = vpop.f32.mrf.mxu2 }
 0x1b7   :  { %v9958_v29 = vld [vmem:[#allocation12 + $0xbb4] sm:$0xf0]  ;;  %v7022_v34 = vor.u32 %v9674_v18, %v7019_v19  ;;  %v6923_v17 = vld [vmem:[#allocation12 + $0x238] sm:$0xf0] }
 0x1b8   :  { %v8138_v36 = vor.u32 %v9958_v29, %v8137_v25  ;;  %v7849_v37 = vld [vmem:[#allocation12 + $0x958] sm:$0xf]  ;;  %3017 = vmatpush.bf16.msra.mxu0 %v7882_v35  ;;  %3043 = vmatpush.bf16.msra.mxu2 %v6862_v56  ;;  %v2792_v35 = vadd.f32 %v2791_v27, %v2779_v8  ;;  %v9602_v56 = vld [vmem:[#allocation12 + $0x9c] sm:$0xf] }
 0x1b9   :  { %v9886_v38 = vld [vmem:[#allocation12 + $0x974] sm:$0xf0]  ;;  %v9770_v8 = vld [vmem:[#allocation12 + $0x5dc] sm:$0xf] }
 0x1ba   :  { %v8105_v0 = vld [vmem:[#allocation12 + $0xb58] sm:$0xf]  ;;  %v7850_v51 = vor.u32 %v9886_v38, %v7849_v37  ;;  %3030 = vmatpush.bf16.msra.mxu1 %v8138_v36  ;;  %3056 = vmatpush.bf16.msra.mxu3 %v7118_v42  ;;  %v2804_v36 = vpop.f32.mrf.mxu3  ;;  %v6731_v37 = vld [vmem:[#allocation12 + $0xb8] sm:$0xf0]  ;;  %v2767_v44 = vpop.f32.mrf.mxu0 }
 0x1bb   :  { %v9950_v43 = vld [vmem:[#allocation12 + $0xb74] sm:$0xf0]  ;;  %v9666_v38 = vld [vmem:[#allocation12 + $0x29c] sm:$0xf]  ;;  %v10837_v39 = vadd.f32 %v2804_v36, %v2792_v35  ;;  %v6734_v48 = vor.u32 %v9602_v56, %v6731_v37 }
 0x1bc   :  { %v7817_v52 = vld [vmem:[#allocation12 + $0x918] sm:$0xf]  ;;  %v8106_v53 = vor.u32 %v9950_v43, %v8105_v0  ;;  %3018 = vmatpush.bf16.msra.mxu0 %v7850_v51  ;;  %3044 = vmatpush.bf16.msra.mxu2 %v6830_v54  ;;  %v6987_v0 = vld [vmem:[#allocation12 + $0x2b8] sm:$0xf0]  ;;  %v3221_v54 = vadd.f32 %v3220_v33, %v3219_v13 }
 0x1bd   :  { %v9878_v55 = vld [vmem:[#allocation12 + $0x934] sm:$0xf0]  ;;  %v7403_v18 = vld [vmem:[#allocation12 + $0x5f8] sm:$0xf0] }
 0x1be   :  { %v8073_v20 = vld [vmem:[#allocation12 + $0xb18] sm:$0xf]  ;;  %v7818_v24 = vor.u32 %v9878_v55, %v7817_v52  ;;  %3031 = vmatpush.bf16.msra.mxu1 %v8106_v53  ;;  %3057 = vmatpush.bf16.msra.mxu3 %v7086_v12  ;;  %v2780_v53 = vpop.f32.mrf.mxu1  ;;  %v3145_v55 = vrot.slane %v10837_v39, 4  ;;  %v9658_v12 = vld [vmem:[#allocation12 + $0x25c] sm:$0xf]  ;;  %v7406_v56 = vor.u32 %v9770_v8, %v7403_v18 }
 0x1bf   :  { %v9942_v57 = vld [vmem:[#allocation12 + $0xb34] sm:$0xf0]  ;;  %v9834_v19 = vld [vmem:[#allocation12 + $0x7dc] sm:$0xf] }
 0x1c0   :  { %v8074_v2 = vor.u32 %v9942_v57, %v8073_v20  ;;  %v7785_v7 = vld [vmem:[#allocation12 + $0x8d8] sm:$0xf]  ;;  %3019 = vmatpush.bf16.msra.mxu0 %v7818_v24  ;;  %3045 = vmatpush.bf16.msra.mxu2 %v6798_v63  ;;  %v6990_v20 = vor.u32 %v9666_v38, %v6987_v0  ;;  %v9594_v57 = vld [vmem:[#allocation12 + $0x5c] sm:$0xf]  ;;  %v3146_v60 = vadd.f32 %v3145_v55, %v10837_v39 }
 0x1c1   :  { %v9870_v46 = vld [vmem:[#allocation12 + $0x8f4] sm:$0xf0]  ;;  %v6702_v63 = vor.u32 %v9594_v57, %v6699_v58  ;;  %v7915_v27 = vld [vmem:[#allocation12 + $0x9f8] sm:$0xf0] }
 0x1c2   :  { %v8041_v9 = vld [vmem:[#allocation12 + $0xad8] sm:$0xf]  ;;  %v7786_v22 = vor.u32 %v9870_v46, %v7785_v7  ;;  %3032 = vmatpush.bf16.msra.mxu1 %v8074_v2  ;;  %3058 = vmatpush.bf16.msra.mxu3 %v7054_v14  ;;  %v6667_v7 = vld [vmem:[#allocation12 + $0x38] sm:$0xf0]  ;;  %v2793_v46 = vpop.f32.mrf.mxu2  ;;  %v3147_v13 = vrot.slane %v3146_v60, 2  ;;  %v6958_v14 = vor.u32 %v9658_v12, %v6955_v59  ;;  %v2806_v11 = vpop.f32.mrf.mxu3 }
 0x1c3   :  { %v9934_v16 = vld [vmem:[#allocation12 + $0xaf4] sm:$0xf0]  ;;  %v8171_v33 = vld [vmem:[#allocation12 + $0xbf8] sm:$0xf0] }
 0x1c4   :  { %v7753_v23 = vld [vmem:[#allocation12 + $0x898] sm:$0xf]  ;;  %v8042_v25 = vor.u32 %v9934_v16, %v8041_v9  ;;  %3020 = vmatpush.bf16.msra.mxu0 %v7786_v22  ;;  %3046 = vmatpush.bf16.msra.mxu2 %v6766_v32  ;;  %v3222_v9 = vrot.slane %v3221_v54, 1  ;;  %v9650_v16 = vld [vmem:[#allocation12 + $0x21c] sm:$0xf]  ;;  %v3148_v22 = vadd.f32 %v3147_v13, %v3146_v60 }
 0x1c5   :  { %v9862_v29 = vld [vmem:[#allocation12 + $0x8b4] sm:$0xf0]  ;;  %v9898_v32 = vld [vmem:[#allocation12 + $0x9dc] sm:$0xf]  ;;  %v6926_v36 = vor.u32 %v9650_v16, %v6923_v17 }
 0x1c6   :  { %v8009_v30 = vld [vmem:[#allocation12 + $0xa98] sm:$0xf]  ;;  %v7754_v42 = vor.u32 %v9862_v29, %v7753_v23  ;;  %3033 = vmatpush.bf16.msra.mxu1 %v8042_v25  ;;  %3059 = vmatpush.bf16.msra.mxu3 %v7022_v34  ;;  %v7659_v25 = vld [vmem:[#allocation12 + $0x7f8] sm:$0xf0]  ;;  %v3223_v34 = vadd.f32 %v3222_v9, %v3221_v54  ;;  %v3149_v35 = vrot.slane %v3148_v22, 1  ;;  %v7918_v38 = vor.u32 %v9898_v32, %v7915_v27  ;;  %v2830_v27 = vpop.f32.mrf.mxu1 }
 0x1c7   :  { %v9926_v40 = vld [vmem:[#allocation12 + $0xab4] sm:$0xf0]  ;;  %v7662_v37 = vor.u32 %v9834_v19, %v7659_v25  ;;  %v9762_v0 = vld [vmem:[#allocation12 + $0x59c] sm:$0xf] }
 0x1c8   :  { %v7721_v43 = vld [vmem:[#allocation12 + $0x858] sm:$0xf]  ;;  %v8010_v47 = vor.u32 %v9926_v40, %v8009_v30  ;;  %3021 = vmatpush.bf16.msra.mxu0 %v7754_v42  ;;  %3047 = vmatpush.bf16.msra.mxu2 %v6734_v48  ;;  %v6670_v30 = vor.u32 %v9586_v6, %v6667_v7  ;;  %v9962_v40 = vld [vmem:[#allocation12 + $0xbdc] sm:$0xf]  ;;  %v3150_v44 = vadd.f32 %v3149_v35, %v3148_v22 }
 0x1c9   :  { %v9854_v49 = vld [vmem:[#allocation12 + $0x874] sm:$0xf0]  ;;  %v7371_v42 = vld [vmem:[#allocation12 + $0x5b8] sm:$0xf0]  ;;  %v3256_v54 = vmul.f32 %v3223_v34, %v10747_v21 }
 0x1ca   :  { %v7977_v51 = vld [vmem:[#allocation12 + $0xa58] sm:$0xf]  ;;  %v7722_v10 = vor.u32 %v9854_v49, %v7721_v43  ;;  %3034 = vmatpush.bf16.msra.mxu1 %v8010_v47  ;;  %3060 = vmatpush.bf16.msra.mxu3 %v6990_v20  ;;  %v9826_v43 = vld [vmem:[#allocation12 + $0x79c] sm:$0xf]  ;;  %v8174_v47 = vor.u32 %v9962_v40, %v8171_v33  ;;  %v3185_v55 = vmul.f32 %v10747_v21, %v3150_v44 }
 0x1cb   :  { %v9918_v52 = vld [vmem:[#allocation12 + $0xa74] sm:$0xf0]  ;;  %v7627_v48 = vld [vmem:[#allocation12 + $0x7b8] sm:$0xf0]  ;;  %v7374_v20 = vor.u32 %v9762_v0, %v7371_v42  ;;  %v10849_v6 = vadd.f32 1e-05, %v3256_v54 }
 0x1cc   :  { %v7689_v61 = vld [vmem:[#allocation12 + $0x818] sm:$0xf]  ;;  %v7978_v2 = vor.u32 %v9918_v52, %v7977_v51  ;;  %3022 = vmatpush.bf16.msra.mxu0 %v7722_v10  ;;  %3048 = vmatpush.bf16.msra.mxu2 %v6702_v63  ;;  %v9890_v49 = vld [vmem:[#allocation12 + $0x99c] sm:$0xf]  ;;  %v7630_v57 = vor.u32 %v9826_v43, %v7627_v48  ;;  %v10844_v10 = vsub.f32 %v10837_v39, %v3185_v55 }
 0x1cd   :  { %v9846_v24 = vld [vmem:[#allocation12 + $0x834] sm:$0xf0]  ;;  %v7883_v51 = vld [vmem:[#allocation12 + $0x9b8] sm:$0xf0]  ;;  %10336 = vrsqrt.f32 %v10849_v6  ;;  %vm3296_vm9 = vweird.f32 %v10849_v6 }
 0x1ce   :  { %v7945_v1 = vld [vmem:[#allocation12 + $0xa18] sm:$0xf]  ;;  %v7690_v23 = vor.u32 %v9846_v24, %v7689_v61  ;;  %3035 = vmatpush.bf16.msra.mxu1 %v7978_v2  ;;  %3061 = vmatpush.bf16.msra.mxu3 %v6958_v14  ;;  %v9954_v52 = vld [vmem:[#allocation12 + $0xb9c] sm:$0xf]  ;;  %v7886_v58 = vor.u32 %v9890_v49, %v7883_v51  ;;  %v3201_v7 = vmul.f32 %v10844_v10, %v10844_v10 }
 0x1cf   :  { %v9910_v4 = vld [vmem:[#allocation12 + $0xa34] sm:$0xf0]  ;;  %v8139_v53 = vld [vmem:[#allocation12 + $0xbb8] sm:$0xf0] }
 0x1d0   :  { %v7946_v29 = vor.u32 %v9910_v4, %v7945_v1  ;;  %3023 = vmatpush.bf16.msra.mxu0 %v7690_v23  ;;  %3049 = vmatpush.bf16.msra.mxu2 %v6670_v30  ;;  %v9754_v12 = vld [vmem:[#allocation12 + $0x55c] sm:$0xf]  ;;  %v8142_v61 = vor.u32 %v9954_v52, %v8139_v53  ;;  %v2817_v23 = vpop.f32.mrf.mxu0 }
 0x1d1   :  { %v7339_v59 = vld [vmem:[#allocation12 + $0x578] sm:$0xf0]  ;;  %v2831_v35 = vadd.f32 %v2830_v27, %v2817_v23 }
 0x1d2   :  { %3036 = vmatpush.bf16.msra.mxu1 %v7946_v29  ;;  %3062 = vmatpush.bf16.msra.mxu3 %v6926_v36  ;;  %v9818_v60 = vld [vmem:[#allocation12 + $0x75c] sm:$0xf]  ;;  %v7342_v39 = vor.u32 %v9754_v12, %v7339_v59  ;;  %v2843_v12 = vpop.f32.mrf.mxu2 }
 0x1d3   :  { %3024 = vmatmul.bf16.vlgmr.msra.gmra.mxu0 %v10705_v41  ;;  %v7595_v24 = vld [vmem:[#allocation12 + $0x778] sm:$0xf0]  ;;  %3050 = vmatmul.bf16.vlgmr.msra.gmra.mxu2 %v10693_v3  ;;  %v3224_v3 = vrot.slane %v3201_v7, 4  ;;  %v10855_v54 = vpop.eup %10336 }
 0x1d4   :  { %3068 = vmatpush.bf16.msrb.mxu0 %v7406_v56  ;;  %3094 = vmatpush.bf16.msrb.mxu2 %v7918_v38  ;;  %v9882_v1 = vld [vmem:[#allocation12 + $0x95c] sm:$0xf]  ;;  %v7598_v9 = vor.u32 %v9818_v60, %v7595_v24  ;;  %v2844_v24 = vadd.f32 %v2843_v12, %v2831_v35  ;;  %vm3297_vm8 = vweird.f32 %v10855_v54 }
 0x1d5   :  { %v7851_v2 = vld [vmem:[#allocation12 + $0x978] sm:$0xf0]  ;;  %3037 = vmatmul.bf16.vlgmr.msra.gmra.mxu1 %v10707_v45  ;;  %3063 = vmatmul.bf16.vlgmr.msra.gmra.mxu3 %v10696_v15  ;;  %v3225_v25 = vadd.f32 %v3224_v3, %v3201_v7  ;;  %v2832_v7 = vpop.f32.mrf.mxu1  ;;  %vm3298_vm11 = vmor %vm3296_vm9, %vm3297_vm8 }
 0x1d6   :  { %3081 = vmatpush.bf16.msrb.mxu1 %v7662_v37  ;;  %3107 = vmatpush.bf16.msrb.mxu3 %v8174_v47  ;;  %v9946_v63 = vld [vmem:[#allocation12 + $0xb5c] sm:$0xf]  ;;  %v7854_v13 = vor.u32 %v9882_v1, %v7851_v2  ;;  %v2856_v1 = vpop.f32.mrf.mxu3 }
 0x1d7   :  { %v8107_v4 = vld [vmem:[#allocation12 + $0xb78] sm:$0xf0]  ;;  %v3226_v36 = vrot.slane %v3225_v25, 2 }
 0x1d8   :  { %3069 = vmatpush.bf16.msrb.mxu0 %v7374_v20  ;;  %v9746_v46 = vld [vmem:[#allocation12 + $0x51c] sm:$0xf]  ;;  %3095 = vmatpush.bf16.msrb.mxu2 %v7886_v58  ;;  %v8110_v11 = vor.u32 %v9946_v63, %v8107_v4 }
 0x1d9   :  { %v7307_v14 = vld [vmem:[#allocation12 + $0x538] sm:$0xf0]  ;;  %v3227_v43 = vadd.f32 %v3226_v36, %v3225_v25 }
 0x1da   :  { %3082 = vmatpush.bf16.msrb.mxu1 %v7630_v57  ;;  %v9810_v16 = vld [vmem:[#allocation12 + $0x71c] sm:$0xf]  ;;  %3108 = vmatpush.bf16.msrb.mxu3 %v8142_v61  ;;  %v7310_v15 = vor.u32 %v9746_v46, %v7307_v14  ;;  %v2819_v61 = vpop.f32.mrf.mxu0 }
 0x1db   :  { %v7563_v17 = vld [vmem:[#allocation12 + $0x738] sm:$0xf0]  ;;  %v3228_v55 = vrot.slane %v3227_v43, 1 }
 0x1dc   :  { %v9874_v8 = vld [vmem:[#allocation12 + $0x91c] sm:$0xf]  ;;  %3070 = vmatpush.bf16.msrb.mxu0 %v7342_v39  ;;  %3096 = vmatpush.bf16.msrb.mxu2 %v7854_v13  ;;  %v7566_v29 = vor.u32 %v9810_v16, %v7563_v17  ;;  %v3291_v39 = vmul.f32 %v10855_v54, %v10849_v6  ;;  %v10859_v16 = vadd.f32 %v2856_v1, %v2844_v24 }
 0x1dd   :  { %v7819_v18 = vld [vmem:[#allocation12 + $0x938] sm:$0xf0]  ;;  %v3229_v2 = vadd.f32 %v3228_v55, %v3227_v43 }
 0x1de   :  { %v9938_v19 = vld [vmem:[#allocation12 + $0xb1c] sm:$0xf]  ;;  %3083 = vmatpush.bf16.msrb.mxu1 %v7598_v9  ;;  %v7822_v30 = vor.u32 %v9874_v8, %v7819_v18  ;;  %3109 = vmatpush.bf16.msrb.mxu3 %v8110_v11 }
 0x1df   :  { %v8075_v22 = vld [vmem:[#allocation12 + $0xb38] sm:$0xf0]  ;;  %v3257_v17 = vmul.f32 %v3229_v2, %v10747_v21 }
 0x1e0   :  { %v9738_v32 = vld [vmem:[#allocation12 + $0x4dc] sm:$0xf]  ;;  %v8078_v56 = vor.u32 %v9938_v19, %v8075_v22  ;;  %3071 = vmatpush.bf16.msrb.mxu0 %v7310_v15  ;;  %3097 = vmatpush.bf16.msrb.mxu2 %v7822_v30  ;;  %v3292_v15 = vmul.f32 %v10855_v54, %v3291_v39 }
 0x1e1   :  { %v7275_v40 = vld [vmem:[#allocation12 + $0x4f8] sm:$0xf0]  ;;  %v3265_v23 = vadd.f32 1e-05, %v3257_v17 }
 0x1e2   :  { %v9802_v33 = vld [vmem:[#allocation12 + $0x6dc] sm:$0xf]  ;;  %v7278_v44 = vor.u32 %v9738_v32, %v7275_v40  ;;  %3084 = vmatpush.bf16.msrb.mxu1 %v7566_v29  ;;  %3110 = vmatpush.bf16.msrb.mxu3 %v8078_v56  ;;  %v2845_v56 = vpop.f32.mrf.mxu2  ;;  %v3293_v43 = vmul.f32 0.5, %v3292_v15 }
 0x1e3   :  { %v7531_v34 = vld [vmem:[#allocation12 + $0x6f8] sm:$0xf0]  ;;  %10338 = vrsqrt.f32 %v3265_v23  ;;  %vm3306_vm12 = vweird.f32 %v3265_v23 }
 0x1e4   :  { %v9866_v37 = vld [vmem:[#allocation12 + $0x8dc] sm:$0xf]  ;;  %v7534_v48 = vor.u32 %v9802_v33, %v7531_v34  ;;  %3072 = vmatpush.bf16.msrb.mxu0 %v7278_v44 }
 0x1e5   :  { %v7787_v38 = vld [vmem:[#allocation12 + $0x8f8] sm:$0xf0] }
 0x1e6   :  { %v9930_v0 = vld [vmem:[#allocation12 + $0xadc] sm:$0xf]  ;;  %v7790_v49 = vor.u32 %v9866_v37, %v7787_v38  ;;  %3085 = vmatpush.bf16.msrb.mxu1 %v7534_v48 }
 0x1e7   :  { %v8043_v42 = vld [vmem:[#allocation12 + $0xaf8] sm:$0xf0] }
 0x1e8   :  { %v9730_v47 = vld [vmem:[#allocation12 + $0x49c] sm:$0xf]  ;;  %v8046_v20 = vor.u32 %v9930_v0, %v8043_v42  ;;  %3098 = vmatpush.bf16.msrb.mxu2 %v7790_v49  ;;  %v2858_v0 = vpop.f32.mrf.mxu3 }
 0x1e9   :  { %v7243_v51 = vld [vmem:[#allocation12 + $0x4b8] sm:$0xf0]  ;;  %v10339_v49 = vpop.eup %10338 }
 0x1ea   :  { %v9794_v52 = vld [vmem:[#allocation12 + $0x69c] sm:$0xf]  ;;  %v7246_v63 = vor.u32 %v9730_v47, %v7243_v51  ;;  %3111 = vmatpush.bf16.msrb.mxu3 %v8046_v20  ;;  %v3294_v51 = vsub.f32 1.5, %v3293_v43  ;;  %vm3307_vm10 = vweird.f32 %v10339_v49  ;;  %v2895_v2 = vpop.f32.mrf.mxu2 }
 0x1eb   :  { %v7499_v53 = vld [vmem:[#allocation12 + $0x6b8] sm:$0xf0]  ;;  %vm3308_vm13 = vmor %vm3306_vm12, %vm3307_vm10 }
 0x1ec   :  { %v9858_v57 = vld [vmem:[#allocation12 + $0x89c] sm:$0xf]  ;;  %v7502_v4 = vor.u32 %v9794_v52, %v7499_v53  ;;  %3073 = vmatpush.bf16.msrb.mxu0 %v7246_v63  ;;  %v3301_v52 = vmul.f32 %v10339_v49, %v3265_v23  ;;  %v3295_v55 = vmul.f32 %v10855_v54, %v3294_v51 }
 0x1ed   :  { %v7755_v58 = vld [vmem:[#allocation12 + $0x8b8] sm:$0xf0] }
 0x1ee   :  { %v9922_v59 = vld [vmem:[#allocation12 + $0xa9c] sm:$0xf]  ;;  %v7758_v46 = vor.u32 %v9858_v57, %v7755_v58  ;;  %3086 = vmatpush.bf16.msrb.mxu1 %v7502_v4  ;;  %v3302_v53 = vmul.f32 %v10339_v49, %v3301_v52  ;;  %v3299_v58 = vsel %vm3298_vm11, %v10855_v54, %v3295_v55 }
 0x1ef   :  { %v8011_v60 = vld [vmem:[#allocation12 + $0xab8] sm:$0xf0] }
 0x1f0   :  { %v9722_v9 = vld [vmem:[#allocation12 + $0x45c] sm:$0xf]  ;;  %v8014_v3 = vor.u32 %v9922_v59, %v8011_v60  ;;  %3099 = vmatpush.bf16.msrb.mxu2 %v7758_v46  ;;  %v3303_v20 = vmul.f32 0.5, %v3302_v53  ;;  %v3359_v60 = vrot.slane %v3299_v58, 6  ;;  %v2908_v63 = vpop.f32.mrf.mxu3 }
 0x1f1   :  { %v7211_v13 = vld [vmem:[#allocation12 + $0x478] sm:$0xf0]  ;;  %v2909_v39 = vadd.f32 %v2908_v63, %v2895_v2 }
 0x1f2   :  { %v9786_v14 = vld [vmem:[#allocation12 + $0x65c] sm:$0xf]  ;;  %v7214_v25 = vor.u32 %v9722_v9, %v7211_v13  ;;  %3112 = vmatpush.bf16.msrb.mxu3 %v8014_v3  ;;  %v3304_v57 = vsub.f32 1.5, %v3303_v20 }
 0x1f3   :  { %v7467_v11 = vld [vmem:[#allocation12 + $0x678] sm:$0xf0] }
 0x1f4   :  { %v9850_v8 = vld [vmem:[#allocation12 + $0x85c] sm:$0xf]  ;;  %v7470_v32 = vor.u32 %v9786_v14, %v7467_v11  ;;  %3074 = vmatpush.bf16.msrb.mxu0 %v7214_v25  ;;  %v3305_v12 = vmul.f32 %v10339_v49, %v3304_v57 }
 0x1f5   :  { %v7723_v18 = vld [vmem:[#allocation12 + $0x878] sm:$0xf0] }
 0x1f6   :  { %v9914_v19 = vld [vmem:[#allocation12 + $0xa5c] sm:$0xf]  ;;  %v7726_v27 = vor.u32 %v9850_v8, %v7723_v18  ;;  %3087 = vmatpush.bf16.msrb.mxu1 %v7470_v32  ;;  %v3309_v59 = vsel %vm3308_vm13, %v10339_v49, %v3305_v12 }
 0x1f7   :  { %v7979_v22 = vld [vmem:[#allocation12 + $0xa78] sm:$0xf0]  ;;  %v3360_v61 = vrot.slane %v3309_v59, 5 }
 0x1f8   :  { %v9714_v29 = vld [vmem:[#allocation12 + $0x41c] sm:$0xf]  ;;  %v7982_v33 = vor.u32 %v9914_v19, %v7979_v22  ;;  %3100 = vmatpush.bf16.msrb.mxu2 %v7726_v27  ;;  %v2910_v17 = vpop.f32.mrf.mxu3 }
 0x1f9   :  { %v7179_v30 = vld [vmem:[#allocation12 + $0x438] sm:$0xf0]  ;;  %v3368_v6 = vsel %vm3367_vm14, %v3359_v60, %v3360_v61 }
 0x1fa   :  { %v9778_v40 = vld [vmem:[#allocation12 + $0x61c] sm:$0xf]  ;;  %v7182_v42 = vor.u32 %v9714_v29, %v7179_v30  ;;  %3113 = vmatpush.bf16.msrb.mxu3 %v7982_v33  ;;  %v10875_v1 = vsel %vm3369_vm15, %v10820_v5, %v3368_v6 }
 0x1fb   :  { %v7435_v34 = vld [vmem:[#allocation12 + $0x638] sm:$0xf0] }
 0x1fc   :  { %v9842_v35 = vld [vmem:[#allocation12 + $0x81c] sm:$0xf]  ;;  %v7438_v44 = vor.u32 %v9778_v40, %v7435_v34  ;;  %3075 = vmatpush.bf16.msrb.mxu0 %v7182_v42 }
 0x1fd   :  { %v7691_v36 = vld [vmem:[#allocation12 + $0x838] sm:$0xf0] }
 0x1fe   :  { %v9906_v37 = vld [vmem:[#allocation12 + $0xa1c] sm:$0xf]  ;;  %v7694_v47 = vor.u32 %v9842_v35, %v7691_v36  ;;  %3088 = vmatpush.bf16.msrb.mxu1 %v7438_v44 }
 0x1ff   :  { %v7947_v38 = vld [vmem:[#allocation12 + $0xa38] sm:$0xf0]  ;;  %3076 = vmatmul.bf16.vlgmr.msrb.gmra.mxu0 %v10699_v28  ;;  %v2869_v28 = vpop.f32.mrf.mxu0 }
 0x200   :  { %v7950_v48 = vor.u32 %v9906_v37, %v7947_v38  ;;  %3101 = vmatpush.bf16.msrb.mxu2 %v7694_v47 }
 0x201   :  { %3089 = vmatmul.bf16.vlgmr.msrb.gmra.mxu1 %v10701_v31  ;;  %v2870_v31 = vadd.f32 %v2869_v28, %v10859_v16  ;;  %v2897_v16 = vpop.f32.mrf.mxu2 }
 0x202   :  { %3114 = vmatpush.bf16.msrb.mxu3 %v7950_v48 }
 0x203   :  { %3102 = vmatmul.bf16.vlgmr.msrb.gmra.mxu2 %v10705_v41  ;;  %v2882_v41 = vpop.f32.mrf.mxu1 }
 0x205   :  { %3115 = vmatmul.bf16.vlgmr.msrb.gmra.mxu3 %v10707_v45  ;;  %v2883_v45 = vadd.f32 %v2882_v41, %v2870_v31 }
 0x207   :  { %v3151_v24 = vrot.slane %v2883_v45, 4  ;;  %v2871_v4 = vpop.f32.mrf.mxu0 }
 0x209   :  { %v3152_v54 = vadd.f32 %v3151_v24, %v2883_v45 }
 0x20b   :  { %v3153_v7 = vrot.slane %v3152_v54, 2  ;;  %v2884_v46 = vpop.f32.mrf.mxu1 }
 0x20d   :  { %v3154_v9 = vadd.f32 %v3153_v7, %v3152_v54 }
 0x20f   :  { %v3155_v13 = vrot.slane %v3154_v9, 1  ;;  %v2921_v18 = vpop.f32.mrf.mxu0 }
 0x210   :  { %v2922_v19 = vadd.f32 %v2921_v18, %v2909_v39 }
 0x211   :  { %v3156_v14 = vadd.f32 %v3155_v13, %v3154_v9 }
 0x213   :  { %v3186_v3 = vmul.f32 %v10747_v21, %v3156_v14  ;;  %v2934_v22 = vpop.f32.mrf.mxu1 }
 0x214   :  { %v2935_v25 = vadd.f32 %v2934_v22, %v2922_v19 }
 0x215   :  { %v10878_v11 = vsub.f32 %v2883_v45, %v3186_v3 }
 0x216   :  { %v2947_v15 = vpop.f32.mrf.mxu2 }
 0x217   :  { %v3202_v5 = vmul.f32 %v10878_v11, %v10878_v11  ;;  %v2948_v27 = vadd.f32 %v2947_v15, %v2935_v25  ;;  %v2923_v40 = vpop.f32.mrf.mxu0 }
 0x218   :  { %v2960_v29 = vpop.f32.mrf.mxu3 }
 0x219   :  { %v3230_v8 = vrot.slane %v3202_v5, 4  ;;  %v2961_v30 = vadd.f32 %v2960_v29, %v2948_v27 }
 0x21b   :  { %v3231_v23 = vadd.f32 %v3230_v8, %v3202_v5  ;;  %v2936_v33 = vpop.f32.mrf.mxu1  ;;  %v3157_v35 = vrot.slane %v2961_v30, 4 }
 0x21d   :  { %v3232_v32 = vrot.slane %v3231_v23, 2  ;;  %v3158_v36 = vadd.f32 %v3157_v35, %v2961_v30 }
 0x21e   :  { %v2949_v56 = vpop.f32.mrf.mxu2 }
 0x21f   :  { %v3233_v34 = vadd.f32 %v3232_v32, %v3231_v23  ;;  %v3159_v38 = vrot.slane %v3158_v36, 2 }
 0x220   :  { %v2962_v0 = vpop.f32.mrf.mxu3 }
 0x221   :  { %v3234_v37 = vrot.slane %v3233_v34, 1  ;;  %v3160_v42 = vadd.f32 %v3159_v38, %v3158_v36 }
 0x223   :  { %v3235_v43 = vadd.f32 %v3234_v37, %v3233_v34  ;;  %v3161_v44 = vrot.slane %v3160_v42, 1 }
 0x225   :  { %v3162_v47 = vadd.f32 %v3161_v44, %v3160_v42  ;;  %v3258_v48 = vmul.f32 %v3235_v43, %v10747_v21 }
 0x227   :  { %v3187_v49 = vmul.f32 %v10747_v21, %v3162_v47  ;;  %v3266_v52 = vadd.f32 1e-05, %v3258_v48 }
 0x229   :  { %v10884_v51 = vsub.f32 %v2961_v30, %v3187_v49  ;;  %10340 = vrsqrt.f32 %v3266_v52  ;;  %vm3316_vm1 = vweird.f32 %v3266_v52 }
 0x22b   :  { %v3203_v53 = vmul.f32 %v10884_v51, %v10884_v51 }
 0x22c   :  { %v2973_v20 = vpop.f32.mrf.mxu0 }
 0x22d   :  { %v3236_v55 = vrot.slane %v3203_v53, 4 }
 0x22e   :  { %v2986_v58 = vpop.f32.mrf.mxu1 }
 0x22f   :  { %v3237_v57 = vadd.f32 %v3236_v55, %v3203_v53  ;;  %v10341_v31 = vpop.eup %10340  ;;  %v2987_v46 = vadd.f32 %v2986_v58, %v2973_v20 }
 0x230   :  { %v3311_v24 = vmul.f32 %v10341_v31, %v3266_v52  ;;  %vm3317_vm0 = vweird.f32 %v10341_v31 }
 0x231   :  { %v3238_v12 = vrot.slane %v3237_v57, 2  ;;  %vm3318_vm3 = vmor %vm3316_vm1, %vm3317_vm0  ;;  %vm3373_vm0 = vcmask 1046534   ;;  %vm3375_vm1 = vcmask 1045508  }
 0x232   :  { %v3312_v63 = vmul.f32 %v10341_v31, %v3311_v24 }
 0x233   :  { %v3239_v28 = vadd.f32 %v3238_v12, %v3237_v57 }
 0x234   :  { %v2975_v60 = vpop.f32.mrf.mxu0  ;;  %v3313_v39 = vmul.f32 0.5, %v3312_v63 }
 0x235   :  { %v3240_v41 = vrot.slane %v3239_v28, 1 }
 0x236   :  { %v2999_v59 = vpop.f32.mrf.mxu2  ;;  %v2988_v6 = vpop.f32.mrf.mxu1  ;;  %v3314_v13 = vsub.f32 1.5, %v3313_v39 }
 0x237   :  { %v3241_v45 = vadd.f32 %v3240_v41, %v3239_v28  ;;  %v3000_v16 = vadd.f32 %v2999_v59, %v2987_v46 }
 0x238   :  { %v3012_v61 = vpop.f32.mrf.mxu3  ;;  %v3315_v3 = vmul.f32 %v10341_v31, %v3314_v13 }
 0x239   :  { %v3259_v54 = vmul.f32 %v3241_v45, %v10747_v21  ;;  %v3013_v8 = vadd.f32 %v3012_v61, %v3000_v16 }
 0x23a   :  { %v3319_v19 = vsel %vm3318_vm3, %v10341_v31, %v3315_v3 }
 0x23b   :  { %v3267_v2 = vadd.f32 1e-05, %v3259_v54  ;;  %v3361_v27 = vrot.slane %v3319_v19, 4 }
 0x23d   :  { %10342 = vrsqrt.f32 %v3267_v2  ;;  %vm3326_vm4 = vweird.f32 %v3267_v2 }
 0x23e   :  { %v3001_v4 = vpop.f32.mrf.mxu2 }
 0x240   :  { %v3014_v7 = vpop.f32.mrf.mxu3 }
 0x243   :  { %v10343_v9 = vpop.eup %10342 }
 0x244   :  { %v3321_v14 = vmul.f32 %v10343_v9, %v3267_v2  ;;  %vm3327_vm2 = vweird.f32 %v10343_v9 }
 0x245   :  { %vm3328_vm6 = vmor %vm3326_vm4, %vm3327_vm2  ;;  %vm3377_vm2 = vcmask 1043456  }
 0x246   :  { %v3322_v17 = vmul.f32 %v10343_v9, %v3321_v14 }
 0x248   :  { %v3323_v5 = vmul.f32 0.5, %v3322_v17 }
 0x24a   :  { %v3324_v18 = vsub.f32 1.5, %v3323_v5 }
 0x24c   :  { %v3325_v22 = vmul.f32 %v10343_v9, %v3324_v18 }
 0x24e   :  { %v3329_v32 = vsel %vm3328_vm6, %v10343_v9, %v3325_v22 }
 0x24f   :  { %v3362_v29 = vrot.slane %v3329_v32, 3 }
 0x250   :  { %v3025_v23 = vpop.f32.mrf.mxu0 }
 0x251   :  { %v3026_v25 = vadd.f32 %v3025_v23, %v3013_v8  ;;  %v10892_v40 = vsel %vm3371_vm7, %v3361_v27, %v3362_v29 }
 0x252   :  { %v3038_v15 = vpop.f32.mrf.mxu1 }
 0x253   :  { %v3039_v30 = vadd.f32 %v3038_v15, %v3026_v25 }
 0x255   :  { %v3163_v33 = vrot.slane %v3039_v30, 4 }
 0x256   :  { %v3051_v35 = vpop.f32.mrf.mxu2 }
 0x257   :  { %v3164_v34 = vadd.f32 %v3163_v33, %v3039_v30 }
 0x258   :  { %v3064_v36 = vpop.f32.mrf.mxu3  ;;  %v3027_v56 = vpop.f32.mrf.mxu0 }
 0x259   :  { %v3165_v37 = vrot.slane %v3164_v34, 2  ;;  %v3065_v55 = vadd.f32 %v3064_v36, %v3051_v35 }
 0x25a   :  { %v3040_v38 = vpop.f32.mrf.mxu1 }
 0x25b   :  { %v3166_v0 = vadd.f32 %v3165_v37, %v3164_v34 }
 0x25d   :  { %v3167_v42 = vrot.slane %v3166_v0, 1 }
 0x25e   :  { %v3053_v44 = vpop.f32.mrf.mxu2 }
 0x25f   :  { %v3168_v43 = vadd.f32 %v3167_v42, %v3166_v0  ;;  %v3124_v44 = vld [vmem:[#allocation14 + $0x1] ss:$8 sm:$0xf] }
 0x260   :  { %v3066_v47 = vpop.f32.mrf.mxu3 }
 0x261   :  { %v3188_v48 = vmul.f32 %v10747_v21, %v3168_v43  ;;  %v3125_v47 = vld [vmem:[#allocation14 + $0x1] ss:$8 sm:$0xf0] }
 0x263   :  { %v10895_v49 = vsub.f32 %v3039_v30, %v3188_v48 }
 0x265   :  { %v3204_v52 = vmul.f32 %v10895_v49, %v10895_v49 }
 0x267   :  { %v3242_v53 = vrot.slane %v3204_v52, 4 }
 0x269   :  { %v3243_v12 = vadd.f32 %v3242_v53, %v3204_v52  ;;  %v3120_v52 = vld [vmem:[#allocation14] ss:$8 sm:$0xf] }
 0x26a   :  { %v3121_v53 = vld [vmem:[#allocation14] ss:$8 sm:$0xf0] }
 0x26b   :  { %v3244_v41 = vrot.slane %v3243_v12, 2 }
 0x26d   :  { %v3245_v24 = vadd.f32 %v3244_v41, %v3243_v12  ;;  %v3122_v12 = vor.u32 %v3121_v53, %v3120_v52 }
 0x26f   :  { %v3246_v4 = vrot.slane %v3245_v24, 1 }
 0x271   :  { %v3247_v9 = vadd.f32 %v3246_v4, %v3245_v24 }
 0x273   :  { %v3260_v16 = vmul.f32 %v3247_v9, %v10747_v21 }
 0x275   :  { %v3268_v5 = vadd.f32 1e-05, %v3260_v16 }
 0x277   :  { %10344 = vrsqrt.f32 %v3268_v5  ;;  %vm3336_vm9 = vweird.f32 %v3268_v5 }
 0x27c   :  { %v3077_v20 = vpop.f32.mrf.mxu0 }
 0x27d   :  { %v3078_v58 = vadd.f32 %v3077_v20, %v3065_v55  ;;  %v10345_v25 = vpop.eup %10344 }
 0x27e   :  { %v3090_v57 = vpop.f32.mrf.mxu1  ;;  %v3331_v27 = vmul.f32 %v10345_v25, %v3268_v5  ;;  %vm3337_vm8 = vweird.f32 %v10345_v25 }
 0x27f   :  { %v3091_v28 = vadd.f32 %v3090_v57, %v3078_v58  ;;  %vm3338_vm11 = vmor %vm3336_vm9, %vm3337_vm8  ;;  %v3126_v57 = vor.u32 %v3125_v47, %v3124_v44 }
 0x280   :  { %v3332_v33 = vmul.f32 %v10345_v25, %v3331_v27 }
 0x281   :  { %v3411_v24 = vperm.slane %v3126_v57, 4 }
 0x282   :  { %v3333_v34 = vmul.f32 0.5, %v3332_v33 }
 0x284   :  { %v3079_v61 = vpop.f32.mrf.mxu0  ;;  %v3334_v36 = vsub.f32 1.5, %v3333_v34 }
 0x285   :  { %v3408_v61 = vperm.slane %v3126_v57, 1 }
 0x286   :  { %v3103_v31 = vpop.f32.mrf.mxu2  ;;  %v3092_v45 = vpop.f32.mrf.mxu1  ;;  %v3335_v38 = vmul.f32 %v10345_v25, %v3334_v36 }
 0x287   :  { %v3104_v59 = vadd.f32 %v3103_v31, %v3091_v28  ;;  %v3409_v45 = vperm.slane %v3126_v57, 2 }
 0x288   :  { %v3116_v60 = vpop.f32.mrf.mxu3  ;;  %v3339_v43 = vsel %vm3338_vm11, %v10345_v25, %v3335_v38 }
 0x289   :  { %v3117_v6 = vadd.f32 %v3116_v60, %v3104_v59  ;;  %v3363_v20 = vrot.slane %v3339_v43, 2  ;;  %v3407_v59 = vperm.slane %v3126_v57, 0 }
 0x28b   :  { %v3169_v54 = vrot.slane %v3117_v6, 4 }
 0x28d   :  { %v3170_v2 = vadd.f32 %v3169_v54, %v3117_v6  ;;  %v3412_v54 = vperm.slane %v3126_v57, 5 }
 0x28e   :  { %v3105_v63 = vpop.f32.mrf.mxu2 }
 0x28f   :  { %v3171_v7 = vrot.slane %v3170_v2, 2  ;;  %v3414_v63 = vperm.slane %v3126_v57, 7 }
 0x290   :  { %v3118_v39 = vpop.f32.mrf.mxu3 }
 0x291   :  { %v3172_v46 = vadd.f32 %v3171_v7, %v3170_v2  ;;  %v3413_v2 = vperm.slane %v3126_v57, 6 }
 0x293   :  { %v3173_v13 = vrot.slane %v3172_v46, 1 }
 0x295   :  { %v3174_v14 = vadd.f32 %v3173_v13, %v3172_v46 }
 0x297   :  { %v3189_v17 = vmul.f32 %v10747_v21, %v3174_v14 }
 0x299   :  { %v10901_v3 = vsub.f32 %v3117_v6, %v3189_v17  ;;  %v3410_v6 = vperm.slane %v3126_v57, 3 }
 0x29b   :  { %v3205_v8 = vmul.f32 %v10901_v3, %v10901_v3 }
 0x29d   :  { %v3248_v18 = vrot.slane %v3205_v8, 4 }
 0x29f   :  { %v3249_v19 = vadd.f32 %v3248_v18, %v3205_v8 }
 0x2a1   :  { %v3250_v22 = vrot.slane %v3249_v19, 2 }
 0x2a3   :  { %v3251_v23 = vadd.f32 %v3250_v22, %v3249_v19 }
 0x2a5   :  { %v3252_v15 = vrot.slane %v3251_v23, 1 }
 0x2a7   :  { %v3253_v32 = vadd.f32 %v3252_v15, %v3251_v23 }
 0x2a9   :  { %v3261_v29 = vmul.f32 %v3253_v32, %v10747_v21 }
 0x2ab   :  { %v3269_v30 = vadd.f32 1e-05, %v3261_v29 }
 0x2ad   :  { %10346 = vrsqrt.f32 %v3269_v30  ;;  %vm3346_vm12 = vweird.f32 %v3269_v30 }
 0x2b3   :  { %v10347_v35 = vpop.eup %10346 }
 0x2b4   :  { %v3341_v56 = vmul.f32 %v10347_v35, %v3269_v30  ;;  %vm3347_vm10 = vweird.f32 %v10347_v35 }
 0x2b5   :  { %vm3348_vm13 = vmor %vm3346_vm12, %vm3347_vm10 }
 0x2b6   :  { %v3342_v37 = vmul.f32 %v10347_v35, %v3341_v56 }
 0x2b8   :  { %v3343_v0 = vmul.f32 0.5, %v3342_v37 }
 0x2ba   :  { %v3344_v42 = vsub.f32 1.5, %v3343_v0 }
 0x2bc   :  { %v3345_v48 = vmul.f32 %v10347_v35, %v3344_v42 }
 0x2be   :  { %v3349_v55 = vsel %vm3348_vm13, %v10347_v35, %v3345_v48 }
 0x2bf   :  { %v3364_v58 = vrot.slane %v3349_v55, 1 }
 0x2c1   :  { %v3374_v28 = vsel %vm3373_vm0, %v3363_v20, %v3364_v58 }
 0x2c2   :  { %v3376_v31 = vsel %vm3375_vm1, %v10892_v40, %v3374_v28 }
 0x2c3   :  { %v3378_v41 = vsel %vm3377_vm2, %v10875_v1, %v3376_v31 }
 0x2c4   :  { %v3380_v60 = vmul.f32 %v3378_v41, %v3122_v12 }
 0x2c6   :  { %v3382_v4 = vperm.slane %v3380_v60, 0  ;;  %v3383_v7 = vperm.slane %v3380_v60, 1  ;;  %v3384_v39 = vperm.slane %v3380_v60, 2  ;;  %v3385_v46 = vperm.slane %v3380_v60, 3 }
 0x2c7   :  { %v3386_v9 = vperm.slane %v3380_v60, 4  ;;  %v3387_v13 = vperm.slane %v3380_v60, 5  ;;  %v3388_v14 = vperm.slane %v3380_v60, 6  ;;  %v3389_v16 = vperm.slane %v3380_v60, 7 }
 0x2c8   :  { %v3398_v40 = vmul.f32 %v3382_v4, %v10751_v50  ;;  %v3399_v1 = vmul.f32 %v3383_v7, %v10766_v62  ;;  %v3400_v17 = vmul.f32 %v3384_v39, %v10828_v26  ;;  %v3401_v5 = vmul.f32 %v3385_v46, %v10844_v10 }
 0x2c9   :  { %v3402_v8 = vmul.f32 %v3386_v9, %v10878_v11  ;;  %v3403_v18 = vmul.f32 %v3387_v13, %v10884_v51  ;;  %v3404_v19 = vmul.f32 %v3388_v14, %v10895_v49  ;;  %v3405_v22 = vmul.f32 %v3389_v16, %v10901_v3 }
 0x2ca   :  { %v10916_v23 = vadd.f32 %v3407_v59, %v3398_v40  ;;  %v10918_v25 = vadd.f32 %v3408_v61, %v3399_v1  ;;  %v10920_v15 = vadd.f32 %v3409_v45, %v3400_v17  ;;  %v10922_v50 = vadd.f32 %v3410_v6, %v3401_v5 }
 0x2cb   :  { %v10924_v62 = vadd.f32 %v3411_v24, %v3402_v8  ;;  %v10926_v26 = vadd.f32 %v3412_v54, %v3403_v18  ;;  %v10928_v10 = vadd.f32 %v3413_v2, %v3404_v19  ;;  %v10930_v11 = vadd.f32 %v3414_v63, %v3405_v22 }
 0x2cc   :  { %v3431_v51 = vmax.f32 %v10916_v23, 0.0  ;;  %v3432_v49 = vmax.f32 %v10918_v25, 0.0  ;;  %v3433_v3 = vmax.f32 %v10920_v15, 0.0  ;;  %v3434_v32 = vmax.f32 %v10922_v50, 0.0 }
 0x2cd   :  { %v3435_v27 = vmax.f32 %v10924_v62, 0.0  ;;  %v3436_v29 = vmax.f32 %v10926_v26, 0.0  ;;  %v3437_v30 = vmax.f32 %v10928_v10, 0.0  ;;  %v3438_v33 = vmax.f32 %v10930_v11, 0.0 }
 0x2ce   :  { %10562 = dma.done.wait [#allocation8], 32768 }
 0x2cf   :  { %10563 = vsyncadd [#allocation8], 4294934528  ;;  %v8289_v34 = vld [vmem:[#allocation2 + $0xe0] sm:$0xf]  ;;  %v9997_v35 = vld [vmem:[#allocation2 + $0xec] sm:$0xf0] }
 0x2d0   :  { %v8417_v36 = vld [vmem:[#allocation2 + $0x1e0] sm:$0xf]  ;;  %v8290_v56 = vor.u32 %v9997_v35, %v8289_v34  ;;  %v10029_v37 = vld [vmem:[#allocation2 + $0x1ec] sm:$0xf0]  ;;  %v8659_v10 = vld [vmem:[#allocation2 + $0x3d0] sm:$0xf0] }
 0x2d1   :  { %v8545_v38 = vld [vmem:[#allocation2 + $0x2e0] sm:$0xf]  ;;  %v10061_v0 = vld [vmem:[#allocation2 + $0x2ec] sm:$0xf0]  ;;  %v8418_v42 = vor.u32 %v10029_v37, %v8417_v36  ;;  %v10019_v11 = vld [vmem:[#allocation2 + $0x1a4] sm:$0xf] }
 0x2d2   :  { %v8546_v43 = vor.u32 %v10061_v0, %v8545_v38  ;;  %v8673_v44 = vld [vmem:[#allocation2 + $0x3e0] sm:$0xf]  ;;  %v10093_v47 = vld [vmem:[#allocation2 + $0x3ec] sm:$0xf0]  ;;  %4987 = vmatpush.bf16.msra.mxu0 %v8290_v56  ;;  %v10083_v26 = vld [vmem:[#allocation2 + $0x3a4] sm:$0xf] }
 0x2d3   :  { %v8273_v48 = vld [vmem:[#allocation2 + $0xc0] sm:$0xf]  ;;  %v8674_v52 = vor.u32 %v10093_v47, %v8673_v44  ;;  %v9993_v53 = vld [vmem:[#allocation2 + $0xcc] sm:$0xf0]  ;;  %5000 = vmatpush.bf16.msra.mxu1 %v8418_v42 }
 0x2d4   :  { %v8401_v55 = vld [vmem:[#allocation2 + $0x1c0] sm:$0xf]  ;;  %v10025_v20 = vld [vmem:[#allocation2 + $0x1cc] sm:$0xf0]  ;;  %5013 = vmatpush.bf16.msra.mxu2 %v8546_v43  ;;  %v8274_v57 = vor.u32 %v9993_v53, %v8273_v48 }
 0x2d5   :  { %v8402_v58 = vor.u32 %v10025_v20, %v8401_v55  ;;  %v8529_v12 = vld [vmem:[#allocation2 + $0x2c0] sm:$0xf]  ;;  %v10057_v28 = vld [vmem:[#allocation2 + $0x2cc] sm:$0xf0]  ;;  %5026 = vmatpush.bf16.msra.mxu3 %v8674_v52 }
 0x2d6   :  { %v8657_v31 = vld [vmem:[#allocation2 + $0x3c0] sm:$0xf]  ;;  %v8530_v41 = vor.u32 %v10057_v28, %v8529_v12  ;;  %v10089_v59 = vld [vmem:[#allocation2 + $0x3cc] sm:$0xf0]  ;;  %4988 = vmatpush.bf16.msra.mxu0 %v8274_v57 }
 0x2d7   :  { %v8257_v60 = vld [vmem:[#allocation2 + $0xa0] sm:$0xf]  ;;  %v9989_v61 = vld [vmem:[#allocation2 + $0xac] sm:$0xf0]  ;;  %v8658_v45 = vor.u32 %v10089_v59, %v8657_v31  ;;  %5001 = vmatpush.bf16.msra.mxu1 %v8402_v58 }
 0x2d8   :  { %v8385_v6 = vld [vmem:[#allocation2 + $0x1a0] sm:$0xf]  ;;  %v10021_v24 = vld [vmem:[#allocation2 + $0x1ac] sm:$0xf0]  ;;  %v8258_v2 = vor.u32 %v9989_v61, %v8257_v60  ;;  %5014 = vmatpush.bf16.msra.mxu2 %v8530_v41 }
 0x2d9   :  { %v8513_v54 = vld [vmem:[#allocation2 + $0x2a0] sm:$0xf]  ;;  %v10053_v63 = vld [vmem:[#allocation2 + $0x2ac] sm:$0xf0]  ;;  %v8386_v39 = vor.u32 %v10021_v24, %v8385_v6  ;;  %5027 = vmatpush.bf16.msra.mxu3 %v8658_v45 }
 0x2da   :  { %v8641_v4 = vld [vmem:[#allocation2 + $0x3a0] sm:$0xf]  ;;  %v10085_v7 = vld [vmem:[#allocation2 + $0x3ac] sm:$0xf0]  ;;  %v8514_v46 = vor.u32 %v10053_v63, %v8513_v54  ;;  %4989 = vmatpush.bf16.msra.mxu0 %v8258_v2 }
 0x2db   :  { %v8241_v9 = vld [vmem:[#allocation2 + $0x80] sm:$0xf]  ;;  %v9985_v13 = vld [vmem:[#allocation2 + $0x8c] sm:$0xf0]  ;;  %v8642_v16 = vor.u32 %v10085_v7, %v8641_v4  ;;  %5002 = vmatpush.bf16.msra.mxu1 %v8386_v39 }
 0x2dc   :  { %v8369_v14 = vld [vmem:[#allocation2 + $0x180] sm:$0xf]  ;;  %v10017_v40 = vld [vmem:[#allocation2 + $0x18c] sm:$0xf0]  ;;  %v8242_v18 = vor.u32 %v9985_v13, %v8241_v9  ;;  %5015 = vmatpush.bf16.msra.mxu2 %v8514_v46 }
 0x2dd   :  { %v8497_v1 = vld [vmem:[#allocation2 + $0x280] sm:$0xf]  ;;  %v10049_v17 = vld [vmem:[#allocation2 + $0x28c] sm:$0xf0]  ;;  %v8370_v19 = vor.u32 %v10017_v40, %v8369_v14  ;;  %5028 = vmatpush.bf16.msra.mxu3 %v8642_v16 }
 0x2de   :  { %v8625_v5 = vld [vmem:[#allocation2 + $0x380] sm:$0xf]  ;;  %v10081_v8 = vld [vmem:[#allocation2 + $0x38c] sm:$0xf0]  ;;  %v8498_v22 = vor.u32 %v10049_v17, %v8497_v1  ;;  %4990 = vmatpush.bf16.msra.mxu0 %v8242_v18 }
 0x2df   :  { %v8225_v34 = vld [vmem:[#allocation2 + $0x60] sm:$0xf]  ;;  %v9981_v35 = vld [vmem:[#allocation2 + $0x6c] sm:$0xf0]  ;;  %v8626_v56 = vor.u32 %v10081_v8, %v8625_v5  ;;  %5003 = vmatpush.bf16.msra.mxu1 %v8370_v19 }
 0x2e0   :  { %v8353_v36 = vld [vmem:[#allocation2 + $0x160] sm:$0xf]  ;;  %v10013_v37 = vld [vmem:[#allocation2 + $0x16c] sm:$0xf0]  ;;  %v8226_v44 = vor.u32 %v9981_v35, %v8225_v34  ;;  %5016 = vmatpush.bf16.msra.mxu2 %v8498_v22 }
 0x2e1   :  { %v8481_v38 = vld [vmem:[#allocation2 + $0x260] sm:$0xf]  ;;  %v10045_v0 = vld [vmem:[#allocation2 + $0x26c] sm:$0xf0]  ;;  %v8354_v47 = vor.u32 %v10013_v37, %v8353_v36  ;;  %5029 = vmatpush.bf16.msra.mxu3 %v8626_v56 }
 0x2e2   :  { %v8609_v42 = vld [vmem:[#allocation2 + $0x360] sm:$0xf]  ;;  %v10077_v43 = vld [vmem:[#allocation2 + $0x36c] sm:$0xf0]  ;;  %v8482_v48 = vor.u32 %v10045_v0, %v8481_v38  ;;  %4991 = vmatpush.bf16.msra.mxu0 %v8226_v44 }
 0x2e3   :  { %v8209_v52 = vld [vmem:[#allocation2 + $0x40] sm:$0xf]  ;;  %v9977_v53 = vld [vmem:[#allocation2 + $0x4c] sm:$0xf0]  ;;  %v8610_v20 = vor.u32 %v10077_v43, %v8609_v42  ;;  %5004 = vmatpush.bf16.msra.mxu1 %v8354_v47 }
 0x2e4   :  { %v8337_v55 = vld [vmem:[#allocation2 + $0x140] sm:$0xf]  ;;  %v10009_v57 = vld [vmem:[#allocation2 + $0x14c] sm:$0xf0]  ;;  %v8210_v41 = vor.u32 %v9977_v53, %v8209_v52  ;;  %5017 = vmatpush.bf16.msra.mxu2 %v8482_v48 }
 0x2e5   :  { %v8465_v58 = vld [vmem:[#allocation2 + $0x240] sm:$0xf]  ;;  %v10041_v12 = vld [vmem:[#allocation2 + $0x24c] sm:$0xf0]  ;;  %v8338_v59 = vor.u32 %v10009_v57, %v8337_v55  ;;  %5030 = vmatpush.bf16.msra.mxu3 %v8610_v20 }
 0x2e6   :  { %v8593_v28 = vld [vmem:[#allocation2 + $0x340] sm:$0xf]  ;;  %v10073_v31 = vld [vmem:[#allocation2 + $0x34c] sm:$0xf0]  ;;  %v8466_v60 = vor.u32 %v10041_v12, %v8465_v58  ;;  %4992 = vmatpush.bf16.msra.mxu0 %v8210_v41 }
 0x2e7   :  { %v8193_v61 = vld [vmem:[#allocation2 + $0x20] sm:$0xf]  ;;  %v9973_v45 = vld [vmem:[#allocation2 + $0x2c] sm:$0xf0]  ;;  %v8594_v24 = vor.u32 %v10073_v31, %v8593_v28  ;;  %5005 = vmatpush.bf16.msra.mxu1 %v8338_v59  ;;  %v10943_v31 = vpack.c.bf16 %v3433_v3, %v3433_v3  ;;  %v10958_v3 = vpack.c.bf16 %v3432_v49, %v3432_v49 }
 0x2e8   :  { %v8321_v6 = vld [vmem:[#allocation2 + $0x120] sm:$0xf]  ;;  %v10005_v54 = vld [vmem:[#allocation2 + $0x12c] sm:$0xf0]  ;;  %v8194_v39 = vor.u32 %v9973_v45, %v8193_v61  ;;  %5018 = vmatpush.bf16.msra.mxu2 %v8466_v60  ;;  %v10948_v60 = vpack.c.bf16 %v3431_v51, %v3431_v51  ;;  %v10953_v61 = vpack.c.bf16 %v3434_v32, %v3434_v32 }
 0x2e9   :  { %v8449_v2 = vld [vmem:[#allocation2 + $0x220] sm:$0xf]  ;;  %v10037_v63 = vld [vmem:[#allocation2 + $0x22c] sm:$0xf0]  ;;  %v8322_v13 = vor.u32 %v10005_v54, %v8321_v6  ;;  %5031 = vmatpush.bf16.msra.mxu3 %v8594_v24 }
 0x2ea   :  { %v8577_v4 = vld [vmem:[#allocation2 + $0x320] sm:$0xf]  ;;  %v10069_v7 = vld [vmem:[#allocation2 + $0x32c] sm:$0xf0]  ;;  %v8450_v14 = vor.u32 %v10037_v63, %v8449_v2  ;;  %4993 = vmatpush.bf16.msra.mxu0 %v8194_v39 }
 0x2eb   :  { %v8177_v46 = vld [vmem:[#allocation2] sm:$0xf]  ;;  %v9969_v9 = vld [vmem:[#allocation2 + $0xc] sm:$0xf0]  ;;  %v8578_v17 = vor.u32 %v10069_v7, %v8577_v4  ;;  %5006 = vmatpush.bf16.msra.mxu1 %v8322_v13 }
 0x2ec   :  { %v8305_v16 = vld [vmem:[#allocation2 + $0x100] sm:$0xf]  ;;  %v10001_v40 = vld [vmem:[#allocation2 + $0x10c] sm:$0xf0]  ;;  %v8178_v35 = vor.u32 %v9969_v9, %v8177_v46  ;;  %5019 = vmatpush.bf16.msra.mxu2 %v8450_v14 }
 0x2ed   :  { %v8433_v1 = vld [vmem:[#allocation2 + $0x200] sm:$0xf]  ;;  %v10033_v5 = vld [vmem:[#allocation2 + $0x20c] sm:$0xf0]  ;;  %v8306_v38 = vor.u32 %v10001_v40, %v8305_v16  ;;  %5032 = vmatpush.bf16.msra.mxu3 %v8578_v17 }
 0x2ee   :  { %v8561_v8 = vld [vmem:[#allocation2 + $0x300] sm:$0xf]  ;;  %v10065_v18 = vld [vmem:[#allocation2 + $0x30c] sm:$0xf0]  ;;  %v8434_v0 = vor.u32 %v10033_v5, %v8433_v1  ;;  %4994 = vmatpush.bf16.msra.mxu0 %v8178_v35 }
 0x2ef   :  { %v8801_v19 = vld [vmem:[#allocation2 + $0x4e0] sm:$0xf]  ;;  %v10125_v22 = vld [vmem:[#allocation2 + $0x4ec] sm:$0xf0]  ;;  %v8562_v44 = vor.u32 %v10065_v18, %v8561_v8  ;;  %5007 = vmatpush.bf16.msra.mxu1 %v8306_v38 }
 0x2f0   :  { %v8929_v34 = vld [vmem:[#allocation2 + $0x5e0] sm:$0xf]  ;;  %v10157_v36 = vld [vmem:[#allocation2 + $0x5ec] sm:$0xf0]  ;;  %v8802_v47 = vor.u32 %v10125_v22, %v8801_v19  ;;  %5020 = vmatpush.bf16.msra.mxu2 %v8434_v0 }
 0x2f1   :  { %v9057_v56 = vld [vmem:[#allocation2 + $0x6e0] sm:$0xf]  ;;  %v10189_v37 = vld [vmem:[#allocation2 + $0x6ec] sm:$0xf0]  ;;  %v8930_v48 = vor.u32 %v10157_v36, %v8929_v34  ;;  %5033 = vmatpush.bf16.msra.mxu3 %v8562_v44  ;;  %4995 = vmatmul.bf16.vlgmr.msra.gmra.mxu0 %v10948_v60 }
 0x2f2   :  { %v9185_v42 = vld [vmem:[#allocation2 + $0x7e0] sm:$0xf]  ;;  %v10221_v43 = vld [vmem:[#allocation2 + $0x7ec] sm:$0xf0]  ;;  %v9058_v52 = vor.u32 %v10189_v37, %v9057_v56  ;;  %5039 = vmatpush.bf16.msrb.mxu0 %v8802_v47  ;;  %5008 = vmatmul.bf16.vlgmr.msra.gmra.mxu1 %v10958_v3 }
 0x2f3   :  { %v8785_v53 = vld [vmem:[#allocation2 + $0x4c0] sm:$0xf]  ;;  %v10121_v55 = vld [vmem:[#allocation2 + $0x4cc] sm:$0xf0]  ;;  %v9186_v57 = vor.u32 %v10221_v43, %v9185_v42  ;;  %5052 = vmatpush.bf16.msrb.mxu1 %v8930_v48  ;;  %5021 = vmatmul.bf16.vlgmr.msra.gmra.mxu2 %v10943_v31 }
 0x2f4   :  { %v8913_v20 = vld [vmem:[#allocation2 + $0x5c0] sm:$0xf]  ;;  %v10153_v58 = vld [vmem:[#allocation2 + $0x5cc] sm:$0xf0]  ;;  %v8786_v15 = vor.u32 %v10121_v55, %v8785_v53  ;;  %5065 = vmatpush.bf16.msrb.mxu2 %v9058_v52  ;;  %5034 = vmatmul.bf16.vlgmr.msra.gmra.mxu3 %v10953_v61 }
 0x2f5   :  { %v9041_v12 = vld [vmem:[#allocation2 + $0x6c0] sm:$0xf]  ;;  %v10185_v28 = vld [vmem:[#allocation2 + $0x6cc] sm:$0xf0]  ;;  %v8914_v45 = vor.u32 %v10153_v58, %v8913_v20  ;;  %5078 = vmatpush.bf16.msrb.mxu3 %v9186_v57 }
 0x2f6   :  { %v9169_v41 = vld [vmem:[#allocation2 + $0x7c0] sm:$0xf]  ;;  %v10217_v59 = vld [vmem:[#allocation2 + $0x7cc] sm:$0xf0]  ;;  %v9042_v23 = vor.u32 %v10185_v28, %v9041_v12  ;;  %5040 = vmatpush.bf16.msrb.mxu0 %v8786_v15 }
 0x2f7   :  { %v8769_v6 = vld [vmem:[#allocation2 + $0x4a0] sm:$0xf]  ;;  %v10117_v51 = vld [vmem:[#allocation2 + $0x4ac] sm:$0xf0]  ;;  %v9170_v50 = vor.u32 %v10217_v59, %v9169_v41  ;;  %5053 = vmatpush.bf16.msrb.mxu1 %v8914_v45 }
 0x2f8   :  { %v8897_v24 = vld [vmem:[#allocation2 + $0x5a0] sm:$0xf]  ;;  %v10149_v54 = vld [vmem:[#allocation2 + $0x5ac] sm:$0xf0]  ;;  %v8770_v25 = vor.u32 %v10117_v51, %v8769_v6  ;;  %5066 = vmatpush.bf16.msrb.mxu2 %v9042_v23 }
 0x2f9   :  { %v9025_v32 = vld [vmem:[#allocation2 + $0x6a0] sm:$0xf]  ;;  %v10181_v2 = vld [vmem:[#allocation2 + $0x6ac] sm:$0xf0]  ;;  %v8898_v49 = vor.u32 %v10149_v54, %v8897_v24  ;;  %5079 = vmatpush.bf16.msrb.mxu3 %v9170_v50 }
 0x2fa   :  { %v9153_v63 = vld [vmem:[#allocation2 + $0x7a0] sm:$0xf]  ;;  %v10213_v4 = vld [vmem:[#allocation2 + $0x7ac] sm:$0xf0]  ;;  %v9026_v7 = vor.u32 %v10181_v2, %v9025_v32  ;;  %5041 = vmatpush.bf16.msrb.mxu0 %v8770_v25 }
 0x2fb   :  { %v8753_v39 = vld [vmem:[#allocation2 + $0x480] sm:$0xf]  ;;  %v10113_v46 = vld [vmem:[#allocation2 + $0x48c] sm:$0xf0]  ;;  %v9154_v13 = vor.u32 %v10213_v4, %v9153_v63  ;;  %5054 = vmatpush.bf16.msrb.mxu1 %v8898_v49 }
 0x2fc   :  { %v8881_v9 = vld [vmem:[#allocation2 + $0x580] sm:$0xf]  ;;  %v10145_v14 = vld [vmem:[#allocation2 + $0x58c] sm:$0xf0]  ;;  %v8754_v5 = vor.u32 %v10113_v46, %v8753_v39  ;;  %5067 = vmatpush.bf16.msrb.mxu2 %v9026_v7 }
 0x2fd   :  { %v9009_v16 = vld [vmem:[#allocation2 + $0x680] sm:$0xf]  ;;  %v10177_v40 = vld [vmem:[#allocation2 + $0x68c] sm:$0xf0]  ;;  %v8882_v8 = vor.u32 %v10145_v14, %v8881_v9  ;;  %5080 = vmatpush.bf16.msrb.mxu3 %v9154_v13 }
 0x2fe   :  { %v9137_v1 = vld [vmem:[#allocation2 + $0x780] sm:$0xf]  ;;  %v10209_v17 = vld [vmem:[#allocation2 + $0x78c] sm:$0xf0]  ;;  %v9010_v18 = vor.u32 %v10177_v40, %v9009_v16  ;;  %5042 = vmatpush.bf16.msrb.mxu0 %v8754_v5  ;;  %v9995_v40 = vld [vmem:[#allocation2 + $0xe4] sm:$0xf] }
 0x2ff   :  { %v8737_v19 = vld [vmem:[#allocation2 + $0x460] sm:$0xf]  ;;  %v10109_v22 = vld [vmem:[#allocation2 + $0x46c] sm:$0xf0]  ;;  %v9138_v35 = vor.u32 %v10209_v17, %v9137_v1  ;;  %5055 = vmatpush.bf16.msrb.mxu1 %v8882_v8  ;;  %v8291_v1 = vld [vmem:[#allocation2 + $0xf0] sm:$0xf0] }
 0x300   :  { %v8865_v34 = vld [vmem:[#allocation2 + $0x560] sm:$0xf]  ;;  %v10141_v36 = vld [vmem:[#allocation2 + $0x56c] sm:$0xf0]  ;;  %v8738_v42 = vor.u32 %v10109_v22, %v8737_v19  ;;  %5068 = vmatpush.bf16.msrb.mxu2 %v9010_v18  ;;  %v10027_v17 = vld [vmem:[#allocation2 + $0x1e4] sm:$0xf] }
 0x301   :  { %v8993_v56 = vld [vmem:[#allocation2 + $0x660] sm:$0xf]  ;;  %v10173_v37 = vld [vmem:[#allocation2 + $0x66c] sm:$0xf0]  ;;  %v8866_v43 = vor.u32 %v10141_v36, %v8865_v34  ;;  %5081 = vmatpush.bf16.msrb.mxu3 %v9138_v35  ;;  %v8419_v8 = vld [vmem:[#allocation2 + $0x1f0] sm:$0xf0] }
 0x302   :  { %v9121_v38 = vld [vmem:[#allocation2 + $0x760] sm:$0xf]  ;;  %v10205_v0 = vld [vmem:[#allocation2 + $0x76c] sm:$0xf0]  ;;  %v8994_v44 = vor.u32 %v10173_v37, %v8993_v56  ;;  %5043 = vmatpush.bf16.msrb.mxu0 %v8738_v42  ;;  %v10059_v18 = vld [vmem:[#allocation2 + $0x2e4] sm:$0xf]  ;;  %v8294_v37 = vor.u32 %v9995_v40, %v8291_v1 }
 0x303   :  { %v8721_v47 = vld [vmem:[#allocation2 + $0x440] sm:$0xf]  ;;  %v10105_v48 = vld [vmem:[#allocation2 + $0x44c] sm:$0xf0]  ;;  %v9122_v53 = vor.u32 %v10205_v0, %v9121_v38  ;;  %5056 = vmatpush.bf16.msrb.mxu1 %v8866_v43  ;;  %v8547_v19 = vld [vmem:[#allocation2 + $0x2f0] sm:$0xf0]  ;;  %v8422_v38 = vor.u32 %v10027_v17, %v8419_v8 }
 0x304   :  { %v8849_v52 = vld [vmem:[#allocation2 + $0x540] sm:$0xf]  ;;  %v10137_v55 = vld [vmem:[#allocation2 + $0x54c] sm:$0xf0]  ;;  %v8722_v28 = vor.u32 %v10105_v48, %v8721_v47  ;;  %5069 = vmatpush.bf16.msrb.mxu2 %v8994_v44  ;;  %v10091_v35 = vld [vmem:[#allocation2 + $0x3e4] sm:$0xf]  ;;  %v8550_v0 = vor.u32 %v10059_v18, %v8547_v19  ;;  %v10967_v48 = vpack.c.bf16 %v3437_v30, %v3437_v30 }
 0x305   :  { %v8977_v20 = vld [vmem:[#allocation2 + $0x640] sm:$0xf]  ;;  %v10169_v57 = vld [vmem:[#allocation2 + $0x64c] sm:$0xf0]  ;;  %v8850_v41 = vor.u32 %v10137_v55, %v8849_v52  ;;  %5082 = vmatpush.bf16.msrb.mxu3 %v9122_v53  ;;  %v8675_v36 = vld [vmem:[#allocation2 + $0x3f0] sm:$0xf0] }
 0x306   :  { %v9105_v58 = vld [vmem:[#allocation2 + $0x740] sm:$0xf]  ;;  %v10201_v12 = vld [vmem:[#allocation2 + $0x74c] sm:$0xf0]  ;;  %v8978_v59 = vor.u32 %v10169_v57, %v8977_v20  ;;  %5044 = vmatpush.bf16.msrb.mxu0 %v8722_v28  ;;  %v9991_v42 = vld [vmem:[#allocation2 + $0xc4] sm:$0xf]  ;;  %v8678_v47 = vor.u32 %v10091_v35, %v8675_v36  ;;  %v10972_v20 = vpack.c.bf16 %v3435_v27, %v3435_v27  ;;  %v10977_v57 = vpack.c.bf16 %v3438_v33, %v3438_v33 }
 0x307   :  { %v8705_v15 = vld [vmem:[#allocation2 + $0x420] sm:$0xf]  ;;  %v10101_v45 = vld [vmem:[#allocation2 + $0x42c] sm:$0xf0]  ;;  %v9106_v6 = vor.u32 %v10201_v12, %v9105_v58  ;;  %5057 = vmatpush.bf16.msrb.mxu1 %v8850_v41  ;;  %v8275_v43 = vld [vmem:[#allocation2 + $0xd0] sm:$0xf0]  ;;  %v10982_v12 = vpack.c.bf16 %v3436_v29, %v3436_v29 }
 0x308   :  { %v8833_v23 = vld [vmem:[#allocation2 + $0x520] sm:$0xf]  ;;  %v10133_v51 = vld [vmem:[#allocation2 + $0x52c] sm:$0xf0]  ;;  %v8706_v2 = vor.u32 %v10101_v45, %v8705_v15  ;;  %5070 = vmatpush.bf16.msrb.mxu2 %v8978_v59  ;;  %v10023_v44 = vld [vmem:[#allocation2 + $0x1c4] sm:$0xf]  ;;  %v8278_v30 = vor.u32 %v9991_v42, %v8275_v43 }
 0x309   :  { %v8961_v24 = vld [vmem:[#allocation2 + $0x620] sm:$0xf]  ;;  %v10165_v50 = vld [vmem:[#allocation2 + $0x62c] sm:$0xf0]  ;;  %v8834_v25 = vor.u32 %v10133_v51, %v8833_v23  ;;  %5083 = vmatpush.bf16.msrb.mxu3 %v9106_v6  ;;  %v8403_v52 = vld [vmem:[#allocation2 + $0x1d0] sm:$0xf0] }
 0x30a   :  { %v9089_v54 = vld [vmem:[#allocation2 + $0x720] sm:$0xf]  ;;  %v10197_v32 = vld [vmem:[#allocation2 + $0x72c] sm:$0xf0]  ;;  %v8962_v49 = vor.u32 %v10165_v50, %v8961_v24  ;;  %5045 = vmatpush.bf16.msrb.mxu0 %v8706_v2  ;;  %v10055_v53 = vld [vmem:[#allocation2 + $0x2c4] sm:$0xf]  ;;  %v8406_v62 = vor.u32 %v10023_v44, %v8403_v52 }
 0x30b   :  { %v8689_v63 = vld [vmem:[#allocation2 + $0x400] sm:$0xf]  ;;  %v10097_v4 = vld [vmem:[#allocation2 + $0x40c] sm:$0xf0]  ;;  %v9090_v9 = vor.u32 %v10197_v32, %v9089_v54  ;;  %5058 = vmatpush.bf16.msrb.mxu1 %v8834_v25  ;;  %v8531_v55 = vld [vmem:[#allocation2 + $0x2d0] sm:$0xf0] }
 0x30c   :  { %v8817_v7 = vld [vmem:[#allocation2 + $0x500] sm:$0xf]  ;;  %v10129_v39 = vld [vmem:[#allocation2 + $0x50c] sm:$0xf0]  ;;  %v8690_v5 = vor.u32 %v10097_v4, %v8689_v63  ;;  %5071 = vmatpush.bf16.msrb.mxu2 %v8962_v49  ;;  %v10087_v58 = vld [vmem:[#allocation2 + $0x3c4] sm:$0xf]  ;;  %v8534_v27 = vor.u32 %v10055_v53, %v8531_v55 }
 0x30d   :  { %v8945_v46 = vld [vmem:[#allocation2 + $0x600] sm:$0xf]  ;;  %v10161_v13 = vld [vmem:[#allocation2 + $0x60c] sm:$0xf0]  ;;  %v8818_v22 = vor.u32 %v10129_v39, %v8817_v7  ;;  %5084 = vmatpush.bf16.msrb.mxu3 %v9090_v9  ;;  %v9987_v28 = vld [vmem:[#allocation2 + $0xa4] sm:$0xf]  ;;  %v8662_v33 = vor.u32 %v10087_v58, %v8659_v10 }
 0x30e   :  { %v9073_v14 = vld [vmem:[#allocation2 + $0x700] sm:$0xf]  ;;  %v10193_v16 = vld [vmem:[#allocation2 + $0x70c] sm:$0xf0]  ;;  %v8946_v34 = vor.u32 %v10161_v13, %v8945_v46  ;;  %5046 = vmatpush.bf16.msrb.mxu0 %v8690_v5  ;;  %v8259_v41 = vld [vmem:[#allocation2 + $0xb0] sm:$0xf0] }
 0x30f   :  { %v9074_v56 = vor.u32 %v10193_v16, %v9073_v14  ;;  %5059 = vmatpush.bf16.msrb.mxu1 %v8818_v22  ;;  %v8387_v59 = vld [vmem:[#allocation2 + $0x1b0] sm:$0xf0]  ;;  %v10051_v15 = vld [vmem:[#allocation2 + $0x2a4] sm:$0xf]  ;;  %v8262_v23 = vor.u32 %v9987_v28, %v8259_v41 }
 0x310   :  { %5072 = vmatpush.bf16.msrb.mxu2 %v8946_v34  ;;  %v8515_v45 = vld [vmem:[#allocation2 + $0x2b0] sm:$0xf0]  ;;  %v8390_v6 = vor.u32 %v10019_v11, %v8387_v59  ;;  %v9983_v24 = vld [vmem:[#allocation2 + $0x84] sm:$0xf] }
 0x311   :  { %5085 = vmatpush.bf16.msrb.mxu3 %v9074_v56  ;;  %5047 = vmatmul.bf16.vlgmr.msrb.gmra.mxu0 %v10972_v20  ;;  %v8643_v29 = vld [vmem:[#allocation2 + $0x3b0] sm:$0xf0]  ;;  %v8518_v51 = vor.u32 %v10051_v15, %v8515_v45  ;;  %v10015_v54 = vld [vmem:[#allocation2 + $0x184] sm:$0xf] }
 0x312   :  { %5091 = vmatpush.bf16.msra.mxu0 %v8294_v37  ;;  %5060 = vmatmul.bf16.vlgmr.msrb.gmra.mxu1 %v10982_v12  ;;  %v8243_v50 = vld [vmem:[#allocation2 + $0x90] sm:$0xf0]  ;;  %v8646_v32 = vor.u32 %v10083_v26, %v8643_v29  ;;  %v10047_v63 = vld [vmem:[#allocation2 + $0x284] sm:$0xf] }
 0x313   :  { %5104 = vmatpush.bf16.msra.mxu1 %v8422_v38  ;;  %5073 = vmatmul.bf16.vlgmr.msrb.gmra.mxu2 %v10967_v48  ;;  %v8371_v2 = vld [vmem:[#allocation2 + $0x190] sm:$0xf0]  ;;  %v10079_v25 = vld [vmem:[#allocation2 + $0x384] sm:$0xf]  ;;  %v8246_v7 = vor.u32 %v9983_v24, %v8243_v50 }
 0x314   :  { %5117 = vmatpush.bf16.msra.mxu2 %v8550_v0  ;;  %5086 = vmatmul.bf16.vlgmr.msrb.gmra.mxu3 %v10977_v57  ;;  %v8499_v4 = vld [vmem:[#allocation2 + $0x290] sm:$0xf0]  ;;  %v8374_v39 = vor.u32 %v10015_v54, %v8371_v2  ;;  %v9979_v9 = vld [vmem:[#allocation2 + $0x64] sm:$0xf] }
 0x315   :  { %5130 = vmatpush.bf16.msra.mxu3 %v8678_v47  ;;  %v8627_v49 = vld [vmem:[#allocation2 + $0x390] sm:$0xf0]  ;;  %v8502_v46 = vor.u32 %v10047_v63, %v8499_v4  ;;  %v10011_v14 = vld [vmem:[#allocation2 + $0x164] sm:$0xf] }
 0x316   :  { %5092 = vmatpush.bf16.msra.mxu0 %v8278_v30  ;;  %v8227_v13 = vld [vmem:[#allocation2 + $0x70] sm:$0xf0]  ;;  %v8630_v16 = vor.u32 %v10079_v25, %v8627_v49  ;;  %v10043_v1 = vld [vmem:[#allocation2 + $0x264] sm:$0xf] }
 0x317   :  { %5105 = vmatpush.bf16.msra.mxu1 %v8406_v62  ;;  %v8355_v40 = vld [vmem:[#allocation2 + $0x170] sm:$0xf0]  ;;  %v10075_v5 = vld [vmem:[#allocation2 + $0x364] sm:$0xf]  ;;  %v8230_v18 = vor.u32 %v9979_v9, %v8227_v13 }
 0x318   :  { %5118 = vmatpush.bf16.msra.mxu2 %v8534_v27  ;;  %v8483_v17 = vld [vmem:[#allocation2 + $0x270] sm:$0xf0]  ;;  %v8358_v19 = vor.u32 %v10011_v14, %v8355_v40  ;;  %v9975_v34 = vld [vmem:[#allocation2 + $0x44] sm:$0xf] }
 0x319   :  { %5131 = vmatpush.bf16.msra.mxu3 %v8662_v33  ;;  %v8611_v8 = vld [vmem:[#allocation2 + $0x370] sm:$0xf0]  ;;  %v8486_v22 = vor.u32 %v10043_v1, %v8483_v17  ;;  %v10007_v36 = vld [vmem:[#allocation2 + $0x144] sm:$0xf] }
 0x31a   :  { %5093 = vmatpush.bf16.msra.mxu0 %v8262_v23  ;;  %v8211_v35 = vld [vmem:[#allocation2 + $0x50] sm:$0xf0]  ;;  %v8614_v56 = vor.u32 %v10075_v5, %v8611_v8  ;;  %v10039_v38 = vld [vmem:[#allocation2 + $0x244] sm:$0xf] }
 0x31b   :  { %5106 = vmatpush.bf16.msra.mxu1 %v8390_v6  ;;  %v8339_v37 = vld [vmem:[#allocation2 + $0x150] sm:$0xf0]  ;;  %v10071_v42 = vld [vmem:[#allocation2 + $0x344] sm:$0xf]  ;;  %v8214_v44 = vor.u32 %v9975_v34, %v8211_v35 }
 0x31c   :  { %5119 = vmatpush.bf16.msra.mxu2 %v8518_v51  ;;  %v8467_v0 = vld [vmem:[#allocation2 + $0x250] sm:$0xf0]  ;;  %v8342_v47 = vor.u32 %v10007_v36, %v8339_v37  ;;  %v9971_v53 = vld [vmem:[#allocation2 + $0x24] sm:$0xf] }
 0x31d   :  { %5132 = vmatpush.bf16.msra.mxu3 %v8646_v32  ;;  %v8595_v43 = vld [vmem:[#allocation2 + $0x350] sm:$0xf0]  ;;  %v8470_v52 = vor.u32 %v10039_v38, %v8467_v0  ;;  %v10003_v58 = vld [vmem:[#allocation2 + $0x124] sm:$0xf] }
 0x31e   :  { %5094 = vmatpush.bf16.msra.mxu0 %v8246_v7  ;;  %v8195_v55 = vld [vmem:[#allocation2 + $0x30] sm:$0xf0]  ;;  %v8598_v10 = vor.u32 %v10071_v42, %v8595_v43  ;;  %v10035_v62 = vld [vmem:[#allocation2 + $0x224] sm:$0xf] }
 0x31f   :  { %5107 = vmatpush.bf16.msra.mxu1 %v8374_v39  ;;  %v8323_v30 = vld [vmem:[#allocation2 + $0x130] sm:$0xf0]  ;;  %v10067_v28 = vld [vmem:[#allocation2 + $0x324] sm:$0xf]  ;;  %v8198_v11 = vor.u32 %v9971_v53, %v8195_v55 }
 0x320   :  { %5120 = vmatpush.bf16.msra.mxu2 %v8502_v46  ;;  %v8451_v27 = vld [vmem:[#allocation2 + $0x230] sm:$0xf0]  ;;  %v9967_v33 = vld [vmem:[#allocation2 + $0x4] sm:$0xf]  ;;  %v8326_v15 = vor.u32 %v10003_v58, %v8323_v30 }
 0x321   :  { %5133 = vmatpush.bf16.msra.mxu3 %v8630_v16  ;;  %v8579_v41 = vld [vmem:[#allocation2 + $0x330] sm:$0xf0]  ;;  %v8454_v45 = vor.u32 %v10035_v62, %v8451_v27  ;;  %v9999_v26 = vld [vmem:[#allocation2 + $0x104] sm:$0xf] }
 0x322   :  { %5095 = vmatpush.bf16.msra.mxu0 %v8230_v18  ;;  %v8179_v59 = vld [vmem:[#allocation2 + $0x10] sm:$0xf0]  ;;  %v10031_v23 = vld [vmem:[#allocation2 + $0x204] sm:$0xf]  ;;  %v8582_v6 = vor.u32 %v10067_v28, %v8579_v41 }
 0x323   :  { %5108 = vmatpush.bf16.msra.mxu1 %v8358_v19  ;;  %v8307_v29 = vld [vmem:[#allocation2 + $0x110] sm:$0xf0]  ;;  %v10063_v24 = vld [vmem:[#allocation2 + $0x304] sm:$0xf]  ;;  %v8182_v63 = vor.u32 %v9967_v33, %v8179_v59 }
 0x324   :  { %5121 = vmatpush.bf16.msra.mxu2 %v8486_v22  ;;  %v8435_v51 = vld [vmem:[#allocation2 + $0x210] sm:$0xf0]  ;;  %v10123_v54 = vld [vmem:[#allocation2 + $0x4e4] sm:$0xf]  ;;  %v8310_v7 = vor.u32 %v9999_v26, %v8307_v29 }
 0x325   :  { %5134 = vmatpush.bf16.msra.mxu3 %v8614_v56  ;;  %v8563_v50 = vld [vmem:[#allocation2 + $0x310] sm:$0xf0]  ;;  %v10155_v2 = vld [vmem:[#allocation2 + $0x5e4] sm:$0xf]  ;;  %v8438_v39 = vor.u32 %v10031_v23, %v8435_v51 }
 0x326   :  { %5096 = vmatpush.bf16.msra.mxu0 %v8214_v44  ;;  %v8803_v32 = vld [vmem:[#allocation2 + $0x4f0] sm:$0xf0]  ;;  %v10187_v25 = vld [vmem:[#allocation2 + $0x6e4] sm:$0xf]  ;;  %v8566_v13 = vor.u32 %v10063_v24, %v8563_v50 }
 0x327   :  { %5109 = vmatpush.bf16.msra.mxu1 %v8342_v47  ;;  %v8931_v4 = vld [vmem:[#allocation2 + $0x5f0] sm:$0xf0]  ;;  %v10219_v46 = vld [vmem:[#allocation2 + $0x7e4] sm:$0xf]  ;;  %v8806_v14 = vor.u32 %v10123_v54, %v8803_v32 }
 0x328   :  { %5122 = vmatpush.bf16.msra.mxu2 %v8470_v52  ;;  %v9059_v49 = vld [vmem:[#allocation2 + $0x6f0] sm:$0xf0]  ;;  %v8934_v16 = vor.u32 %v10155_v2, %v8931_v4  ;;  %v10119_v1 = vld [vmem:[#allocation2 + $0x4c4] sm:$0xf] }
 0x329   :  { %5135 = vmatpush.bf16.msra.mxu3 %v8598_v10  ;;  %v9187_v9 = vld [vmem:[#allocation2 + $0x7f0] sm:$0xf0]  ;;  %v9062_v40 = vor.u32 %v10187_v25, %v9059_v49  ;;  %v10151_v5 = vld [vmem:[#allocation2 + $0x5c4] sm:$0xf] }
 0x32a   :  { %5097 = vmatpush.bf16.msra.mxu0 %v8198_v11  ;;  %v8787_v17 = vld [vmem:[#allocation2 + $0x4d0] sm:$0xf0]  ;;  %v9190_v8 = vor.u32 %v10219_v46, %v9187_v9  ;;  %v10183_v19 = vld [vmem:[#allocation2 + $0x6c4] sm:$0xf] }
 0x32b   :  { %5110 = vmatpush.bf16.msra.mxu1 %v8326_v15  ;;  %v8915_v18 = vld [vmem:[#allocation2 + $0x5d0] sm:$0xf0]  ;;  %v10215_v34 = vld [vmem:[#allocation2 + $0x7c4] sm:$0xf]  ;;  %v8790_v36 = vor.u32 %v10119_v1, %v8787_v17 }
 0x32c   :  { %5123 = vmatpush.bf16.msra.mxu2 %v8454_v45  ;;  %v9043_v22 = vld [vmem:[#allocation2 + $0x6d0] sm:$0xf0]  ;;  %v8918_v56 = vor.u32 %v10151_v5, %v8915_v18  ;;  %v10115_v38 = vld [vmem:[#allocation2 + $0x4a4] sm:$0xf] }
 0x32d   :  { %5136 = vmatpush.bf16.msra.mxu3 %v8582_v6  ;;  %v9171_v35 = vld [vmem:[#allocation2 + $0x7d0] sm:$0xf0]  ;;  %v9046_v37 = vor.u32 %v10183_v19, %v9043_v22  ;;  %v10147_v42 = vld [vmem:[#allocation2 + $0x5a4] sm:$0xf] }
 0x32e   :  { %5098 = vmatpush.bf16.msra.mxu0 %v8182_v63  ;;  %v8771_v0 = vld [vmem:[#allocation2 + $0x4b0] sm:$0xf0]  ;;  %v9174_v43 = vor.u32 %v10215_v34, %v9171_v35  ;;  %v10179_v47 = vld [vmem:[#allocation2 + $0x6a4] sm:$0xf] }
 0x32f   :  { %5111 = vmatpush.bf16.msra.mxu1 %v8310_v7  ;;  %v8899_v44 = vld [vmem:[#allocation2 + $0x5b0] sm:$0xf0]  ;;  %v10211_v53 = vld [vmem:[#allocation2 + $0x7a4] sm:$0xf]  ;;  %v8774_v58 = vor.u32 %v10115_v38, %v8771_v0 }
 0x330   :  { %5124 = vmatpush.bf16.msra.mxu2 %v8438_v39  ;;  %v9027_v52 = vld [vmem:[#allocation2 + $0x6b0] sm:$0xf0]  ;;  %v8902_v10 = vor.u32 %v10147_v42, %v8899_v44  ;;  %v10111_v62 = vld [vmem:[#allocation2 + $0x484] sm:$0xf] }
 0x331   :  { %5137 = vmatpush.bf16.msra.mxu3 %v8566_v13  ;;  %v9155_v55 = vld [vmem:[#allocation2 + $0x7b0] sm:$0xf0]  ;;  %5099 = vmatmul.bf16.vlgmr.msra.gmra.mxu0 %v10948_v60  ;;  %v9030_v30 = vor.u32 %v10179_v47, %v9027_v52  ;;  %v10143_v28 = vld [vmem:[#allocation2 + $0x584] sm:$0xf] }
 0x332   :  { %5143 = vmatpush.bf16.msrb.mxu0 %v8806_v14  ;;  %5112 = vmatmul.bf16.vlgmr.msra.gmra.mxu1 %v10958_v3  ;;  %v8755_v27 = vld [vmem:[#allocation2 + $0x490] sm:$0xf0]  ;;  %v9158_v41 = vor.u32 %v10211_v53, %v9155_v55  ;;  %v10175_v33 = vld [vmem:[#allocation2 + $0x684] sm:$0xf] }
 0x333   :  { %5156 = vmatpush.bf16.msrb.mxu1 %v8934_v16  ;;  %5125 = vmatmul.bf16.vlgmr.msra.gmra.mxu2 %v10943_v31  ;;  %v8883_v11 = vld [vmem:[#allocation2 + $0x590] sm:$0xf0]  ;;  %v10207_v15 = vld [vmem:[#allocation2 + $0x784] sm:$0xf]  ;;  %v8758_v26 = vor.u32 %v10111_v62, %v8755_v27 }
 0x334   :  { %5169 = vmatpush.bf16.msrb.mxu2 %v9062_v40  ;;  %5138 = vmatmul.bf16.vlgmr.msra.gmra.mxu3 %v10953_v61  ;;  %v9011_v59 = vld [vmem:[#allocation2 + $0x690] sm:$0xf0]  ;;  %v8886_v29 = vor.u32 %v10143_v28, %v8883_v11  ;;  %v10107_v6 = vld [vmem:[#allocation2 + $0x464] sm:$0xf]  ;;  %v8297_v28 = vld [vmem:[#allocation2 + $0xe8] sm:$0xf] }
 0x335   :  { %5182 = vmatpush.bf16.msrb.mxu3 %v9190_v8  ;;  %v9139_v45 = vld [vmem:[#allocation2 + $0x790] sm:$0xf0]  ;;  %v9014_v23 = vor.u32 %v10175_v33, %v9011_v59  ;;  %v10139_v24 = vld [vmem:[#allocation2 + $0x564] sm:$0xf]  ;;  %v8425_v11 = vld [vmem:[#allocation2 + $0x1e8] sm:$0xf] }
 0x336   :  { %5144 = vmatpush.bf16.msrb.mxu0 %v8790_v36  ;;  %v8739_v51 = vld [vmem:[#allocation2 + $0x470] sm:$0xf0]  ;;  %v9142_v50 = vor.u32 %v10207_v15, %v9139_v45  ;;  %v10171_v32 = vld [vmem:[#allocation2 + $0x664] sm:$0xf]  ;;  %v10030_v59 = vld [vmem:[#allocation2 + $0x1f4] sm:$0xf0] }
 0x337   :  { %5157 = vmatpush.bf16.msrb.mxu1 %v8918_v56  ;;  %v8867_v54 = vld [vmem:[#allocation2 + $0x570] sm:$0xf0]  ;;  %v10203_v63 = vld [vmem:[#allocation2 + $0x764] sm:$0xf]  ;;  %v8742_v25 = vor.u32 %v10107_v6, %v8739_v51  ;;  %v8553_v15 = vld [vmem:[#allocation2 + $0x2e8] sm:$0xf] }
 0x338   :  { %5170 = vmatpush.bf16.msrb.mxu2 %v9046_v37  ;;  %v8995_v2 = vld [vmem:[#allocation2 + $0x670] sm:$0xf0]  ;;  %v8870_v49 = vor.u32 %v10139_v24, %v8867_v54  ;;  %v10103_v39 = vld [vmem:[#allocation2 + $0x444] sm:$0xf]  ;;  %v10062_v45 = vld [vmem:[#allocation2 + $0x2f4] sm:$0xf0] }
 0x339   :  { %5183 = vmatpush.bf16.msrb.mxu3 %v9174_v43  ;;  %v9123_v4 = vld [vmem:[#allocation2 + $0x770] sm:$0xf0]  ;;  %v8998_v7 = vor.u32 %v10171_v32, %v8995_v2  ;;  %v10135_v9 = vld [vmem:[#allocation2 + $0x544] sm:$0xf]  ;;  %v10094_v6 = vld [vmem:[#allocation2 + $0x3f4] sm:$0xf0]  ;;  %v8554_v54 = vor.u32 %v10062_v45, %v8553_v15 }
 0x33a   :  { %5145 = vmatpush.bf16.msrb.mxu0 %v8774_v58  ;;  %v8723_v46 = vld [vmem:[#allocation2 + $0x450] sm:$0xf0]  ;;  %v9126_v13 = vor.u32 %v10203_v63, %v9123_v4  ;;  %v10167_v16 = vld [vmem:[#allocation2 + $0x644] sm:$0xf]  ;;  %v8281_v32 = vld [vmem:[#allocation2 + $0xc8] sm:$0xf] }
 0x33b   :  { %5158 = vmatpush.bf16.msrb.mxu1 %v8902_v10  ;;  %v8851_v14 = vld [vmem:[#allocation2 + $0x550] sm:$0xf0]  ;;  %v10199_v1 = vld [vmem:[#allocation2 + $0x744] sm:$0xf]  ;;  %v8726_v5 = vor.u32 %v10103_v39, %v8723_v46  ;;  %v9994_v2 = vld [vmem:[#allocation2 + $0xd4] sm:$0xf0] }
 0x33c   :  { %5171 = vmatpush.bf16.msrb.mxu2 %v9030_v30  ;;  %v8979_v40 = vld [vmem:[#allocation2 + $0x650] sm:$0xf0]  ;;  %v8854_v8 = vor.u32 %v10135_v9, %v8851_v14  ;;  %v10099_v19 = vld [vmem:[#allocation2 + $0x424] sm:$0xf]  ;;  %v8409_v63 = vld [vmem:[#allocation2 + $0x1c8] sm:$0xf]  ;;  %v8282_v9 = vor.u32 %v9994_v2, %v8281_v32 }
 0x33d   :  { %5184 = vmatpush.bf16.msrb.mxu3 %v9158_v41  ;;  %v9107_v17 = vld [vmem:[#allocation2 + $0x750] sm:$0xf0]  ;;  %v8982_v18 = vor.u32 %v10167_v16, %v8979_v40  ;;  %v10131_v34 = vld [vmem:[#allocation2 + $0x524] sm:$0xf]  ;;  %v9998_v41 = vld [vmem:[#allocation2 + $0xf4] sm:$0xf0] }
 0x33e   :  { %5146 = vmatpush.bf16.msrb.mxu0 %v8758_v26  ;;  %v8707_v22 = vld [vmem:[#allocation2 + $0x430] sm:$0xf0]  ;;  %v9110_v35 = vor.u32 %v10199_v1, %v9107_v17  ;;  %v10163_v56 = vld [vmem:[#allocation2 + $0x624] sm:$0xf]  ;;  %v8298_v24 = vor.u32 %v9998_v41, %v8297_v28  ;;  %v8665_v39 = vld [vmem:[#allocation2 + $0x3c8] sm:$0xf] }
 0x33f   :  { %5159 = vmatpush.bf16.msrb.mxu1 %v8886_v29  ;;  %v8835_v36 = vld [vmem:[#allocation2 + $0x530] sm:$0xf0]  ;;  %v10195_v38 = vld [vmem:[#allocation2 + $0x724] sm:$0xf]  ;;  %v8710_v42 = vor.u32 %v10099_v19, %v8707_v22  ;;  %v10090_v46 = vld [vmem:[#allocation2 + $0x3d4] sm:$0xf0] }
 0x340   :  { %5172 = vmatpush.bf16.msrb.mxu2 %v9014_v23  ;;  %v8963_v37 = vld [vmem:[#allocation2 + $0x630] sm:$0xf0]  ;;  %v10095_v43 = vld [vmem:[#allocation2 + $0x404] sm:$0xf]  ;;  %v8838_v47 = vor.u32 %v10131_v34, %v8835_v36  ;;  %v8681_v23 = vld [vmem:[#allocation2 + $0x3e8] sm:$0xf]  ;;  %v8666_v17 = vor.u32 %v10090_v46, %v8665_v39 }
 0x341   :  { %5185 = vmatpush.bf16.msrb.mxu3 %v9142_v50  ;;  %v9091_v0 = vld [vmem:[#allocation2 + $0x730] sm:$0xf0]  ;;  %v8966_v52 = vor.u32 %v10163_v56, %v8963_v37  ;;  %v10127_v53 = vld [vmem:[#allocation2 + $0x504] sm:$0xf]  ;;  %v8426_v50 = vor.u32 %v10030_v59, %v8425_v11  ;;  %v8682_v4 = vor.u32 %v10094_v6, %v8681_v23  ;;  %v8265_v16 = vld [vmem:[#allocation2 + $0xa8] sm:$0xf] }
 0x342   :  { %5147 = vmatpush.bf16.msrb.mxu0 %v8742_v25  ;;  %v8691_v44 = vld [vmem:[#allocation2 + $0x410] sm:$0xf0]  ;;  %v10159_v58 = vld [vmem:[#allocation2 + $0x604] sm:$0xf]  ;;  %v9094_v10 = vor.u32 %v10195_v38, %v9091_v0  ;;  %v10026_v25 = vld [vmem:[#allocation2 + $0x1d4] sm:$0xf0] }
 0x343   :  { %5160 = vmatpush.bf16.msrb.mxu1 %v8870_v49  ;;  %v8819_v55 = vld [vmem:[#allocation2 + $0x510] sm:$0xf0]  ;;  %v10191_v62 = vld [vmem:[#allocation2 + $0x704] sm:$0xf]  ;;  %v8694_v33 = vor.u32 %v10095_v43, %v8691_v44  ;;  %v8537_v49 = vld [vmem:[#allocation2 + $0x2c8] sm:$0xf] }
 0x344   :  { %5173 = vmatpush.bf16.msrb.mxu2 %v8998_v7  ;;  %v8947_v30 = vld [vmem:[#allocation2 + $0x610] sm:$0xf0]  ;;  %v8822_v26 = vor.u32 %v10127_v53, %v8819_v55  ;;  %v10058_v7 = vld [vmem:[#allocation2 + $0x2d4] sm:$0xf0]  ;;  %v8393_v1 = vld [vmem:[#allocation2 + $0x1a8] sm:$0xf] }
 0x345   :  { %5186 = vmatpush.bf16.msrb.mxu3 %v9126_v13  ;;  %v9075_v27 = vld [vmem:[#allocation2 + $0x710] sm:$0xf0]  ;;  %v8950_v29 = vor.u32 %v10159_v58, %v8947_v30  ;;  %v8410_v13 = vor.u32 %v10026_v25, %v8409_v63  ;;  %v8538_v14 = vor.u32 %v10058_v7, %v8537_v49  ;;  %v9990_v40 = vld [vmem:[#allocation2 + $0xb4] sm:$0xf0]  ;;  %v8649_v19 = vld [vmem:[#allocation2 + $0x3a8] sm:$0xf] }
 0x346   :  { %5148 = vmatpush.bf16.msrb.mxu0 %v8726_v5  ;;  %v9078_v51 = vor.u32 %v10191_v62, %v9075_v27  ;;  %v10022_v5 = vld [vmem:[#allocation2 + $0x1b4] sm:$0xf0]  ;;  %v8266_v34 = vor.u32 %v9990_v40, %v8265_v16  ;;  %v8249_v56 = vld [vmem:[#allocation2 + $0x88] sm:$0xf] }
 0x347   :  { %5161 = vmatpush.bf16.msrb.mxu1 %v8854_v8  ;;  %v8521_v8 = vld [vmem:[#allocation2 + $0x2a8] sm:$0xf]  ;;  %v10086_v22 = vld [vmem:[#allocation2 + $0x3b4] sm:$0xf0] }
 0x348   :  { %5174 = vmatpush.bf16.msrb.mxu2 %v8982_v18  ;;  %v10054_v18 = vld [vmem:[#allocation2 + $0x2b4] sm:$0xf0]  ;;  %v8377_v38 = vld [vmem:[#allocation2 + $0x188] sm:$0xf]  ;;  %v8650_v0 = vor.u32 %v10086_v22, %v8649_v19 }
 0x349   :  { %5187 = vmatpush.bf16.msrb.mxu3 %v9110_v35  ;;  %v8394_v35 = vor.u32 %v10022_v5, %v8393_v1  ;;  %v8522_v36 = vor.u32 %v10054_v18, %v8521_v8  ;;  %v9986_v37 = vld [vmem:[#allocation2 + $0x94] sm:$0xf0]  ;;  %v8505_v43 = vld [vmem:[#allocation2 + $0x288] sm:$0xf] }
 0x34a   :  { %5149 = vmatpush.bf16.msrb.mxu0 %v8710_v42  ;;  %v10018_v42 = vld [vmem:[#allocation2 + $0x194] sm:$0xf0]  ;;  %v8250_v53 = vor.u32 %v9986_v37, %v8249_v56  ;;  %v8361_v62 = vld [vmem:[#allocation2 + $0x168] sm:$0xf] }
 0x34b   :  { %5162 = vmatpush.bf16.msrb.mxu1 %v8838_v47  ;;  %v10050_v44 = vld [vmem:[#allocation2 + $0x294] sm:$0xf0]  ;;  %v8633_v47 = vld [vmem:[#allocation2 + $0x388] sm:$0xf]  ;;  %v8378_v55 = vor.u32 %v10018_v42, %v8377_v38 }
 0x34c   :  { %5175 = vmatpush.bf16.msrb.mxu2 %v8966_v52  ;;  %v10082_v52 = vld [vmem:[#allocation2 + $0x394] sm:$0xf0]  ;;  %v8506_v58 = vor.u32 %v10050_v44, %v8505_v43  ;;  %v8489_v41 = vld [vmem:[#allocation2 + $0x268] sm:$0xf] }
 0x34d   :  { %5188 = vmatpush.bf16.msrb.mxu3 %v9094_v10  ;;  %v8233_v10 = vld [vmem:[#allocation2 + $0x68] sm:$0xf]  ;;  %v9982_v30 = vld [vmem:[#allocation2 + $0x74] sm:$0xf0]  ;;  %v8634_v27 = vor.u32 %v10082_v52, %v8633_v47 }
 0x34e   :  { %5150 = vmatpush.bf16.msrb.mxu0 %v8694_v33  ;;  %v10014_v28 = vld [vmem:[#allocation2 + $0x174] sm:$0xf0]  ;;  %v8617_v33 = vld [vmem:[#allocation2 + $0x368] sm:$0xf]  ;;  %v8234_v15 = vor.u32 %v9982_v30, %v8233_v10 }
 0x34f   :  { %5163 = vmatpush.bf16.msrb.mxu1 %v8822_v26  ;;  %v10046_v11 = vld [vmem:[#allocation2 + $0x274] sm:$0xf0]  ;;  %v8362_v45 = vor.u32 %v10014_v28, %v8361_v62  ;;  %v8345_v6 = vld [vmem:[#allocation2 + $0x148] sm:$0xf] }
 0x350   :  { %5176 = vmatpush.bf16.msrb.mxu2 %v8950_v29  ;;  %v10078_v59 = vld [vmem:[#allocation2 + $0x374] sm:$0xf0]  ;;  %v8490_v26 = vor.u32 %v10046_v11, %v8489_v41  ;;  %v8217_v29 = vld [vmem:[#allocation2 + $0x48] sm:$0xf] }
 0x351   :  { %5189 = vmatpush.bf16.msrb.mxu3 %v9078_v51  ;;  %5151 = vmatmul.bf16.vlgmr.msrb.gmra.mxu0 %v10972_v20  ;;  %v9978_v23 = vld [vmem:[#allocation2 + $0x54] sm:$0xf0]  ;;  %v8618_v51 = vor.u32 %v10078_v59, %v8617_v33  ;;  %v8601_v32 = vld [vmem:[#allocation2 + $0x348] sm:$0xf] }
 0x352   :  { %5195 = vmatpush.bf16.msra.mxu0 %v8298_v24  ;;  %5164 = vmatmul.bf16.vlgmr.msrb.gmra.mxu1 %v10982_v12  ;;  %v10010_v24 = vld [vmem:[#allocation2 + $0x154] sm:$0xf0]  ;;  %v8218_v63 = vor.u32 %v9978_v23, %v8217_v29  ;;  %v8201_v49 = vld [vmem:[#allocation2 + $0x28] sm:$0xf] }
 0x353   :  { %5208 = vmatpush.bf16.msra.mxu1 %v8426_v50  ;;  %5177 = vmatmul.bf16.vlgmr.msrb.gmra.mxu2 %v10967_v48  ;;  %v8473_v50 = vld [vmem:[#allocation2 + $0x248] sm:$0xf]  ;;  %v10074_v2 = vld [vmem:[#allocation2 + $0x354] sm:$0xf0] }
 0x354   :  { %5221 = vmatpush.bf16.msra.mxu2 %v8554_v54  ;;  %5190 = vmatmul.bf16.vlgmr.msrb.gmra.mxu3 %v10977_v57  ;;  %v10042_v54 = vld [vmem:[#allocation2 + $0x254] sm:$0xf0]  ;;  %v8329_v39 = vld [vmem:[#allocation2 + $0x128] sm:$0xf]  ;;  %v8602_v46 = vor.u32 %v10074_v2, %v8601_v32 }
 0x355   :  { %5234 = vmatpush.bf16.msra.mxu3 %v8682_v4  ;;  %v8346_v4 = vor.u32 %v10010_v24, %v8345_v6  ;;  %v8474_v25 = vor.u32 %v10042_v54, %v8473_v50  ;;  %v9974_v7 = vld [vmem:[#allocation2 + $0x34] sm:$0xf0]  ;;  %v8585_v16 = vld [vmem:[#allocation2 + $0x328] sm:$0xf] }
 0x356   :  { %5196 = vmatpush.bf16.msra.mxu0 %v8282_v9  ;;  %v10006_v9 = vld [vmem:[#allocation2 + $0x134] sm:$0xf0]  ;;  %v8202_v1 = vor.u32 %v9974_v7, %v8201_v49  ;;  %v8313_v19 = vld [vmem:[#allocation2 + $0x108] sm:$0xf] }
 0x357   :  { %5209 = vmatpush.bf16.msra.mxu1 %v8410_v13  ;;  %v8457_v13 = vld [vmem:[#allocation2 + $0x228] sm:$0xf]  ;;  %v10070_v40 = vld [vmem:[#allocation2 + $0x334] sm:$0xf0]  ;;  %v8330_v8 = vor.u32 %v10006_v9, %v8329_v39 }
 0x358   :  { %5222 = vmatpush.bf16.msra.mxu2 %v8538_v14  ;;  %v10038_v14 = vld [vmem:[#allocation2 + $0x234] sm:$0xf0]  ;;  %v8569_v56 = vld [vmem:[#allocation2 + $0x308] sm:$0xf] }
 0x359   :  { %5235 = vmatpush.bf16.msra.mxu3 %v8666_v17  ;;  %v8185_v17 = vld [vmem:[#allocation2 + $0x8] sm:$0xf]  ;;  %v9970_v5 = vld [vmem:[#allocation2 + $0x14] sm:$0xf0]  ;;  %v8458_v18 = vor.u32 %v10038_v14, %v8457_v13 }
 0x35a   :  { %5197 = vmatpush.bf16.msra.mxu0 %v8266_v34  ;;  %v10002_v22 = vld [vmem:[#allocation2 + $0x114] sm:$0xf0]  ;;  %v8441_v34 = vld [vmem:[#allocation2 + $0x208] sm:$0xf]  ;;  %v8186_v43 = vor.u32 %v9970_v5, %v8185_v17 }
 0x35b   :  { %5210 = vmatpush.bf16.msra.mxu1 %v8394_v35  ;;  %v8586_v35 = vor.u32 %v10070_v40, %v8585_v16  ;;  %v10066_v37 = vld [vmem:[#allocation2 + $0x314] sm:$0xf0]  ;;  %v8809_v38 = vld [vmem:[#allocation2 + $0x4e8] sm:$0xf] }
 0x35c   :  { %5223 = vmatpush.bf16.msra.mxu2 %v8522_v36  ;;  %v10034_v36 = vld [vmem:[#allocation2 + $0x214] sm:$0xf0]  ;;  %v8937_v42 = vld [vmem:[#allocation2 + $0x5e8] sm:$0xf]  ;;  %v8570_v30 = vor.u32 %v10066_v37, %v8569_v56 }
 0x35d   :  { %5236 = vmatpush.bf16.msra.mxu3 %v8650_v0  ;;  %v10126_v0 = vld [vmem:[#allocation2 + $0x4f4] sm:$0xf0]  ;;  %v9065_v47 = vld [vmem:[#allocation2 + $0x6e8] sm:$0xf] }
 0x35e   :  { %5198 = vmatpush.bf16.msra.mxu0 %v8250_v53  ;;  %v10158_v44 = vld [vmem:[#allocation2 + $0x5f4] sm:$0xf0]  ;;  %v8314_v53 = vor.u32 %v10002_v22, %v8313_v19  ;;  %v8810_v62 = vor.u32 %v10126_v0, %v8809_v38  ;;  %v8793_v41 = vld [vmem:[#allocation2 + $0x4c8] sm:$0xf] }
 0x35f   :  { %5211 = vmatpush.bf16.msra.mxu1 %v8378_v55  ;;  %v10190_v52 = vld [vmem:[#allocation2 + $0x6f4] sm:$0xf0]  ;;  %v8442_v55 = vor.u32 %v10034_v36, %v8441_v34  ;;  %v8921_v33 = vld [vmem:[#allocation2 + $0x5c8] sm:$0xf] }
 0x360   :  { %5224 = vmatpush.bf16.msra.mxu2 %v8506_v58  ;;  %v9193_v58 = vld [vmem:[#allocation2 + $0x7e8] sm:$0xf]  ;;  %v10222_v10 = vld [vmem:[#allocation2 + $0x7f4] sm:$0xf0]  ;;  %v9066_v28 = vor.u32 %v10190_v52, %v9065_v47 }
 0x361   :  { %5237 = vmatpush.bf16.msra.mxu3 %v8634_v27  ;;  %v8938_v27 = vor.u32 %v10158_v44, %v8937_v42  ;;  %v10122_v11 = vld [vmem:[#allocation2 + $0x4d4] sm:$0xf0]  ;;  %v9194_v59 = vor.u32 %v10222_v10, %v9193_v58  ;;  %v9177_v29 = vld [vmem:[#allocation2 + $0x7c8] sm:$0xf] }
 0x362   :  { %5199 = vmatpush.bf16.msra.mxu0 %v8234_v15  ;;  %v10154_v15 = vld [vmem:[#allocation2 + $0x5d4] sm:$0xf0]  ;;  %v8794_v6 = vor.u32 %v10122_v11, %v8793_v41  ;;  %v8777_v50 = vld [vmem:[#allocation2 + $0x4a8] sm:$0xf] }
 0x363   :  { %5212 = vmatpush.bf16.msra.mxu1 %v8362_v45  ;;  %v9049_v45 = vld [vmem:[#allocation2 + $0x6c8] sm:$0xf]  ;;  %v10218_v23 = vld [vmem:[#allocation2 + $0x7d4] sm:$0xf0] }
 0x364   :  { %5225 = vmatpush.bf16.msra.mxu2 %v8490_v26  ;;  %v10186_v26 = vld [vmem:[#allocation2 + $0x6d4] sm:$0xf0]  ;;  %v8905_v32 = vld [vmem:[#allocation2 + $0x5a8] sm:$0xf]  ;;  %v9178_v2 = vor.u32 %v10218_v23, %v9177_v29 }
 0x365   :  { %5238 = vmatpush.bf16.msra.mxu3 %v8618_v51  ;;  %v8922_v51 = vor.u32 %v10154_v15, %v8921_v33  ;;  %v9050_v24 = vor.u32 %v10186_v26, %v9049_v45  ;;  %v10118_v54 = vld [vmem:[#allocation2 + $0x4b4] sm:$0xf0]  ;;  %v9161_v49 = vld [vmem:[#allocation2 + $0x7a8] sm:$0xf] }
 0x366   :  { %5200 = vmatpush.bf16.msra.mxu0 %v8218_v63  ;;  %v10150_v63 = vld [vmem:[#allocation2 + $0x5b4] sm:$0xf0]  ;;  %v8778_v39 = vor.u32 %v10118_v54, %v8777_v50  ;;  %v8761_v13 = vld [vmem:[#allocation2 + $0x488] sm:$0xf] }
 0x367   :  { %5213 = vmatpush.bf16.msra.mxu1 %v8346_v4  ;;  %v9033_v4 = vld [vmem:[#allocation2 + $0x6a8] sm:$0xf]  ;;  %v10214_v7 = vld [vmem:[#allocation2 + $0x7b4] sm:$0xf0] }
 0x368   :  { %5226 = vmatpush.bf16.msra.mxu2 %v8474_v25  ;;  %v10182_v25 = vld [vmem:[#allocation2 + $0x6b4] sm:$0xf0]  ;;  %v8889_v16 = vld [vmem:[#allocation2 + $0x588] sm:$0xf]  ;;  %v9162_v40 = vor.u32 %v10214_v7, %v9161_v49 }
 0x369   :  { %5239 = vmatpush.bf16.msra.mxu3 %v8602_v46  ;;  %v8906_v46 = vor.u32 %v10150_v63, %v8905_v32  ;;  %v9034_v9 = vor.u32 %v10182_v25, %v9033_v4  ;;  %v10114_v14 = vld [vmem:[#allocation2 + $0x494] sm:$0xf0]  ;;  %v9017_v17 = vld [vmem:[#allocation2 + $0x688] sm:$0xf] }
 0x36a   :  { %5201 = vmatpush.bf16.msra.mxu0 %v8202_v1  ;;  %v10146_v1 = vld [vmem:[#allocation2 + $0x594] sm:$0xf0]  ;;  %v8762_v19 = vor.u32 %v10114_v14, %v8761_v13  ;;  %v8745_v36 = vld [vmem:[#allocation2 + $0x468] sm:$0xf] }
 0x36b   :  { %5214 = vmatpush.bf16.msra.mxu1 %v8330_v8  ;;  %v10178_v5 = vld [vmem:[#allocation2 + $0x694] sm:$0xf0]  ;;  %v9145_v8 = vld [vmem:[#allocation2 + $0x788] sm:$0xf]  ;;  %v8890_v34 = vor.u32 %v10146_v1, %v8889_v16 }
 0x36c   :  { %5227 = vmatpush.bf16.msra.mxu2 %v8458_v18  ;;  %v10210_v18 = vld [vmem:[#allocation2 + $0x794] sm:$0xf0]  ;;  %v8873_v37 = vld [vmem:[#allocation2 + $0x568] sm:$0xf] }
 0x36d   :  { %5240 = vmatpush.bf16.msra.mxu3 %v8586_v35  ;;  %v9018_v35 = vor.u32 %v10178_v5, %v9017_v17  ;;  %v10110_v56 = vld [vmem:[#allocation2 + $0x474] sm:$0xf0]  ;;  %v9146_v0 = vor.u32 %v10210_v18, %v9145_v8  ;;  %v9129_v52 = vld [vmem:[#allocation2 + $0x768] sm:$0xf] }
 0x36e   :  { %5202 = vmatpush.bf16.msra.mxu0 %v8186_v43  ;;  %v4996_v22 = vpop.f32.mrf.mxu0  ;;  %v10142_v42 = vld [vmem:[#allocation2 + $0x574] sm:$0xf0]  ;;  %v9001_v43 = vld [vmem:[#allocation2 + $0x668] sm:$0xf] }
 0x36f   :  { %5215 = vmatpush.bf16.msra.mxu1 %v8314_v53  ;;  %v5009_v38 = vpop.f32.mrf.mxu1  ;;  %v10174_v44 = vld [vmem:[#allocation2 + $0x674] sm:$0xf0]  ;;  %v8874_v58 = vor.u32 %v10142_v42, %v8873_v37  ;;  %v8985_v33 = vld [vmem:[#allocation2 + $0x648] sm:$0xf]  ;;  %v10028_v37 = vld [vmem:[#allocation2 + $0x1ec] sm:$0xf] }
 0x370   :  { %5228 = vmatpush.bf16.msra.mxu2 %v8442_v55  ;;  %v5010_v47 = vadd.f32 %v5009_v38, %v4996_v22  ;;  %v10206_v53 = vld [vmem:[#allocation2 + $0x774] sm:$0xf0]  ;;  %v8746_v55 = vor.u32 %v10110_v56, %v8745_v36  ;;  %v9002_v10 = vor.u32 %v10174_v44, %v9001_v43  ;;  %v9113_v26 = vld [vmem:[#allocation2 + $0x748] sm:$0xf]  ;;  %v9996_v36 = vld [vmem:[#allocation2 + $0xec] sm:$0xf] }
 0x371   :  { %5241 = vmatpush.bf16.msra.mxu3 %v8570_v30  ;;  %5203 = vmatmul.bf16.vlgmr.msra.gmra.mxu0 %v10948_v60  ;;  %v8729_v30 = vld [vmem:[#allocation2 + $0x448] sm:$0xf]  ;;  %v9130_v41 = vor.u32 %v10206_v53, %v9129_v52  ;;  %v10138_v11 = vld [vmem:[#allocation2 + $0x554] sm:$0xf0]  ;;  %v8299_v56 = vld [vmem:[#allocation2 + $0xf8] sm:$0xf0] }
 0x372   :  { %5247 = vmatpush.bf16.msrb.mxu0 %v8810_v62  ;;  %5216 = vmatmul.bf16.vlgmr.msra.gmra.mxu1 %v10958_v3  ;;  %v10106_v62 = vld [vmem:[#allocation2 + $0x454] sm:$0xf0]  ;;  %v8713_v54 = vld [vmem:[#allocation2 + $0x428] sm:$0xf]  ;;  %v10060_v42 = vld [vmem:[#allocation2 + $0x2ec] sm:$0xf] }
 0x373   :  { %5260 = vmatpush.bf16.msrb.mxu1 %v8938_v27  ;;  %5229 = vmatmul.bf16.vlgmr.msra.gmra.mxu2 %v10943_v31  ;;  %v8857_v27 = vld [vmem:[#allocation2 + $0x548] sm:$0xf]  ;;  %v10202_v29 = vld [vmem:[#allocation2 + $0x754] sm:$0xf0]  ;;  %v8730_v23 = vor.u32 %v10106_v62, %v8729_v30  ;;  %v8555_v43 = vld [vmem:[#allocation2 + $0x2f8] sm:$0xf0] }
 0x374   :  { %5273 = vmatpush.bf16.msrb.mxu2 %v9066_v28  ;;  %5242 = vmatmul.bf16.vlgmr.msra.gmra.mxu3 %v10953_v61  ;;  %v10102_v32 = vld [vmem:[#allocation2 + $0x434] sm:$0xf0]  ;;  %v9114_v4 = vor.u32 %v10202_v29, %v9113_v26  ;;  %v8969_v49 = vld [vmem:[#allocation2 + $0x628] sm:$0xf]  ;;  %v10092_v52 = vld [vmem:[#allocation2 + $0x3ec] sm:$0xf]  ;;  %v8558_v30 = vor.u32 %v10060_v42, %v8555_v43 }
 0x375   :  { %5286 = vmatpush.bf16.msrb.mxu3 %v9194_v59  ;;  %v10170_v59 = vld [vmem:[#allocation2 + $0x654] sm:$0xf0]  ;;  %v8697_v13 = vld [vmem:[#allocation2 + $0x408] sm:$0xf]  ;;  %v8683_v53 = vld [vmem:[#allocation2 + $0x3f8] sm:$0xf0] }
 0x376   :  { %5248 = vmatpush.bf16.msrb.mxu0 %v8794_v6  ;;  %v5022_v28 = vpop.f32.mrf.mxu2  ;;  %v8986_v50 = vor.u32 %v10170_v59, %v8985_v33  ;;  %v10134_v25 = vld [vmem:[#allocation2 + $0x534] sm:$0xf0]  ;;  %v8825_v1 = vld [vmem:[#allocation2 + $0x508] sm:$0xf]  ;;  %v9992_v62 = vld [vmem:[#allocation2 + $0xcc] sm:$0xf] }
 0x377   :  { %5261 = vmatpush.bf16.msrb.mxu1 %v8922_v51  ;;  %v5023_v15 = vadd.f32 %v5022_v28, %v5010_v47  ;;  %v5035_v45 = vpop.f32.mrf.mxu3  ;;  %v4998_v51 = vpop.f32.mrf.mxu0  ;;  %v10166_v7 = vld [vmem:[#allocation2 + $0x634] sm:$0xf0]  ;;  %v8953_v5 = vld [vmem:[#allocation2 + $0x608] sm:$0xf]  ;;  %v10024_v28 = vld [vmem:[#allocation2 + $0x1cc] sm:$0xf] }
 0x378   :  { %5274 = vmatpush.bf16.msrb.mxu2 %v9050_v24  ;;  %v8858_v24 = vor.u32 %v10138_v11, %v8857_v27  ;;  %v5011_v63 = vpop.f32.mrf.mxu1  ;;  %v10098_v14 = vld [vmem:[#allocation2 + $0x414] sm:$0xf0]  ;;  %v9081_v22 = vld [vmem:[#allocation2 + $0x708] sm:$0xf]  ;;  %v8283_v27 = vld [vmem:[#allocation2 + $0xd8] sm:$0xf0] }
 0x379   :  { %5287 = vmatpush.bf16.msrb.mxu3 %v9178_v2  ;;  %v11000_v6 = vadd.f32 %v5035_v45, %v5023_v15  ;;  %v8841_v2 = vld [vmem:[#allocation2 + $0x528] sm:$0xf]  ;;  %v10130_v17 = vld [vmem:[#allocation2 + $0x514] sm:$0xf0]  ;;  %v8698_v38 = vor.u32 %v10098_v14, %v8697_v13  ;;  %v8411_v11 = vld [vmem:[#allocation2 + $0x1d8] sm:$0xf0]  ;;  %v8286_v26 = vor.u32 %v9992_v62, %v8283_v27 }
 0x37a   :  { %5249 = vmatpush.bf16.msrb.mxu0 %v8778_v39  ;;  %v9097_v39 = vld [vmem:[#allocation2 + $0x728] sm:$0xf]  ;;  %v8842_v16 = vor.u32 %v10134_v25, %v8841_v2  ;;  %v8826_v44 = vor.u32 %v10130_v17, %v8825_v1  ;;  %v10056_v33 = vld [vmem:[#allocation2 + $0x2cc] sm:$0xf]  ;;  %v8539_v59 = vld [vmem:[#allocation2 + $0x2d8] sm:$0xf0]  ;;  %v8414_v29 = vor.u32 %v10024_v28, %v8411_v11 }
 0x37b   :  { %5262 = vmatpush.bf16.msrb.mxu1 %v8906_v46  ;;  %v10198_v46 = vld [vmem:[#allocation2 + $0x734] sm:$0xf0]  ;;  %v10088_v15 = vld [vmem:[#allocation2 + $0x3cc] sm:$0xf]  ;;  %v8667_v45 = vld [vmem:[#allocation2 + $0x3d8] sm:$0xf0] }
 0x37c   :  { %5275 = vmatpush.bf16.msrb.mxu2 %v9034_v9  ;;  %v8714_v9 = vor.u32 %v10102_v32, %v8713_v54  ;;  %v9098_v18 = vor.u32 %v10198_v46, %v9097_v39  ;;  %v9988_v51 = vld [vmem:[#allocation2 + $0xac] sm:$0xf]  ;;  %v8670_v54 = vor.u32 %v10088_v15, %v8667_v45  ;;  %v8395_v32 = vld [vmem:[#allocation2 + $0x1b8] sm:$0xf0] }
 0x37d   :  { %5288 = vmatpush.bf16.msrb.mxu3 %v9162_v40  ;;  %v8970_v40 = vor.u32 %v10166_v7, %v8969_v49  ;;  %v10052_v2 = vld [vmem:[#allocation2 + $0x2ac] sm:$0xf]  ;;  %v8523_v63 = vld [vmem:[#allocation2 + $0x2b8] sm:$0xf0] }
 0x37e   :  { %5250 = vmatpush.bf16.msrb.mxu0 %v8762_v19  ;;  %v5024_v8 = vpop.f32.mrf.mxu2  ;;  %v10162_v19 = vld [vmem:[#allocation2 + $0x614] sm:$0xf0]  ;;  %v8651_v25 = vld [vmem:[#allocation2 + $0x3b8] sm:$0xf0]  ;;  %v8526_v39 = vor.u32 %v10052_v2, %v8523_v63  ;;  %v9984_v46 = vld [vmem:[#allocation2 + $0x8c] sm:$0xf] }
 0x37f   :  { %5263 = vmatpush.bf16.msrb.mxu1 %v8890_v34  ;;  %v10194_v34 = vld [vmem:[#allocation2 + $0x714] sm:$0xf0]  ;;  %v8954_v47 = vor.u32 %v10162_v19, %v8953_v5  ;;  %v10016_v13 = vld [vmem:[#allocation2 + $0x18c] sm:$0xf]  ;;  %v8507_v1 = vld [vmem:[#allocation2 + $0x298] sm:$0xf0] }
 0x380   :  { %5276 = vmatpush.bf16.msrb.mxu2 %v9018_v35  ;;  %v5037_v35 = vpop.f32.mrf.mxu3  ;;  %v10080_v17 = vld [vmem:[#allocation2 + $0x38c] sm:$0xf]  ;;  %v8635_v5 = vld [vmem:[#allocation2 + $0x398] sm:$0xf0] }
 0x381   :  { %5289 = vmatpush.bf16.msrb.mxu3 %v9146_v0  ;;  %v8427_v0 = vld [vmem:[#allocation2 + $0x1f8] sm:$0xf0]  ;;  %v10044_v42 = vld [vmem:[#allocation2 + $0x26c] sm:$0xf] }
 0x382   :  { %5251 = vmatpush.bf16.msrb.mxu0 %v8746_v55  ;;  %v9082_v55 = vor.u32 %v10194_v34, %v9081_v22  ;;  %v8491_v43 = vld [vmem:[#allocation2 + $0x278] sm:$0xf0]  ;;  %v10008_v62 = vld [vmem:[#allocation2 + $0x14c] sm:$0xf] }
 0x383   :  { %5264 = vmatpush.bf16.msrb.mxu1 %v8874_v58  ;;  %v8302_v58 = vor.u32 %v9996_v36, %v8299_v56  ;;  %v9980_v36 = vld [vmem:[#allocation2 + $0x6c] sm:$0xf]  ;;  %v8235_v56 = vld [vmem:[#allocation2 + $0x78] sm:$0xf0] }
 0x384   :  { %5277 = vmatpush.bf16.msrb.mxu2 %v9002_v10  ;;  %v8430_v10 = vor.u32 %v10028_v37, %v8427_v0  ;;  %v10012_v37 = vld [vmem:[#allocation2 + $0x16c] sm:$0xf]  ;;  %v8363_v0 = vld [vmem:[#allocation2 + $0x178] sm:$0xf0] }
 0x385   :  { %5290 = vmatpush.bf16.msrb.mxu3 %v9130_v41  ;;  %v8686_v41 = vor.u32 %v10092_v52, %v8683_v53  ;;  %v8619_v52 = vld [vmem:[#allocation2 + $0x378] sm:$0xf0]  ;;  %v8238_v53 = vor.u32 %v9980_v36, %v8235_v56  ;;  %v10072_v15 = vld [vmem:[#allocation2 + $0x34c] sm:$0xf] }
 0x386   :  { %5252 = vmatpush.bf16.msrb.mxu0 %v8730_v23  ;;  %v8542_v23 = vor.u32 %v10056_v33, %v8539_v59  ;;  %v8347_v11 = vld [vmem:[#allocation2 + $0x158] sm:$0xf0]  ;;  %v10040_v33 = vld [vmem:[#allocation2 + $0x24c] sm:$0xf] }
 0x387   :  { %5265 = vmatpush.bf16.msrb.mxu1 %v8858_v24  ;;  %v8267_v24 = vld [vmem:[#allocation2 + $0xb8] sm:$0xf0]  ;;  %v10156_v56 = vld [vmem:[#allocation2 + $0x5ec] sm:$0xf] }
 0x388   :  { %5278 = vmatpush.bf16.msrb.mxu2 %v8986_v50  ;;  %v10020_v50 = vld [vmem:[#allocation2 + $0x1ac] sm:$0xf]  ;;  %v8270_v49 = vor.u32 %v9988_v51, %v8267_v24  ;;  %v8475_v59 = vld [vmem:[#allocation2 + $0x258] sm:$0xf0]  ;;  %v8350_v51 = vor.u32 %v10008_v62, %v8347_v11 }
 0x389   :  { %5291 = vmatpush.bf16.msrb.mxu3 %v9114_v4  ;;  %v10084_v4 = vld [vmem:[#allocation2 + $0x3ac] sm:$0xf]  ;;  %v8398_v7 = vor.u32 %v10020_v50, %v8395_v32  ;;  %v8603_v45 = vld [vmem:[#allocation2 + $0x358] sm:$0xf0]  ;;  %v8478_v24 = vor.u32 %v10040_v33, %v8475_v59 }
 0x38a   :  { %5253 = vmatpush.bf16.msrb.mxu0 %v8714_v9  ;;  %v8251_v9 = vld [vmem:[#allocation2 + $0x98] sm:$0xf0]  ;;  %v8654_v14 = vor.u32 %v10084_v4, %v8651_v25  ;;  %v9972_v50 = vld [vmem:[#allocation2 + $0x2c] sm:$0xf]  ;;  %v8606_v63 = vor.u32 %v10072_v15, %v8603_v45 }
 0x38b   :  { %5266 = vmatpush.bf16.msrb.mxu1 %v8842_v16  ;;  %v8379_v16 = vld [vmem:[#allocation2 + $0x198] sm:$0xf0]  ;;  %v8254_v8 = vor.u32 %v9984_v46, %v8251_v9  ;;  %v10004_v32 = vld [vmem:[#allocation2 + $0x12c] sm:$0xf] }
 0x38c   :  { %5279 = vmatpush.bf16.msrb.mxu2 %v8970_v40  ;;  %v10048_v40 = vld [vmem:[#allocation2 + $0x28c] sm:$0xf]  ;;  %v8382_v19 = vor.u32 %v10016_v13, %v8379_v16  ;;  %v8331_v4 = vld [vmem:[#allocation2 + $0x138] sm:$0xf0] }
 0x38d   :  { %5292 = vmatpush.bf16.msrb.mxu3 %v9098_v18  ;;  %v8510_v22 = vor.u32 %v10048_v40, %v8507_v1  ;;  %v10036_v25 = vld [vmem:[#allocation2 + $0x22c] sm:$0xf]  ;;  %v8187_v13 = vld [vmem:[#allocation2 + $0x18] sm:$0xf0] }
 0x38e   :  { %5254 = vmatpush.bf16.msrb.mxu0 %v8698_v38  ;;  %v5048_v18 = vpop.f32.mrf.mxu0  ;;  %v8638_v38 = vor.u32 %v10080_v17, %v8635_v5  ;;  %v9968_v9 = vld [vmem:[#allocation2 + $0xc] sm:$0xf]  ;;  %v8315_v1 = vld [vmem:[#allocation2 + $0x118] sm:$0xf0] }
 0x38f   :  { %5267 = vmatpush.bf16.msrb.mxu1 %v8826_v44  ;;  %v5049_v34 = vadd.f32 %v5048_v18, %v11000_v6  ;;  %v5061_v35 = vpop.f32.mrf.mxu1  ;;  %v9976_v6 = vld [vmem:[#allocation2 + $0x4c] sm:$0xf]  ;;  %v8443_v18 = vld [vmem:[#allocation2 + $0x218] sm:$0xf0] }
 0x390   :  { %5280 = vmatpush.bf16.msrb.mxu2 %v8954_v47  ;;  %v10076_v47 = vld [vmem:[#allocation2 + $0x36c] sm:$0xf]  ;;  %v8811_v36 = vld [vmem:[#allocation2 + $0x4f8] sm:$0xf0] }
 0x391   :  { %5293 = vmatpush.bf16.msrb.mxu3 %v9082_v55  ;;  %5255 = vmatmul.bf16.vlgmr.msrb.gmra.mxu0 %v10972_v20  ;;  %v5062_v44 = vadd.f32 %v5061_v35, %v5049_v34  ;;  %v8366_v55 = vor.u32 %v10012_v37, %v8363_v0  ;;  %v8622_v27 = vor.u32 %v10076_v47, %v8619_v52  ;;  %v10000_v40 = vld [vmem:[#allocation2 + $0x10c] sm:$0xf]  ;;  %v9195_v52 = vld [vmem:[#allocation2 + $0x7f8] sm:$0xf0] }
 0x392   :  { %5299 = vmatpush.bf16.msra.mxu0 %v8302_v58  ;;  %5268 = vmatmul.bf16.vlgmr.msrb.gmra.mxu1 %v10982_v12  ;;  %v8494_v58 = vor.u32 %v10044_v42, %v8491_v43  ;;  %v10032_v17 = vld [vmem:[#allocation2 + $0x20c] sm:$0xf]  ;;  %v8190_v37 = vor.u32 %v9968_v9, %v8187_v13  ;;  %v9067_v42 = vld [vmem:[#allocation2 + $0x6f8] sm:$0xf0]  ;;  %v8318_v43 = vor.u32 %v10000_v40, %v8315_v1 }
 0x393   :  { %5312 = vmatpush.bf16.msra.mxu1 %v8430_v10  ;;  %5281 = vmatmul.bf16.vlgmr.msrb.gmra.mxu2 %v10967_v48  ;;  %v10124_v35 = vld [vmem:[#allocation2 + $0x4ec] sm:$0xf]  ;;  %v9051_v11 = vld [vmem:[#allocation2 + $0x6d8] sm:$0xf0] }
 0x394   :  { %5325 = vmatpush.bf16.msra.mxu2 %v8558_v30  ;;  %5294 = vmatmul.bf16.vlgmr.msrb.gmra.mxu3 %v10977_v57  ;;  %v8219_v30 = vld [vmem:[#allocation2 + $0x58] sm:$0xf0]  ;;  %v10188_v0 = vld [vmem:[#allocation2 + $0x6ec] sm:$0xf] }
 0x395   :  { %5338 = vmatpush.bf16.msra.mxu3 %v8686_v41  ;;  %v10220_v47 = vld [vmem:[#allocation2 + $0x7ec] sm:$0xf]  ;;  %v9179_v59 = vld [vmem:[#allocation2 + $0x7d8] sm:$0xf0] }
 0x396   :  { %5300 = vmatpush.bf16.msra.mxu0 %v8286_v26  ;;  %v5074_v10 = vpop.f32.mrf.mxu2  ;;  %v10152_v62 = vld [vmem:[#allocation2 + $0x5cc] sm:$0xf] }
 0x397   :  { %5313 = vmatpush.bf16.msra.mxu1 %v8414_v29  ;;  %v5075_v28 = vadd.f32 %v5074_v10, %v5062_v44  ;;  %v5087_v41 = vpop.f32.mrf.mxu3  ;;  %v8222_v29 = vor.u32 %v9976_v6, %v8219_v30  ;;  %v5063_v2 = vpop.f32.mrf.mxu1  ;;  %v8446_v44 = vor.u32 %v10032_v17, %v8443_v18  ;;  %v9070_v10 = vor.u32 %v10188_v0, %v9067_v42  ;;  %v10120_v6 = vld [vmem:[#allocation2 + $0x4cc] sm:$0xf]  ;;  %v8795_v30 = vld [vmem:[#allocation2 + $0x4d8] sm:$0xf0] }
 0x398   :  { %5326 = vmatpush.bf16.msra.mxu2 %v8542_v23  ;;  %v5050_v23 = vpop.f32.mrf.mxu0  ;;  %v10216_v33 = vld [vmem:[#allocation2 + $0x7cc] sm:$0xf]  ;;  %v8798_v15 = vor.u32 %v10120_v6, %v8795_v30  ;;  %v9035_v2 = vld [vmem:[#allocation2 + $0x6b8] sm:$0xf0] }
 0x399   :  { %5339 = vmatpush.bf16.msra.mxu3 %v8670_v54  ;;  %v11007_v26 = vadd.f32 %v5087_v41, %v5075_v28  ;;  %v8203_v54 = vld [vmem:[#allocation2 + $0x38] sm:$0xf0]  ;;  %v10184_v41 = vld [vmem:[#allocation2 + $0x6cc] sm:$0xf] }
 0x39a   :  { %5301 = vmatpush.bf16.msra.mxu0 %v8270_v49  ;;  %v8459_v49 = vld [vmem:[#allocation2 + $0x238] sm:$0xf0]  ;;  %v8206_v46 = vor.u32 %v9972_v50, %v8203_v54  ;;  %v10116_v23 = vld [vmem:[#allocation2 + $0x4ac] sm:$0xf]  ;;  %v9182_v50 = vor.u32 %v10216_v33, %v9179_v59 }
 0x39b   :  { %5314 = vmatpush.bf16.msra.mxu1 %v8398_v7  ;;  %v10068_v7 = vld [vmem:[#allocation2 + $0x32c] sm:$0xf]  ;;  %v8462_v16 = vor.u32 %v10036_v25, %v8459_v49  ;;  %v8923_v28 = vld [vmem:[#allocation2 + $0x5d8] sm:$0xf0]  ;;  %v5407_v25 = vrot.slane %v11007_v26, 4 }
 0x39c   :  { %5327 = vmatpush.bf16.msra.mxu2 %v8526_v39  ;;  %v8587_v39 = vld [vmem:[#allocation2 + $0x338] sm:$0xf0]  ;;  %v8926_v45 = vor.u32 %v10152_v62, %v8923_v28  ;;  %v10144_v9 = vld [vmem:[#allocation2 + $0x58c] sm:$0xf] }
 0x39d   :  { %5340 = vmatpush.bf16.msra.mxu3 %v8654_v14  ;;  %v8334_v14 = vor.u32 %v10004_v32, %v8331_v4  ;;  %v8907_v54 = vld [vmem:[#allocation2 + $0x5b8] sm:$0xf0]  ;;  %v10180_v32 = vld [vmem:[#allocation2 + $0x6ac] sm:$0xf]  ;;  %v5408_v1 = vadd.f32 %v5407_v25, %v11007_v26 }
 0x39e   :  { %5302 = vmatpush.bf16.msra.mxu0 %v8254_v8  ;;  %v5076_v5 = vpop.f32.mrf.mxu2  ;;  %v8590_v8 = vor.u32 %v10068_v7, %v8587_v39  ;;  %v9163_v4 = vld [vmem:[#allocation2 + $0x7b8] sm:$0xf0]  ;;  %v9038_v39 = vor.u32 %v10180_v32, %v9035_v2  ;;  %v10208_v40 = vld [vmem:[#allocation2 + $0x78c] sm:$0xf] }
 0x39f   :  { %5315 = vmatpush.bf16.msra.mxu1 %v8382_v19  ;;  %v10064_v19 = vld [vmem:[#allocation2 + $0x30c] sm:$0xf]  ;;  %v5089_v34 = vpop.f32.mrf.mxu3  ;;  %v9131_v42 = vld [vmem:[#allocation2 + $0x778] sm:$0xf0] }
 0x3a0   :  { %5328 = vmatpush.bf16.msra.mxu2 %v8510_v22  ;;  %v8571_v22 = vld [vmem:[#allocation2 + $0x318] sm:$0xf0]  ;;  %v10108_v18 = vld [vmem:[#allocation2 + $0x46c] sm:$0xf] }
 0x3a1   :  { %5341 = vmatpush.bf16.msra.mxu3 %v8638_v38  ;;  %v8939_v38 = vld [vmem:[#allocation2 + $0x5f8] sm:$0xf0]  ;;  %v10204_v0 = vld [vmem:[#allocation2 + $0x76c] sm:$0xf] }
 0x3a2   :  { %5303 = vmatpush.bf16.msra.mxu0 %v8238_v53  ;;  %v8574_v53 = vor.u32 %v10064_v19, %v8571_v22  ;;  %v8747_v19 = vld [vmem:[#allocation2 + $0x478] sm:$0xf0]  ;;  %v10140_v22 = vld [vmem:[#allocation2 + $0x56c] sm:$0xf]  ;;  %v9134_v6 = vor.u32 %v10204_v0, %v9131_v42 }
 0x3a3   :  { %5316 = vmatpush.bf16.msra.mxu1 %v8366_v55  ;;  %v8814_v55 = vor.u32 %v10124_v35, %v8811_v36  ;;  %v8875_v36 = vld [vmem:[#allocation2 + $0x578] sm:$0xf0]  ;;  %v10168_v62 = vld [vmem:[#allocation2 + $0x64c] sm:$0xf] }
 0x3a4   :  { %5329 = vmatpush.bf16.msra.mxu2 %v8494_v58  ;;  %v8942_v58 = vor.u32 %v10156_v56, %v8939_v38  ;;  %v10172_v56 = vld [vmem:[#allocation2 + $0x66c] sm:$0xf]  ;;  %v8859_v30 = vld [vmem:[#allocation2 + $0x558] sm:$0xf0] }
 0x3a5   :  { %5342 = vmatpush.bf16.msra.mxu3 %v8622_v27  ;;  %v9198_v27 = vor.u32 %v10220_v47, %v9195_v52  ;;  %v8878_v47 = vor.u32 %v10140_v22, %v8875_v36  ;;  %v9115_v33 = vld [vmem:[#allocation2 + $0x758] sm:$0xf0] }
 0x3a6   :  { %5304 = vmatpush.bf16.msra.mxu0 %v8222_v29  ;;  %v9054_v29 = vor.u32 %v10184_v41, %v9051_v11  ;;  %v10200_v11 = vld [vmem:[#allocation2 + $0x74c] sm:$0xf]  ;;  %v8971_v25 = vld [vmem:[#allocation2 + $0x638] sm:$0xf0] }
 0x3a7   :  { %5317 = vmatpush.bf16.msra.mxu1 %v8350_v51  ;;  %v8779_v51 = vld [vmem:[#allocation2 + $0x4b8] sm:$0xf0]  ;;  %v9118_v2 = vor.u32 %v10200_v11, %v9115_v33 }
 0x3a8   :  { %5330 = vmatpush.bf16.msra.mxu2 %v8478_v24  ;;  %v10148_v24 = vld [vmem:[#allocation2 + $0x5ac] sm:$0xf]  ;;  %v8782_v49 = vor.u32 %v10116_v23, %v8779_v51 }
 0x3a9   :  { %5343 = vmatpush.bf16.msra.mxu3 %v8606_v63  ;;  %v10212_v63 = vld [vmem:[#allocation2 + $0x7ac] sm:$0xf]  ;;  %v8910_v7 = vor.u32 %v10148_v24, %v8907_v54 }
 0x3aa   :  { %5305 = vmatpush.bf16.msra.mxu0 %v8206_v46  ;;  %v8763_v46 = vld [vmem:[#allocation2 + $0x498] sm:$0xf0]  ;;  %v9166_v13 = vor.u32 %v10212_v63, %v9163_v4  ;;  %v10100_v24 = vld [vmem:[#allocation2 + $0x42c] sm:$0xf] }
 0x3ab   :  { %5318 = vmatpush.bf16.msra.mxu1 %v8334_v14  ;;  %v8891_v14 = vld [vmem:[#allocation2 + $0x598] sm:$0xf0]  ;;  %v10132_v54 = vld [vmem:[#allocation2 + $0x52c] sm:$0xf] }
 0x3ac   :  { %5331 = vmatpush.bf16.msra.mxu2 %v8462_v16  ;;  %v10176_v16 = vld [vmem:[#allocation2 + $0x68c] sm:$0xf]  ;;  %v8843_v63 = vld [vmem:[#allocation2 + $0x538] sm:$0xf0] }
 0x3ad   :  { %5344 = vmatpush.bf16.msra.mxu3 %v8590_v8  ;;  %v10164_v4 = vld [vmem:[#allocation2 + $0x62c] sm:$0xf] }
 0x3ae   :  { %5306 = vmatpush.bf16.msra.mxu0 %v8190_v37  ;;  %v5100_v5 = vpop.f32.mrf.mxu0  ;;  %v9003_v37 = vld [vmem:[#allocation2 + $0x678] sm:$0xf0] }
 0x3af   :  { %5319 = vmatpush.bf16.msra.mxu1 %v8318_v43  ;;  %v5113_v34 = vpop.f32.mrf.mxu1  ;;  %v5409_v43 = vrot.slane %v5408_v1, 2  ;;  %v9006_v52 = vor.u32 %v10172_v56, %v9003_v37 }
 0x3b0   :  { %5332 = vmatpush.bf16.msra.mxu2 %v8446_v44  ;;  %v5114_v38 = vadd.f32 %v5113_v34, %v5100_v5  ;;  %v8750_v44 = vor.u32 %v10108_v18, %v8747_v19 }
 0x3b1   :  { %5345 = vmatpush.bf16.msra.mxu3 %v8574_v53  ;;  %5307 = vmatmul.bf16.vlgmr.msra.gmra.mxu0 %v10948_v60  ;;  %v9019_v60 = vld [vmem:[#allocation2 + $0x698] sm:$0xf0]  ;;  %v10104_v53 = vld [vmem:[#allocation2 + $0x44c] sm:$0xf]  ;;  %v5410_v59 = vadd.f32 %v5409_v43, %v5408_v1 }
 0x3b2   :  { %5351 = vmatpush.bf16.msrb.mxu0 %v8814_v55  ;;  %5320 = vmatmul.bf16.vlgmr.msra.gmra.mxu1 %v10958_v3  ;;  %v8894_v3 = vor.u32 %v10144_v9, %v8891_v14  ;;  %v9022_v8 = vor.u32 %v10176_v16, %v9019_v60  ;;  %v8731_v55 = vld [vmem:[#allocation2 + $0x458] sm:$0xf0]  ;;  %v8974_v9 = vor.u32 %v10164_v4, %v8971_v25  ;;  %v10128_v16 = vld [vmem:[#allocation2 + $0x50c] sm:$0xf] }
 0x3b3   :  { %5364 = vmatpush.bf16.msrb.mxu1 %v8942_v58  ;;  %5333 = vmatmul.bf16.vlgmr.msra.gmra.mxu2 %v10943_v31  ;;  %v10112_v31 = vld [vmem:[#allocation2 + $0x48c] sm:$0xf]  ;;  %v8699_v14 = vld [vmem:[#allocation2 + $0x418] sm:$0xf0] }
 0x3b4   :  { %5377 = vmatpush.bf16.msrb.mxu2 %v9070_v10  ;;  %5346 = vmatmul.bf16.vlgmr.msra.gmra.mxu3 %v10953_v61  ;;  %v9147_v61 = vld [vmem:[#allocation2 + $0x798] sm:$0xf0]  ;;  %v8766_v17 = vor.u32 %v10112_v31, %v8763_v46  ;;  %v10136_v58 = vld [vmem:[#allocation2 + $0x54c] sm:$0xf]  ;;  %v8846_v46 = vor.u32 %v10132_v54, %v8843_v63 }
 0x3b5   :  { %5390 = vmatpush.bf16.msrb.mxu3 %v9198_v27  ;;  %v9150_v35 = vor.u32 %v10208_v40, %v9147_v61  ;;  %v8987_v27 = vld [vmem:[#allocation2 + $0x658] sm:$0xf0]  ;;  %v8862_v23 = vor.u32 %v10136_v58, %v8859_v30  ;;  %v10160_v1 = vld [vmem:[#allocation2 + $0x60c] sm:$0xf] }
 0x3b6   :  { %5352 = vmatpush.bf16.msrb.mxu0 %v8798_v15  ;;  %v5126_v10 = vpop.f32.mrf.mxu2  ;;  %v8734_v15 = vor.u32 %v10104_v53, %v8731_v55  ;;  %v8990_v51 = vor.u32 %v10168_v62, %v8987_v27  ;;  %v8827_v61 = vld [vmem:[#allocation2 + $0x518] sm:$0xf0] }
 0x3b7   :  { %5365 = vmatpush.bf16.msrb.mxu1 %v8926_v45  ;;  %v5127_v28 = vadd.f32 %v5126_v10, %v5114_v38  ;;  %v5139_v41 = vpop.f32.mrf.mxu3  ;;  %v5115_v32 = vpop.f32.mrf.mxu1  ;;  %v8830_v22 = vor.u32 %v10128_v16, %v8827_v61 }
 0x3b8   :  { %5378 = vmatpush.bf16.msrb.mxu2 %v9054_v29  ;;  %v5102_v29 = vpop.f32.mrf.mxu0 }
 0x3b9   :  { %5391 = vmatpush.bf16.msrb.mxu3 %v9182_v50  ;;  %v5140_v45 = vadd.f32 %v5139_v41, %v5127_v28  ;;  %v8715_v50 = vld [vmem:[#allocation2 + $0x438] sm:$0xf0] }
 0x3ba   :  { %5353 = vmatpush.bf16.msrb.mxu0 %v8782_v49  ;;  %v10196_v49 = vld [vmem:[#allocation2 + $0x72c] sm:$0xf]  ;;  %v8718_v31 = vor.u32 %v10100_v24, %v8715_v50 }
 0x3bb   :  { %5366 = vmatpush.bf16.msrb.mxu1 %v8910_v7  ;;  %v9099_v7 = vld [vmem:[#allocation2 + $0x738] sm:$0xf0] }
 0x3bc   :  { %5379 = vmatpush.bf16.msrb.mxu2 %v9038_v39  ;;  %v5411_v39 = vrot.slane %v5410_v59, 1  ;;  %v9102_v40 = vor.u32 %v10196_v49, %v9099_v7 }
 0x3bd   :  { %5392 = vmatpush.bf16.msrb.mxu3 %v9166_v13  ;;  %v10096_v13 = vld [vmem:[#allocation2 + $0x40c] sm:$0xf] }
 0x3be   :  { %5354 = vmatpush.bf16.msrb.mxu0 %v8766_v17  ;;  %v5128_v60 = vpop.f32.mrf.mxu2  ;;  %v8955_v17 = vld [vmem:[#allocation2 + $0x618] sm:$0xf0]  ;;  %v5412_v18 = vadd.f32 %v5411_v39, %v5410_v59  ;;  %v8702_v19 = vor.u32 %v10096_v13, %v8699_v14 }
 0x3bf   :  { %5367 = vmatpush.bf16.msrb.mxu1 %v8894_v3  ;;  %v5141_v5 = vpop.f32.mrf.mxu3  ;;  %v10192_v3 = vld [vmem:[#allocation2 + $0x70c] sm:$0xf]  ;;  %v8958_v34 = vor.u32 %v10160_v1, %v8955_v17 }
 0x3c0   :  { %5380 = vmatpush.bf16.msrb.mxu2 %v9022_v8  ;;  %v9083_v8 = vld [vmem:[#allocation2 + $0x718] sm:$0xf0]  ;;  %v5431_v36 = vmul.f32 %v5412_v18, %v10747_v21 }
 0x3c1   :  { %5393 = vmatpush.bf16.msrb.mxu3 %v9150_v35  ;;  %v9086_v35 = vor.u32 %v10192_v3, %v9083_v8 }
 0x3c2   :  { %5355 = vmatpush.bf16.msrb.mxu0 %v8750_v44  ;;  %v11018_v56 = vsub.f32 %v11007_v26, %v5431_v36 }
 0x3c3   :  { %5368 = vmatpush.bf16.msrb.mxu1 %v8878_v47 }
 0x3c4   :  { %5381 = vmatpush.bf16.msrb.mxu2 %v9006_v52  ;;  %v5439_v37 = vmul.f32 %v11018_v56, %v11018_v56 }
 0x3c5   :  { %5394 = vmatpush.bf16.msrb.mxu3 %v9134_v6 }
 0x3c6   :  { %5356 = vmatpush.bf16.msrb.mxu0 %v8734_v15  ;;  %v5443_v43 = vrot.slane %v5439_v37, 4 }
 0x3c7   :  { %5369 = vmatpush.bf16.msrb.mxu1 %v8862_v23 }
 0x3c8   :  { %5382 = vmatpush.bf16.msrb.mxu2 %v8990_v51  ;;  %v5444_v52 = vadd.f32 %v5443_v43, %v5439_v37 }
 0x3c9   :  { %5395 = vmatpush.bf16.msrb.mxu3 %v9118_v2 }
 0x3ca   :  { %5357 = vmatpush.bf16.msrb.mxu0 %v8718_v31 }
 0x3cb   :  { %5370 = vmatpush.bf16.msrb.mxu1 %v8846_v46 }
 0x3cc   :  { %5383 = vmatpush.bf16.msrb.mxu2 %v8974_v9 }
 0x3cd   :  { %5396 = vmatpush.bf16.msrb.mxu3 %v9102_v40 }
 0x3ce   :  { %5358 = vmatpush.bf16.msrb.mxu0 %v8702_v19  ;;  %v5152_v38 = vpop.f32.mrf.mxu0 }
 0x3cf   :  { %5371 = vmatpush.bf16.msrb.mxu1 %v8830_v22  ;;  %v5153_v0 = vadd.f32 %v5152_v38, %v5140_v45  ;;  %v5165_v42 = vpop.f32.mrf.mxu1 }
 0x3d0   :  { %5384 = vmatpush.bf16.msrb.mxu2 %v8958_v34 }
 0x3d1   :  { %5397 = vmatpush.bf16.msrb.mxu3 %v9086_v35  ;;  %5359 = vmatmul.bf16.vlgmr.msrb.gmra.mxu0 %v10972_v20  ;;  %v5166_v44 = vadd.f32 %v5165_v42, %v5153_v0 }
 0x3d2   :  { %5372 = vmatmul.bf16.vlgmr.msrb.gmra.mxu1 %v10982_v12  ;;  %v5445_v12 = vrot.slane %v5444_v52, 2 }
 0x3d3   :  { %5385 = vmatmul.bf16.vlgmr.msrb.gmra.mxu2 %v10967_v48 }
 0x3d4   :  { %5398 = vmatmul.bf16.vlgmr.msrb.gmra.mxu3 %v10977_v57  ;;  %v5446_v57 = vadd.f32 %v5445_v12, %v5444_v52 }
 0x3d6   :  { %v5178_v47 = vpop.f32.mrf.mxu2  ;;  %v5154_v55 = vpop.f32.mrf.mxu0  ;;  %v5447_v28 = vrot.slane %v5446_v57, 1 }
 0x3d7   :  { %v5179_v20 = vadd.f32 %v5178_v47, %v5166_v44  ;;  %v5191_v53 = vpop.f32.mrf.mxu3  ;;  %v5167_v58 = vpop.f32.mrf.mxu1 }
 0x3d8   :  { %v5448_v33 = vadd.f32 %v5447_v28, %v5446_v57 }
 0x3d9   :  { %v5192_v26 = vadd.f32 %v5191_v53, %v5179_v20 }
 0x3da   :  { %v5467_v45 = vmul.f32 %v5448_v33, %v10747_v21 }
 0x3db   :  { %v5413_v10 = vrot.slane %v5192_v26, 4 }
 0x3dc   :  { %v5471_v51 = vadd.f32 1e-05, %v5467_v45 }
 0x3dd   :  { %v5414_v48 = vadd.f32 %v5413_v10, %v5192_v26 }
 0x3de   :  { %v5180_v6 = vpop.f32.mrf.mxu2  ;;  %10348 = vrsqrt.f32 %v5471_v51  ;;  %vm5481_vm8 = vweird.f32 %v5471_v51 }
 0x3df   :  { %v5415_v30 = vrot.slane %v5414_v48, 2  ;;  %v5193_v62 = vpop.f32.mrf.mxu3 }
 0x3e1   :  { %v5416_v27 = vadd.f32 %v5415_v30, %v5414_v48 }
 0x3e3   :  { %v5417_v41 = vrot.slane %v5416_v27, 1 }
 0x3e4   :  { %v10349_v13 = vpop.eup %10348 }
 0x3e5   :  { %v5418_v11 = vadd.f32 %v5417_v41, %v5416_v27  ;;  %v5476_v60 = vmul.f32 %v10349_v13, %v5471_v51  ;;  %vm5482_vm4 = vweird.f32 %v10349_v13 }
 0x3e6   :  { %vm5483_vm9 = vmor %vm5481_vm8, %vm5482_vm4 }
 0x3e7   :  { %v5432_v59 = vmul.f32 %v5418_v11, %v10747_v21  ;;  %v5477_v1 = vmul.f32 %v10349_v13, %v5476_v60 }
 0x3e9   :  { %v11026_v15 = vsub.f32 %v5192_v26, %v5432_v59  ;;  %v5478_v5 = vmul.f32 0.5, %v5477_v1 }
 0x3eb   :  { %v5440_v29 = vmul.f32 %v11026_v15, %v11026_v15  ;;  %v5479_v18 = vsub.f32 1.5, %v5478_v5 }
 0x3ed   :  { %v5449_v23 = vrot.slane %v5440_v29, 4  ;;  %v5480_v34 = vmul.f32 %v10349_v13, %v5479_v18 }
 0x3ee   :  { %v5204_v50 = vpop.f32.mrf.mxu0 }
 0x3ef   :  { %v5450_v24 = vadd.f32 %v5449_v23, %v5440_v29  ;;  %v5217_v54 = vpop.f32.mrf.mxu1  ;;  %v5484_v42 = vsel %vm5483_vm9, %v10349_v13, %v5480_v34 }
 0x3f0   :  { %v5218_v2 = vadd.f32 %v5217_v54, %v5204_v50 }
 0x3f1   :  { %v5451_v32 = vrot.slane %v5450_v24, 2 }
 0x3f3   :  { %v5452_v63 = vadd.f32 %v5451_v32, %v5450_v24 }
 0x3f5   :  { %v5453_v25 = vrot.slane %v5452_v63, 1 }
 0x3f6   :  { %v5230_v4 = vpop.f32.mrf.mxu2  ;;  %v5206_v46 = vpop.f32.mrf.mxu0 }
 0x3f7   :  { %v5231_v49 = vadd.f32 %v5230_v4, %v5218_v2  ;;  %v5243_v7 = vpop.f32.mrf.mxu3  ;;  %v5454_v39 = vadd.f32 %v5453_v25, %v5452_v63  ;;  %v5219_v9 = vpop.f32.mrf.mxu1 }
 0x3f9   :  { %v5244_v31 = vadd.f32 %v5243_v7, %v5231_v49  ;;  %v5468_v14 = vmul.f32 %v5454_v39, %v10747_v21 }
 0x3fb   :  { %v5472_v16 = vadd.f32 1e-05, %v5468_v14 }
 0x3fd   :  { %10350 = vrsqrt.f32 %v5472_v16  ;;  %vm5491_vm6 = vweird.f32 %v5472_v16 }
 0x3fe   :  { %v5232_v40 = vpop.f32.mrf.mxu2 }
 0x3ff   :  { %v5245_v61 = vpop.f32.mrf.mxu3 }
 0x403   :  { %v10351_v17 = vpop.eup %10350 }
 0x404   :  { %v5486_v3 = vmul.f32 %v10351_v17, %v5472_v16  ;;  %vm5492_vm3 = vweird.f32 %v10351_v17 }
 0x405   :  { %vm5493_vm7 = vmor %vm5491_vm6, %vm5492_vm3 }
 0x406   :  { %v5487_v8 = vmul.f32 %v10351_v17, %v5486_v3 }
 0x408   :  { %v5488_v19 = vmul.f32 0.5, %v5487_v8 }
 0x40a   :  { %v5489_v22 = vsub.f32 1.5, %v5488_v19 }
 0x40c   :  { %v5490_v35 = vmul.f32 %v10351_v17, %v5489_v22 }
 0x40e   :  { %v5256_v36 = vpop.f32.mrf.mxu0  ;;  %v5494_v38 = vsel %vm5493_vm7, %v10351_v17, %v5490_v35 }
 0x40f   :  { %v5269_v37 = vpop.f32.mrf.mxu1  ;;  %v5519_v0 = vrot.slane %v5494_v38, 7  ;;  %v5257_v47 = vadd.f32 %v5256_v36, %v5244_v31 }
 0x411   :  { %v11033_v43 = vsel %vm3365_vm5, %v5484_v42, %v5519_v0  ;;  %v5270_v26 = vadd.f32 %v5269_v37, %v5257_v47 }
 0x416   :  { %v5282_v44 = vpop.f32.mrf.mxu2  ;;  %v5258_v20 = vpop.f32.mrf.mxu0 }
 0x417   :  { %v5295_v52 = vpop.f32.mrf.mxu3  ;;  %v5271_v53 = vpop.f32.mrf.mxu1  ;;  %v5283_v58 = vadd.f32 %v5282_v44, %v5270_v26 }
 0x419   :  { %v5296_v10 = vadd.f32 %v5295_v52, %v5283_v58 }
 0x41b   :  { %v5419_v48 = vrot.slane %v5296_v10, 4 }
 0x41d   :  { %v5420_v6 = vadd.f32 %v5419_v48, %v5296_v10 }
 0x41e   :  { %v5284_v55 = vpop.f32.mrf.mxu2 }
 0x41f   :  { %v5297_v12 = vpop.f32.mrf.mxu3  ;;  %v5421_v57 = vrot.slane %v5420_v6, 2 }
 0x421   :  { %v5422_v27 = vadd.f32 %v5421_v57, %v5420_v6 }
 0x423   :  { %v5423_v11 = vrot.slane %v5422_v27, 1 }
 0x425   :  { %v5424_v45 = vadd.f32 %v5423_v11, %v5422_v27 }
 0x427   :  { %v5433_v51 = vmul.f32 %v5424_v45, %v10747_v21 }
 0x429   :  { %v11036_v24 = vsub.f32 %v5296_v10, %v5433_v51  ;;  %v5406_v51 = vld [vmem:[#allocation14 + $0x3] ss:$8 sm:$0xf] }
 0x42b   :  { %v5441_v54 = vmul.f32 %v11036_v24, %v11036_v24 }
 0x42d   :  { %v5455_v2 = vrot.slane %v5441_v54, 4 }
 0x42e   :  { %v5308_v30 = vpop.f32.mrf.mxu0 }
 0x42f   :  { %v5321_v62 = vpop.f32.mrf.mxu1  ;;  %v5456_v7 = vadd.f32 %v5455_v2, %v5441_v54  ;;  %v5541_v2 = vperm.slane %v5406_v51, 0 }
 0x430   :  { %v5322_v50 = vadd.f32 %v5321_v62, %v5308_v30 }
 0x431   :  { %v5457_v46 = vrot.slane %v5456_v7, 2 }
 0x433   :  { %v5458_v40 = vadd.f32 %v5457_v46, %v5456_v7 }
 0x435   :  { %v5459_v5 = vrot.slane %v5458_v40, 1 }
 0x436   :  { %v5334_v28 = vpop.f32.mrf.mxu2  ;;  %v5310_v33 = vpop.f32.mrf.mxu0 }
 0x437   :  { %v5347_v41 = vpop.f32.mrf.mxu3  ;;  %v5323_v59 = vpop.f32.mrf.mxu1  ;;  %v5335_v32 = vadd.f32 %v5334_v28, %v5322_v50  ;;  %v5460_v19 = vadd.f32 %v5459_v5, %v5458_v40 }
 0x439   :  { %v5348_v63 = vadd.f32 %v5347_v41, %v5335_v32  ;;  %v5469_v35 = vmul.f32 %v5460_v19, %v10747_v21 }
 0x43b   :  { %v5473_v38 = vadd.f32 1e-05, %v5469_v35 }
 0x43d   :  { %10352 = vrsqrt.f32 %v5473_v38  ;;  %vm5501_vm11 = vweird.f32 %v5473_v38 }
 0x43e   :  { %v5336_v29 = vpop.f32.mrf.mxu2 }
 0x43f   :  { %v5349_v23 = vpop.f32.mrf.mxu3 }
 0x440   :  { %v5404_v23 = vld [vmem:[#allocation14 + $0x2] ss:$8 sm:$0xf] }
 0x443   :  { %v10353_v20 = vpop.eup %10352 }
 0x444   :  { %v5496_v55 = vmul.f32 %v10353_v20, %v5473_v38  ;;  %vm5502_vm10 = vweird.f32 %v10353_v20 }
 0x445   :  { %vm5503_vm13 = vmor %vm5501_vm11, %vm5502_vm10 }
 0x446   :  { %v5497_v10 = vmul.f32 %v10353_v20, %v5496_v55 }
 0x448   :  { %v5498_v48 = vmul.f32 0.5, %v5497_v10 }
 0x44a   :  { %v5499_v57 = vsub.f32 1.5, %v5498_v48 }
 0x44c   :  { %v5500_v27 = vmul.f32 %v10353_v20, %v5499_v57 }
 0x44e   :  { %v5360_v4 = vpop.f32.mrf.mxu0  ;;  %v5504_v11 = vsel %vm5503_vm13, %v10353_v20, %v5500_v27 }
 0x44f   :  { %v5373_v25 = vpop.f32.mrf.mxu1  ;;  %v5361_v49 = vadd.f32 %v5360_v4, %v5348_v63  ;;  %v5520_v45 = vrot.slane %v5504_v11, 6  ;;  %v5542_v63 = vperm.slane %v5406_v51, 1  ;;  %v5543_v4 = vperm.slane %v5406_v51, 2 }
 0x451   :  { %v5374_v39 = vadd.f32 %v5373_v25, %v5361_v49  ;;  %v5544_v25 = vperm.slane %v5406_v51, 3 }
 0x456   :  { %v5386_v31 = vpop.f32.mrf.mxu2  ;;  %v5362_v14 = vpop.f32.mrf.mxu0 }
 0x457   :  { %v5387_v9 = vadd.f32 %v5386_v31, %v5374_v39  ;;  %v5399_v13 = vpop.f32.mrf.mxu3  ;;  %v5375_v16 = vpop.f32.mrf.mxu1 }
 0x459   :  { %v5400_v60 = vadd.f32 %v5399_v13, %v5387_v9 }
 0x45b   :  { %v5425_v61 = vrot.slane %v5400_v60, 4 }
 0x45d   :  { %v5426_v1 = vadd.f32 %v5425_v61, %v5400_v60 }
 0x45e   :  { %v5388_v17 = vpop.f32.mrf.mxu2 }
 0x45f   :  { %v5427_v3 = vrot.slane %v5426_v1, 2  ;;  %v5401_v8 = vpop.f32.mrf.mxu3 }
 0x461   :  { %v5428_v18 = vadd.f32 %v5427_v3, %v5426_v1 }
 0x463   :  { %v5429_v22 = vrot.slane %v5428_v18, 1 }
 0x465   :  { %v5430_v34 = vadd.f32 %v5429_v22, %v5428_v18 }
 0x467   :  { %v5434_v36 = vmul.f32 %v5430_v34, %v10747_v21 }
 0x469   :  { %v5438_v37 = vsub.f32 %v5400_v60, %v5434_v36 }
 0x46b   :  { %v5442_v0 = vmul.f32 %v5438_v37, %v5438_v37 }
 0x46d   :  { %v5461_v42 = vrot.slane %v5442_v0, 4 }
 0x46f   :  { %v5462_v44 = vadd.f32 %v5461_v42, %v5442_v0 }
 0x471   :  { %v5463_v47 = vrot.slane %v5462_v44, 2 }
 0x473   :  { %v5464_v52 = vadd.f32 %v5463_v47, %v5462_v44 }
 0x475   :  { %v5465_v53 = vrot.slane %v5464_v52, 1 }
 0x477   :  { %v5466_v26 = vadd.f32 %v5465_v53, %v5464_v52 }
 0x479   :  { %v5470_v58 = vmul.f32 %v5466_v26, %v10747_v21 }
 0x47b   :  { %v5474_v12 = vadd.f32 1e-05, %v5470_v58 }
 0x47d   :  { %10354 = vrsqrt.f32 %v5474_v12  ;;  %vm5511_vm0 = vweird.f32 %v5474_v12 }
 0x483   :  { %v10355_v6 = vpop.eup %10354 }
 0x484   :  { %v5506_v30 = vmul.f32 %v10355_v6, %v5474_v12  ;;  %vm5512_vm12 = vweird.f32 %v10355_v6 }
 0x485   :  { %vm5513_vm1 = vmor %vm5511_vm0, %vm5512_vm12 }
 0x486   :  { %v5507_v62 = vmul.f32 %v10355_v6, %v5506_v30 }
 0x488   :  { %v5508_v28 = vmul.f32 0.5, %v5507_v62 }
 0x48a   :  { %v5509_v41 = vsub.f32 1.5, %v5508_v28 }
 0x48c   :  { %v5510_v33 = vmul.f32 %v10355_v6, %v5509_v41 }
 0x48e   :  { %v5514_v59 = vsel %vm5513_vm1, %v10355_v6, %v5510_v33 }
 0x48f   :  { %v5521_v29 = vrot.slane %v5514_v59, 5 }
 0x491   :  { %v5523_v50 = vsel %vm3367_vm14, %v5520_v45, %v5521_v29 }
 0x492   :  { %v5524_v54 = vsel %vm3369_vm15, %v11033_v43, %v5523_v50 }
 0x493   :  { %v5526_v32 = vmul.f32 %v5524_v54, %v5404_v23 }
 0x495   :  { %v5528_v49 = vperm.slane %v5526_v32, 0  ;;  %v5529_v7 = vperm.slane %v5526_v32, 1  ;;  %v5530_v39 = vperm.slane %v5526_v32, 2  ;;  %v5531_v31 = vperm.slane %v5526_v32, 3 }
 0x497   :  { %v5536_v46 = vmul.f32 %v5528_v49, %v11018_v56  ;;  %v5537_v9 = vmul.f32 %v5529_v7, %v11026_v15  ;;  %v5538_v13 = vmul.f32 %v5530_v39, %v11036_v24  ;;  %v5539_v14 = vmul.f32 %v5531_v31, %v5438_v37 }
 0x499   :  { %v11049_v16 = vadd.f32 %v5541_v2, %v5536_v46  ;;  %v11051_v60 = vadd.f32 %v5542_v63, %v5537_v9  ;;  %v11053_v43 = vadd.f32 %v5543_v4, %v5538_v13  ;;  %v11055_v40 = vadd.f32 %v5544_v25, %v5539_v14 }
 0x49b   :  { %v5553_v61 = vmax.f32 %v11049_v16, 0.0  ;;  %v5554_v1 = vmax.f32 %v11051_v60, 0.0  ;;  %v5555_v17 = vmax.f32 %v11053_v43, 0.0  ;;  %v5556_v56 = vmax.f32 %v11055_v40, 0.0 }
 0x49c   :  { %10564 = dma.done.wait [#allocation8 + $0x1], 8192 }
 0x49d   :  { %10565 = vsyncadd [#allocation8 + $0x1], 4294959104  ;;  %v9257_v15 = vld [vmem:[#allocation3 + $0x70] sm:$0xf]  ;;  %v10238_v24 = vld [vmem:[#allocation3 + $0x74] sm:$0xf0] }
 0x49e   :  { %v9321_v5 = vld [vmem:[#allocation3 + $0xf0] sm:$0xf]  ;;  %v9258_v3 = vor.u32 %v10238_v24, %v9257_v15  ;;  %v10254_v8 = vld [vmem:[#allocation3 + $0xf4] sm:$0xf0]  ;;  %v9249_v37 = vld [vmem:[#allocation3 + $0x60] sm:$0xf] }
 0x49f   :  { %v9385_v18 = vld [vmem:[#allocation3 + $0x170] sm:$0xf]  ;;  %v10270_v19 = vld [vmem:[#allocation3 + $0x174] sm:$0xf0]  ;;  %v9322_v22 = vor.u32 %v10254_v8, %v9321_v5  ;;  %v10236_v0 = vld [vmem:[#allocation3 + $0x64] sm:$0xf0] }
 0x4a0   :  { %v9386_v34 = vor.u32 %v10270_v19, %v9385_v18  ;;  %v9449_v35 = vld [vmem:[#allocation3 + $0x1f0] sm:$0xf]  ;;  %v10286_v36 = vld [vmem:[#allocation3 + $0x1f4] sm:$0xf0]  ;;  %5949 = vmatpush.bf16.msra.mxu0 %v9258_v3  ;;  %v9313_v42 = vld [vmem:[#allocation3 + $0xe0] sm:$0xf]  ;;  %v9250_v47 = vor.u32 %v10236_v0, %v9249_v37 }
 0x4a1   :  { %v9450_v38 = vor.u32 %v10286_v36, %v9449_v35  ;;  %v10252_v44 = vld [vmem:[#allocation3 + $0xe4] sm:$0xf0]  ;;  %5962 = vmatpush.bf16.msra.mxu1 %v9322_v22  ;;  %v9377_v20 = vld [vmem:[#allocation3 + $0x160] sm:$0xf]  ;;  %v9241_v12 = vld [vmem:[#allocation3 + $0x50] sm:$0xf] }
 0x4a2   :  { %5975 = vmatpush.bf16.msra.mxu2 %v9386_v34  ;;  %v9314_v52 = vor.u32 %v10252_v44, %v9313_v42  ;;  %v10268_v53 = vld [vmem:[#allocation3 + $0x164] sm:$0xf0]  ;;  %v9441_v26 = vld [vmem:[#allocation3 + $0x1e0] sm:$0xf]  ;;  %v10234_v10 = vld [vmem:[#allocation3 + $0x54] sm:$0xf0] }
 0x4a3   :  { %5988 = vmatpush.bf16.msra.mxu3 %v9450_v38  ;;  %v9378_v55 = vor.u32 %v10268_v53, %v9377_v20  ;;  %v10284_v58 = vld [vmem:[#allocation3 + $0x1e4] sm:$0xf0]  ;;  %v9305_v6 = vld [vmem:[#allocation3 + $0xd0] sm:$0xf]  ;;  %v10250_v57 = vld [vmem:[#allocation3 + $0xd4] sm:$0xf0]  ;;  %v9242_v62 = vor.u32 %v10234_v10, %v9241_v12 }
 0x4a4   :  { %v9442_v48 = vor.u32 %v10284_v58, %v9441_v26  ;;  %v9369_v30 = vld [vmem:[#allocation3 + $0x150] sm:$0xf]  ;;  %5950 = vmatpush.bf16.msra.mxu0 %v9250_v47  ;;  %v10266_v27 = vld [vmem:[#allocation3 + $0x154] sm:$0xf0]  ;;  %v9306_v11 = vor.u32 %v10250_v57, %v9305_v6  ;;  %v9233_v59 = vld [vmem:[#allocation3 + $0x40] sm:$0xf] }
 0x4a5   :  { %v9433_v28 = vld [vmem:[#allocation3 + $0x1d0] sm:$0xf]  ;;  %v10282_v41 = vld [vmem:[#allocation3 + $0x1d4] sm:$0xf0]  ;;  %5963 = vmatpush.bf16.msra.mxu1 %v9314_v52  ;;  %v9370_v33 = vor.u32 %v10266_v27, %v9369_v30  ;;  %v10232_v45 = vld [vmem:[#allocation3 + $0x44] sm:$0xf0] }
 0x4a6   :  { %5976 = vmatpush.bf16.msra.mxu2 %v9378_v55  ;;  %v9297_v29 = vld [vmem:[#allocation3 + $0xc0] sm:$0xf]  ;;  %v9434_v23 = vor.u32 %v10282_v41, %v9433_v28  ;;  %v10248_v51 = vld [vmem:[#allocation3 + $0xc4] sm:$0xf0]  ;;  %v9234_v63 = vor.u32 %v10232_v45, %v9233_v59  ;;  %v9225_v49 = vld [vmem:[#allocation3 + $0x30] sm:$0xf] }
 0x4a7   :  { %5989 = vmatpush.bf16.msra.mxu3 %v9442_v48  ;;  %v9361_v50 = vld [vmem:[#allocation3 + $0x140] sm:$0xf]  ;;  %v10264_v54 = vld [vmem:[#allocation3 + $0x144] sm:$0xf0]  ;;  %v9298_v4 = vor.u32 %v10248_v51, %v9297_v29  ;;  %v10230_v7 = vld [vmem:[#allocation3 + $0x34] sm:$0xf0] }
 0x4a8   :  { %v9425_v32 = vld [vmem:[#allocation3 + $0x1c0] sm:$0xf]  ;;  %v10280_v2 = vld [vmem:[#allocation3 + $0x1c4] sm:$0xf0]  ;;  %5951 = vmatpush.bf16.msra.mxu0 %v9242_v62  ;;  %v9362_v25 = vor.u32 %v10264_v54, %v9361_v50  ;;  %v9289_v39 = vld [vmem:[#allocation3 + $0xb0] sm:$0xf]  ;;  %v9226_v24 = vor.u32 %v10230_v7, %v9225_v49 }
 0x4a9   :  { %5964 = vmatpush.bf16.msra.mxu1 %v9306_v11  ;;  %v9426_v31 = vor.u32 %v10280_v2, %v9425_v32  ;;  %v10246_v46 = vld [vmem:[#allocation3 + $0xb4] sm:$0xf0]  ;;  %v9353_v9 = vld [vmem:[#allocation3 + $0x130] sm:$0xf]  ;;  %v9217_v8 = vld [vmem:[#allocation3 + $0x20] sm:$0xf] }
 0x4aa   :  { %5977 = vmatpush.bf16.msra.mxu2 %v9370_v33  ;;  %v10262_v13 = vld [vmem:[#allocation3 + $0x134] sm:$0xf0]  ;;  %v9417_v14 = vld [vmem:[#allocation3 + $0x1b0] sm:$0xf]  ;;  %v9290_v5 = vor.u32 %v10246_v46, %v9289_v39  ;;  %v10228_v18 = vld [vmem:[#allocation3 + $0x24] sm:$0xf0] }
 0x4ab   :  { %5990 = vmatpush.bf16.msra.mxu3 %v9434_v23  ;;  %v10278_v15 = vld [vmem:[#allocation3 + $0x1b4] sm:$0xf0]  ;;  %v9354_v3 = vor.u32 %v10262_v13, %v9353_v9  ;;  %v9281_v19 = vld [vmem:[#allocation3 + $0xa0] sm:$0xf]  ;;  %v10244_v34 = vld [vmem:[#allocation3 + $0xa4] sm:$0xf0]  ;;  %v9218_v0 = vor.u32 %v10228_v18, %v9217_v8  ;;  %v11069_v18 = vpack.c.bf16 %v5556_v56, %v5556_v56 }
 0x4ac   :  { %5952 = vmatpush.bf16.msra.mxu0 %v9234_v63  ;;  %v9418_v22 = vor.u32 %v10278_v15, %v9417_v14  ;;  %v9345_v35 = vld [vmem:[#allocation3 + $0x120] sm:$0xf]  ;;  %v10260_v36 = vld [vmem:[#allocation3 + $0x124] sm:$0xf0]  ;;  %v9282_v42 = vor.u32 %v10244_v34, %v9281_v19  ;;  %v9209_v47 = vld [vmem:[#allocation3 + $0x10] sm:$0xf]  ;;  %v11074_v34 = vpack.c.bf16 %v5553_v61, %v5553_v61 }
 0x4ad   :  { %5965 = vmatpush.bf16.msra.mxu1 %v9298_v4  ;;  %v9409_v37 = vld [vmem:[#allocation3 + $0x1a0] sm:$0xf]  ;;  %v10276_v38 = vld [vmem:[#allocation3 + $0x1a4] sm:$0xf0]  ;;  %v9346_v44 = vor.u32 %v10260_v36, %v9345_v35  ;;  %v10226_v52 = vld [vmem:[#allocation3 + $0x14] sm:$0xf0] }
 0x4ae   :  { %5978 = vmatpush.bf16.msra.mxu2 %v9362_v25  ;;  %v9273_v20 = vld [vmem:[#allocation3 + $0x90] sm:$0xf]  ;;  %v9410_v53 = vor.u32 %v10276_v38, %v9409_v37  ;;  %v10242_v26 = vld [vmem:[#allocation3 + $0x94] sm:$0xf0]  ;;  %v9210_v48 = vor.u32 %v10226_v52, %v9209_v47  ;;  %v9201_v6 = vld [vmem:[#allocation3] sm:$0xf] }
 0x4af   :  { %5991 = vmatpush.bf16.msra.mxu3 %v9426_v31  ;;  %v9337_v55 = vld [vmem:[#allocation3 + $0x110] sm:$0xf]  ;;  %v10258_v58 = vld [vmem:[#allocation3 + $0x114] sm:$0xf0]  ;;  %v10224_v57 = vld [vmem:[#allocation3 + $0x4] sm:$0xf0]  ;;  %v9274_v30 = vor.u32 %v10242_v26, %v9273_v20 }
 0x4b0   :  { %5953 = vmatpush.bf16.msra.mxu0 %v9226_v24  ;;  %v9401_v12 = vld [vmem:[#allocation3 + $0x190] sm:$0xf]  ;;  %v10274_v10 = vld [vmem:[#allocation3 + $0x194] sm:$0xf0]  ;;  %v9338_v62 = vor.u32 %v10258_v58, %v9337_v55  ;;  %v9265_v27 = vld [vmem:[#allocation3 + $0x80] sm:$0xf]  ;;  %v9202_v50 = vor.u32 %v10224_v57, %v9201_v6  ;;  %v11064_v24 = vpack.c.bf16 %v5555_v17, %v5555_v17  ;;  %v11079_v17 = vpack.c.bf16 %v5554_v1, %v5554_v1 }
 0x4b1   :  { %5966 = vmatpush.bf16.msra.mxu1 %v9290_v5  ;;  %v10240_v28 = vld [vmem:[#allocation3 + $0x84] sm:$0xf0]  ;;  %v9329_v41 = vld [vmem:[#allocation3 + $0x100] sm:$0xf]  ;;  %v9402_v11 = vor.u32 %v10274_v10, %v9401_v12  ;;  %v10237_v29 = vld [vmem:[#allocation3 + $0x74] sm:$0xf] }
 0x4b2   :  { %5979 = vmatpush.bf16.msra.mxu2 %v9354_v3  ;;  %v10256_v33 = vld [vmem:[#allocation3 + $0x104] sm:$0xf0]  ;;  %v9393_v59 = vld [vmem:[#allocation3 + $0x180] sm:$0xf]  ;;  %v9259_v23 = vld [vmem:[#allocation3 + $0x78] sm:$0xf0]  ;;  %v9266_v63 = vor.u32 %v10240_v28, %v9265_v27 }
 0x4b3   :  { %5992 = vmatpush.bf16.msra.mxu3 %v9418_v22  ;;  %v10272_v45 = vld [vmem:[#allocation3 + $0x184] sm:$0xf0]  ;;  %v10253_v51 = vld [vmem:[#allocation3 + $0xf4] sm:$0xf]  ;;  %v9323_v54 = vld [vmem:[#allocation3 + $0xf8] sm:$0xf0]  ;;  %v9330_v4 = vor.u32 %v10256_v33, %v9329_v41  ;;  %v9262_v39 = vor.u32 %v10237_v29, %v9259_v23 }
 0x4b4   :  { %5954 = vmatpush.bf16.msra.mxu0 %v9218_v0  ;;  %v10269_v32 = vld [vmem:[#allocation3 + $0x174] sm:$0xf]  ;;  %v9387_v2 = vld [vmem:[#allocation3 + $0x178] sm:$0xf0]  ;;  %v9394_v7 = vor.u32 %v10272_v45, %v9393_v59  ;;  %v9326_v31 = vor.u32 %v10253_v51, %v9323_v54  ;;  %v10235_v9 = vld [vmem:[#allocation3 + $0x64] sm:$0xf] }
 0x4b5   :  { %5967 = vmatpush.bf16.msra.mxu1 %v9282_v42  ;;  %v10285_v25 = vld [vmem:[#allocation3 + $0x1f4] sm:$0xf]  ;;  %v9451_v49 = vld [vmem:[#allocation3 + $0x1f8] sm:$0xf0]  ;;  %v9390_v46 = vor.u32 %v10269_v32, %v9387_v2  ;;  %v9251_v13 = vld [vmem:[#allocation3 + $0x68] sm:$0xf0] }
 0x4b6   :  { %5980 = vmatpush.bf16.msra.mxu2 %v9346_v44  ;;  %v10251_v14 = vld [vmem:[#allocation3 + $0xe4] sm:$0xf]  ;;  %v9454_v15 = vor.u32 %v10285_v25, %v9451_v49  ;;  %v9315_v5 = vld [vmem:[#allocation3 + $0xe8] sm:$0xf0]  ;;  %v9254_v43 = vor.u32 %v10235_v9, %v9251_v13  ;;  %v10233_v35 = vld [vmem:[#allocation3 + $0x54] sm:$0xf] }
 0x4b7   :  { %5993 = vmatpush.bf16.msra.mxu3 %v9410_v53  ;;  %v10267_v3 = vld [vmem:[#allocation3 + $0x164] sm:$0xf]  ;;  %v9379_v8 = vld [vmem:[#allocation3 + $0x168] sm:$0xf0]  ;;  %v9318_v40 = vor.u32 %v10251_v14, %v9315_v5  ;;  %v9243_v36 = vld [vmem:[#allocation3 + $0x58] sm:$0xf0] }
 0x4b8   :  { %5955 = vmatpush.bf16.msra.mxu0 %v9210_v48  ;;  %v10283_v19 = vld [vmem:[#allocation3 + $0x1e4] sm:$0xf]  ;;  %v9443_v22 = vld [vmem:[#allocation3 + $0x1e8] sm:$0xf0]  ;;  %v9382_v56 = vor.u32 %v10267_v3, %v9379_v8  ;;  %v10249_v37 = vld [vmem:[#allocation3 + $0xd4] sm:$0xf]  ;;  %v9246_v42 = vor.u32 %v10233_v35, %v9243_v36 }
 0x4b9   :  { %5968 = vmatpush.bf16.msra.mxu1 %v9274_v30  ;;  %v9446_v16 = vor.u32 %v10283_v19, %v9443_v22  ;;  %v9307_v61 = vld [vmem:[#allocation3 + $0xd8] sm:$0xf0]  ;;  %v10265_v38 = vld [vmem:[#allocation3 + $0x154] sm:$0xf]  ;;  %v10231_v52 = vld [vmem:[#allocation3 + $0x44] sm:$0xf] }
 0x4ba   :  { %5981 = vmatpush.bf16.msra.mxu2 %v9338_v62  ;;  %v9371_v0 = vld [vmem:[#allocation3 + $0x158] sm:$0xf0]  ;;  %v10281_v60 = vld [vmem:[#allocation3 + $0x1d4] sm:$0xf]  ;;  %v9310_v44 = vor.u32 %v10249_v37, %v9307_v61  ;;  %v9235_v20 = vld [vmem:[#allocation3 + $0x48] sm:$0xf0] }
 0x4bb   :  { %5994 = vmatpush.bf16.msra.mxu3 %v9402_v11  ;;  %v9435_v1 = vld [vmem:[#allocation3 + $0x1d8] sm:$0xf0]  ;;  %v9374_v47 = vor.u32 %v10265_v38, %v9371_v0  ;;  %v10247_v53 = vld [vmem:[#allocation3 + $0xc4] sm:$0xf]  ;;  %v9299_v55 = vld [vmem:[#allocation3 + $0xc8] sm:$0xf0]  ;;  %v9238_v6 = vor.u32 %v10231_v52, %v9235_v20 }
 0x4bc   :  { %5956 = vmatpush.bf16.msra.mxu0 %v9202_v50  ;;  %v9438_v26 = vor.u32 %v10281_v60, %v9435_v1  ;;  %v10263_v58 = vld [vmem:[#allocation3 + $0x144] sm:$0xf]  ;;  %v9363_v12 = vld [vmem:[#allocation3 + $0x148] sm:$0xf0]  ;;  %v9302_v57 = vor.u32 %v10247_v53, %v9299_v55  ;;  %v10229_v62 = vld [vmem:[#allocation3 + $0x34] sm:$0xf] }
 0x4bd   :  { %5969 = vmatpush.bf16.msra.mxu1 %v9266_v63  ;;  %v10279_v10 = vld [vmem:[#allocation3 + $0x1c4] sm:$0xf]  ;;  %v9427_v48 = vld [vmem:[#allocation3 + $0x1c8] sm:$0xf0]  ;;  %v9366_v30 = vor.u32 %v10263_v58, %v9363_v12  ;;  %v9227_v27 = vld [vmem:[#allocation3 + $0x38] sm:$0xf0] }
 0x4be   :  { %5982 = vmatpush.bf16.msra.mxu2 %v9330_v4  ;;  %v10245_v28 = vld [vmem:[#allocation3 + $0xb4] sm:$0xf]  ;;  %v9430_v41 = vor.u32 %v10279_v10, %v9427_v48  ;;  %v9291_v11 = vld [vmem:[#allocation3 + $0xb8] sm:$0xf0]  ;;  %v9230_v23 = vor.u32 %v10229_v62, %v9227_v27  ;;  %v10227_v54 = vld [vmem:[#allocation3 + $0x24] sm:$0xf] }
 0x4bf   :  { %5995 = vmatpush.bf16.msra.mxu3 %v9394_v7  ;;  %5957 = vmatmul.bf16.vlgmr.msra.gmra.mxu0 %v11074_v34  ;;  %v10261_v33 = vld [vmem:[#allocation3 + $0x134] sm:$0xf]  ;;  %v9355_v59 = vld [vmem:[#allocation3 + $0x138] sm:$0xf0]  ;;  %v9294_v51 = vor.u32 %v10245_v28, %v9291_v11  ;;  %v9219_v32 = vld [vmem:[#allocation3 + $0x28] sm:$0xf0] }
 0x4c0   :  { %6001 = vmatpush.bf16.msrb.mxu0 %v9262_v39  ;;  %5970 = vmatmul.bf16.vlgmr.msra.gmra.mxu1 %v11079_v17  ;;  %v10277_v45 = vld [vmem:[#allocation3 + $0x1b4] sm:$0xf]  ;;  %v9419_v29 = vld [vmem:[#allocation3 + $0x1b8] sm:$0xf0]  ;;  %v9358_v50 = vor.u32 %v10261_v33, %v9355_v59  ;;  %v10243_v2 = vld [vmem:[#allocation3 + $0xa4] sm:$0xf] }
 0x4c1   :  { %6014 = vmatpush.bf16.msrb.mxu1 %v9326_v31  ;;  %5983 = vmatmul.bf16.vlgmr.msra.gmra.mxu2 %v11064_v24  ;;  %v9422_v63 = vor.u32 %v10277_v45, %v9419_v29  ;;  %v9283_v4 = vld [vmem:[#allocation3 + $0xa8] sm:$0xf0]  ;;  %v10259_v25 = vld [vmem:[#allocation3 + $0x124] sm:$0xf]  ;;  %v9222_v31 = vor.u32 %v10227_v54, %v9219_v32  ;;  %v10225_v13 = vld [vmem:[#allocation3 + $0x14] sm:$0xf] }
 0x4c2   :  { %6027 = vmatpush.bf16.msrb.mxu2 %v9390_v46  ;;  %5996 = vmatmul.bf16.vlgmr.msra.gmra.mxu3 %v11069_v18  ;;  %v9347_v49 = vld [vmem:[#allocation3 + $0x128] sm:$0xf0]  ;;  %v10275_v7 = vld [vmem:[#allocation3 + $0x1a4] sm:$0xf]  ;;  %v9286_v46 = vor.u32 %v10243_v2, %v9283_v4  ;;  %v9211_v14 = vld [vmem:[#allocation3 + $0x18] sm:$0xf0] }
 0x4c3   :  { %6040 = vmatpush.bf16.msrb.mxu3 %v9454_v15  ;;  %v9411_v39 = vld [vmem:[#allocation3 + $0x1a8] sm:$0xf0]  ;;  %v9350_v9 = vor.u32 %v10259_v25, %v9347_v49  ;;  %v10241_v15 = vld [vmem:[#allocation3 + $0x94] sm:$0xf]  ;;  %v9275_v3 = vld [vmem:[#allocation3 + $0x98] sm:$0xf0] }
 0x4c4   :  { %6002 = vmatpush.bf16.msrb.mxu0 %v9254_v43  ;;  %v9414_v5 = vor.u32 %v10275_v7, %v9411_v39  ;;  %v10257_v8 = vld [vmem:[#allocation3 + $0x114] sm:$0xf]  ;;  %v9339_v19 = vld [vmem:[#allocation3 + $0x118] sm:$0xf0]  ;;  %v10223_v36 = vld [vmem:[#allocation3 + $0x4] sm:$0xf] }
 0x4c5   :  { %6015 = vmatpush.bf16.msrb.mxu1 %v9318_v40  ;;  %v10273_v22 = vld [vmem:[#allocation3 + $0x194] sm:$0xf]  ;;  %v9403_v43 = vld [vmem:[#allocation3 + $0x198] sm:$0xf0]  ;;  %v9214_v40 = vor.u32 %v10225_v13, %v9211_v14  ;;  %v9342_v35 = vor.u32 %v10257_v8, %v9339_v19  ;;  %v9203_v37 = vld [vmem:[#allocation3 + $0x8] sm:$0xf0] }
 0x4c6   :  { %6028 = vmatpush.bf16.msrb.mxu2 %v9382_v56  ;;  %v9278_v56 = vor.u32 %v10241_v15, %v9275_v3  ;;  %v9406_v61 = vor.u32 %v10273_v22, %v9403_v43  ;;  %v9267_v38 = vld [vmem:[#allocation3 + $0x88] sm:$0xf0]  ;;  %v10255_v0 = vld [vmem:[#allocation3 + $0x104] sm:$0xf] }
 0x4c7   :  { %6041 = vmatpush.bf16.msrb.mxu3 %v9446_v16  ;;  %v10239_v16 = vld [vmem:[#allocation3 + $0x84] sm:$0xf]  ;;  %v9331_v60 = vld [vmem:[#allocation3 + $0x108] sm:$0xf0] }
 0x4c8   :  { %6003 = vmatpush.bf16.msrb.mxu0 %v9246_v42  ;;  %v10271_v1 = vld [vmem:[#allocation3 + $0x184] sm:$0xf]  ;;  %v9395_v42 = vld [vmem:[#allocation3 + $0x188] sm:$0xf0]  ;;  %v9334_v52 = vor.u32 %v10255_v0, %v9331_v60 }
 0x4c9   :  { %6016 = vmatpush.bf16.msrb.mxu1 %v9310_v44  ;;  %v9206_v44 = vor.u32 %v10223_v36, %v9203_v37  ;;  %v9398_v20 = vor.u32 %v10271_v1, %v9395_v42 }
 0x4ca   :  { %6029 = vmatpush.bf16.msrb.mxu2 %v9374_v47  ;;  %v9270_v47 = vor.u32 %v10239_v16, %v9267_v38 }
 0x4cb   :  { %6042 = vmatpush.bf16.msrb.mxu3 %v9438_v26 }
 0x4cc   :  { %6004 = vmatpush.bf16.msrb.mxu0 %v9238_v6 }
 0x4cd   :  { %6017 = vmatpush.bf16.msrb.mxu1 %v9302_v57 }
 0x4ce   :  { %6030 = vmatpush.bf16.msrb.mxu2 %v9366_v30 }
 0x4cf   :  { %6043 = vmatpush.bf16.msrb.mxu3 %v9430_v41 }
 0x4d0   :  { %6005 = vmatpush.bf16.msrb.mxu0 %v9230_v23 }
 0x4d1   :  { %6018 = vmatpush.bf16.msrb.mxu1 %v9294_v51 }
 0x4d2   :  { %6031 = vmatpush.bf16.msrb.mxu2 %v9358_v50 }
 0x4d3   :  { %6044 = vmatpush.bf16.msrb.mxu3 %v9422_v63 }
 0x4d4   :  { %6006 = vmatpush.bf16.msrb.mxu0 %v9222_v31 }
 0x4d5   :  { %6019 = vmatpush.bf16.msrb.mxu1 %v9286_v46 }
 0x4d6   :  { %6032 = vmatpush.bf16.msrb.mxu2 %v9350_v9 }
 0x4d7   :  { %6045 = vmatpush.bf16.msrb.mxu3 %v9414_v5 }
 0x4d8   :  { %6007 = vmatpush.bf16.msrb.mxu0 %v9214_v40 }
 0x4d9   :  { %6020 = vmatpush.bf16.msrb.mxu1 %v9278_v56 }
 0x4da   :  { %6033 = vmatpush.bf16.msrb.mxu2 %v9342_v35 }
 0x4db   :  { %6046 = vmatpush.bf16.msrb.mxu3 %v9406_v61 }
 0x4dc   :  { %6008 = vmatpush.bf16.msrb.mxu0 %v9206_v44 }
 0x4dd   :  { %6021 = vmatpush.bf16.msrb.mxu1 %v9270_v47 }
 0x4de   :  { %6034 = vmatpush.bf16.msrb.mxu2 %v9334_v52 }
 0x4df   :  { %6047 = vmatpush.bf16.msrb.mxu3 %v9398_v20  ;;  %6009 = vmatmul.bf16.vlgmr.msrb.gmra.mxu0 %v11074_v34 }
 0x4e0   :  { %6022 = vmatmul.bf16.vlgmr.msrb.gmra.mxu1 %v11079_v17 }
 0x4e1   :  { %6035 = vmatmul.bf16.vlgmr.msrb.gmra.mxu2 %v11064_v24 }
 0x4e2   :  { %6048 = vmatmul.bf16.vlgmr.msrb.gmra.mxu3 %v11069_v18 }
 0x53c   :  { %v5958_v53 = vpop.f32.mrf.mxu0 }
 0x53d   :  { %v5971_v26 = vpop.f32.mrf.mxu1 }
 0x53e   :  { %v5972_v55 = vadd.f32 %v5971_v26, %v5958_v53 }
 0x544   :  { %v5984_v58 = vpop.f32.mrf.mxu2  ;;  %v5960_v6 = vpop.f32.mrf.mxu0 }
 0x545   :  { %v5985_v12 = vadd.f32 %v5984_v58, %v5972_v55  ;;  %v5997_v10 = vpop.f32.mrf.mxu3  ;;  %v5973_v57 = vpop.f32.mrf.mxu1 }
 0x547   :  { %v5998_v48 = vadd.f32 %v5997_v10, %v5985_v12 }
 0x549   :  { %v6057_v30 = vrot.slane %v5998_v48, 4 }
 0x54b   :  { %v6058_v62 = vadd.f32 %v6057_v30, %v5998_v48  ;;  %v6056_v30 = vld [vmem:[#allocation14 + $0x5] ss:$8 sm:$0x3] }
 0x54c   :  { %v5986_v27 = vpop.f32.mrf.mxu2 }
 0x54d   :  { %v6059_v28 = vrot.slane %v6058_v62, 2  ;;  %v5999_v34 = vpop.f32.mrf.mxu3 }
 0x54f   :  { %v6060_v41 = vadd.f32 %v6059_v28, %v6058_v62 }
 0x551   :  { %v6061_v17 = vrot.slane %v6060_v41, 1 }
 0x553   :  { %v6062_v11 = vadd.f32 %v6061_v17, %v6060_v41  ;;  %v6125_v41 = vperm.slane %v6056_v30, 0  ;;  %v6126_v17 = vperm.slane %v6056_v30, 1 }
 0x555   :  { %v6069_v24 = vmul.f32 %v6062_v11, %v10747_v21 }
 0x557   :  { %v11090_v18 = vsub.f32 %v5998_v48, %v6069_v24  ;;  %v6054_v48 = vld [vmem:[#allocation14 + $0x4] ss:$8 sm:$0x3] }
 0x559   :  { %v6073_v33 = vmul.f32 %v11090_v18, %v11090_v18 }
 0x55b   :  { %v6075_v29 = vrot.slane %v6073_v33, 4 }
 0x55c   :  { %v6010_v59 = vpop.f32.mrf.mxu0 }
 0x55d   :  { %v6023_v45 = vpop.f32.mrf.mxu1  ;;  %v6076_v50 = vadd.f32 %v6075_v29, %v6073_v33 }
 0x55e   :  { %v6024_v23 = vadd.f32 %v6023_v45, %v6010_v59 }
 0x55f   :  { %v6077_v25 = vrot.slane %v6076_v50, 2 }
 0x561   :  { %v6078_v31 = vadd.f32 %v6077_v25, %v6076_v50 }
 0x563   :  { %v6079_v14 = vrot.slane %v6078_v31, 1 }
 0x564   :  { %v6036_v51 = vpop.f32.mrf.mxu2  ;;  %v6012_v2 = vpop.f32.mrf.mxu0 }
 0x565   :  { %v6037_v54 = vadd.f32 %v6036_v51, %v6024_v23  ;;  %v6049_v32 = vpop.f32.mrf.mxu3  ;;  %v6025_v63 = vpop.f32.mrf.mxu1  ;;  %v6080_v3 = vadd.f32 %v6079_v14, %v6078_v31 }
 0x567   :  { %v6050_v4 = vadd.f32 %v6049_v32, %v6037_v54  ;;  %v6087_v22 = vmul.f32 %v6080_v3, %v10747_v21 }
 0x569   :  { %v6063_v49 = vrot.slane %v6050_v4, 4  ;;  %v6089_v56 = vadd.f32 1e-05, %v6087_v22 }
 0x56b   :  { %v6064_v7 = vadd.f32 %v6063_v49, %v6050_v4  ;;  %10356 = vrsqrt.f32 %v6089_v56  ;;  %vm6097_vm4 = vweird.f32 %v6089_v56 }
 0x56c   :  { %v6038_v39 = vpop.f32.mrf.mxu2 }
 0x56d   :  { %v6065_v46 = vrot.slane %v6064_v7, 2  ;;  %v6051_v9 = vpop.f32.mrf.mxu3 }
 0x56f   :  { %v6066_v13 = vadd.f32 %v6065_v46, %v6064_v7 }
 0x571   :  { %v6067_v15 = vrot.slane %v6066_v13, 1  ;;  %v10357_v38 = vpop.eup %10356 }
 0x572   :  { %v6092_v1 = vmul.f32 %v10357_v38, %v6089_v56  ;;  %vm6098_vm15 = vweird.f32 %v10357_v38 }
 0x573   :  { %v6068_v5 = vadd.f32 %v6067_v15, %v6066_v13  ;;  %vm6099_vm6 = vmor %vm6097_vm4, %vm6098_vm15 }
 0x574   :  { %v6093_v42 = vmul.f32 %v10357_v38, %v6092_v1 }
 0x575   :  { %v6070_v8 = vmul.f32 %v6068_v5, %v10747_v21 }
 0x576   :  { %v6094_v47 = vmul.f32 0.5, %v6093_v42 }
 0x577   :  { %v6072_v19 = vsub.f32 %v6050_v4, %v6070_v8 }
 0x578   :  { %v6095_v53 = vsub.f32 1.5, %v6094_v47 }
 0x579   :  { %v6074_v43 = vmul.f32 %v6072_v19, %v6072_v19 }
 0x57a   :  { %v6096_v58 = vmul.f32 %v10357_v38, %v6095_v53 }
 0x57b   :  { %v6081_v40 = vrot.slane %v6074_v43, 4 }
 0x57c   :  { %v6100_v57 = vsel %vm6099_vm6, %v10357_v38, %v6096_v58 }
 0x57d   :  { %v6082_v35 = vadd.f32 %v6081_v40, %v6074_v43 }
 0x57f   :  { %v6083_v36 = vrot.slane %v6082_v35, 2 }
 0x581   :  { %v6084_v37 = vadd.f32 %v6083_v36, %v6082_v35 }
 0x583   :  { %v6085_v16 = vrot.slane %v6084_v37, 1 }
 0x585   :  { %v6086_v61 = vadd.f32 %v6085_v16, %v6084_v37 }
 0x587   :  { %v6088_v0 = vmul.f32 %v6086_v61, %v10747_v21 }
 0x589   :  { %v6090_v60 = vadd.f32 1e-05, %v6088_v0 }
 0x58b   :  { %10358 = vrsqrt.f32 %v6090_v60  ;;  %vm6107_vm2 = vweird.f32 %v6090_v60 }
 0x591   :  { %v10359_v44 = vpop.eup %10358 }
 0x592   :  { %v6102_v52 = vmul.f32 %v10359_v44, %v6090_v60  ;;  %vm6108_vm14 = vweird.f32 %v10359_v44 }
 0x593   :  { %vm6109_vm3 = vmor %vm6107_vm2, %vm6108_vm14 }
 0x594   :  { %v6103_v20 = vmul.f32 %v10359_v44, %v6102_v52 }
 0x596   :  { %v6104_v26 = vmul.f32 0.5, %v6103_v20 }
 0x598   :  { %v6105_v55 = vsub.f32 1.5, %v6104_v26 }
 0x59a   :  { %v6106_v12 = vmul.f32 %v10359_v44, %v6105_v55 }
 0x59c   :  { %v6110_v10 = vsel %vm6109_vm3, %v10359_v44, %v6106_v12 }
 0x59d   :  { %v6113_v6 = vrot.slane %v6110_v10, 7 }
 0x59f   :  { %v6114_v62 = vsel %vm3365_vm5, %v6100_v57, %v6113_v6 }
 0x5a0   :  { %v6116_v27 = vmul.f32 %v6114_v62, %v6054_v48 }
 0x5a2   :  { %v6118_v28 = vperm.slane %v6116_v27, 0  ;;  %v6119_v34 = vperm.slane %v6116_v27, 1 }
 0x5a4   :  { %v6122_v11 = vmul.f32 %v6118_v28, %v11090_v18  ;;  %v6123_v24 = vmul.f32 %v6119_v34, %v6072_v19 }
 0x5a6   :  { %v6129_v33 = vadd.f32 %v6125_v41, %v6122_v11  ;;  %v6130_v59 = vadd.f32 %v6126_v17, %v6123_v24 }
 0x5a8   :  { %v6131_v45 = vmax.f32 %v6129_v33, 0.0  ;;  %v6132_v29 = vmax.f32 %v6130_v59, 0.0 }
 0x5a9   :  { %10566 = dma.done.wait [#allocation8 + $0x2], 2048 }
 0x5aa   :  { %10567 = vsyncadd [#allocation8 + $0x2], 4294965248  ;;  %v10294_v23 = vld [vmem:[#allocation4 + $0x38] sm:$0xff]  ;;  %v10293_v50 = vld [vmem:[#allocation4 + $0x30] sm:$0xff]  ;;  %v6137_v13 = vpack.c.bf16 %v6131_v45, %v6131_v45  ;;  %v6138_v14 = vpack.c.bf16 %v6132_v29, %v6132_v29 }
 0x5ab   :  { %v10302_v51 = vld [vmem:[#allocation4 + $0x78] sm:$0xff]  ;;  %6267 = vmatpush.bf16.msra.mxu0 %v10294_v23  ;;  %v10301_v54 = vld [vmem:[#allocation4 + $0x70] sm:$0xff]  ;;  %v10292_v32 = vld [vmem:[#allocation4 + $0x28] sm:$0xff] }
 0x5ac   :  { %6280 = vmatpush.bf16.msra.mxu1 %v10302_v51  ;;  %v10300_v2 = vld [vmem:[#allocation4 + $0x68] sm:$0xff]  ;;  %v10291_v18 = vld [vmem:[#allocation4 + $0x20] sm:$0xff]  ;;  %v10290_v4 = vld [vmem:[#allocation4 + $0x18] sm:$0xff] }
 0x5ad   :  { %v10299_v63 = vld [vmem:[#allocation4 + $0x60] sm:$0xff]  ;;  %v10298_v25 = vld [vmem:[#allocation4 + $0x58] sm:$0xff]  ;;  %v10289_v49 = vld [vmem:[#allocation4 + $0x10] sm:$0xff] }
 0x5ae   :  { %v10297_v7 = vld [vmem:[#allocation4 + $0x50] sm:$0xff]  ;;  %v10288_v39 = vld [vmem:[#allocation4 + $0x8] sm:$0xff]  ;;  %v10287_v46 = vld [vmem:[#allocation4] sm:$0xff] }
 0x5af   :  { %6268 = vmatpush.bf16.msra.mxu0 %v10293_v50  ;;  %v10296_v31 = vld [vmem:[#allocation4 + $0x48] sm:$0xff]  ;;  %v10295_v9 = vld [vmem:[#allocation4 + $0x40] sm:$0xff] }
 0x5b0   :  { %6281 = vmatpush.bf16.msra.mxu1 %v10301_v54  ;;  %v6293_v12 = vld [vmem:[#allocation14 + $0x6] ss:$0 sm:$0xff]  ;;  %v6294_v57 = vld [vmem:[#allocation14 + $0x7] ss:$0 sm:$0xff] }
 0x5b3   :  { %6269 = vmatpush.bf16.msra.mxu0 %v10292_v32 }
 0x5b4   :  { %6282 = vmatpush.bf16.msra.mxu1 %v10300_v2 }
 0x5b7   :  { %6270 = vmatpush.bf16.msra.mxu0 %v10291_v18 }
 0x5b8   :  { %6283 = vmatpush.bf16.msra.mxu1 %v10299_v63 }
 0x5bb   :  { %6271 = vmatpush.bf16.msra.mxu0 %v10290_v4 }
 0x5bc   :  { %6284 = vmatpush.bf16.msra.mxu1 %v10298_v25 }
 0x5bf   :  { %6272 = vmatpush.bf16.msra.mxu0 %v10289_v49 }
 0x5c0   :  { %6285 = vmatpush.bf16.msra.mxu1 %v10297_v7 }
 0x5c3   :  { %6273 = vmatpush.bf16.msra.mxu0 %v10288_v39 }
 0x5c4   :  { %6286 = vmatpush.bf16.msra.mxu1 %v10296_v31 }
 0x5c7   :  { %6274 = vmatpush.bf16.msra.mxu0 %v10287_v46 }
 0x5c8   :  { %6287 = vmatpush.bf16.msra.mxu1 %v10295_v9 }
 0x5ca   :  { %6275 = vmatmul.bf16.vlgmr.msra.gmra.mxu0 %v6137_v13 }
 0x5cb   :  { %6288 = vmatmul.bf16.vlgmr.msra.gmra.mxu1 %v6138_v14 }
 0x647   :  { %v6276_v15 = vpop.f32.mrf.mxu0 }
 0x648   :  { %v6289_v5 = vpop.f32.mrf.mxu1 }
 0x649   :  { %v6290_v3 = vadd.f32 %v6289_v5, %v6276_v15 }
 0x64b   :  { %v6295_v8 = vrot.slane %v6290_v3, 4 }
 0x64d   :  { %v6296_v19 = vadd.f32 %v6295_v8, %v6290_v3 }
 0x64f   :  { %v6297_v22 = vrot.slane %v6296_v19, 2  ;;  %v6278_v43 = vpop.f32.mrf.mxu0 }
 0x650   :  { %v6291_v40 = vpop.f32.mrf.mxu1 }
 0x651   :  { %v6298_v56 = vadd.f32 %v6297_v22, %v6296_v19 }
 0x653   :  { %v6299_v35 = vrot.slane %v6298_v56, 1 }
 0x655   :  { %v6300_v36 = vadd.f32 %v6299_v35, %v6298_v56 }
 0x657   :  { %v6301_v37 = vmul.f32 %v6300_v36, %v10747_v21 }
 0x659   :  { %v6302_v16 = vsub.f32 %v6290_v3, %v6301_v37 }
 0x65b   :  { %v6303_v61 = vmul.f32 %v6302_v16, %v6302_v16 }
 0x65d   :  { %v6304_v38 = vrot.slane %v6303_v61, 4 }
 0x65f   :  { %v6305_v0 = vadd.f32 %v6304_v38, %v6303_v61 }
 0x661   :  { %v6306_v60 = vrot.slane %v6305_v0, 2 }
 0x663   :  { %v6307_v1 = vadd.f32 %v6306_v60, %v6305_v0 }
 0x665   :  { %v6308_v42 = vrot.slane %v6307_v1, 1 }
 0x667   :  { %v6309_v44 = vadd.f32 %v6308_v42, %v6307_v1 }
 0x669   :  { %v6310_v47 = vmul.f32 %v6309_v44, %v10747_v21 }
 0x66b   :  { %v6311_v52 = vadd.f32 1e-05, %v6310_v47 }
 0x66d   :  { %10360 = vrsqrt.f32 %v6311_v52  ;;  %vm6318_vm7 = vweird.f32 %v6311_v52 }
 0x673   :  { %v10361_v20 = vpop.eup %10360 }
 0x674   :  { %v6313_v53 = vmul.f32 %v10361_v20, %v6311_v52  ;;  %vm6319_vm5 = vweird.f32 %v10361_v20 }
 0x675   :  { %vm6320_vm8 = vmor %vm6318_vm7, %vm6319_vm5 }
 0x676   :  { %v6314_v26 = vmul.f32 %v10361_v20, %v6313_v53 }
 0x678   :  { %v6315_v55 = vmul.f32 0.5, %v6314_v26 }
 0x67a   :  { %v6316_v58 = vsub.f32 1.5, %v6315_v55 }
 0x67c   :  { %v6317_v10 = vmul.f32 %v10361_v20, %v6316_v58 }
 0x67e   :  { %v6321_v48 = vsel %vm6320_vm8, %v10361_v20, %v6317_v10 }
 0x67f   :  { %v6322_v6 = vmul.f32 %v6321_v48, %v6293_v12 }
 0x681   :  { %v6323_v30 = vmul.f32 %v6322_v6, %v6302_v16 }
 0x683   :  { %v6324_v62 = vadd.f32 %v6323_v30, %v6294_v57 }
 0x685   :  { %v6325_v27 = vmax.f32 %v6324_v62, 0.0 }
 0x686   :  { %10568 = dma.done.wait [#allocation8 + $0x3], 1024 }
 0x687   :  { %10569 = vsyncadd [#allocation8 + $0x3], 4294966272  ;;  %v10310_v28 = vld [vmem:[#allocation5 + $0x38] sm:$0xff]  ;;  %v10309_v34 = vld [vmem:[#allocation5 + $0x28] sm:$0xff]  ;;  %v6330_v45 = vpack.c.bf16 %v6325_v27, %v6325_v27  ;;  %vm6410_vm9 = vcmask 523264  }
 0x688   :  { %6395 = vmatpush.bf16.msra.mxu2 %v10310_v28  ;;  %v10308_v41 = vld [vmem:[#allocation5 + $0x20] sm:$0xff]  ;;  %v10307_v17 = vld [vmem:[#allocation5 + $0x8] sm:$0xff]  ;;  %v10306_v11 = vld [vmem:[#allocation5 + $0x10] sm:$0xff] }
 0x689   :  { %v10305_v24 = vld [vmem:[#allocation5 + $0x18] sm:$0xff]  ;;  %v10304_v33 = vld [vmem:[#allocation5] sm:$0xff]  ;;  %v10303_v59 = vld [vmem:[#allocation5 + $0x30] sm:$0xff] }
 0x68a   :  { %v6408_v40 = vld [vmem:[#allocation14 + $0x40] ss:$0 sm:$0xff]  ;;  %v6409_v37 = vld [vmem:[#allocation14 + $0x41] ss:$0 sm:$0xff] }
 0x68c   :  { %6396 = vmatpush.bf16.msra.mxu2 %v10309_v34 }
 0x690   :  { %6397 = vmatpush.bf16.msra.mxu2 %v10308_v41 }
 0x694   :  { %6398 = vmatpush.bf16.msra.mxu2 %v10307_v17 }
 0x698   :  { %6399 = vmatpush.bf16.msra.mxu2 %v10306_v11 }
 0x69c   :  { %6400 = vmatpush.bf16.msra.mxu2 %v10305_v24 }
 0x6a0   :  { %6401 = vmatpush.bf16.msra.mxu2 %v10304_v33 }
 0x6a4   :  { %6402 = vmatpush.bf16.msra.mxu2 %v10303_v59 }
 0x6a7   :  { %6403 = vmatmul.bf16.vlgmr.msra.gmra.mxu2 %v6330_v45 }
 0x72a   :  { %v6404_v29 = vpop.f32.mrf.mxu2 }
 0x72b   :  { %v6411_v23 = vsel %vm6410_vm9, %v6404_v29, 0.0 }
 0x72c   :  { %v6412_v51 = vrot.slane %v6411_v23, 4 }
 0x72e   :  { %v6413_v50 = vadd.f32 %v6412_v51, %v6411_v23 }
 0x730   :  { %v6414_v54 = vrot.slane %v6413_v50, 2 }
 0x732   :  { %v6415_v32 = vadd.f32 %v6414_v54, %v6413_v50  ;;  %v6406_v2 = vpop.f32.mrf.mxu2 }
 0x734   :  { %v6416_v18 = vrot.slane %v6415_v32, 1 }
 0x736   :  { %v6417_v63 = vadd.f32 %v6416_v18, %v6415_v32 }
 0x738   :  { %v6418_v4 = vmul.f32 %v6417_v63, %v10747_v21 }
 0x73a   :  { %v6419_v25 = vsub.f32 %v6404_v29, %v6418_v4 }
 0x73c   :  { %v6420_v49 = vmul.f32 %v6419_v25, %v6419_v25 }
 0x73e   :  { %v6421_v7 = vsel %vm6410_vm9, %v6420_v49, 0.0 }
 0x73f   :  { %v6422_v39 = vrot.slane %v6421_v7, 4 }
 0x741   :  { %v6423_v31 = vadd.f32 %v6422_v39, %v6421_v7 }
 0x743   :  { %v6424_v46 = vrot.slane %v6423_v31, 2 }
 0x745   :  { %v6425_v9 = vadd.f32 %v6424_v46, %v6423_v31 }
 0x747   :  { %v6426_v13 = vrot.slane %v6425_v9, 1 }
 0x749   :  { %v6427_v14 = vadd.f32 %v6426_v13, %v6425_v9 }
 0x74b   :  { %v6428_v15 = vmul.f32 %v6427_v14, %v10747_v21 }
 0x74d   :  { %v6429_v5 = vadd.f32 1e-05, %v6428_v15 }
 0x74f   :  { %10362 = vrsqrt.f32 %v6429_v5  ;;  %vm6436_vm11 = vweird.f32 %v6429_v5 }
 0x755   :  { %v10363_v3 = vpop.eup %10362 }
 0x756   :  { %v6431_v8 = vmul.f32 %v10363_v3, %v6429_v5  ;;  %vm6437_vm10 = vweird.f32 %v10363_v3 }
 0x757   :  { %vm6438_vm12 = vmor %vm6436_vm11, %vm6437_vm10 }
 0x758   :  { %v6432_v19 = vmul.f32 %v10363_v3, %v6431_v8 }
 0x75a   :  { %v6433_v22 = vmul.f32 0.5, %v6432_v19 }
 0x75c   :  { %v6434_v43 = vsub.f32 1.5, %v6433_v22 }
 0x75e   :  { %v6435_v56 = vmul.f32 %v10363_v3, %v6434_v43 }
 0x760   :  { %v6439_v35 = vsel %vm6438_vm12, %v10363_v3, %v6435_v56 }
 0x761   :  { %v6440_v36 = vmul.f32 %v6439_v35, %v6408_v40 }
 0x763   :  { %v6441_v16 = vmul.f32 %v6440_v36, %v6419_v25 }
 0x765   :  { %v6442_v61 = vadd.f32 %v6441_v16, %v6409_v37 }
 0x767   :  { %v6443_v38 = vmax.f32 %v6442_v61, 0.0 }
 0x768   :  { %10570 = dma.done.wait [#allocation8 + $0x4], 512 }
 0x769   :  { %10571 = vsyncadd [#allocation8 + $0x4], 4294966784  ;;  %v10314_v0 = vld [vmem:[#allocation6 + $0x8] sm:$0xff]  ;;  %v10313_v60 = vld [vmem:[#allocation6 + $0x10] sm:$0xff]  ;;  %v6448_v44 = vpack.c.bf16 %v6443_v38, %v6443_v38  ;;  %vm6499_vm13 = vcmask 261120  }
 0x76a   :  { %6488 = vmatpush.bf16.msra.mxu3 %v10314_v0  ;;  %v10312_v1 = vld [vmem:[#allocation6 + $0x18] sm:$0xff]  ;;  %v10311_v42 = vld [vmem:[#allocation6] sm:$0xff] }
 0x76b   :  { %v6497_v51 = vld [vmem:[#allocation14 + $0x42] ss:$0 sm:$0xff]  ;;  %v6498_v2 = vld [vmem:[#allocation14 + $0x43] ss:$0 sm:$0xff] }
 0x76e   :  { %6489 = vmatpush.bf16.msra.mxu3 %v10313_v60 }
 0x772   :  { %6490 = vmatpush.bf16.msra.mxu3 %v10312_v1 }
 0x776   :  { %6491 = vmatpush.bf16.msra.mxu3 %v10311_v42 }
 0x779   :  { %9567 = vmatmul.msk.bf16.vlgmr.msra.gmra.mxu3 %vm6410_vm9, %v6448_v44 }
 0x7fc   :  { %v6493_v47 = vpop.f32.mrf.mxu3 }
 0x7fd   :  { %v6500_v52 = vsel %vm6499_vm13, %v6493_v47, 0.0 }
 0x7fe   :  { %v6501_v20 = vrot.slane %v6500_v52, 4 }
 0x800   :  { %v6502_v53 = vadd.f32 %v6501_v20, %v6500_v52 }
 0x802   :  { %v6503_v26 = vrot.slane %v6502_v53, 2 }
 0x804   :  { %v6504_v55 = vadd.f32 %v6503_v26, %v6502_v53  ;;  %v6495_v58 = vpop.f32.mrf.mxu3 }
 0x806   :  { %v6505_v12 = vrot.slane %v6504_v55, 1 }
 0x808   :  { %v6506_v10 = vadd.f32 %v6505_v12, %v6504_v55 }
 0x80a   :  { %v6507_v48 = vmul.f32 %v6506_v10, %v10747_v21 }
 0x80c   :  { %v6508_v6 = vsub.f32 %v6493_v47, %v6507_v48 }
 0x80e   :  { %v6509_v57 = vmul.f32 %v6508_v6, %v6508_v6 }
 0x810   :  { %v6510_v30 = vsel %vm6499_vm13, %v6509_v57, 0.0 }
 0x811   :  { %v6511_v62 = vrot.slane %v6510_v30, 4 }
 0x813   :  { %v6512_v27 = vadd.f32 %v6511_v62, %v6510_v30 }
 0x815   :  { %v6513_v28 = vrot.slane %v6512_v27, 2 }
 0x817   :  { %v6514_v34 = vadd.f32 %v6513_v28, %v6512_v27 }
 0x819   :  { %v6515_v41 = vrot.slane %v6514_v34, 1 }
 0x81b   :  { %v6516_v17 = vadd.f32 %v6515_v41, %v6514_v34 }
 0x81d   :  { %v6517_v11 = vmul.f32 %v6516_v17, %v10747_v21 }
 0x81f   :  { %v6518_v24 = vadd.f32 1e-05, %v6517_v11 }
 0x821   :  { %10364 = vrsqrt.f32 %v6518_v24  ;;  %vm6525_vm1 = vweird.f32 %v6518_v24 }
 0x827   :  { %v10365_v33 = vpop.eup %10364 }
 0x828   :  { %v6520_v59 = vmul.f32 %v10365_v33, %v6518_v24  ;;  %vm6526_vm0 = vweird.f32 %v10365_v33 }
 0x829   :  { %vm6527_vm14 = vmor %vm6525_vm1, %vm6526_vm0 }
 0x82a   :  { %v6521_v45 = vmul.f32 %v10365_v33, %v6520_v59 }
 0x82c   :  { %v6522_v29 = vmul.f32 0.5, %v6521_v45 }
 0x82e   :  { %v6523_v23 = vsub.f32 1.5, %v6522_v29 }
 0x830   :  { %v6524_v50 = vmul.f32 %v10365_v33, %v6523_v23 }
 0x832   :  { %v6528_v54 = vsel %vm6527_vm14, %v10365_v33, %v6524_v50 }
 0x833   :  { %v6529_v32 = vmul.f32 %v6528_v54, %v6497_v51 }
 0x835   :  { %v6530_v18 = vmul.f32 %v6529_v32, %v6508_v6 }
 0x837   :  { %v6531_v63 = vadd.f32 %v6530_v18, %v6498_v2 }
 0x839   :  { %v6532_v4 = vmax.f32 %v6531_v63, 0.0 }
 0x83a   :  { %10572 = dma.done.wait [#allocation8 + $0x5], 256 }
 0x83b   :  { %10573 = vsyncadd [#allocation8 + $0x5], 4294967040  ;;  %v10316_v21 = vld [vmem:[#allocation7 + $0x8] sm:$0xff]  ;;  %v10315_v25 = vld [vmem:[#allocation7] sm:$0xff]  ;;  %v6538_v49 = vpack.c.bf16 %v6532_v4, %v6532_v4  ;;  %s10588_s8 = smov [#allocation15]   ;;  %s6579_s4 = sshll.u32 %s11123_s9, 4  ;;  %s6580_s4 = int_to_ptr.hbm [resolvable:$true] %s6579_s4 }
 0x83c   :  { %6564 = vmatpush.bf16.msrb.mxu3 %v10316_v21  ;;  %v6537_v7 = vld [vmem:[#allocation14 + $0x44] ss:$0 sm:$0xff]  ;;  %s6577_s18 = sshll.u32 %s10588_s8, 4  ;;  %s6578_s18 = int_to_ptr.vmem [resolvable:$true] %s6577_s18 }
 0x840   :  { %6565 = vmatpush.bf16.msrb.mxu3 %v10315_v25 }
 0x843   :  { %9576 = vmatmul.msk.bf16.vlgmr.msrb.gmra.mxu3 %vm6499_vm13, %v6538_v49 }
 0x8c6   :  { %v6567_v39 = vpop.f32.mrf.mxu3 }
 0x8c7   :  { %v6568_v31 = vadd.f32 %v6567_v39, %v6537_v7 }
 0x8c9   :  { %6571 = vst [vmem:[#allocation15] sm:$0xff] %v6568_v31 }
 0x8ca   :  { %6582 = dma.vmem_to_hbm [thread:$0]  %s6578_s18, 128, %s6580_s4, [#allocation11]  }
 0x8ce   :  { %v6569_v46 = vpop.f32.mrf.mxu3 }
 0x8cf   :  { %10574 = dma.done.wait [#allocation11], 128  }
 0x8d0   :  { %10575 = vsyncadd [#allocation11], 4294967168 }
 0x8d1   :  { %6587 = vsyncpa [#allocation10], 1 }
 0x8d2   :  { %6588 = vsyncpa [#allocation13], 1 }
 0x8d3   :  { %6589 = vsyncpa [#allocation11], 1 }
 0x8d4   :  { %6590 = vsyncmov [#allocation8] }
 0x8d7   :  { %s6591_s21 = vpop.sfrf %6590 }
 0x8d8   :  { %p9577_p0 = scmp.ne.s32.totalorder %s6591_s21, 0 }
 0x8da   :  { %6595 = shalt.err (%p9577_p0)  }
 0x8db   :  { %6597 = vsyncmov [#allocation8 + $0x1] }
 0x8de   :  { %s6598_s22 = vpop.sfrf %6597 }
 0x8df   :  { %p9578_p1 = scmp.ne.s32.totalorder %s6598_s22, 0 }
 0x8e1   :  { %6602 = shalt.err (%p9578_p1)  }
 0x8e2   :  { %6604 = vsyncmov [#allocation8 + $0x2] }
 0x8e5   :  { %s6605_s9 = vpop.sfrf %6604 }
 0x8e6   :  { %p9579_p2 = scmp.ne.s32.totalorder %s6605_s9, 0 }
 0x8e8   :  { %6609 = shalt.err (%p9579_p2)  }
 0x8e9   :  { %6611 = vsyncmov [#allocation8 + $0x3] }
 0x8ec   :  { %s6612_s5 = vpop.sfrf %6611 }
 0x8ed   :  { %p9580_p3 = scmp.ne.s32.totalorder %s6612_s5, 0 }
 0x8ef   :  { %6616 = shalt.err (%p9580_p3)  }
 0x8f0   :  { %6618 = vsyncmov [#allocation8 + $0x4] }
 0x8f3   :  { %s6619_s23 = vpop.sfrf %6618 }
 0x8f4   :  { %p9581_p4 = scmp.ne.s32.totalorder %s6619_s23, 0 }
 0x8f6   :  { %6623 = shalt.err (%p9581_p4)  }
 0x8f7   :  { %6625 = vsyncmov [#allocation8 + $0x5] }
 0x8fa   :  { %s6626_s1 = vpop.sfrf %6625 }
 0x8fb   :  { %p9582_p5 = scmp.ne.s32.totalorder %s6626_s1, 0 }
 0x8fd   :  { %6630 = shalt.err (%p9582_p5)  }

</bundles_post_ra>
